<compile_context>
chip_gen: v6e
topology: v6e:2x2x1
jax: 0.10.0
libtpu: 0.0.40
codegen_flags: <defaults>
</compile_context>

<pallas_src>
import functools

import jax
import jax.numpy as jnp
from jax.experimental import pallas as pl
from jax.experimental.pallas import tpu as pltpu

NEG_SLOPE = 0.2
BN_EPS = 1e-5
VMEM_LIMIT = 32 * 1024 * 1024


# ----------------------------- helpers --------------------------------------


def _pick_tile(dim, target, mult):
    """Largest divisor of `dim` that is <= target and a multiple of `mult`,
    falling back to the full dim (full-extent blocks are always legal)."""
    if dim <= target:
        return dim
    start = target - target % mult
    for t in range(start, 0, -mult):
        if dim % t == 0:
            return t
    return dim


# ----------------------------- Pallas kernels ------------------------------


def _conv_mm_kernel(*refs, fuse_in, fuse_out):
    """Single-shot (full-K resident) matmul tile: o = A' @ B.

    fuse_in : apply per-feature affine + LeakyReLU to A before the dot (folds
              the previous layer's BatchNorm+LeakyReLU into the im2col'd raw
              activation).  Elementwise math in f32, MXU operands bf16.
    fuse_out: None | "lrelu" (activation on result)
                   | "stats" (per-channel sum / sum-of-squares for BatchNorm).
    """
    idx = 0
    a_ref = refs[idx]; idx += 1
    if fuse_in:
        scale_ref = refs[idx]
        shift_ref = refs[idx + 1]
        idx += 2
    b_ref = refs[idx]; idx += 1
    o_ref = refs[idx]; idx += 1
    stats_ref = refs[idx] if fuse_out == "stats" else None

    a = a_ref[...]
    if fuse_in:
        z = a.astype(jnp.float32) * scale_ref[...] + shift_ref[...]
        z = jnp.where(z >= 0, z, NEG_SLOPE * z)
        a = z.astype(jnp.bfloat16)

    r = jnp.dot(a, b_ref[...], preferred_element_type=jnp.float32)

    if fuse_out == "lrelu":
        r = jnp.where(r >= 0, r, NEG_SLOPE * r)
    o_ref[...] = r.astype(o_ref.dtype)

    if fuse_out == "stats":
        # Two direct row writes (no concatenate / extra materialization).
        stats_ref[:, 0, :] = jnp.sum(r, axis=0, keepdims=True)
        stats_ref[:, 1, :] = jnp.sum(r * r, axis=0, keepdims=True)


def pallas_conv_matmul(a, b, *, scale=None, shift=None, fuse_out=None,
                       out_dtype=jnp.bfloat16, tm_target=256):
    """(M, K) @ (K, N) with the whole K contraction resident in VMEM.

    Grid = (M tiles, N tiles), both "parallel".  When `scale`/`shift` (K,)
    vectors are given, A is transformed with lrelu(a*scale + shift) before the
    dot (fused BatchNorm apply).  fuse_out: None | "lrelu" | "stats".
    With "stats", also returns per-M-tile partial channel stats (gm, 2, N).
    """
    M, K = a.shape
    K2, N = b.shape
    assert K == K2
    fuse_in = scale is not None

    tm = _pick_tile(M, tm_target, 16)      # bf16 packs 16 rows / vreg
    tn = N                                 # weights stay fully resident
    # Give the second v7x TensorCore work when the grid would otherwise have a
    # single step (costs one extra ~0.35us grid step on 1-TC chips).
    if M // tm == 1 and N // tn == 1:
        if tm % 32 == 0:
            tm //= 2
        elif tn % 256 == 0:
            tn //= 2
    gm, gn = M // tm, N // tn

    in_specs = [pl.BlockSpec((tm, K), lambda i, j: (i, 0))]
    args = [a.astype(jnp.bfloat16)]
    if fuse_in:
        in_specs += [pl.BlockSpec((1, K), lambda i, j: (0, 0)),
                     pl.BlockSpec((1, K), lambda i, j: (0, 0))]
        args += [scale.reshape(1, K).astype(jnp.float32),
                 shift.reshape(1, K).astype(jnp.float32)]
    in_specs += [pl.BlockSpec((K, tn), lambda i, j: (0, j))]
    args += [b.astype(jnp.bfloat16)]

    y_spec = pl.BlockSpec((tm, tn), lambda i, j: (i, j))
    if fuse_out == "stats":
        out_shape = (jax.ShapeDtypeStruct((M, N), out_dtype),
                     jax.ShapeDtypeStruct((gm, 2, N), jnp.float32))
        out_specs = [y_spec,
                     pl.BlockSpec((1, 2, tn), lambda i, j: (i, 0, j))]
    else:
        out_shape = jax.ShapeDtypeStruct((M, N), out_dtype)
        out_specs = y_spec

    kernel = functools.partial(_conv_mm_kernel,
                               fuse_in=fuse_in, fuse_out=fuse_out)
    return pl.pallas_call(
        kernel,
        out_shape=out_shape,
        grid_spec=pltpu.PrefetchScalarGridSpec(
            num_scalar_prefetch=0,
            grid=(gm, gn),
            in_specs=in_specs,
            out_specs=out_specs,
        ),
        compiler_params=pltpu.CompilerParams(
            dimension_semantics=("parallel", "parallel"),
            vmem_limit_bytes=VMEM_LIMIT),
    )(*args)


def _final_kernel(a_ref, scale_ref, shift_ref, w_ref, o_ref):
    """Fused BN3+LeakyReLU on the patch rows, then the 1-output conv as a VPU
    multiply + lane reduction against the real (K,) weight."""
    z = a_ref[...].astype(jnp.float32) * scale_ref[...] + shift_ref[...]
    z = jnp.where(z >= 0, z, NEG_SLOPE * z)
    o_ref[...] = jnp.sum(z * w_ref[...], axis=-1, keepdims=True)


def pallas_final_conv(a, scale, shift, w_vec, *, tm_target=512):
    """(M, K) rows reduced against a single (K,) weight -> (M, 1) f32."""
    M, K = a.shape
    tm = _pick_tile(M, tm_target, 8)
    return pl.pallas_call(
        _final_kernel,
        out_shape=jax.ShapeDtypeStruct((M, 1), jnp.float32),
        grid_spec=pltpu.PrefetchScalarGridSpec(
            num_scalar_prefetch=0,
            grid=(M // tm,),
            in_specs=[
                pl.BlockSpec((tm, K), lambda i: (i, 0)),
                pl.BlockSpec((1, K), lambda i: (0, 0)),
                pl.BlockSpec((1, K), lambda i: (0, 0)),
                pl.BlockSpec((1, K), lambda i: (0, 0)),
            ],
            out_specs=pl.BlockSpec((tm, 1), lambda i: (i, 0)),
        ),
        compiler_params=pltpu.CompilerParams(
            dimension_semantics=("parallel",),
            vmem_limit_bytes=VMEM_LIMIT),
    )(a.astype(jnp.bfloat16),
      scale.reshape(1, K).astype(jnp.float32),
      shift.reshape(1, K).astype(jnp.float32),
      w_vec.reshape(1, K).astype(jnp.float32))


# ------------------------------ JAX glue ------------------------------------


def bn_scale_shift(stats, gamma, beta, m_rows):
    """Reduce partial (sum, sumsq) stats to per-channel scale/shift (f32) and
    the raw-activation border value that the fused affine maps to exactly 0."""
    tot = jnp.sum(stats, axis=0)                       # (2, C)
    mean = tot[0] / m_rows
    var = jnp.maximum(tot[1] / m_rows - mean * mean, 0.0)
    inv = jax.lax.rsqrt(var + BN_EPS)
    scale = gamma * inv
    shift = beta - mean * scale
    # Padding the raw (pre-BN) activation border with `padval` is equivalent to
    # PyTorch's zero-padding of the post-BN/LeakyReLU activation, because
    # lrelu(scale*padval + shift) == 0.  (Only degenerate if gamma == 0, which
    # never happens with default BatchNorm init.)
    safe = jnp.where(scale == 0, 1.0, scale)
    padval = jnp.where(scale == 0, 0.0, -shift / safe)
    return scale, shift, padval


def im2col(x_nhwc, kh, kw, stride, pad, pad_value=None):
    """Extract conv patches; rows are (N*Ho*Wo), features ordered (kh,kw,Cin).
    `pad_value` optionally gives a per-channel (C,) border fill."""
    # TODO(synk): gather patches in-kernel (manual DMA / Element index_map)
    # instead of materializing the duplicated im2col tensor in HBM; that is the
    # dominant HBM traffic for batch >= 8.
    N, H, W, C = x_nhwc.shape
    if pad:
        Hp, Wp = H + 2 * pad, W + 2 * pad
        if pad_value is None:
            x_nhwc = jnp.pad(x_nhwc, ((0, 0), (pad, pad), (pad, pad), (0, 0)))
        else:
            pv = pad_value.astype(x_nhwc.dtype)[None, None, None, :]
            full = jnp.broadcast_to(pv, (N, Hp, Wp, C))
            x_nhwc = jax.lax.dynamic_update_slice(full, x_nhwc, (0, pad, pad, 0))
        H, W = Hp, Wp
    Ho = (H - kh) // stride + 1
    Wo = (W - kw) // stride + 1
    cols = [x_nhwc[:, i:i + stride * Ho:stride, j:j + stride * Wo:stride, :]
            for i in range(kh) for j in range(kw)]
    p = jnp.stack(cols, axis=3)  # (N, Ho, Wo, kh*kw, C)
    return p.reshape(N * Ho * Wo, kh * kw * C), (N, Ho, Wo)


def conv_weight_to_matmul(w_oihw, cin_pad=None):
    """PyTorch (Cout, Cin, kh, kw) -> bf16 (kh*kw*Cin_pad, Cout)."""
    Cout, Cin, kh, kw = w_oihw.shape
    if cin_pad is not None and cin_pad > Cin:
        w_oihw = jnp.pad(w_oihw, ((0, 0), (0, cin_pad - Cin), (0, 0), (0, 0)))
        Cin = cin_pad
    w = jnp.transpose(w_oihw, (2, 3, 1, 0)).reshape(kh * kw * Cin, Cout)
    return w.astype(jnp.bfloat16)


def init_params(key):
    k1, k2, k3, k4 = jax.random.split(key, 4)
    w1 = jax.random.normal(k1, (128, 3, 4, 4), jnp.float32) * 0.02
    w2 = jax.random.normal(k2, (256, 128, 4, 4), jnp.float32) * 0.02
    w3 = jax.random.normal(k3, (512, 256, 4, 4), jnp.float32) * 0.02
    w4 = jax.random.normal(k4, (1, 512, 4, 4), jnp.float32) * 0.02
    return {
        "w1": conv_weight_to_matmul(w1, cin_pad=8),      # K = 4*4*8 = 128
        "w2": conv_weight_to_matmul(w2),                 # (2048, 256)
        "w3": conv_weight_to_matmul(w3),                 # (4096, 512)
        # Layer-4 weight kept as the real (8192,) f32 vector (no zero-padding).
        "w4": jnp.transpose(w4, (2, 3, 1, 0)).reshape(-1).astype(jnp.float32),
        # BatchNorm2d default init: weight=1, bias=0 (f32)
        "g2": jnp.ones((256,), jnp.float32),
        "b2": jnp.zeros((256,), jnp.float32),
        "g3": jnp.ones((512,), jnp.float32),
        "b3": jnp.zeros((512,), jnp.float32),
    }


def discriminator_forward(x_nchw, params):
    # NCHW (PyTorch) -> NHWC bf16; pad Cin 3 -> 8 so layer-1 K is lane aligned.
    x = jnp.transpose(x_nchw, (0, 2, 3, 1)).astype(jnp.bfloat16)
    x = jnp.pad(x, ((0, 0), (0, 0), (0, 0), (0, 8 - x.shape[-1])))

    # Conv2d(3, 128, 4, 2, 1, bias=False) + LeakyReLU(0.2)   : 32x32 -> 16x16
    p, (N, Ho, Wo) = im2col(x, 4, 4, 2, 1)
    y1 = pallas_conv_matmul(p, params["w1"], fuse_out="lrelu")
    x = y1.reshape(N, Ho, Wo, 128)

    # Conv2d(128, 256, 4, 2, 1, bias=False)                  : 16x16 -> 8x8
    # Raw (pre-BN) output + per-channel stats fused in the epilogue.
    p, (N, Ho, Wo) = im2col(x, 4, 4, 2, 1)
    y2, st2 = pallas_conv_matmul(p, params["w2"], fuse_out="stats")
    sc2, sh2, pv2 = bn_scale_shift(st2, params["g2"], params["b2"], p.shape[0])
    x = y2.reshape(N, Ho, Wo, 256)                # raw (pre-BN) activation

    # Conv2d(256, 512, 4, 2, 1, bias=False)                  : 8x8 -> 4x4
    # BN2 + LeakyReLU fused into this matmul's A-path (scale/shift tiled to K);
    # the raw y2 border is padded with pv2 so padding still maps to exactly 0.
    p, (N, Ho, Wo) = im2col(x, 4, 4, 2, 1, pad_value=pv2)
    y3, st3 = pallas_conv_matmul(p, params["w3"],
                                 scale=jnp.tile(sc2, 16),
                                 shift=jnp.tile(sh2, 16),
                                 fuse_out="stats")
    sc3, sh3, _ = bn_scale_shift(st3, params["g3"], params["b3"], p.shape[0])
    x = y3.reshape(N, Ho, Wo, 512)                # raw (pre-BN) activation

    # Conv2d(512, 1, 4, 1, 0, bias=False)                     : 4x4 -> 1x1
    # BN3 + LeakyReLU fused into the A-path; conv done as a VPU mul-reduce
    # against the real weight (no spatial padding here, so no pad handling).
    p, (N, Ho, Wo) = im2col(x, 4, 4, 1, 0)
    y4 = pallas_final_conv(p, jnp.tile(sc3, 16), jnp.tile(sh3, 16),
                           params["w4"])

    # back to NCHW: (N, 1, 1, 1), f32
    return jnp.transpose(y4.reshape(N, Ho, Wo, 1), (0, 3, 1, 2))


if __name__ == "__main__":
    key = jax.random.PRNGKey(0)
    pkey, xkey = jax.random.split(key)
    params = init_params(pkey)

    # Smallest shape consistent with the module: the final 4x4 valid conv
    # forces 32x32 spatial input (CIFAR-10). Batch kept small (2).
    x = jax.random.normal(xkey, (2, 3, 32, 32), jnp.float32)

    out = jax.jit(discriminator_forward)(x, params)
    jax.block_until_ready(out)
    assert out.shape == (2, 1, 1, 1), out.shape
    assert out.dtype == jnp.float32
    print("KERNEL_OK")
</pallas_src>

<mosaic_0001>
module attributes {stable_mosaic.version = 11 : i64} {
  func.func @_conv_mm_kernel(%arg0: i32, %arg1: i32, %arg2: memref<256x128xbf16, #tpu.memory_space<vmem>>, %arg3: memref<128x128xbf16, #tpu.memory_space<vmem>>, %arg4: memref<256x128xbf16, #tpu.memory_space<vmem>>) attributes {dimension_semantics = [#tpu.dimension_semantics<parallel>, #tpu.dimension_semantics<parallel>], iteration_bounds = array<i64: 2, 1>, scalar_prefetch = 0 : i64, scratch_operands = 0 : i64, tpu.core_type = #tpu.core_type<tc>, window_params = [{transform_indices = @transform_0, window_bounds = array<i64: 256, 128>}, {transform_indices = @transform_1, window_bounds = array<i64: 128, 128>}, {transform_indices = @transform_2, window_bounds = array<i64: 256, 128>}]} {
    %c0 = arith.constant 0 : index
    %c0_0 = arith.constant 0 : index
    %0 = vector.load %arg2[%c0, %c0_0] : memref<256x128xbf16, #tpu.memory_space<vmem>>, vector<256x128xbf16>
    %c0_1 = arith.constant 0 : index
    %c0_2 = arith.constant 0 : index
    %1 = vector.load %arg3[%c0_1, %c0_2] : memref<128x128xbf16, #tpu.memory_space<vmem>>, vector<128x128xbf16>
    %cst = arith.constant dense<0.000000e+00> : vector<256x128xf32>
    %2 = tpu.matmul %0, %1, %cst {dimension_numbers = #tpu.dot_dimension_numbers<[1], [0], [0], [1], [0, 0, 1, 1], [], []>} : vector<256x128xbf16>, vector<128x128xbf16>, vector<256x128xf32> -> vector<256x128xf32>
    %cst_3 = arith.constant 0.000000e+00 : f32
    %3 = vector.broadcast %cst_3 : f32 to vector<256x128xf32>
    %4 = arith.cmpf oge, %2, %3 : vector<256x128xf32>
    %cst_4 = arith.constant 2.000000e-01 : f32
    %5 = vector.broadcast %cst_4 : f32 to vector<256x128xf32>
    %6 = arith.mulf %5, %2 : vector<256x128xf32>
    %7 = arith.select %4, %2, %6 : vector<256x128xi1>, vector<256x128xf32>
    %8 = arith.truncf %7 : vector<256x128xf32> to vector<256x128xbf16>
    %c0_5 = arith.constant 0 : index
    %c0_6 = arith.constant 0 : index
    %9 = vector.load %arg4[%c0_5, %c0_6] : memref<256x128xbf16, #tpu.memory_space<vmem>>, vector<256x128xbf16>
    tpu.vector_store %arg4[%c0_5, %c0_6], %8 {strides = array<i32>} : memref<256x128xbf16, #tpu.memory_space<vmem>>, vector<256x128xbf16>,
    return
  }
  func.func @transform_0(%arg0: i32, %arg1: i32) -> (i32, i32) {
    %c0_i32 = arith.constant 0 : i32
    %c0_i32_0 = arith.constant 0 : i32
    return %arg0, %c0_i32 : i32, i32
  }
  func.func @transform_1(%arg0: i32, %arg1: i32) -> (i32, i32) {
    %c0_i32 = arith.constant 0 : i32
    %c0_i32_0 = arith.constant 0 : i32
    return %c0_i32, %arg1 : i32, i32
  }
  func.func @transform_2(%arg0: i32, %arg1: i32) -> (i32, i32) {
    %c0_i32 = arith.constant 0 : i32
    return %arg0, %arg1 : i32, i32
  }
}

module attributes {stable_mosaic.version = 11 : i64} {
  func.func @_conv_mm_kernel(%arg0: i32, %arg1: i32, %arg2: memref<64x2048xbf16, #tpu.memory_space<vmem>>, %arg3: memref<2048x256xbf16, #tpu.memory_space<vmem>>, %arg4: memref<64x256xbf16, #tpu.memory_space<vmem>>, %arg5: memref<1x2x256xf32, #tpu.memory_space<vmem>>) attributes {dimension_semantics = [#tpu.dimension_semantics<parallel>, #tpu.dimension_semantics<parallel>], iteration_bounds = array<i64: 2, 1>, scalar_prefetch = 0 : i64, scratch_operands = 0 : i64, tpu.core_type = #tpu.core_type<tc>, window_params = [{transform_indices = @transform_0, window_bounds = array<i64: 64, 2048>}, {transform_indices = @transform_1, window_bounds = array<i64: 2048, 256>}, {transform_indices = @transform_2, window_bounds = array<i64: 64, 256>}, {transform_indices = @transform_3, window_bounds = array<i64: 1, 2, 256>}]} {
    %c0 = arith.constant 0 : index
    %c0_0 = arith.constant 0 : index
    %0 = vector.load %arg2[%c0, %c0_0] : memref<64x2048xbf16, #tpu.memory_space<vmem>>, vector<64x2048xbf16>
    %c0_1 = arith.constant 0 : index
    %c0_2 = arith.constant 0 : index
    %1 = vector.load %arg3[%c0_1, %c0_2] : memref<2048x256xbf16, #tpu.memory_space<vmem>>, vector<2048x256xbf16>
    %cst = arith.constant dense<0.000000e+00> : vector<64x256xf32>
    %2 = tpu.matmul %0, %1, %cst {dimension_numbers = #tpu.dot_dimension_numbers<[1], [0], [0], [1], [0, 0, 1, 1], [], []>} : vector<64x2048xbf16>, vector<2048x256xbf16>, vector<64x256xf32> -> vector<64x256xf32>
    %3 = arith.truncf %2 : vector<64x256xf32> to vector<64x256xbf16>
    %c0_3 = arith.constant 0 : index
    %c0_4 = arith.constant 0 : index
    %4 = vector.load %arg4[%c0_3, %c0_4] : memref<64x256xbf16, #tpu.memory_space<vmem>>, vector<64x256xbf16>
    tpu.vector_store %arg4[%c0_3, %c0_4], %3 {strides = array<i32>} : memref<64x256xbf16, #tpu.memory_space<vmem>>, vector<64x256xbf16>,
    %cst_5 = arith.constant dense<0.000000e+00> : vector<256xf32>
    %5 = vector.multi_reduction <add>, %2, %cst_5 [0] : vector<64x256xf32> to vector<256xf32>
    %6 = vector.shape_cast %5 : vector<256xf32> to vector<1x256xf32>
    %c0_6 = arith.constant 0 : index
    %c0_7 = arith.constant 0 : index
    %c0_8 = arith.constant 0 : index
    %7 = vector.load %arg5[%c0_6, %c0_7, %c0_8] : memref<1x2x256xf32, #tpu.memory_space<vmem>>, vector<1x1x256xf32>
    %8 = vector.shape_cast %7 : vector<1x1x256xf32> to vector<1x256xf32>
    %9 = vector.shape_cast %6 : vector<1x256xf32> to vector<1x1x256xf32>
    tpu.vector_store %arg5[%c0_6, %c0_7, %c0_8], %9 {strides = array<i32>} : memref<1x2x256xf32, #tpu.memory_space<vmem>>, vector<1x1x256xf32>,
    %10 = arith.mulf %2, %2 : vector<64x256xf32>
    %cst_9 = arith.constant dense<0.000000e+00> : vector<256xf32>
    %11 = vector.multi_reduction <add>, %10, %cst_9 [0] : vector<64x256xf32> to vector<256xf32>
    %12 = vector.shape_cast %11 : vector<256xf32> to vector<1x256xf32>
    %c0_10 = arith.constant 0 : index
    %c1 = arith.constant 1 : index
    %c0_11 = arith.constant 0 : index
    %13 = vector.load %arg5[%c0_10, %c1, %c0_11] : memref<1x2x256xf32, #tpu.memory_space<vmem>>, vector<1x1x256xf32>
    %14 = vector.shape_cast %13 : vector<1x1x256xf32> to vector<1x256xf32>
    %15 = vector.shape_cast %12 : vector<1x256xf32> to vector<1x1x256xf32>
    tpu.vector_store %arg5[%c0_10, %c1, %c0_11], %15 {strides = array<i32>} : memref<1x2x256xf32, #tpu.memory_space<vmem>>, vector<1x1x256xf32>,
    return
  }
  func.func @transform_0(%arg0: i32, %arg1: i32) -> (i32, i32) {
    %c0_i32 = arith.constant 0 : i32
    %c0_i32_0 = arith.constant 0 : i32
    return %arg0, %c0_i32 : i32, i32
  }
  func.func @transform_1(%arg0: i32, %arg1: i32) -> (i32, i32) {
    %c0_i32 = arith.constant 0 : i32
    %c0_i32_0 = arith.constant 0 : i32
    return %c0_i32, %arg1 : i32, i32
  }
  func.func @transform_2(%arg0: i32, %arg1: i32) -> (i32, i32) {
    %c0_i32 = arith.constant 0 : i32
    return %arg0, %arg1 : i32, i32
  }
  func.func @transform_3(%arg0: i32, %arg1: i32) -> (i32, i32, i32) {
    %c0_i32 = arith.constant 0 : i32
    %c0_i32_0 = arith.constant 0 : i32
    return %arg0, %c0_i32, %arg1 : i32, i32, i32
  }
}

module attributes {stable_mosaic.version = 11 : i64} {
  func.func @_conv_mm_kernel(%arg0: i32, %arg1: i32, %arg2: memref<16x4096xbf16, #tpu.memory_space<vmem>>, %arg3: memref<1x4096xf32, #tpu.memory_space<vmem>>, %arg4: memref<1x4096xf32, #tpu.memory_space<vmem>>, %arg5: memref<4096x512xbf16, #tpu.memory_space<vmem>>, %arg6: memref<16x512xbf16, #tpu.memory_space<vmem>>, %arg7: memref<1x2x512xf32, #tpu.memory_space<vmem>>) attributes {dimension_semantics = [#tpu.dimension_semantics<parallel>, #tpu.dimension_semantics<parallel>], iteration_bounds = array<i64: 2, 1>, scalar_prefetch = 0 : i64, scratch_operands = 0 : i64, tpu.core_type = #tpu.core_type<tc>, window_params = [{transform_indices = @transform_0, window_bounds = array<i64: 16, 4096>}, {pipeline_mode = #tpu.pipeline_mode<synchronous>, transform_indices = @transform_1, window_bounds = array<i64: 1, 4096>}, {pipeline_mode = #tpu.pipeline_mode<synchronous>, transform_indices = @transform_2, window_bounds = array<i64: 1, 4096>}, {transform_indices = @transform_3, window_bounds = array<i64: 4096, 512>}, {transform_indices = @transform_4, window_bounds = array<i64: 16, 512>}, {transform_indices = @transform_5, window_bounds = array<i64: 1, 2, 512>}]} {
    %c0 = arith.constant 0 : index
    %c0_0 = arith.constant 0 : index
    %0 = vector.load %arg2[%c0, %c0_0] : memref<16x4096xbf16, #tpu.memory_space<vmem>>, vector<16x4096xbf16>
    %1 = arith.extf %0 : vector<16x4096xbf16> to vector<16x4096xf32>
    %c0_1 = arith.constant 0 : index
    %c0_2 = arith.constant 0 : index
    %2 = vector.load %arg3[%c0_1, %c0_2] : memref<1x4096xf32, #tpu.memory_space<vmem>>, vector<1x4096xf32>
    %3 = vector.broadcast %2 : vector<1x4096xf32> to vector<16x4096xf32>
    %4 = arith.mulf %1, %3 : vector<16x4096xf32>
    %c0_3 = arith.constant 0 : index
    %c0_4 = arith.constant 0 : index
    %5 = vector.load %arg4[%c0_3, %c0_4] : memref<1x4096xf32, #tpu.memory_space<vmem>>, vector<1x4096xf32>
    %6 = vector.broadcast %5 : vector<1x4096xf32> to vector<16x4096xf32>
    %7 = arith.addf %4, %6 : vector<16x4096xf32>
    %cst = arith.constant 0.000000e+00 : f32
    %8 = vector.broadcast %cst : f32 to vector<16x4096xf32>
    %9 = arith.cmpf oge, %7, %8 : vector<16x4096xf32>
    %cst_5 = arith.constant 2.000000e-01 : f32
    %10 = vector.broadcast %cst_5 : f32 to vector<16x4096xf32>
    %11 = arith.mulf %10, %7 : vector<16x4096xf32>
    %12 = arith.select %9, %7, %11 : vector<16x4096xi1>, vector<16x4096xf32>
    %13 = arith.truncf %12 : vector<16x4096xf32> to vector<16x4096xbf16>
    %c0_6 = arith.constant 0 : index
    %c0_7 = arith.constant 0 : index
    %14 = vector.load %arg5[%c0_6, %c0_7] : memref<4096x512xbf16, #tpu.memory_space<vmem>>, vector<4096x512xbf16>
    %cst_8 = arith.constant dense<0.000000e+00> : vector<16x512xf32>
    %15 = tpu.matmul %13, %14, %cst_8 {dimension_numbers = #tpu.dot_dimension_numbers<[1], [0], [0], [1], [0, 0, 1, 1], [], []>} : vector<16x4096xbf16>, vector<4096x512xbf16>, vector<16x512xf32> -> vector<16x512xf32>
    %16 = arith.truncf %15 : vector<16x512xf32> to vector<16x512xbf16>
    %c0_9 = arith.constant 0 : index
    %c0_10 = arith.constant 0 : index
    %17 = vector.load %arg6[%c0_9, %c0_10] : memref<16x512xbf16, #tpu.memory_space<vmem>>, vector<16x512xbf16>
    tpu.vector_store %arg6[%c0_9, %c0_10], %16 {strides = array<i32>} : memref<16x512xbf16, #tpu.memory_space<vmem>>, vector<16x512xbf16>,
    %cst_11 = arith.constant dense<0.000000e+00> : vector<512xf32>
    %18 = vector.multi_reduction <add>, %15, %cst_11 [0] : vector<16x512xf32> to vector<512xf32>
    %19 = vector.shape_cast %18 : vector<512xf32> to vector<1x512xf32>
    %c0_12 = arith.constant 0 : index
    %c0_13 = arith.constant 0 : index
    %c0_14 = arith.constant 0 : index
    %20 = vector.load %arg7[%c0_12, %c0_13, %c0_14] : memref<1x2x512xf32, #tpu.memory_space<vmem>>, vector<1x1x512xf32>
    %21 = vector.shape_cast %20 : vector<1x1x512xf32> to vector<1x512xf32>
    %22 = vector.shape_cast %19 : vector<1x512xf32> to vector<1x1x512xf32>
    tpu.vector_store %arg7[%c0_12, %c0_13, %c0_14], %22 {strides = array<i32>} : memref<1x2x512xf32, #tpu.memory_space<vmem>>, vector<1x1x512xf32>,
    %23 = arith.mulf %15, %15 : vector<16x512xf32>
    %cst_15 = arith.constant dense<0.000000e+00> : vector<512xf32>
    %24 = vector.multi_reduction <add>, %23, %cst_15 [0] : vector<16x512xf32> to vector<512xf32>
    %25 = vector.shape_cast %24 : vector<512xf32> to vector<1x512xf32>
    %c0_16 = arith.constant 0 : index
    %c1 = arith.constant 1 : index
    %c0_17 = arith.constant 0 : index
    %26 = vector.load %arg7[%c0_16, %c1, %c0_17] : memref<1x2x512xf32, #tpu.memory_space<vmem>>, vector<1x1x512xf32>
    %27 = vector.shape_cast %26 : vector<1x1x512xf32> to vector<1x512xf32>
    %28 = vector.shape_cast %25 : vector<1x512xf32> to vector<1x1x512xf32>
    tpu.vector_store %arg7[%c0_16, %c1, %c0_17], %28 {strides = array<i32>} : memref<1x2x512xf32, #tpu.memory_space<vmem>>, vector<1x1x512xf32>,
    return
  }
  func.func @transform_0(%arg0: i32, %arg1: i32) -> (i32, i32) {
    %c0_i32 = arith.constant 0 : i32
    %c0_i32_0 = arith.constant 0 : i32
    return %arg0, %c0_i32 : i32, i32
  }
  func.func @transform_1(%arg0: i32, %arg1: i32) -> (i32, i32) {
    %c0_i32 = arith.constant 0 : i32
    %c0_i32_0 = arith.constant 0 : i32
    %c0_i32_1 = arith.constant 0 : i32
    return %c0_i32, %c0_i32_0 : i32, i32
  }
  func.func @transform_2(%arg0: i32, %arg1: i32) -> (i32, i32) {
    %c0_i32 = arith.constant 0 : i32
    %c0_i32_0 = arith.constant 0 : i32
    %c0_i32_1 = arith.constant 0 : i32
    return %c0_i32, %c0_i32_0 : i32, i32
  }
  func.func @transform_3(%arg0: i32, %arg1: i32) -> (i32, i32) {
    %c0_i32 = arith.constant 0 : i32
    %c0_i32_0 = arith.constant 0 : i32
    return %c0_i32, %arg1 : i32, i32
  }
  func.func @transform_4(%arg0: i32, %arg1: i32) -> (i32, i32) {
    %c0_i32 = arith.constant 0 : i32
    return %arg0, %arg1 : i32, i32
  }
  func.func @transform_5(%arg0: i32, %arg1: i32) -> (i32, i32, i32) {
    %c0_i32 = arith.constant 0 : i32
    %c0_i32_0 = arith.constant 0 : i32
    return %arg0, %c0_i32, %arg1 : i32, i32, i32
  }
}

module attributes {stable_mosaic.version = 11 : i64} {
  func.func @_final_kernel(%arg0: i32, %arg1: memref<2x8192xbf16, #tpu.memory_space<vmem>>, %arg2: memref<1x8192xf32, #tpu.memory_space<vmem>>, %arg3: memref<1x8192xf32, #tpu.memory_space<vmem>>, %arg4: memref<1x8192xf32, #tpu.memory_space<vmem>>, %arg5: memref<2x1xf32, #tpu.memory_space<vmem>>) attributes {dimension_semantics = [#tpu.dimension_semantics<parallel>], iteration_bounds = array<i64: 1>, scalar_prefetch = 0 : i64, scratch_operands = 0 : i64, tpu.core_type = #tpu.core_type<tc>, window_params = [{transform_indices = @transform_0, window_bounds = array<i64: 2, 8192>}, {pipeline_mode = #tpu.pipeline_mode<synchronous>, transform_indices = @transform_1, window_bounds = array<i64: 1, 8192>}, {pipeline_mode = #tpu.pipeline_mode<synchronous>, transform_indices = @transform_2, window_bounds = array<i64: 1, 8192>}, {pipeline_mode = #tpu.pipeline_mode<synchronous>, transform_indices = @transform_3, window_bounds = array<i64: 1, 8192>}, {transform_indices = @transform_4, window_bounds = array<i64: 2, 1>}]} {
    %c0 = arith.constant 0 : index
    %c0_0 = arith.constant 0 : index
    %0 = vector.load %arg1[%c0, %c0_0] : memref<2x8192xbf16, #tpu.memory_space<vmem>>, vector<2x8192xbf16>
    %1 = arith.extf %0 : vector<2x8192xbf16> to vector<2x8192xf32>
    %c0_1 = arith.constant 0 : index
    %c0_2 = arith.constant 0 : index
    %2 = vector.load %arg2[%c0_1, %c0_2] : memref<1x8192xf32, #tpu.memory_space<vmem>>, vector<1x8192xf32>
    %3 = vector.broadcast %2 : vector<1x8192xf32> to vector<2x8192xf32>
    %4 = arith.mulf %1, %3 : vector<2x8192xf32>
    %c0_3 = arith.constant 0 : index
    %c0_4 = arith.constant 0 : index
    %5 = vector.load %arg3[%c0_3, %c0_4] : memref<1x8192xf32, #tpu.memory_space<vmem>>, vector<1x8192xf32>
    %6 = vector.broadcast %5 : vector<1x8192xf32> to vector<2x8192xf32>
    %7 = arith.addf %4, %6 : vector<2x8192xf32>
    %cst = arith.constant 0.000000e+00 : f32
    %8 = vector.broadcast %cst : f32 to vector<2x8192xf32>
    %9 = arith.cmpf oge, %7, %8 : vector<2x8192xf32>
    %cst_5 = arith.constant 2.000000e-01 : f32
    %10 = vector.broadcast %cst_5 : f32 to vector<2x8192xf32>
    %11 = arith.mulf %10, %7 : vector<2x8192xf32>
    %12 = arith.select %9, %7, %11 : vector<2x8192xi1>, vector<2x8192xf32>
    %c0_6 = arith.constant 0 : index
    %c0_7 = arith.constant 0 : index
    %13 = vector.load %arg4[%c0_6, %c0_7] : memref<1x8192xf32, #tpu.memory_space<vmem>>, vector<1x8192xf32>
    %14 = vector.broadcast %13 : vector<1x8192xf32> to vector<2x8192xf32>
    %15 = arith.mulf %12, %14 : vector<2x8192xf32>
    %cst_8 = arith.constant dense<0.000000e+00> : vector<2xf32>
    %16 = vector.multi_reduction <add>, %15, %cst_8 [1] : vector<2x8192xf32> to vector<2xf32>
    %17 = vector.shape_cast %16 : vector<2xf32> to vector<2x1xf32>
    %c0_9 = arith.constant 0 : index
    %c0_10 = arith.constant 0 : index
    %18 = vector.load %arg5[%c0_9, %c0_10] : memref<2x1xf32, #tpu.memory_space<vmem>>, vector<2x1xf32>
    tpu.vector_store %arg5[%c0_9, %c0_10], %17 {strides = array<i32>} : memref<2x1xf32, #tpu.memory_space<vmem>>, vector<2x1xf32>,
    return
  }
  func.func @transform_0(%arg0: i32) -> (i32, i32) {
    %c0_i32 = arith.constant 0 : i32
    %c0_i32_0 = arith.constant 0 : i32
    return %arg0, %c0_i32 : i32, i32
  }
  func.func @transform_1(%arg0: i32) -> (i32, i32) {
    %c0_i32 = arith.constant 0 : i32
    %c0_i32_0 = arith.constant 0 : i32
    %c0_i32_1 = arith.constant 0 : i32
    return %c0_i32, %c0_i32_0 : i32, i32
  }
  func.func @transform_2(%arg0: i32) -> (i32, i32) {
    %c0_i32 = arith.constant 0 : i32
    %c0_i32_0 = arith.constant 0 : i32
    %c0_i32_1 = arith.constant 0 : i32
    return %c0_i32, %c0_i32_0 : i32, i32
  }
  func.func @transform_3(%arg0: i32) -> (i32, i32) {
    %c0_i32 = arith.constant 0 : i32
    %c0_i32_0 = arith.constant 0 : i32
    %c0_i32_1 = arith.constant 0 : i32
    return %c0_i32, %c0_i32_0 : i32, i32
  }
  func.func @transform_4(%arg0: i32) -> (i32, i32) {
    %c0_i32 = arith.constant 0 : i32
    %c0_i32_0 = arith.constant 0 : i32
    return %arg0, %c0_i32 : i32, i32
  }
}

</mosaic_0001>

<bundles_post_ra>
// kernel: discriminator_forward.4
= control target key start
LH: loop header
LB: loop body
LE: loop exit
PB: predicated region body
PF: predicated region fallthrough
CT: control target
= control target key end

     0   :  { %s1254_s9 = smov 0   ;;  %s1256_s10 = smov 0   ;;  %s1359_s0 = inlined_call_operand.vmem [shape: bf16[512,128], index: 0, kind: input, shape index: {}]   ;;  %s1360_s1 = inlined_call_operand.vmem [shape: bf16[128,128], index: 1, kind: input, shape index: {}]   ;;  %s1361_s2 = inlined_call_operand.vmem [shape: bf16[512,128], index: 2, kind: output, shape index: {}]  }
   0x1   :  { %s1258_s11 = smov 0  }
   0x2 LB: > { %s24_s12 = sadd.s32 1, %s1233_s10  ;;  %p889_p0 = scmp.ge.s32.totalorder %s1237_s11, 1  ;;  %s1237_s11 = sphi %s1258_s11, %s12_s11   ;;  %s1233_s10 = sphi %s1256_s10, %s1363_s10   ;;  %s1229_s9 = sphi %s1254_s9, %s1362_s9  }
   0x3   : > { %p26_p1 = scmp.ge.s32.totalorder %s24_s12, 2  ;;  %p136_p2 = scmp.lt.s32.totalorder %s1237_s11, 3 }
   0x5   : > { %s1365_s12 = smov (%p26_p1, %s24_s12), 0  ;;  %p137_p3 = pnand %p889_p0, %p136_p2 }
   0x6   : > { %s890_s15 = sshll.u32 (!%p137_p3), %s1229_s9, 5 }
   0x7   : > { %140 = sbr.rel (%p137_p3) target bundleno = 275 (0x113), region = 28  ;;  %p166_p4 = scmp.lt.s32.totalorder (!%p137_p3), %s890_s15, 63 }
   0xc   : > { %v1191_v0 = vld [vmem:[%s1360_s1 + $0x38] sm:$0xff]   ;;  %v1192_v1 = vld [vmem:[%s1360_s1 + $0x30] sm:$0xff]   ;;  %s1367_s15 = smov (!%p166_p4, %s890_s15), 63  ;;  %v1193_v2 = vld [vmem:[%s1360_s1 + $0x28] sm:$0xff]  }
   0xd   : > { %1103 = vmatprep.subr.bf16.mxu0 %v1191_v0  ;;  %1151 = vmatprep.subr.bf16.mxu1 %v1191_v0  ;;  %s891_s20 = sshll.u32 %s1367_s15, 2  ;;  %v1194_v3 = vld [vmem:[%s1360_s1 + $0x20] sm:$0xff]   ;;  %v1195_v6 = vld [vmem:[%s1360_s1 + $0x18] sm:$0xff]   ;;  %v1196_v7 = vld [vmem:[%s1360_s1 + $0x10] sm:$0xff]  }
   0xe   : > { %1104 = vmatpush3.bf16.msra.mxu0 %v1191_v0  ;;  %1159 = vmatpush3.bf16.msra.mxu1 %v1191_v0  ;;  %s1289_s23 = scalar_lea.vmem %s1359_s0, %s891_s20  ;;  %v1197_v8 = vld [vmem:[%s1360_s1 + $0x8] sm:$0xff]   ;;  %v1198_v9 = vld [vmem:[%s1360_s1] sm:$0xff]   ;;  %s1327_s8 = scalar_lea.vmem %s1361_s2, %s891_s20 }
   0xf   : > { %1105 = vmatprep.subr.bf16.mxu0 %v1192_v1  ;;  %1152 = vmatprep.subr.bf16.mxu1 %v1192_v1  ;;  %v1199_v4 = vld [vmem:[%s1289_s23] sm:$0xff]   ;;  %v1201_v10 = vld [vmem:[%s1289_s23 + $0x8] sm:$0xff]   ;;  %v1203_v12 = vld [vmem:[%s1289_s23 + $0x10] sm:$0xff]  }
  0x10   : > { %v1200_v5 = vld [vmem:[%s1289_s23 + $0x40] sm:$0xff]   ;;  %1119 = vmatprep.mubr.bf16.mxu0 %v1199_v4  ;;  %v1202_v11 = vld [vmem:[%s1289_s23 + $0x48] sm:$0xff]   ;;  %v1204_v13 = vld [vmem:[%s1289_s23 + $0x50] sm:$0xff]  }
  0x11   : > { %1135 = vmatprep.mubr.bf16.mxu1 %v1200_v5  ;;  %v1205_v14 = vld [vmem:[%s1289_s23 + $0x18] sm:$0xff]   ;;  %v1207_v16 = vld [vmem:[%s1289_s23 + $0x20] sm:$0xff]   ;;  %v1209_v18 = vld [vmem:[%s1289_s23 + $0x28] sm:$0xff]  }
  0x12   : > { %1106 = vmatpush3.bf16.msra.mxu0 %v1192_v1  ;;  %1160 = vmatpush3.bf16.msra.mxu1 %v1192_v1  ;;  %v1206_v15 = vld [vmem:[%s1289_s23 + $0x58] sm:$0xff]   ;;  %v1208_v17 = vld [vmem:[%s1289_s23 + $0x60] sm:$0xff]   ;;  %v1210_v19 = vld [vmem:[%s1289_s23 + $0x68] sm:$0xff]  }
  0x13   : > { %1107 = vmatprep.subr.bf16.mxu0 %v1193_v2  ;;  %1153 = vmatprep.subr.bf16.mxu1 %v1193_v2  ;;  %v1211_v20 = vld [vmem:[%s1289_s23 + $0x30] sm:$0xff]   ;;  %v1213_v22 = vld [vmem:[%s1289_s23 + $0x38] sm:$0xff]  }
  0x14   : > { %v1212_v21 = vld [vmem:[%s1289_s23 + $0x70] sm:$0xff]   ;;  %v1214_v23 = vld [vmem:[%s1289_s23 + $0x78] sm:$0xff]  }
  0x16   : > { %1108 = vmatpush3.bf16.msra.mxu0 %v1193_v2  ;;  %1161 = vmatpush3.bf16.msra.mxu1 %v1193_v2 }
  0x17   : > { %1109 = vmatprep.subr.bf16.mxu0 %v1194_v3  ;;  %1154 = vmatprep.subr.bf16.mxu1 %v1194_v3 }
  0x1a   : > { %1110 = vmatpush3.bf16.msra.mxu0 %v1194_v3  ;;  %1162 = vmatpush3.bf16.msra.mxu1 %v1194_v3 }
  0x1b   : > { %1111 = vmatprep.subr.bf16.mxu0 %v1195_v6  ;;  %1155 = vmatprep.subr.bf16.mxu1 %v1195_v6 }
  0x1e   : > { %1112 = vmatpush3.bf16.msra.mxu0 %v1195_v6  ;;  %1163 = vmatpush3.bf16.msra.mxu1 %v1195_v6 }
  0x1f   : > { %1113 = vmatprep.subr.bf16.mxu0 %v1196_v7  ;;  %1156 = vmatprep.subr.bf16.mxu1 %v1196_v7 }
  0x22   : > { %1114 = vmatpush3.bf16.msra.mxu0 %v1196_v7  ;;  %1164 = vmatpush3.bf16.msra.mxu1 %v1196_v7 }
  0x23   : > { %1115 = vmatprep.subr.bf16.mxu0 %v1197_v8  ;;  %1157 = vmatprep.subr.bf16.mxu1 %v1197_v8 }
  0x26   : > { %1116 = vmatpush3.bf16.msra.mxu0 %v1197_v8  ;;  %1165 = vmatpush3.bf16.msra.mxu1 %v1197_v8 }
  0x27   : > { %1117 = vmatprep.subr.bf16.mxu0 %v1198_v9  ;;  %1158 = vmatprep.subr.bf16.mxu1 %v1198_v9 }
  0x2a   : > { %1118 = vmatpush3.bf16.msra.mxu0 %v1198_v9  ;;  %1166 = vmatpush3.bf16.msra.mxu1 %v1198_v9 }
  0x2d   : > { %1120 = vmatmul.mubr.bf16.vlgmr.msra.gmra.mxu0 %v1201_v10  ;;  %1136 = vmatmul.mubr.bf16.vlgmr.msra.gmra.mxu1 %v1202_v11 }
  0x2e   : > { %1123 = vmatprep.mubr.bf16.mxu0 %v1203_v12  ;;  %1139 = vmatprep.mubr.bf16.mxu1 %v1204_v13 }
  0x35   : > { %1124 = vmatmul.mubr.bf16.gmra.mxu0 %v1205_v14  ;;  %1140 = vmatmul.mubr.bf16.gmra.mxu1 %v1206_v15 }
  0x36   : > { %1127 = vmatprep.mubr.bf16.mxu0 %v1207_v16  ;;  %1143 = vmatprep.mubr.bf16.mxu1 %v1208_v17 }
  0x3d   : > { %1128 = vmatmul.mubr.bf16.gmra.mxu0 %v1209_v18  ;;  %1144 = vmatmul.mubr.bf16.gmra.mxu1 %v1210_v19 }
  0x3e   : > { %1131 = vmatprep.mubr.bf16.mxu0 %v1211_v20  ;;  %1147 = vmatprep.mubr.bf16.mxu1 %v1212_v21 }
  0x45   : > { %1132 = vmatmul.mubr.bf16.gmra.mxu0 %v1213_v22  ;;  %1148 = vmatmul.mubr.bf16.gmra.mxu1 %v1214_v23 }
  0xed   : > { %v1121_v24 = vpop.f32.mrf.mxu0  ;;  %v1137_v25 = vpop.f32.mrf.mxu1 }
  0xee   : > { %vm540_vm0 = vcmp.ge.f32.partialorder %v1121_v24, 0.0  ;;  %v572_v26 = vmul.f32 0.2, %v1121_v24  ;;  %v588_v27 = vmul.f32 0.2, %v1137_v25  ;;  %vm556_vm1 = vcmp.ge.f32.partialorder %v1137_v25, 0.0 }
  0xef   : > { %v411_v28 = vpop.f32.mrf.mxu0  ;;  %v475_v29 = vpop.f32.mrf.mxu1 }
  0xf0   : > { %v604_v30 = vsel %vm540_vm0, %v1121_v24, %v572_v26  ;;  %v570_v31 = vmul.f32 0.2, %v411_v28  ;;  %vm538_vm2 = vcmp.ge.f32.partialorder %v411_v28, 0.0  ;;  %v620_v35 = vsel %vm556_vm1, %v1137_v25, %v588_v27 }
  0xf1   : > { %v1122_v32 = vpop.f32.mrf.mxu0  ;;  %v1138_v33 = vpop.f32.mrf.mxu1  ;;  %vm554_vm5 = vcmp.ge.f32.partialorder %v475_v29, 0.0  ;;  %v586_v36 = vmul.f32 0.2, %v475_v29 }
  0xf2   : > { %vm541_vm3 = vcmp.ge.f32.partialorder %v1122_v32, 0.0  ;;  %v573_v34 = vmul.f32 0.2, %v1122_v32  ;;  %vm557_vm4 = vcmp.ge.f32.partialorder %v1138_v33, 0.0  ;;  %v589_v37 = vmul.f32 0.2, %v1138_v33 }
  0xf3   : > { %v414_v38 = vpop.f32.mrf.mxu0  ;;  %v478_v39 = vpop.f32.mrf.mxu1  ;;  %v602_v42 = vsel %vm538_vm2, %v411_v28, %v570_v31  ;;  %v618_v51 = vsel %vm554_vm5, %v475_v29, %v586_v36 }
  0xf4   : > { %v605_v40 = vsel %vm541_vm3, %v1122_v32, %v573_v34  ;;  %vm539_vm6 = vcmp.ge.f32.partialorder %v414_v38, 0.0  ;;  %v571_v41 = vmul.f32 0.2, %v414_v38  ;;  %vm555_vm7 = vcmp.ge.f32.partialorder %v478_v39, 0.0 }
  0xf5   : > { %v992_v43 = vpack.c.bf16 %v605_v40, %v604_v30  ;;  %v621_v44 = vsel %vm557_vm4, %v1138_v33, %v589_v37  ;;  %v587_v45 = vmul.f32 0.2, %v478_v39  ;;  %v1125_v46 = vpop.f32.mrf.mxu0  ;;  %v1141_v47 = vpop.f32.mrf.mxu1 }
  0xf6   : > { %v1032_v48 = vpack.c.bf16 %v621_v44, %v620_v35  ;;  %v603_v49 = vsel %vm539_vm6, %v414_v38, %v571_v41  ;;  %vm544_vm8 = vcmp.ge.f32.partialorder %v1125_v46, 0.0  ;;  %v576_v50 = vmul.f32 0.2, %v1125_v46 }
  0xf7   : > { %1064 = vst [vmem:[%s1327_s8 + $0x8] sm:$0xff] %v992_v43   ;;  %v987_v52 = vpack.c.bf16 %v603_v49, %v602_v42  ;;  %v619_v53 = vsel %vm555_vm7, %v478_v39, %v587_v45  ;;  %v592_v54 = vmul.f32 0.2, %v1141_v47  ;;  %v427_v55 = vpop.f32.mrf.mxu0  ;;  %v491_v56 = vpop.f32.mrf.mxu1  ;;  %vm560_vm9 = vcmp.ge.f32.partialorder %v1141_v47, 0.0 }
  0xf8   : > { %1072 = vst [vmem:[%s1327_s8 + $0x48] sm:$0xff] %v1032_v48   ;;  %v1027_v57 = vpack.c.bf16 %v619_v53, %v618_v51  ;;  %v608_v58 = vsel %vm544_vm8, %v1125_v46, %v576_v50  ;;  %v574_v59 = vmul.f32 0.2, %v427_v55  ;;  %vm542_vm10 = vcmp.ge.f32.partialorder %v427_v55, 0.0 }
  0xf9   : > { %988 = vst [vmem:[%s1327_s8] sm:$0xff] %v987_v52   ;;  %v1126_v60 = vpop.f32.mrf.mxu0  ;;  %v1142_v61 = vpop.f32.mrf.mxu1  ;;  %v624_v63 = vsel %vm560_vm9, %v1141_v47, %v592_v54  ;;  %vm558_vm13 = vcmp.ge.f32.partialorder %v491_v56, 0.0  ;;  %v590_v0 = vmul.f32 0.2, %v491_v56 }
  0xfa   : > { %1071 = vst [vmem:[%s1327_s8 + $0x40] sm:$0xff] %v1027_v57   ;;  %vm545_vm11 = vcmp.ge.f32.partialorder %v1126_v60, 0.0  ;;  %v577_v62 = vmul.f32 0.2, %v1126_v60  ;;  %vm561_vm12 = vcmp.ge.f32.partialorder %v1142_v61, 0.0  ;;  %v606_v6 = vsel %vm542_vm10, %v427_v55, %v574_v59 }
  0xfb   : > { %v593_v1 = vmul.f32 0.2, %v1142_v61  ;;  %v430_v2 = vpop.f32.mrf.mxu0  ;;  %v494_v3 = vpop.f32.mrf.mxu1  ;;  %v622_v15 = vsel %vm558_vm13, %v491_v56, %v590_v0 }
  0xfc   : > { %v609_v4 = vsel %vm545_vm11, %v1126_v60, %v577_v62  ;;  %vm543_vm14 = vcmp.ge.f32.partialorder %v430_v2, 0.0  ;;  %v575_v5 = vmul.f32 0.2, %v430_v2  ;;  %vm559_vm15 = vcmp.ge.f32.partialorder %v494_v3, 0.0 }
  0xfd   : > { %v1002_v7 = vpack.c.bf16 %v609_v4, %v608_v58  ;;  %v625_v8 = vsel %vm561_vm12, %v1142_v61, %v593_v1  ;;  %v591_v9 = vmul.f32 0.2, %v494_v3  ;;  %v1129_v10 = vpop.f32.mrf.mxu0  ;;  %v1145_v11 = vpop.f32.mrf.mxu1 }
  0xfe   : > { %v1042_v12 = vpack.c.bf16 %v625_v8, %v624_v63  ;;  %v607_v13 = vsel %vm543_vm14, %v430_v2, %v575_v5  ;;  %vm548_vm0 = vcmp.ge.f32.partialorder %v1129_v10, 0.0  ;;  %v580_v14 = vmul.f32 0.2, %v1129_v10 }
  0xff   : > { %1066 = vst [vmem:[%s1327_s8 + $0x18] sm:$0xff] %v1002_v7   ;;  %v997_v16 = vpack.c.bf16 %v607_v13, %v606_v6  ;;  %v623_v17 = vsel %vm559_vm15, %v494_v3, %v591_v9  ;;  %v596_v18 = vmul.f32 0.2, %v1145_v11  ;;  %v443_v19 = vpop.f32.mrf.mxu0  ;;  %v507_v20 = vpop.f32.mrf.mxu1  ;;  %vm564_vm1 = vcmp.ge.f32.partialorder %v1145_v11, 0.0 }
 0x100   : > { %1074 = vst [vmem:[%s1327_s8 + $0x58] sm:$0xff] %v1042_v12   ;;  %v1037_v21 = vpack.c.bf16 %v623_v17, %v622_v15  ;;  %v612_v22 = vsel %vm548_vm0, %v1129_v10, %v580_v14  ;;  %v578_v23 = vmul.f32 0.2, %v443_v19  ;;  %vm546_vm2 = vcmp.ge.f32.partialorder %v443_v19, 0.0 }
 0x101   : > { %1065 = vst [vmem:[%s1327_s8 + $0x10] sm:$0xff] %v997_v16   ;;  %v1130_v24 = vpop.f32.mrf.mxu0  ;;  %v1146_v25 = vpop.f32.mrf.mxu1  ;;  %v628_v27 = vsel %vm564_vm1, %v1145_v11, %v596_v18  ;;  %vm562_vm5 = vcmp.ge.f32.partialorder %v507_v20, 0.0  ;;  %v594_v28 = vmul.f32 0.2, %v507_v20 }
 0x102   : > { %1073 = vst [vmem:[%s1327_s8 + $0x50] sm:$0xff] %v1037_v21   ;;  %vm549_vm3 = vcmp.ge.f32.partialorder %v1130_v24, 0.0  ;;  %v581_v26 = vmul.f32 0.2, %v1130_v24  ;;  %vm565_vm4 = vcmp.ge.f32.partialorder %v1146_v25, 0.0  ;;  %v610_v34 = vsel %vm546_vm2, %v443_v19, %v578_v23 }
 0x103   : > { %v597_v29 = vmul.f32 0.2, %v1146_v25  ;;  %v446_v30 = vpop.f32.mrf.mxu0  ;;  %v510_v31 = vpop.f32.mrf.mxu1  ;;  %v626_v43 = vsel %vm562_vm5, %v507_v20, %v594_v28 }
 0x104   : > { %v613_v32 = vsel %vm549_vm3, %v1130_v24, %v581_v26  ;;  %vm547_vm6 = vcmp.ge.f32.partialorder %v446_v30, 0.0  ;;  %v579_v33 = vmul.f32 0.2, %v446_v30  ;;  %vm563_vm7 = vcmp.ge.f32.partialorder %v510_v31, 0.0 }
 0x105   : > { %v1012_v35 = vpack.c.bf16 %v613_v32, %v612_v22  ;;  %v629_v36 = vsel %vm565_vm4, %v1146_v25, %v597_v29  ;;  %v595_v37 = vmul.f32 0.2, %v510_v31  ;;  %v1133_v38 = vpop.f32.mrf.mxu0  ;;  %v1149_v39 = vpop.f32.mrf.mxu1 }
 0x106   : > { %v1052_v40 = vpack.c.bf16 %v629_v36, %v628_v27  ;;  %v611_v41 = vsel %vm547_vm6, %v446_v30, %v579_v33  ;;  %vm552_vm8 = vcmp.ge.f32.partialorder %v1133_v38, 0.0  ;;  %v584_v42 = vmul.f32 0.2, %v1133_v38 }
 0x107   : > { %1068 = vst [vmem:[%s1327_s8 + $0x28] sm:$0xff] %v1012_v35   ;;  %v1007_v44 = vpack.c.bf16 %v611_v41, %v610_v34  ;;  %v627_v45 = vsel %vm563_vm7, %v510_v31, %v595_v37  ;;  %v459_v46 = vpop.f32.mrf.mxu0  ;;  %v523_v47 = vpop.f32.mrf.mxu1  ;;  %vm568_vm9 = vcmp.ge.f32.partialorder %v1149_v39, 0.0  ;;  %v600_v50 = vmul.f32 0.2, %v1149_v39 }
 0x108   : > { %1076 = vst [vmem:[%s1327_s8 + $0x68] sm:$0xff] %v1052_v40   ;;  %v1047_v48 = vpack.c.bf16 %v627_v45, %v626_v43  ;;  %v616_v49 = vsel %vm552_vm8, %v1133_v38, %v584_v42  ;;  %v582_v53 = vmul.f32 0.2, %v459_v46  ;;  %vm550_vm12 = vcmp.ge.f32.partialorder %v459_v46, 0.0 }
 0x109   : > { %1067 = vst [vmem:[%s1327_s8 + $0x20] sm:$0xff] %v1007_v44   ;;  %v1134_v51 = vpop.f32.mrf.mxu0  ;;  %v1150_v52 = vpop.f32.mrf.mxu1  ;;  %vm566_vm13 = vcmp.ge.f32.partialorder %v523_v47, 0.0  ;;  %v598_v55 = vmul.f32 0.2, %v523_v47  ;;  %v632_v61 = vsel %vm568_vm9, %v1149_v39, %v600_v50 }
 0x10a   : > { %1075 = vst [vmem:[%s1327_s8 + $0x60] sm:$0xff] %v1047_v48   ;;  %vm553_vm10 = vcmp.ge.f32.partialorder %v1134_v51, 0.0  ;;  %v585_v54 = vmul.f32 0.2, %v1134_v51  ;;  %vm569_vm11 = vcmp.ge.f32.partialorder %v1150_v52, 0.0  ;;  %v614_v1 = vsel %vm550_vm12, %v459_v46, %v582_v53 }
 0x10b   : > { %v601_v56 = vmul.f32 0.2, %v1150_v52  ;;  %v462_v57 = vpop.f32.mrf.mxu0  ;;  %v526_v58 = vpop.f32.mrf.mxu1  ;;  %v630_v4 = vsel %vm566_vm13, %v523_v47, %v598_v55 }
 0x10c   : > { %v617_v59 = vsel %vm553_vm10, %v1134_v51, %v585_v54  ;;  %vm551_vm14 = vcmp.ge.f32.partialorder %v462_v57, 0.0  ;;  %v583_v60 = vmul.f32 0.2, %v462_v57  ;;  %vm567_vm15 = vcmp.ge.f32.partialorder %v526_v58, 0.0 }
 0x10d   : > { %v1022_v62 = vpack.c.bf16 %v617_v59, %v616_v49  ;;  %v633_v63 = vsel %vm569_vm11, %v1150_v52, %v601_v56  ;;  %v599_v0 = vmul.f32 0.2, %v526_v58 }
 0x10e   : > { %v1062_v2 = vpack.c.bf16 %v633_v63, %v632_v61  ;;  %v615_v3 = vsel %vm551_vm14, %v462_v57, %v583_v60 }
 0x10f   : > { %1070 = vst [vmem:[%s1327_s8 + $0x38] sm:$0xff] %v1022_v62   ;;  %v1017_v5 = vpack.c.bf16 %v615_v3, %v614_v1  ;;  %v631_v6 = vsel %vm567_vm15, %v526_v58, %v599_v0 }
 0x110   : > { %1078 = vst [vmem:[%s1327_s8 + $0x78] sm:$0xff] %v1062_v2   ;;  %v1057_v7 = vpack.c.bf16 %v631_v6, %v630_v4 }
 0x111   : > { %1069 = vst [vmem:[%s1327_s8 + $0x30] sm:$0xff] %v1017_v5  }
 0x112   : > { %1077 = vst [vmem:[%s1327_s8 + $0x70] sm:$0xff] %v1057_v7  }
 0x113 PF: > { %s12_s11 = sadd.s32 1, %s1237_s11   ;;  %s1362_s9 = smov %s1233_s10 }
 0x114   : > { %p9_p5 = scmp.ge.s32.totalorder %s12_s11, 4   ;;  %s1363_s10 = smov %s1365_s12 }
 0x116   :  { %11 = sbr.rel (!%p9_p5) target bundleno = 2 (0x2), region = 61 }

// kernel: discriminator_forward.5
= control target key start
LH: loop header
LB: loop body
LE: loop exit
PB: predicated region body
PF: predicated region fallthrough
CT: control target
= control target key end

     0   :  { %s3878_s12 = smov 0   ;;  %s3880_s13 = smov 0   ;;  %s5007_s0 = inlined_call_operand.vmem [shape: bf16[128,2048], index: 0, kind: input, shape index: {}]   ;;  %s5008_s1 = inlined_call_operand.vmem [shape: bf16[2048,256], index: 1, kind: input, shape index: {}]   ;;  %s5009_s2 = inlined_call_operand.vmem [shape: bf16[128,256], index: 2, kind: output, shape index: {0}]   ;;  %s5010_s3 = inlined_call_operand.vmem [shape: f32[2,2,256], index: 3, kind: output, shape index: {1}]  }
   0x1   :  { %s3882_s14 = smov 0  }
   0x2 LB: > { %s26_s15 = sadd.s32 1, %s3851_s13  ;;  %p3073_p0 = scmp.ge.s32.totalorder %s3855_s14, 1  ;;  %s3855_s14 = sphi %s3882_s14, %s14_s14   ;;  %s3851_s13 = sphi %s3880_s13, %s5058_s13   ;;  %s3847_s12 = sphi %s3878_s12, %s5057_s12  }
   0x3   : > { %p28_p1 = scmp.ge.s32.totalorder %s26_s15, 2  ;;  %p169_p2 = scmp.lt.s32.totalorder %s3855_s14, 3 }
   0x5   : > { %s5060_s15 = smov (%p28_p1, %s26_s15), 0  ;;  %p170_p3 = pnand %p3073_p0, %p169_p2 }
   0x7   : > { %173 = sbr.rel (%p170_p3) target bundleno = 520 (0x208), region = 28 }
   0xc   : > { %v3449_v0 = vld [vmem:[%s5008_s1 + $0x74] ss:$8 sps:$4 sm:$0xff]   ;;  %v3453_v2 = vld [vmem:[%s5008_s1 + $0x70] ss:$8 sps:$4 sm:$0xff]   ;;  %v3455_v4 = vld [vmem:[%s5008_s1 + $0x64] ss:$8 sps:$4 sm:$0xff]  }
   0xd   : > { %v3451_v1 = vld [vmem:[%s5008_s1 + $0x174] ss:$8 sps:$4 sm:$0xff]   ;;  %2168 = vmatprep.subr.bf16.mxu0 %v3449_v0  ;;  %v3454_v3 = vld [vmem:[%s5008_s1 + $0x170] ss:$8 sps:$4 sm:$0xff]   ;;  %v3457_v5 = vld [vmem:[%s5008_s1 + $0x164] ss:$8 sps:$4 sm:$0xff]  }
   0xe   : > { %2241 = vmatprep.subr.bf16.mxu1 %v3451_v1  ;;  %2169 = vmatpush1.bf16.msra.mxu0 %v3453_v2  ;;  %v3459_v6 = vld [vmem:[%s5008_s1 + $0x60] ss:$8 sps:$4 sm:$0xff]   ;;  %v3461_v8 = vld [vmem:[%s5008_s1 + $0x54] ss:$8 sps:$4 sm:$0xff]   ;;  %v3465_v10 = vld [vmem:[%s5008_s1 + $0x50] ss:$8 sps:$4 sm:$0xff]  }
   0xf   : > { %2242 = vmatpush1.bf16.msra.mxu1 %v3454_v3  ;;  %2170 = vmatprep.subr.bf16.mxu0 %v3455_v4  ;;  %v3460_v7 = vld [vmem:[%s5008_s1 + $0x160] ss:$8 sps:$4 sm:$0xff]   ;;  %v3463_v9 = vld [vmem:[%s5008_s1 + $0x154] ss:$8 sps:$4 sm:$0xff]   ;;  %v3466_v11 = vld [vmem:[%s5008_s1 + $0x150] ss:$8 sps:$4 sm:$0xff]  }
  0x10   : > { %2243 = vmatprep.subr.bf16.mxu1 %v3457_v5  ;;  %v3467_v12 = vld [vmem:[%s5008_s1 + $0x44] ss:$8 sps:$4 sm:$0xff]   ;;  %v3471_v14 = vld [vmem:[%s5008_s1 + $0x40] ss:$8 sps:$4 sm:$0xff]   ;;  %v3473_v16 = vld [vmem:[%s5008_s1 + $0x34] ss:$8 sps:$4 sm:$0xff]  }
  0x11   : > { %v3469_v13 = vld [vmem:[%s5008_s1 + $0x144] ss:$8 sps:$4 sm:$0xff]   ;;  %v3472_v15 = vld [vmem:[%s5008_s1 + $0x140] ss:$8 sps:$4 sm:$0xff]   ;;  %v3475_v17 = vld [vmem:[%s5008_s1 + $0x134] ss:$8 sps:$4 sm:$0xff]  }
  0x12   : > { %2171 = vmatpush1.bf16.msra.mxu0 %v3459_v6  ;;  %v3477_v18 = vld [vmem:[%s5008_s1 + $0x30] ss:$8 sps:$4 sm:$0xff]   ;;  %v3479_v20 = vld [vmem:[%s5008_s1 + $0x24] ss:$8 sps:$4 sm:$0xff]   ;;  %v3483_v22 = vld [vmem:[%s5008_s1 + $0x20] ss:$8 sps:$4 sm:$0xff]  }
  0x13   : > { %2244 = vmatpush1.bf16.msra.mxu1 %v3460_v7  ;;  %2172 = vmatprep.subr.bf16.mxu0 %v3461_v8  ;;  %v3478_v19 = vld [vmem:[%s5008_s1 + $0x130] ss:$8 sps:$4 sm:$0xff]   ;;  %v3481_v21 = vld [vmem:[%s5008_s1 + $0x124] ss:$8 sps:$4 sm:$0xff]   ;;  %v3484_v23 = vld [vmem:[%s5008_s1 + $0x120] ss:$8 sps:$4 sm:$0xff]  }
  0x14   : > { %2245 = vmatprep.subr.bf16.mxu1 %v3463_v9  ;;  %v3485_v24 = vld [vmem:[%s5008_s1 + $0x14] ss:$8 sps:$4 sm:$0xff]   ;;  %v3489_v26 = vld [vmem:[%s5008_s1 + $0x10] ss:$8 sps:$4 sm:$0xff]   ;;  %v3491_v28 = vld [vmem:[%s5008_s1 + $0x4] ss:$8 sps:$4 sm:$0xff]  }
  0x15   : > { %v3487_v25 = vld [vmem:[%s5008_s1 + $0x114] ss:$8 sps:$4 sm:$0xff]   ;;  %v3490_v27 = vld [vmem:[%s5008_s1 + $0x110] ss:$8 sps:$4 sm:$0xff]   ;;  %v3493_v29 = vld [vmem:[%s5008_s1 + $0x104] ss:$8 sps:$4 sm:$0xff]  }
  0x16   : > { %2173 = vmatpush1.bf16.msra.mxu0 %v3465_v10  ;;  %s3074_s30 = sshll.u32 %s3847_s12, 3  ;;  %v3495_v30 = vld [vmem:[%s5008_s1] ss:$8 sps:$4 sm:$0xff]   ;;  %v3497_v32 = vld [vmem:[%s5008_s1 + $0xf4] ss:$8 sps:$4 sm:$0xff]   ;;  %p239_p5 = scmp.lt.s32.totalorder %s3847_s12, 1 }
  0x17   : > { %2246 = vmatpush1.bf16.msra.mxu1 %v3466_v11  ;;  %2174 = vmatprep.subr.bf16.mxu0 %v3467_v12  ;;  %v3496_v31 = vld [vmem:[%s5008_s1 + $0x100] ss:$8 sps:$4 sm:$0xff]   ;;  %p214_p4 = scmp.lt.s32.totalorder %s3074_s30, 15  ;;  %v3499_v33 = vld [vmem:[%s5008_s1 + $0x1f4] ss:$8 sps:$4 sm:$0xff]  }
  0x18   : > { %2247 = vmatprep.subr.bf16.mxu1 %v3469_v13  ;;  %v3501_v34 = vld [vmem:[%s5008_s1 + $0xf0] ss:$8 sps:$4 sm:$0xff]   ;;  %v3503_v36 = vld [vmem:[%s5008_s1 + $0xe4] ss:$8 sps:$4 sm:$0xff]   ;;  %v3507_v38 = vld [vmem:[%s5008_s1 + $0xe0] ss:$8 sps:$4 sm:$0xff]  }
  0x19   : > { %v3502_v35 = vld [vmem:[%s5008_s1 + $0x1f0] ss:$8 sps:$4 sm:$0xff]   ;;  %s5062_s30 = smov (!%p214_p4, %s3074_s30), 15  ;;  %v3505_v37 = vld [vmem:[%s5008_s1 + $0x1e4] ss:$8 sps:$4 sm:$0xff]   ;;  %s5064_s12 = smov (!%p239_p5, %s3847_s12), 1 }
  0x1a   : > { %2175 = vmatpush1.bf16.msra.mxu0 %v3471_v14  ;;  %v3508_v39 = vld [vmem:[%s5008_s1 + $0x1e0] ss:$8 sps:$4 sm:$0xff]   ;;  %v3509_v40 = vld [vmem:[%s5008_s1 + $0xd4] ss:$8 sps:$4 sm:$0xff]   ;;  %s3413_s4 = sshll.u32 %s5062_s30, 6  ;;  %s3415_s24 = sshll.u32 %s5064_s12, 2 }
  0x1b   : > { %2248 = vmatpush1.bf16.msra.mxu1 %v3472_v15  ;;  %2176 = vmatprep.subr.bf16.mxu0 %v3473_v16  ;;  %v3511_v41 = vld [vmem:[%s5008_s1 + $0x1d4] ss:$8 sps:$4 sm:$0xff]   ;;  %v3513_v42 = vld [vmem:[%s5008_s1 + $0xd0] ss:$8 sps:$4 sm:$0xff]   ;;  %s4037_s17 = scalar_lea.vmem %s5007_s0, %s3413_s4  ;;  %v3515_v44 = vld [vmem:[%s5008_s1 + $0xc4] ss:$8 sps:$4 sm:$0xff]   ;;  %s246_s27 = scalar_lea.vmem %s5010_s3, %s3415_s24 }
  0x1c   : > { %2249 = vmatprep.subr.bf16.mxu1 %v3475_v17  ;;  %v3514_v43 = vld [vmem:[%s5008_s1 + $0x1d0] ss:$8 sps:$4 sm:$0xff]   ;;  %v3517_v45 = vld [vmem:[%s5008_s1 + $0x1c4] ss:$8 sps:$4 sm:$0xff]   ;;  %v3519_v46 = vld [vmem:[%s5008_s1 + $0xc0] ss:$8 sps:$4 sm:$0xff]  }
  0x1d   : > { %v3520_v47 = vld [vmem:[%s5008_s1 + $0x1c0] ss:$8 sps:$4 sm:$0xff]   ;;  %v3521_v52 = vld [vmem:[%s5008_s1 + $0xb4] ss:$8 sps:$4 sm:$0xff]   ;;  %v3525_v56 = vld [vmem:[%s5008_s1 + $0xb0] ss:$8 sps:$4 sm:$0xff]  }
  0x1e   : > { %2177 = vmatpush1.bf16.msra.mxu0 %v3477_v18  ;;  %v248_v48 = vld [vmem:[%s4037_s17] sm:$0xff]  ;;  %v249_v50 = vld [vmem:[%s4037_s17 + $0x8] sm:$0xff]  ;;  %v3523_v54 = vld [vmem:[%s5008_s1 + $0x1b4] ss:$8 sps:$4 sm:$0xff]  }
  0x1f   : > { %2250 = vmatpush1.bf16.msra.mxu1 %v3478_v19  ;;  %2178 = vmatprep.subr.bf16.mxu0 %v3479_v20  ;;  %v256_v49 = vld [vmem:[%s4037_s17 + $0x40] sm:$0xff]  ;;  %v257_v51 = vld [vmem:[%s4037_s17 + $0x48] sm:$0xff]  ;;  %v3526_v57 = vld [vmem:[%s5008_s1 + $0x1b0] ss:$8 sps:$4 sm:$0xff]  }
  0x20   : > { %2251 = vmatprep.subr.bf16.mxu1 %v3481_v21  ;;  %v3083_v53 = vcombine.high %v248_v48, %v256_v49  ;;  %v3085_v55 = vcombine.high %v249_v50, %v257_v51  ;;  %v3527_v58 = vld [vmem:[%s5008_s1 + $0xa4] ss:$8 sps:$4 sm:$0xff]   ;;  %v3531_v60 = vld [vmem:[%s5008_s1 + $0xa0] ss:$8 sps:$4 sm:$0xff]   ;;  %v3533_v62 = vld [vmem:[%s5008_s1 + $0x94] ss:$8 sps:$4 sm:$0xff]   ;;  %v3082_v8 = vcombine.low %v248_v48, %v256_v49  ;;  %v3084_v9 = vcombine.low %v249_v50, %v257_v51 }
  0x21   : > { %v3529_v59 = vld [vmem:[%s5008_s1 + $0x1a4] ss:$8 sps:$4 sm:$0xff]   ;;  %v3532_v61 = vld [vmem:[%s5008_s1 + $0x1a0] ss:$8 sps:$4 sm:$0xff]   ;;  %v3535_v63 = vld [vmem:[%s5008_s1 + $0x194] ss:$8 sps:$4 sm:$0xff]  }
  0x22   : > { %2179 = vmatpush1.bf16.msra.mxu0 %v3483_v22  ;;  %2200 = vmatprep.mubr.bf16.mxu0 %v3083_v53  ;;  %v3537_v0 = vld [vmem:[%s5008_s1 + $0x90] ss:$8 sps:$4 sm:$0xff]   ;;  %v3539_v2 = vld [vmem:[%s5008_s1 + $0x84] ss:$8 sps:$4 sm:$0xff]   ;;  %v3543_v4 = vld [vmem:[%s5008_s1 + $0x80] ss:$8 sps:$4 sm:$0xff]  }
  0x23   : > { %2252 = vmatpush1.bf16.msra.mxu1 %v3484_v23  ;;  %2180 = vmatprep.subr.bf16.mxu0 %v3485_v24  ;;  %v3538_v1 = vld [vmem:[%s5008_s1 + $0x190] ss:$8 sps:$4 sm:$0xff]   ;;  %v3541_v3 = vld [vmem:[%s5008_s1 + $0x184] ss:$8 sps:$4 sm:$0xff]   ;;  %v3544_v5 = vld [vmem:[%s5008_s1 + $0x180] ss:$8 sps:$4 sm:$0xff]  }
  0x24   : > { %2253 = vmatprep.subr.bf16.mxu1 %v3487_v25  ;;  %2273 = vmatprep.mubr.bf16.mxu1 %v3085_v55  ;;  %v3547_v6 = vld [vmem:[%s5008_s1 + $0x274] ss:$8 sps:$4 sm:$0xff]   ;;  %v3545_v10 = vld [vmem:[%s5008_s1 + $0x270] ss:$8 sps:$4 sm:$0xff]   ;;  %v3553_v12 = vld [vmem:[%s5008_s1 + $0x264] ss:$8 sps:$4 sm:$0xff]  }
  0x25   : > { %v3550_v7 = vld [vmem:[%s5008_s1 + $0x374] ss:$8 sps:$4 sm:$0xff]   ;;  %v3548_v11 = vld [vmem:[%s5008_s1 + $0x370] ss:$8 sps:$4 sm:$0xff]   ;;  %v3556_v13 = vld [vmem:[%s5008_s1 + $0x364] ss:$8 sps:$4 sm:$0xff]  }
  0x26   : > { %2181 = vmatpush1.bf16.msra.mxu0 %v3489_v26  ;;  %v3551_v14 = vld [vmem:[%s5008_s1 + $0x260] ss:$8 sps:$4 sm:$0xff]   ;;  %v3559_v16 = vld [vmem:[%s5008_s1 + $0x254] ss:$8 sps:$4 sm:$0xff]   ;;  %v3557_v24 = vld [vmem:[%s5008_s1 + $0x250] ss:$8 sps:$4 sm:$0xff]  }
  0x27   : > { %2254 = vmatpush1.bf16.msra.mxu1 %v3490_v27  ;;  %2182 = vmatprep.subr.bf16.mxu0 %v3491_v28  ;;  %v3554_v15 = vld [vmem:[%s5008_s1 + $0x360] ss:$8 sps:$4 sm:$0xff]   ;;  %v3562_v17 = vld [vmem:[%s5008_s1 + $0x354] ss:$8 sps:$4 sm:$0xff]   ;;  %v3560_v25 = vld [vmem:[%s5008_s1 + $0x350] ss:$8 sps:$4 sm:$0xff]  }
  0x28   : > { %2255 = vmatprep.subr.bf16.mxu1 %v3493_v29  ;;  %v264_v18 = vld [vmem:[%s4037_s17 + $0x80] sm:$0xff]  ;;  %v265_v20 = vld [vmem:[%s4037_s17 + $0x88] sm:$0xff]  ;;  %v3586_v55 = vld [vmem:[%s5008_s1 + $0x314] ss:$8 sps:$4 sm:$0xff]  }
  0x29   : > { %v272_v19 = vld [vmem:[%s4037_s17 + $0xc0] sm:$0xff]  ;;  %v273_v22 = vld [vmem:[%s4037_s17 + $0xc8] sm:$0xff] }
  0x2a   : > { %2183 = vmatpush1.bf16.msra.mxu0 %v3495_v30  ;;  %v3099_v21 = vcombine.high %v264_v18, %v272_v19  ;;  %v3101_v23 = vcombine.high %v265_v20, %v273_v22  ;;  %v3098_v26 = vcombine.low %v264_v18, %v272_v19  ;;  %v3100_v27 = vcombine.low %v265_v20, %v273_v22  ;;  %v3565_v28 = vld [vmem:[%s5008_s1 + $0x244] ss:$8 sps:$4 sm:$0xff]   ;;  %v3563_v30 = vld [vmem:[%s5008_s1 + $0x240] ss:$8 sps:$4 sm:$0xff]   ;;  %v3619_v22 = vld [vmem:[%s5008_s1 + $0x2b4] ss:$8 sps:$4 sm:$0xff]  }
  0x2b   : > { %2256 = vmatpush1.bf16.msra.mxu1 %v3496_v31  ;;  %2184 = vmatprep.subr.bf16.mxu0 %v3497_v32  ;;  %v3568_v29 = vld [vmem:[%s5008_s1 + $0x344] ss:$8 sps:$4 sm:$0xff]   ;;  %v3566_v31 = vld [vmem:[%s5008_s1 + $0x340] ss:$8 sps:$4 sm:$0xff]  }
  0x2c   : > { %2257 = vmatprep.subr.bf16.mxu1 %v3499_v33  ;;  %v280_v32 = vld [vmem:[%s4037_s17 + $0x100] sm:$0xff]  ;;  %v297_v49 = vld [vmem:[%s4037_s17 + $0x188] sm:$0xff] }
  0x2d   : > { %v288_v33 = vld [vmem:[%s4037_s17 + $0x140] sm:$0xff]  ;;  %v305_v50 = vld [vmem:[%s4037_s17 + $0x1c8] sm:$0xff] }
  0x2e   : > { %2185 = vmatpush2.bf16.msra.mxu0 %v3501_v34  ;;  %v281_v34 = vld [vmem:[%s4037_s17 + $0x108] sm:$0xff]  ;;  %v3133_v53 = vcombine.high %v297_v49, %v305_v50 }
  0x2f   : > { %2258 = vmatpush2.bf16.msra.mxu1 %v3502_v35  ;;  %2186 = vmatprep.subr.bf16.mxu0 %v3503_v36  ;;  %v289_v35 = vld [vmem:[%s4037_s17 + $0x148] sm:$0xff]  ;;  %v3571_v36 = vld [vmem:[%s5008_s1 + $0x234] ss:$8 sps:$4 sm:$0xff]  }
  0x30   : > { %2259 = vmatprep.subr.bf16.mxu1 %v3505_v37  ;;  %v3115_v37 = vcombine.high %v280_v32, %v288_v33  ;;  %v3575_v51 = vld [vmem:[%s5008_s1 + $0x220] ss:$8 sps:$4 sm:$0xff]   ;;  %v3613_v18 = vld [vmem:[%s5008_s1 + $0x2c4] ss:$8 sps:$4 sm:$0xff]  }
  0x31   : > { %v3616_v19 = vld [vmem:[%s5008_s1 + $0x3c4] ss:$8 sps:$4 sm:$0xff]   ;;  %v3611_v20 = vld [vmem:[%s5008_s1 + $0x2c0] ss:$8 sps:$4 sm:$0xff]  }
  0x32   : > { %2187 = vmatpush2.bf16.msra.mxu0 %v3507_v38  ;;  %v3117_v38 = vcombine.high %v281_v34, %v289_v35 }
  0x33   : > { %2260 = vmatpush2.bf16.msra.mxu1 %v3508_v39  ;;  %2188 = vmatprep.subr.bf16.mxu0 %v3509_v40  ;;  %v3574_v39 = vld [vmem:[%s5008_s1 + $0x334] ss:$8 sps:$4 sm:$0xff]   ;;  %v3569_v40 = vld [vmem:[%s5008_s1 + $0x230] ss:$8 sps:$4 sm:$0xff]  }
  0x34   : > { %2261 = vmatprep.subr.bf16.mxu1 %v3511_v41  ;;  %v3572_v41 = vld [vmem:[%s5008_s1 + $0x330] ss:$8 sps:$4 sm:$0xff]  }
  0x36   : > { %2189 = vmatpush2.bf16.msra.mxu0 %v3513_v42  ;;  %v3114_v42 = vcombine.low %v280_v32, %v288_v33  ;;  %v3629_v32 = vld [vmem:[%s5008_s1 + $0x290] ss:$8 sps:$4 sm:$0xff]  }
  0x37   : > { %2262 = vmatpush2.bf16.msra.mxu1 %v3514_v43  ;;  %2190 = vmatprep.subr.bf16.mxu0 %v3515_v44  ;;  %v3116_v43 = vcombine.low %v281_v34, %v289_v35  ;;  %v3577_v44 = vld [vmem:[%s5008_s1 + $0x224] ss:$8 sps:$4 sm:$0xff]   ;;  %v3632_v33 = vld [vmem:[%s5008_s1 + $0x390] ss:$8 sps:$4 sm:$0xff]  }
  0x38   : > { %2263 = vmatprep.subr.bf16.mxu1 %v3517_v45  ;;  %v3580_v45 = vld [vmem:[%s5008_s1 + $0x324] ss:$8 sps:$4 sm:$0xff]  }
  0x39   : > { %v3637_v34 = vld [vmem:[%s5008_s1 + $0x284] ss:$8 sps:$4 sm:$0xff]  }
  0x3a   : > { %2191 = vmatpush2.bf16.msra.mxu0 %v3519_v46  ;;  %v296_v46 = vld [vmem:[%s4037_s17 + $0x180] sm:$0xff] }
  0x3b   : > { %2264 = vmatpush2.bf16.msra.mxu1 %v3520_v47  ;;  %2192 = vmatprep.subr.bf16.mxu0 %v3521_v52  ;;  %v304_v47 = vld [vmem:[%s4037_s17 + $0x1c0] sm:$0xff] }
  0x3c   : > { %2265 = vmatprep.subr.bf16.mxu1 %v3523_v54  ;;  %v3131_v48 = vcombine.high %v296_v46, %v304_v47  ;;  %v3578_v52 = vld [vmem:[%s5008_s1 + $0x320] ss:$8 sps:$4 sm:$0xff]   ;;  %v3583_v54 = vld [vmem:[%s5008_s1 + $0x214] ss:$8 sps:$4 sm:$0xff]   ;;  %v3640_v35 = vld [vmem:[%s5008_s1 + $0x384] ss:$8 sps:$4 sm:$0xff]  }
  0x3e   : > { %2193 = vmatpush2.bf16.msra.mxu0 %v3525_v56  ;;  %v3581_v56 = vld [vmem:[%s5008_s1 + $0x210] ss:$8 sps:$4 sm:$0xff]  }
  0x3f   : > { %2266 = vmatpush2.bf16.msra.mxu1 %v3526_v57  ;;  %2194 = vmatprep.subr.bf16.mxu0 %v3527_v58  ;;  %v3584_v57 = vld [vmem:[%s5008_s1 + $0x310] ss:$8 sps:$4 sm:$0xff]   ;;  %v3130_v58 = vcombine.low %v296_v46, %v304_v47 }
  0x40   : > { %2267 = vmatprep.subr.bf16.mxu1 %v3529_v59  ;;  %v3132_v59 = vcombine.low %v297_v49, %v305_v50  ;;  %v267_v46 = vld [vmem:[%s4037_s17 + $0x98] sm:$0xff]  ;;  %v3652_v49 = vld [vmem:[%s5008_s1 + $0x564] ss:$8 sps:$4 sm:$0xff]  }
  0x41   : > { %v275_v47 = vld [vmem:[%s4037_s17 + $0xd8] sm:$0xff] }
  0x42   : > { %2195 = vmatpush2.bf16.msra.mxu0 %v3531_v60  ;;  %v3589_v60 = vld [vmem:[%s5008_s1 + $0x204] ss:$8 sps:$4 sm:$0xff]  }
  0x43   : > { %2268 = vmatpush2.bf16.msra.mxu1 %v3532_v61  ;;  %2196 = vmatprep.subr.bf16.mxu0 %v3533_v62  ;;  %v3592_v61 = vld [vmem:[%s5008_s1 + $0x304] ss:$8 sps:$4 sm:$0xff]   ;;  %v3587_v62 = vld [vmem:[%s5008_s1 + $0x200] ss:$8 sps:$4 sm:$0xff]  }
  0x44   : > { %2269 = vmatprep.subr.bf16.mxu1 %v3535_v63  ;;  %v3590_v63 = vld [vmem:[%s5008_s1 + $0x300] ss:$8 sps:$4 sm:$0xff]  }
  0x46   : > { %2197 = vmatpush2.bf16.msra.mxu0 %v3537_v0  ;;  %v4212_v0 = vld [vmem:[%s4037_s17 + $0x10] sm:$0xff] }
  0x47   : > { %2270 = vmatpush2.bf16.msra.mxu1 %v3538_v1  ;;  %2198 = vmatprep.subr.bf16.mxu0 %v3539_v2  ;;  %v4215_v1 = vld [vmem:[%s4037_s17 + $0x50] sm:$0xff]  ;;  %v4218_v2 = vld [vmem:[%s4037_s17 + $0x18] sm:$0xff] }
  0x48   : > { %2271 = vmatprep.subr.bf16.mxu1 %v3541_v3  ;;  %v4221_v3 = vld [vmem:[%s4037_s17 + $0x58] sm:$0xff] }
  0x4a   : > { %2199 = vmatpush2.bf16.msra.mxu0 %v3543_v4  ;;  %v3595_v4 = vld [vmem:[%s5008_s1 + $0x2f4] ss:$8 sps:$4 sm:$0xff]  }
  0x4b   : > { %2272 = vmatpush2.bf16.msra.mxu1 %v3544_v5  ;;  %2314 = vmatprep.subr.bf16.mxu0 %v3547_v6  ;;  %v3087_v5 = vcombine.high %v4212_v0, %v4215_v1  ;;  %v3598_v6 = vld [vmem:[%s5008_s1 + $0x3f4] ss:$8 sps:$4 sm:$0xff]  }
  0x4c   : > { %2387 = vmatprep.subr.bf16.mxu1 %v3550_v7  ;;  %v3089_v7 = vcombine.high %v4218_v2, %v4221_v3 }
  0x4d   : > { %2201 = vmatmul.mubr.bf16.vlgmr.msra.gmra.mxu0 %v3082_v8  ;;  %v3593_v8 = vld [vmem:[%s5008_s1 + $0x2f0] ss:$8 sps:$4 sm:$0xff]  }
  0x4e   : > { %2274 = vmatmul.mubr.bf16.vlgmr.msra.gmra.mxu1 %v3084_v9  ;;  %2315 = vmatpush1.bf16.msra.mxu0 %v3545_v10  ;;  %v3596_v9 = vld [vmem:[%s5008_s1 + $0x3f0] ss:$8 sps:$4 sm:$0xff]   ;;  %v3601_v10 = vld [vmem:[%s5008_s1 + $0x2e4] ss:$8 sps:$4 sm:$0xff]  }
  0x4f   : > { %2388 = vmatpush1.bf16.msra.mxu1 %v3548_v11  ;;  %2316 = vmatprep.subr.bf16.mxu0 %v3553_v12  ;;  %v3604_v11 = vld [vmem:[%s5008_s1 + $0x3e4] ss:$8 sps:$4 sm:$0xff]   ;;  %v3599_v12 = vld [vmem:[%s5008_s1 + $0x2e0] ss:$8 sps:$4 sm:$0xff]  }
  0x50   : > { %2389 = vmatprep.subr.bf16.mxu1 %v3556_v13  ;;  %2210 = vmatprep.mubr.bf16.mxu0 %v3099_v21  ;;  %v3602_v13 = vld [vmem:[%s5008_s1 + $0x3e0] ss:$8 sps:$4 sm:$0xff]  }
  0x51   : > { %2283 = vmatprep.mubr.bf16.mxu1 %v3101_v23  ;;  %v3614_v21 = vld [vmem:[%s5008_s1 + $0x3c0] ss:$8 sps:$4 sm:$0xff]   ;;  %v3622_v23 = vld [vmem:[%s5008_s1 + $0x3b4] ss:$8 sps:$4 sm:$0xff]  }
  0x52   : > { %2317 = vmatpush1.bf16.msra.mxu0 %v3551_v14  ;;  %v3607_v14 = vld [vmem:[%s5008_s1 + $0x2d4] ss:$8 sps:$4 sm:$0xff]  }
  0x53   : > { %2390 = vmatpush1.bf16.msra.mxu1 %v3554_v15  ;;  %2318 = vmatprep.subr.bf16.mxu0 %v3559_v16  ;;  %v3610_v15 = vld [vmem:[%s5008_s1 + $0x3d4] ss:$8 sps:$4 sm:$0xff]   ;;  %v3605_v16 = vld [vmem:[%s5008_s1 + $0x2d0] ss:$8 sps:$4 sm:$0xff]  }
  0x54   : > { %2391 = vmatprep.subr.bf16.mxu1 %v3562_v17  ;;  %v3608_v17 = vld [vmem:[%s5008_s1 + $0x3d0] ss:$8 sps:$4 sm:$0xff]  }
  0x55   : > { %2211 = vmatmul.mubr.bf16.gmra.mxu0 %v3098_v26  ;;  %v3625_v26 = vld [vmem:[%s5008_s1 + $0x2a4] ss:$8 sps:$4 sm:$0xff]  }
  0x56   : > { %2284 = vmatmul.mubr.bf16.gmra.mxu1 %v3100_v27  ;;  %2319 = vmatpush1.bf16.msra.mxu0 %v3557_v24  ;;  %v3617_v24 = vld [vmem:[%s5008_s1 + $0x2b0] ss:$8 sps:$4 sm:$0xff]   ;;  %v3628_v27 = vld [vmem:[%s5008_s1 + $0x3a4] ss:$8 sps:$4 sm:$0xff]  }
  0x57   : > { %2392 = vmatpush1.bf16.msra.mxu1 %v3560_v25  ;;  %2320 = vmatprep.subr.bf16.mxu0 %v3565_v28  ;;  %v3620_v25 = vld [vmem:[%s5008_s1 + $0x3b0] ss:$8 sps:$4 sm:$0xff]   ;;  %v3623_v28 = vld [vmem:[%s5008_s1 + $0x2a0] ss:$8 sps:$4 sm:$0xff]  }
  0x58   : > { %2393 = vmatprep.subr.bf16.mxu1 %v3568_v29  ;;  %2220 = vmatprep.mubr.bf16.mxu0 %v3115_v37  ;;  %v3626_v29 = vld [vmem:[%s5008_s1 + $0x3a0] ss:$8 sps:$4 sm:$0xff]  }
  0x59   : > { %2293 = vmatprep.mubr.bf16.mxu1 %v3117_v38  ;;  %v3638_v37 = vld [vmem:[%s5008_s1 + $0x380] ss:$8 sps:$4 sm:$0xff]   ;;  %v3643_v38 = vld [vmem:[%s5008_s1 + $0x474] ss:$8 sps:$4 sm:$0xff]  }
  0x5a   : > { %2321 = vmatpush1.bf16.msra.mxu0 %v3563_v30  ;;  %v3631_v30 = vld [vmem:[%s5008_s1 + $0x294] ss:$8 sps:$4 sm:$0xff]  }
  0x5b   : > { %2394 = vmatpush1.bf16.msra.mxu1 %v3566_v31  ;;  %2322 = vmatprep.subr.bf16.mxu0 %v3571_v36  ;;  %v3634_v31 = vld [vmem:[%s5008_s1 + $0x394] ss:$8 sps:$4 sm:$0xff]   ;;  %v3635_v36 = vld [vmem:[%s5008_s1 + $0x280] ss:$8 sps:$4 sm:$0xff]  }
  0x5c   : > { %2395 = vmatprep.subr.bf16.mxu1 %v3574_v39  ;;  %v3646_v39 = vld [vmem:[%s5008_s1 + $0x574] ss:$8 sps:$4 sm:$0xff]  }
  0x5d   : > { %2221 = vmatmul.mubr.bf16.gmra.mxu0 %v3114_v42  ;;  %v266_v42 = vld [vmem:[%s4037_s17 + $0x90] sm:$0xff] }
  0x5e   : > { %2294 = vmatmul.mubr.bf16.gmra.mxu1 %v3116_v43  ;;  %2323 = vmatpush1.bf16.msra.mxu0 %v3569_v40  ;;  %v3641_v40 = vld [vmem:[%s5008_s1 + $0x470] ss:$8 sps:$4 sm:$0xff]  }
  0x5f   : > { %2396 = vmatpush1.bf16.msra.mxu1 %v3572_v41  ;;  %2324 = vmatprep.subr.bf16.mxu0 %v3577_v44  ;;  %v3644_v41 = vld [vmem:[%s5008_s1 + $0x570] ss:$8 sps:$4 sm:$0xff]   ;;  %v3086_v44 = vcombine.low %v4212_v0, %v4215_v1  ;;  %v3661_v0 = vld [vmem:[%s5008_s1 + $0x444] ss:$8 sps:$4 sm:$0xff]  }
  0x60   : > { %2397 = vmatprep.subr.bf16.mxu1 %v3580_v45  ;;  %2230 = vmatprep.mubr.bf16.mxu0 %v3131_v48  ;;  %v274_v43 = vld [vmem:[%s4037_s17 + $0xd0] sm:$0xff]  ;;  %v3088_v45 = vcombine.low %v4218_v2, %v4221_v3  ;;  %v3649_v48 = vld [vmem:[%s5008_s1 + $0x464] ss:$8 sps:$4 sm:$0xff]  }
  0x61   : > { %2303 = vmatprep.mubr.bf16.mxu1 %v3133_v53  ;;  %v3103_v50 = vcombine.high %v266_v42, %v274_v43  ;;  %v3650_v53 = vld [vmem:[%s5008_s1 + $0x560] ss:$8 sps:$4 sm:$0xff]   ;;  %v3664_v1 = vld [vmem:[%s5008_s1 + $0x544] ss:$8 sps:$4 sm:$0xff]  }
  0x62   : > { %2325 = vmatpush1.bf16.msra.mxu0 %v3575_v51  ;;  %v3105_v51 = vcombine.high %v267_v46, %v275_v47 }
  0x63   : > { %2398 = vmatpush1.bf16.msra.mxu1 %v3578_v52  ;;  %2326 = vmatprep.subr.bf16.mxu0 %v3583_v54  ;;  %v3647_v52 = vld [vmem:[%s5008_s1 + $0x460] ss:$8 sps:$4 sm:$0xff]   ;;  %v3655_v54 = vld [vmem:[%s5008_s1 + $0x454] ss:$8 sps:$4 sm:$0xff]  }
  0x64   : > { %2399 = vmatprep.subr.bf16.mxu1 %v3586_v55  ;;  %v3658_v55 = vld [vmem:[%s5008_s1 + $0x554] ss:$8 sps:$4 sm:$0xff]  }
  0x65   : > { %2231 = vmatmul.mubr.bf16.gmra.mxu0 %v3130_v58  ;;  %v282_v58 = vld [vmem:[%s4037_s17 + $0x110] sm:$0xff] }
  0x66   : > { %2304 = vmatmul.mubr.bf16.gmra.mxu1 %v3132_v59  ;;  %2327 = vmatpush1.bf16.msra.mxu0 %v3581_v56  ;;  %v3653_v56 = vld [vmem:[%s5008_s1 + $0x450] ss:$8 sps:$4 sm:$0xff]  }
  0x67   : > { %2400 = vmatpush1.bf16.msra.mxu1 %v3584_v57  ;;  %2328 = vmatprep.subr.bf16.mxu0 %v3589_v60  ;;  %v3656_v57 = vld [vmem:[%s5008_s1 + $0x550] ss:$8 sps:$4 sm:$0xff]   ;;  %v3102_v60 = vcombine.low %v266_v42, %v274_v43  ;;  %v3697_v42 = vld [vmem:[%s5008_s1 + $0x4e4] ss:$8 sps:$4 sm:$0xff]  }
  0x68   : > { %2401 = vmatprep.subr.bf16.mxu1 %v3592_v61  ;;  %2346 = vmatprep.mubr.bf16.mxu0 %v3087_v5  ;;  %v290_v59 = vld [vmem:[%s4037_s17 + $0x150] sm:$0xff]  ;;  %v3104_v61 = vcombine.low %v267_v46, %v275_v47  ;;  %v3662_v5 = vld [vmem:[%s5008_s1 + $0x540] ss:$8 sps:$4 sm:$0xff]   ;;  %v3700_v43 = vld [vmem:[%s5008_s1 + $0x5e4] ss:$8 sps:$4 sm:$0xff]  }
  0x69   : > { %2419 = vmatprep.mubr.bf16.mxu1 %v3089_v7  ;;  %v3119_v2 = vcombine.high %v282_v58, %v290_v59  ;;  %v3670_v7 = vld [vmem:[%s5008_s1 + $0x534] ss:$8 sps:$4 sm:$0xff]  }
  0x6a   : > { %2329 = vmatpush1.bf16.msra.mxu0 %v3587_v62  ;;  %v283_v62 = vld [vmem:[%s4037_s17 + $0x118] sm:$0xff] }
  0x6b   : > { %2402 = vmatpush1.bf16.msra.mxu1 %v3590_v63  ;;  %2330 = vmatprep.subr.bf16.mxu0 %v3595_v4  ;;  %v291_v63 = vld [vmem:[%s4037_s17 + $0x158] sm:$0xff]  ;;  %v3659_v4 = vld [vmem:[%s5008_s1 + $0x440] ss:$8 sps:$4 sm:$0xff]  }
  0x6c   : > { %2403 = vmatprep.subr.bf16.mxu1 %v3598_v6  ;;  %v3121_v3 = vcombine.high %v283_v62, %v291_v63  ;;  %v3667_v6 = vld [vmem:[%s5008_s1 + $0x434] ss:$8 sps:$4 sm:$0xff]  }
  0x6d   : > { %v3703_v46 = vld [vmem:[%s5008_s1 + $0x4d4] ss:$8 sps:$4 sm:$0xff]  }
  0x6e   : > { %2331 = vmatpush2.bf16.msra.mxu0 %v3593_v8  ;;  %v3665_v8 = vld [vmem:[%s5008_s1 + $0x430] ss:$8 sps:$4 sm:$0xff]   ;;  %v3706_v47 = vld [vmem:[%s5008_s1 + $0x5d4] ss:$8 sps:$4 sm:$0xff]  }
  0x6f   : > { %2404 = vmatpush2.bf16.msra.mxu1 %v3596_v9  ;;  %2332 = vmatprep.subr.bf16.mxu0 %v3601_v10  ;;  %v298_v9 = vld [vmem:[%s4037_s17 + $0x190] sm:$0xff] }
  0x70   : > { %2405 = vmatprep.subr.bf16.mxu1 %v3604_v11  ;;  %v306_v10 = vld [vmem:[%s4037_s17 + $0x1d0] sm:$0xff]  ;;  %v3118_v11 = vcombine.low %v282_v58, %v290_v59  ;;  %v3721_v58 = vld [vmem:[%s5008_s1 + $0x4a4] ss:$8 sps:$4 sm:$0xff]  }
  0x71   : > { %v3724_v59 = vld [vmem:[%s5008_s1 + $0x5a4] ss:$8 sps:$4 sm:$0xff]  }
  0x72   : > { %2333 = vmatpush2.bf16.msra.mxu0 %v3599_v12  ;;  %v3120_v12 = vcombine.low %v283_v62, %v291_v63  ;;  %v3727_v62 = vld [vmem:[%s5008_s1 + $0x494] ss:$8 sps:$4 sm:$0xff]  }
  0x73   : > { %2406 = vmatpush2.bf16.msra.mxu1 %v3602_v13  ;;  %2334 = vmatprep.subr.bf16.mxu0 %v3607_v14  ;;  %v299_v13 = vld [vmem:[%s4037_s17 + $0x198] sm:$0xff] }
  0x74   : > { %2407 = vmatprep.subr.bf16.mxu1 %v3610_v15  ;;  %v307_v14 = vld [vmem:[%s4037_s17 + $0x1d8] sm:$0xff] }
  0x75   : > { %v3668_v15 = vld [vmem:[%s5008_s1 + $0x530] ss:$8 sps:$4 sm:$0xff]   ;;  %v3730_v63 = vld [vmem:[%s5008_s1 + $0x594] ss:$8 sps:$4 sm:$0xff]  }
  0x76   : > { %2335 = vmatpush2.bf16.msra.mxu0 %v3605_v16  ;;  %v3673_v16 = vld [vmem:[%s5008_s1 + $0x424] ss:$8 sps:$4 sm:$0xff]  }
  0x77   : > { %2408 = vmatpush2.bf16.msra.mxu1 %v3608_v17  ;;  %2336 = vmatprep.subr.bf16.mxu0 %v3613_v18  ;;  %v3676_v17 = vld [vmem:[%s5008_s1 + $0x524] ss:$8 sps:$4 sm:$0xff]   ;;  %v3135_v18 = vcombine.high %v298_v9, %v306_v10 }
  0x78   : > { %2409 = vmatprep.subr.bf16.mxu1 %v3616_v19  ;;  %v3137_v19 = vcombine.high %v299_v13, %v307_v14 }
  0x7a   : > { %2337 = vmatpush2.bf16.msra.mxu0 %v3611_v20  ;;  %v3671_v20 = vld [vmem:[%s5008_s1 + $0x420] ss:$8 sps:$4 sm:$0xff]  }
  0x7b   : > { %2410 = vmatpush2.bf16.msra.mxu1 %v3614_v21  ;;  %2338 = vmatprep.subr.bf16.mxu0 %v3619_v22  ;;  %v3674_v21 = vld [vmem:[%s5008_s1 + $0x520] ss:$8 sps:$4 sm:$0xff]   ;;  %v3679_v22 = vld [vmem:[%s5008_s1 + $0x414] ss:$8 sps:$4 sm:$0xff]  }
  0x7c   : > { %2411 = vmatprep.subr.bf16.mxu1 %v3622_v23  ;;  %v3682_v23 = vld [vmem:[%s5008_s1 + $0x514] ss:$8 sps:$4 sm:$0xff]  }
  0x7e   : > { %2339 = vmatpush2.bf16.msra.mxu0 %v3617_v24  ;;  %v4418_v24 = vld [vmem:[%s4037_s17 + $0x20] sm:$0xff] }
  0x7f   : > { %2412 = vmatpush2.bf16.msra.mxu1 %v3620_v25  ;;  %2340 = vmatprep.subr.bf16.mxu0 %v3625_v26  ;;  %v4421_v25 = vld [vmem:[%s4037_s17 + $0x60] sm:$0xff]  ;;  %v3134_v26 = vcombine.low %v298_v9, %v306_v10 }
  0x80   : > { %2413 = vmatprep.subr.bf16.mxu1 %v3628_v27  ;;  %v3136_v27 = vcombine.low %v299_v13, %v307_v14  ;;  %v3090_v9 = vcombine.low %v4418_v24, %v4421_v25  ;;  %v277_v13 = vld [vmem:[%s4037_s17 + $0xe8] sm:$0xff]  ;;  %v3737_v14 = vld [vmem:[%s5008_s1 + $0x670] ss:$8 sps:$4 sm:$0xff]  }
  0x82   : > { %2341 = vmatpush2.bf16.msra.mxu0 %v3623_v28  ;;  %v4424_v28 = vld [vmem:[%s4037_s17 + $0x28] sm:$0xff] }
  0x83   : > { %2414 = vmatpush2.bf16.msra.mxu1 %v3626_v29  ;;  %2342 = vmatprep.subr.bf16.mxu0 %v3631_v30  ;;  %v4427_v29 = vld [vmem:[%s4037_s17 + $0x68] sm:$0xff]  ;;  %v3677_v30 = vld [vmem:[%s5008_s1 + $0x410] ss:$8 sps:$4 sm:$0xff]  }
  0x84   : > { %2415 = vmatprep.subr.bf16.mxu1 %v3634_v31  ;;  %v3680_v31 = vld [vmem:[%s5008_s1 + $0x510] ss:$8 sps:$4 sm:$0xff]   ;;  %v3092_v10 = vcombine.low %v4424_v28, %v4427_v29 }
  0x86   : > { %2343 = vmatpush2.bf16.msra.mxu0 %v3629_v32  ;;  %v3685_v32 = vld [vmem:[%s5008_s1 + $0x404] ss:$8 sps:$4 sm:$0xff]  }
  0x87   : > { %2416 = vmatpush2.bf16.msra.mxu1 %v3632_v33  ;;  %2344 = vmatprep.subr.bf16.mxu0 %v3637_v34  ;;  %v3688_v33 = vld [vmem:[%s5008_s1 + $0x504] ss:$8 sps:$4 sm:$0xff]   ;;  %v3091_v34 = vcombine.high %v4418_v24, %v4421_v25 }
  0x88   : > { %2417 = vmatprep.subr.bf16.mxu1 %v3640_v35  ;;  %v3093_v35 = vcombine.high %v4424_v28, %v4427_v29  ;;  %v284_v24 = vld [vmem:[%s4037_s17 + $0x120] sm:$0xff]  ;;  %v285_v28 = vld [vmem:[%s4037_s17 + $0x128] sm:$0xff] }
  0x89   : > { %v293_v29 = vld [vmem:[%s4037_s17 + $0x168] sm:$0xff] }
  0x8a   : > { %2345 = vmatpush2.bf16.msra.mxu0 %v3635_v36  ;;  %v3683_v36 = vld [vmem:[%s5008_s1 + $0x400] ss:$8 sps:$4 sm:$0xff]  }
  0x8b   : > { %2418 = vmatpush2.bf16.msra.mxu1 %v3638_v37  ;;  %2460 = vmatprep.subr.bf16.mxu0 %v3643_v38  ;;  %v3686_v37 = vld [vmem:[%s5008_s1 + $0x500] ss:$8 sps:$4 sm:$0xff]   ;;  %v3691_v38 = vld [vmem:[%s5008_s1 + $0x4f4] ss:$8 sps:$4 sm:$0xff]  }
  0x8c   : > { %2533 = vmatprep.subr.bf16.mxu1 %v3646_v39  ;;  %v3694_v39 = vld [vmem:[%s5008_s1 + $0x5f4] ss:$8 sps:$4 sm:$0xff]  }
  0x8d   : > { %2347 = vmatmul.mubr.bf16.vlgmr.msra.gmra.mxu0 %v3086_v44  ;;  %v3695_v44 = vld [vmem:[%s5008_s1 + $0x4e0] ss:$8 sps:$4 sm:$0xff]  }
  0x8e   : > { %2420 = vmatmul.mubr.bf16.vlgmr.msra.gmra.mxu1 %v3088_v45  ;;  %2461 = vmatpush1.bf16.msra.mxu0 %v3641_v40  ;;  %v3689_v40 = vld [vmem:[%s5008_s1 + $0x4f0] ss:$8 sps:$4 sm:$0xff]   ;;  %v3698_v45 = vld [vmem:[%s5008_s1 + $0x5e0] ss:$8 sps:$4 sm:$0xff]  }
  0x8f   : > { %2534 = vmatpush1.bf16.msra.mxu1 %v3644_v41  ;;  %2462 = vmatprep.subr.bf16.mxu0 %v3649_v48  ;;  %v3692_v41 = vld [vmem:[%s5008_s1 + $0x5f0] ss:$8 sps:$4 sm:$0xff]  }
  0x90   : > { %2535 = vmatprep.subr.bf16.mxu1 %v3652_v49  ;;  %2356 = vmatprep.mubr.bf16.mxu0 %v3103_v50  ;;  %v3701_v48 = vld [vmem:[%s5008_s1 + $0x4d0] ss:$8 sps:$4 sm:$0xff]   ;;  %v3709_v50 = vld [vmem:[%s5008_s1 + $0x4c4] ss:$8 sps:$4 sm:$0xff]  }
  0x91   : > { %2429 = vmatprep.mubr.bf16.mxu1 %v3105_v51  ;;  %v3704_v49 = vld [vmem:[%s5008_s1 + $0x5d0] ss:$8 sps:$4 sm:$0xff]   ;;  %v3712_v51 = vld [vmem:[%s5008_s1 + $0x5c4] ss:$8 sps:$4 sm:$0xff]  }
  0x92   : > { %2463 = vmatpush1.bf16.msra.mxu0 %v3647_v52  ;;  %v3707_v52 = vld [vmem:[%s5008_s1 + $0x4c0] ss:$8 sps:$4 sm:$0xff]  }
  0x93   : > { %2536 = vmatpush1.bf16.msra.mxu1 %v3650_v53  ;;  %2464 = vmatprep.subr.bf16.mxu0 %v3655_v54  ;;  %v3710_v53 = vld [vmem:[%s5008_s1 + $0x5c0] ss:$8 sps:$4 sm:$0xff]   ;;  %v3715_v54 = vld [vmem:[%s5008_s1 + $0x4b4] ss:$8 sps:$4 sm:$0xff]  }
  0x94   : > { %2537 = vmatprep.subr.bf16.mxu1 %v3658_v55  ;;  %v3718_v55 = vld [vmem:[%s5008_s1 + $0x5b4] ss:$8 sps:$4 sm:$0xff]  }
  0x95   : > { %2357 = vmatmul.mubr.bf16.gmra.mxu0 %v3102_v60  ;;  %v3719_v60 = vld [vmem:[%s5008_s1 + $0x4a0] ss:$8 sps:$4 sm:$0xff]  }
  0x96   : > { %2430 = vmatmul.mubr.bf16.gmra.mxu1 %v3104_v61  ;;  %2465 = vmatpush1.bf16.msra.mxu0 %v3653_v56  ;;  %v3713_v56 = vld [vmem:[%s5008_s1 + $0x4b0] ss:$8 sps:$4 sm:$0xff]   ;;  %v3722_v61 = vld [vmem:[%s5008_s1 + $0x5a0] ss:$8 sps:$4 sm:$0xff]  }
  0x97   : > { %2538 = vmatpush1.bf16.msra.mxu1 %v3656_v57  ;;  %2466 = vmatprep.subr.bf16.mxu0 %v3661_v0  ;;  %v3716_v57 = vld [vmem:[%s5008_s1 + $0x5b0] ss:$8 sps:$4 sm:$0xff]  }
  0x98   : > { %2539 = vmatprep.subr.bf16.mxu1 %v3664_v1  ;;  %2366 = vmatprep.mubr.bf16.mxu0 %v3119_v2  ;;  %v3725_v0 = vld [vmem:[%s5008_s1 + $0x490] ss:$8 sps:$4 sm:$0xff]   ;;  %v3733_v2 = vld [vmem:[%s5008_s1 + $0x484] ss:$8 sps:$4 sm:$0xff]  }
  0x99   : > { %2439 = vmatprep.mubr.bf16.mxu1 %v3121_v3  ;;  %v3728_v1 = vld [vmem:[%s5008_s1 + $0x590] ss:$8 sps:$4 sm:$0xff]   ;;  %v3736_v3 = vld [vmem:[%s5008_s1 + $0x584] ss:$8 sps:$4 sm:$0xff]  }
  0x9a   : > { %2467 = vmatpush1.bf16.msra.mxu0 %v3659_v4  ;;  %v3731_v4 = vld [vmem:[%s5008_s1 + $0x480] ss:$8 sps:$4 sm:$0xff]  }
  0x9b   : > { %2540 = vmatpush1.bf16.msra.mxu1 %v3662_v5  ;;  %2468 = vmatprep.subr.bf16.mxu0 %v3667_v6  ;;  %v3734_v5 = vld [vmem:[%s5008_s1 + $0x580] ss:$8 sps:$4 sm:$0xff]   ;;  %v3739_v6 = vld [vmem:[%s5008_s1 + $0x674] ss:$8 sps:$4 sm:$0xff]  }
  0x9c   : > { %2541 = vmatprep.subr.bf16.mxu1 %v3670_v7  ;;  %v3742_v7 = vld [vmem:[%s5008_s1 + $0x774] ss:$8 sps:$4 sm:$0xff]  }
  0x9d   : > { %2367 = vmatmul.mubr.bf16.gmra.mxu0 %v3118_v11  ;;  %v276_v11 = vld [vmem:[%s4037_s17 + $0xe0] sm:$0xff] }
  0x9e   : > { %2440 = vmatmul.mubr.bf16.gmra.mxu1 %v3120_v12  ;;  %2469 = vmatpush1.bf16.msra.mxu0 %v3665_v8  ;;  %v268_v8 = vld [vmem:[%s4037_s17 + $0xa0] sm:$0xff]  ;;  %v269_v12 = vld [vmem:[%s4037_s17 + $0xa8] sm:$0xff] }
  0x9f   : > { %2542 = vmatpush1.bf16.msra.mxu1 %v3668_v15  ;;  %2470 = vmatprep.subr.bf16.mxu0 %v3673_v16  ;;  %v3740_v15 = vld [vmem:[%s5008_s1 + $0x770] ss:$8 sps:$4 sm:$0xff]   ;;  %v3745_v16 = vld [vmem:[%s5008_s1 + $0x664] ss:$8 sps:$4 sm:$0xff]   ;;  %v3106_v25 = vcombine.low %v268_v8, %v276_v11 }
  0xa0   : > { %2543 = vmatprep.subr.bf16.mxu1 %v3676_v17  ;;  %2376 = vmatprep.mubr.bf16.mxu0 %v3135_v18  ;;  %v3748_v17 = vld [vmem:[%s5008_s1 + $0x764] ss:$8 sps:$4 sm:$0xff]   ;;  %v3107_v18 = vcombine.high %v268_v8, %v276_v11  ;;  %v3785_v8 = vld [vmem:[%s5008_s1 + $0x6f0] ss:$8 sps:$4 sm:$0xff]  }
  0xa1   : > { %2449 = vmatprep.mubr.bf16.mxu1 %v3137_v19  ;;  %v3109_v19 = vcombine.high %v269_v12, %v277_v13  ;;  %v3796_v11 = vld [vmem:[%s5008_s1 + $0x7e4] ss:$8 sps:$4 sm:$0xff]  }
  0xa2   : > { %2471 = vmatpush1.bf16.msra.mxu0 %v3671_v20  ;;  %v3743_v20 = vld [vmem:[%s5008_s1 + $0x660] ss:$8 sps:$4 sm:$0xff]  }
  0xa3   : > { %2544 = vmatpush1.bf16.msra.mxu1 %v3674_v21  ;;  %2472 = vmatprep.subr.bf16.mxu0 %v3679_v22  ;;  %v3746_v21 = vld [vmem:[%s5008_s1 + $0x760] ss:$8 sps:$4 sm:$0xff]   ;;  %v3751_v22 = vld [vmem:[%s5008_s1 + $0x654] ss:$8 sps:$4 sm:$0xff]  }
  0xa4   : > { %2545 = vmatprep.subr.bf16.mxu1 %v3682_v23  ;;  %v3754_v23 = vld [vmem:[%s5008_s1 + $0x754] ss:$8 sps:$4 sm:$0xff]  }
  0xa5   : > { %2377 = vmatmul.mubr.bf16.gmra.mxu0 %v3134_v26  ;;  %v3108_v26 = vcombine.low %v269_v12, %v277_v13  ;;  %v3791_v12 = vld [vmem:[%s5008_s1 + $0x6e0] ss:$8 sps:$4 sm:$0xff]  }
  0xa6   : > { %2450 = vmatmul.mubr.bf16.gmra.mxu1 %v3136_v27  ;;  %2473 = vmatpush1.bf16.msra.mxu0 %v3677_v30  ;;  %v292_v27 = vld [vmem:[%s4037_s17 + $0x160] sm:$0xff]  ;;  %v3749_v30 = vld [vmem:[%s5008_s1 + $0x650] ss:$8 sps:$4 sm:$0xff]  }
  0xa7   : > { %2546 = vmatpush1.bf16.msra.mxu1 %v3680_v31  ;;  %2474 = vmatprep.subr.bf16.mxu0 %v3685_v32  ;;  %v3752_v31 = vld [vmem:[%s5008_s1 + $0x750] ss:$8 sps:$4 sm:$0xff]   ;;  %v3757_v32 = vld [vmem:[%s5008_s1 + $0x644] ss:$8 sps:$4 sm:$0xff]   ;;  %v3794_v13 = vld [vmem:[%s5008_s1 + $0x7e0] ss:$8 sps:$4 sm:$0xff]  }
  0xa8   : > { %2547 = vmatprep.subr.bf16.mxu1 %v3688_v33  ;;  %2492 = vmatprep.mubr.bf16.mxu0 %v3091_v34  ;;  %v3760_v33 = vld [vmem:[%s5008_s1 + $0x744] ss:$8 sps:$4 sm:$0xff]   ;;  %v3123_v34 = vcombine.high %v284_v24, %v292_v27 }
  0xa9   : > { %2565 = vmatprep.mubr.bf16.mxu1 %v3093_v35  ;;  %v3125_v35 = vcombine.high %v285_v28, %v293_v29 }
  0xaa   : > { %2475 = vmatpush1.bf16.msra.mxu0 %v3683_v36  ;;  %v3755_v36 = vld [vmem:[%s5008_s1 + $0x640] ss:$8 sps:$4 sm:$0xff]  }
  0xab   : > { %2548 = vmatpush1.bf16.msra.mxu1 %v3686_v37  ;;  %2476 = vmatprep.subr.bf16.mxu0 %v3691_v38  ;;  %v3758_v37 = vld [vmem:[%s5008_s1 + $0x740] ss:$8 sps:$4 sm:$0xff]   ;;  %v3763_v38 = vld [vmem:[%s5008_s1 + $0x634] ss:$8 sps:$4 sm:$0xff]  }
  0xac   : > { %2549 = vmatprep.subr.bf16.mxu1 %v3694_v39  ;;  %v3766_v39 = vld [vmem:[%s5008_s1 + $0x734] ss:$8 sps:$4 sm:$0xff]  }
  0xae   : > { %2477 = vmatpush2.bf16.msra.mxu0 %v3689_v40  ;;  %v300_v40 = vld [vmem:[%s4037_s17 + $0x1a0] sm:$0xff] }
  0xaf   : > { %2550 = vmatpush2.bf16.msra.mxu1 %v3692_v41  ;;  %2478 = vmatprep.subr.bf16.mxu0 %v3697_v42  ;;  %v3122_v41 = vcombine.low %v284_v24, %v292_v27  ;;  %v3124_v42 = vcombine.low %v285_v28, %v293_v29  ;;  %v3809_v24 = vld [vmem:[%s5008_s1 + $0x6b0] ss:$8 sps:$4 sm:$0xff]   ;;  %v3820_v27 = vld [vmem:[%s5008_s1 + $0x7a4] ss:$8 sps:$4 sm:$0xff]   ;;  %v3815_v28 = vld [vmem:[%s5008_s1 + $0x6a0] ss:$8 sps:$4 sm:$0xff]  }
  0xb0   : > { %2551 = vmatprep.subr.bf16.mxu1 %v3700_v43  ;;  %v308_v43 = vld [vmem:[%s4037_s17 + $0x1e0] sm:$0xff] }
  0xb1   : > { %v3818_v29 = vld [vmem:[%s5008_s1 + $0x7a0] ss:$8 sps:$4 sm:$0xff]  }
  0xb2   : > { %2479 = vmatpush2.bf16.msra.mxu0 %v3695_v44  ;;  %v301_v44 = vld [vmem:[%s4037_s17 + $0x1a8] sm:$0xff] }
  0xb3   : > { %2552 = vmatpush2.bf16.msra.mxu1 %v3698_v45  ;;  %2480 = vmatprep.subr.bf16.mxu0 %v3703_v46  ;;  %v309_v45 = vld [vmem:[%s4037_s17 + $0x1e8] sm:$0xff]  ;;  %v3761_v46 = vld [vmem:[%s5008_s1 + $0x630] ss:$8 sps:$4 sm:$0xff]  }
  0xb4   : > { %2553 = vmatprep.subr.bf16.mxu1 %v3706_v47  ;;  %v3764_v47 = vld [vmem:[%s5008_s1 + $0x730] ss:$8 sps:$4 sm:$0xff]  }
  0xb6   : > { %2481 = vmatpush2.bf16.msra.mxu0 %v3701_v48  ;;  %v3769_v48 = vld [vmem:[%s5008_s1 + $0x624] ss:$8 sps:$4 sm:$0xff]  }
  0xb7   : > { %2554 = vmatpush2.bf16.msra.mxu1 %v3704_v49  ;;  %2482 = vmatprep.subr.bf16.mxu0 %v3709_v50  ;;  %v3772_v49 = vld [vmem:[%s5008_s1 + $0x724] ss:$8 sps:$4 sm:$0xff]   ;;  %v3139_v50 = vcombine.high %v300_v40, %v308_v43 }
  0xb8   : > { %2555 = vmatprep.subr.bf16.mxu1 %v3712_v51  ;;  %v3141_v51 = vcombine.high %v301_v44, %v309_v45 }
  0xba   : > { %2483 = vmatpush2.bf16.msra.mxu0 %v3707_v52  ;;  %v3767_v52 = vld [vmem:[%s5008_s1 + $0x620] ss:$8 sps:$4 sm:$0xff]  }
  0xbb   : > { %2556 = vmatpush2.bf16.msra.mxu1 %v3710_v53  ;;  %2484 = vmatprep.subr.bf16.mxu0 %v3715_v54  ;;  %v3770_v53 = vld [vmem:[%s5008_s1 + $0x720] ss:$8 sps:$4 sm:$0xff]   ;;  %v3775_v54 = vld [vmem:[%s5008_s1 + $0x614] ss:$8 sps:$4 sm:$0xff]  }
  0xbc   : > { %2557 = vmatprep.subr.bf16.mxu1 %v3718_v55  ;;  %v3778_v55 = vld [vmem:[%s5008_s1 + $0x714] ss:$8 sps:$4 sm:$0xff]  }
  0xbe   : > { %2485 = vmatpush2.bf16.msra.mxu0 %v3713_v56  ;;  %v4642_v56 = vld [vmem:[%s4037_s17 + $0x30] sm:$0xff] }
  0xbf   : > { %2558 = vmatpush2.bf16.msra.mxu1 %v3716_v57  ;;  %2486 = vmatprep.subr.bf16.mxu0 %v3721_v58  ;;  %v3138_v57 = vcombine.low %v300_v40, %v308_v43  ;;  %v3140_v58 = vcombine.low %v301_v44, %v309_v45  ;;  %v271_v40 = vld [vmem:[%s4037_s17 + $0xb8] sm:$0xff] }
  0xc0   : > { %2559 = vmatprep.subr.bf16.mxu1 %v3724_v59  ;;  %v4645_v59 = vld [vmem:[%s4037_s17 + $0x70] sm:$0xff] }
  0xc2   : > { %2487 = vmatpush2.bf16.msra.mxu0 %v3719_v60  ;;  %v4648_v60 = vld [vmem:[%s4037_s17 + $0x38] sm:$0xff] }
  0xc3   : > { %2560 = vmatpush2.bf16.msra.mxu1 %v3722_v61  ;;  %2488 = vmatprep.subr.bf16.mxu0 %v3727_v62  ;;  %v4651_v61 = vld [vmem:[%s4037_s17 + $0x78] sm:$0xff] }
  0xc4   : > { %2561 = vmatprep.subr.bf16.mxu1 %v3730_v63  ;;  %v3773_v62 = vld [vmem:[%s5008_s1 + $0x610] ss:$8 sps:$4 sm:$0xff]   ;;  %v3096_v43 = vcombine.low %v4648_v60, %v4651_v61 }
  0xc5   : > { %v3776_v63 = vld [vmem:[%s5008_s1 + $0x710] ss:$8 sps:$4 sm:$0xff]  }
  0xc6   : > { %2489 = vmatpush2.bf16.msra.mxu0 %v3725_v0  ;;  %v3781_v0 = vld [vmem:[%s5008_s1 + $0x604] ss:$8 sps:$4 sm:$0xff]  }
  0xc7   : > { %2562 = vmatpush2.bf16.msra.mxu1 %v3728_v1  ;;  %2490 = vmatprep.subr.bf16.mxu0 %v3733_v2  ;;  %v3784_v1 = vld [vmem:[%s5008_s1 + $0x704] ss:$8 sps:$4 sm:$0xff]   ;;  %v3095_v2 = vcombine.high %v4642_v56, %v4645_v59 }
  0xc8   : > { %2563 = vmatprep.subr.bf16.mxu1 %v3736_v3  ;;  %v3097_v3 = vcombine.high %v4648_v60, %v4651_v61 }
  0xca   : > { %2491 = vmatpush2.bf16.msra.mxu0 %v3731_v4  ;;  %v3779_v4 = vld [vmem:[%s5008_s1 + $0x600] ss:$8 sps:$4 sm:$0xff]  }
  0xcb   : > { %2564 = vmatpush2.bf16.msra.mxu1 %v3734_v5  ;;  %2606 = vmatprep.subr.bf16.mxu0 %v3739_v6  ;;  %v3782_v5 = vld [vmem:[%s5008_s1 + $0x700] ss:$8 sps:$4 sm:$0xff]   ;;  %v3787_v6 = vld [vmem:[%s5008_s1 + $0x6f4] ss:$8 sps:$4 sm:$0xff]  }
  0xcc   : > { %2679 = vmatprep.subr.bf16.mxu1 %v3742_v7  ;;  %v3790_v7 = vld [vmem:[%s5008_s1 + $0x7f4] ss:$8 sps:$4 sm:$0xff]  }
  0xcd   : > { %2493 = vmatmul.mubr.bf16.vlgmr.msra.gmra.mxu0 %v3090_v9  ;;  %v3788_v9 = vld [vmem:[%s5008_s1 + $0x7f0] ss:$8 sps:$4 sm:$0xff]  }
  0xce   : > { %2566 = vmatmul.mubr.bf16.vlgmr.msra.gmra.mxu1 %v3092_v10  ;;  %2607 = vmatpush1.bf16.msra.mxu0 %v3737_v14  ;;  %v3793_v10 = vld [vmem:[%s5008_s1 + $0x6e4] ss:$8 sps:$4 sm:$0xff]   ;;  %v3799_v14 = vld [vmem:[%s5008_s1 + $0x6d4] ss:$8 sps:$4 sm:$0xff]  }
  0xcf   : > { %2680 = vmatpush1.bf16.msra.mxu1 %v3740_v15  ;;  %2608 = vmatprep.subr.bf16.mxu0 %v3745_v16  ;;  %v3802_v15 = vld [vmem:[%s5008_s1 + $0x7d4] ss:$8 sps:$4 sm:$0xff]   ;;  %v3797_v16 = vld [vmem:[%s5008_s1 + $0x6d0] ss:$8 sps:$4 sm:$0xff]  }
  0xd0   : > { %2681 = vmatprep.subr.bf16.mxu1 %v3748_v17  ;;  %2502 = vmatprep.mubr.bf16.mxu0 %v3107_v18  ;;  %v3800_v17 = vld [vmem:[%s5008_s1 + $0x7d0] ss:$8 sps:$4 sm:$0xff]   ;;  %v3805_v18 = vld [vmem:[%s5008_s1 + $0x6c4] ss:$8 sps:$4 sm:$0xff]  }
  0xd1   : > { %2575 = vmatprep.mubr.bf16.mxu1 %v3109_v19  ;;  %v3808_v19 = vld [vmem:[%s5008_s1 + $0x7c4] ss:$8 sps:$4 sm:$0xff]  }
  0xd2   : > { %2609 = vmatpush1.bf16.msra.mxu0 %v3743_v20  ;;  %v3803_v20 = vld [vmem:[%s5008_s1 + $0x6c0] ss:$8 sps:$4 sm:$0xff]  }
  0xd3   : > { %2682 = vmatpush1.bf16.msra.mxu1 %v3746_v21  ;;  %2610 = vmatprep.subr.bf16.mxu0 %v3751_v22  ;;  %v3806_v21 = vld [vmem:[%s5008_s1 + $0x7c0] ss:$8 sps:$4 sm:$0xff]   ;;  %v3811_v22 = vld [vmem:[%s5008_s1 + $0x6b4] ss:$8 sps:$4 sm:$0xff]  }
  0xd4   : > { %2683 = vmatprep.subr.bf16.mxu1 %v3754_v23  ;;  %v3814_v23 = vld [vmem:[%s5008_s1 + $0x7b4] ss:$8 sps:$4 sm:$0xff]  }
  0xd5   : > { %2503 = vmatmul.mubr.bf16.gmra.mxu0 %v3106_v25  ;;  %v3812_v25 = vld [vmem:[%s5008_s1 + $0x7b0] ss:$8 sps:$4 sm:$0xff]  }
  0xd6   : > { %2576 = vmatmul.mubr.bf16.gmra.mxu1 %v3108_v26  ;;  %2611 = vmatpush1.bf16.msra.mxu0 %v3749_v30  ;;  %v3817_v26 = vld [vmem:[%s5008_s1 + $0x6a4] ss:$8 sps:$4 sm:$0xff]   ;;  %v3823_v30 = vld [vmem:[%s5008_s1 + $0x694] ss:$8 sps:$4 sm:$0xff]  }
  0xd7   : > { %2684 = vmatpush1.bf16.msra.mxu1 %v3752_v31  ;;  %2612 = vmatprep.subr.bf16.mxu0 %v3757_v32  ;;  %v3826_v31 = vld [vmem:[%s5008_s1 + $0x794] ss:$8 sps:$4 sm:$0xff]   ;;  %v3821_v32 = vld [vmem:[%s5008_s1 + $0x690] ss:$8 sps:$4 sm:$0xff]  }
  0xd8   : > { %2685 = vmatprep.subr.bf16.mxu1 %v3760_v33  ;;  %2512 = vmatprep.mubr.bf16.mxu0 %v3123_v34  ;;  %v3824_v33 = vld [vmem:[%s5008_s1 + $0x790] ss:$8 sps:$4 sm:$0xff]   ;;  %v3829_v34 = vld [vmem:[%s5008_s1 + $0x684] ss:$8 sps:$4 sm:$0xff]  }
  0xd9   : > { %2585 = vmatprep.mubr.bf16.mxu1 %v3125_v35  ;;  %v3832_v35 = vld [vmem:[%s5008_s1 + $0x784] ss:$8 sps:$4 sm:$0xff]  }
  0xda   : > { %2613 = vmatpush1.bf16.msra.mxu0 %v3755_v36  ;;  %v3827_v36 = vld [vmem:[%s5008_s1 + $0x680] ss:$8 sps:$4 sm:$0xff]  }
  0xdb   : > { %2686 = vmatpush1.bf16.msra.mxu1 %v3758_v37  ;;  %2614 = vmatprep.subr.bf16.mxu0 %v3763_v38  ;;  %v3830_v37 = vld [vmem:[%s5008_s1 + $0x780] ss:$8 sps:$4 sm:$0xff]   ;;  %v270_v38 = vld [vmem:[%s4037_s17 + $0xb0] sm:$0xff] }
  0xdc   : > { %2687 = vmatprep.subr.bf16.mxu1 %v3766_v39  ;;  %v278_v39 = vld [vmem:[%s4037_s17 + $0xf0] sm:$0xff] }
  0xdd   : > { %2513 = vmatmul.mubr.bf16.gmra.mxu0 %v3122_v41  ;;  %v279_v41 = vld [vmem:[%s4037_s17 + $0xf8] sm:$0xff]  ;;  %v3111_v44 = vcombine.high %v270_v38, %v278_v39 }
  0xde   : > { %2586 = vmatmul.mubr.bf16.gmra.mxu1 %v3124_v42  ;;  %2615 = vmatpush1.bf16.msra.mxu0 %v3761_v46  ;;  %v3094_v42 = vcombine.low %v4642_v56, %v4645_v59  ;;  %v3113_v45 = vcombine.high %v271_v40, %v279_v41  ;;  %v3112_v59 = vcombine.low %v271_v40, %v279_v41 }
  0xdf   : > { %2688 = vmatpush1.bf16.msra.mxu1 %v3764_v47  ;;  %2616 = vmatprep.subr.bf16.mxu0 %v3769_v48 }
  0xe0   : > { %2689 = vmatprep.subr.bf16.mxu1 %v3772_v49  ;;  %2522 = vmatprep.mubr.bf16.mxu0 %v3139_v50  ;;  %v286_v49 = vld [vmem:[%s4037_s17 + $0x130] sm:$0xff] }
  0xe1   : > { %2595 = vmatprep.mubr.bf16.mxu1 %v3141_v51 }
  0xe2   : > { %2617 = vmatpush1.bf16.msra.mxu0 %v3767_v52  ;;  %v294_v52 = vld [vmem:[%s4037_s17 + $0x170] sm:$0xff] }
  0xe3   : > { %2690 = vmatpush1.bf16.msra.mxu1 %v3770_v53  ;;  %2618 = vmatprep.subr.bf16.mxu0 %v3775_v54  ;;  %v287_v53 = vld [vmem:[%s4037_s17 + $0x138] sm:$0xff]  ;;  %v3127_v61 = vcombine.high %v286_v49, %v294_v52 }
  0xe4   : > { %2691 = vmatprep.subr.bf16.mxu1 %v3778_v55  ;;  %v295_v54 = vld [vmem:[%s4037_s17 + $0x178] sm:$0xff] }
  0xe5   : > { %2523 = vmatmul.mubr.bf16.gmra.mxu0 %v3138_v57 }
  0xe6   : > { %2596 = vmatmul.mubr.bf16.gmra.mxu1 %v3140_v58  ;;  %2619 = vmatpush1.bf16.msra.mxu0 %v3773_v62  ;;  %v3110_v58 = vcombine.low %v270_v38, %v278_v39  ;;  %v3129_v62 = vcombine.high %v287_v53, %v295_v54 }
  0xe7   : > { %2692 = vmatpush1.bf16.msra.mxu1 %v3776_v63  ;;  %2620 = vmatprep.subr.bf16.mxu0 %v3781_v0 }
  0xe8   : > { %2693 = vmatprep.subr.bf16.mxu1 %v3784_v1  ;;  %2638 = vmatprep.mubr.bf16.mxu0 %v3095_v2 }
  0xe9   : > { %2711 = vmatprep.mubr.bf16.mxu1 %v3097_v3 }
  0xea   : > { %2621 = vmatpush1.bf16.msra.mxu0 %v3779_v4  ;;  %v302_v4 = vld [vmem:[%s4037_s17 + $0x1b0] sm:$0xff] }
  0xeb   : > { %2694 = vmatpush1.bf16.msra.mxu1 %v3782_v5  ;;  %2622 = vmatprep.subr.bf16.mxu0 %v3787_v6  ;;  %v310_v6 = vld [vmem:[%s4037_s17 + $0x1f0] sm:$0xff] }
  0xec   : > { %2695 = vmatprep.subr.bf16.mxu1 %v3790_v7  ;;  %v303_v7 = vld [vmem:[%s4037_s17 + $0x1b8] sm:$0xff] }
  0xee   : > { %2623 = vmatpush2.bf16.msra.mxu0 %v3785_v8  ;;  %v311_v8 = vld [vmem:[%s4037_s17 + $0x1f8] sm:$0xff]  ;;  %s3414_s17 = sshll.u32 %s5062_s30, 3 }
  0xef   : > { %2696 = vmatpush2.bf16.msra.mxu1 %v3788_v9  ;;  %2624 = vmatprep.subr.bf16.mxu0 %v3793_v10  ;;  %s4954_s23 = scalar_lea.vmem %s5009_s2, %s3414_s17 }
  0xf0   : > { %2697 = vmatprep.subr.bf16.mxu1 %v3796_v11 }
  0xf2   : > { %2625 = vmatpush2.bf16.msra.mxu0 %v3791_v12  ;;  %v3126_v12 = vcombine.low %v286_v49, %v294_v52 }
  0xf3   : > { %2698 = vmatpush2.bf16.msra.mxu1 %v3794_v13  ;;  %2626 = vmatprep.subr.bf16.mxu0 %v3799_v14  ;;  %v3128_v13 = vcombine.low %v287_v53, %v295_v54 }
  0xf4   : > { %2699 = vmatprep.subr.bf16.mxu1 %v3802_v15 }
  0xf6   : > { %2627 = vmatpush2.bf16.msra.mxu0 %v3797_v16  ;;  %v3143_v16 = vcombine.high %v302_v4, %v310_v6 }
  0xf7   : > { %2700 = vmatpush2.bf16.msra.mxu1 %v3800_v17  ;;  %2628 = vmatprep.subr.bf16.mxu0 %v3805_v18  ;;  %v3145_v17 = vcombine.high %v303_v7, %v311_v8 }
  0xf8   : > { %2701 = vmatprep.subr.bf16.mxu1 %v3808_v19 }
  0xfa   : > { %2629 = vmatpush2.bf16.msra.mxu0 %v3803_v20 }
  0xfb   : > { %2702 = vmatpush2.bf16.msra.mxu1 %v3806_v21  ;;  %2630 = vmatprep.subr.bf16.mxu0 %v3811_v22 }
  0xfc   : > { %2703 = vmatprep.subr.bf16.mxu1 %v3814_v23 }
  0xfe   : > { %2631 = vmatpush2.bf16.msra.mxu0 %v3809_v24 }
  0xff   : > { %2704 = vmatpush2.bf16.msra.mxu1 %v3812_v25  ;;  %2632 = vmatprep.subr.bf16.mxu0 %v3817_v26 }
 0x100   : > { %2705 = vmatprep.subr.bf16.mxu1 %v3820_v27 }
 0x102   : > { %2633 = vmatpush2.bf16.msra.mxu0 %v3815_v28  ;;  %v3142_v28 = vcombine.low %v302_v4, %v310_v6 }
 0x103   : > { %2706 = vmatpush2.bf16.msra.mxu1 %v3818_v29  ;;  %2634 = vmatprep.subr.bf16.mxu0 %v3823_v30  ;;  %v3144_v29 = vcombine.low %v303_v7, %v311_v8 }
 0x104   : > { %2707 = vmatprep.subr.bf16.mxu1 %v3826_v31 }
 0x106   : > { %2635 = vmatpush2.bf16.msra.mxu0 %v3821_v32 }
 0x107   : > { %2708 = vmatpush2.bf16.msra.mxu1 %v3824_v33  ;;  %2636 = vmatprep.subr.bf16.mxu0 %v3829_v34 }
 0x108   : > { %2709 = vmatprep.subr.bf16.mxu1 %v3832_v35 }
 0x10a   : > { %2637 = vmatpush2.bf16.msra.mxu0 %v3827_v36 }
 0x10b   : > { %2710 = vmatpush2.bf16.msra.mxu1 %v3830_v37 }
 0x10d   : > { %v2202_v46 = vpop.f32.mrf.mxu0  ;;  %2639 = vmatmul.mubr.bf16.vlgmr.msra.gmra.mxu0 %v3094_v42 }
 0x10e   : > { %v2275_v47 = vpop.f32.mrf.mxu1  ;;  %2712 = vmatmul.mubr.bf16.vlgmr.msra.gmra.mxu1 %v3096_v43  ;;  %2648 = vmatprep.mubr.bf16.mxu0 %v3111_v44 }
 0x10f   : > { %v4779_v48 = vadd.f32 %v2275_v47, %v2202_v46  ;;  %2721 = vmatprep.mubr.bf16.mxu1 %v3113_v45  ;;  %v2204_v50 = vpop.f32.mrf.mxu0 }
 0x110   : > { %v2277_v51 = vpop.f32.mrf.mxu1 }
 0x111   : > { %v4785_v55 = vadd.f32 %v2277_v51, %v2204_v50  ;;  %v2206_v56 = vpop.f32.mrf.mxu0 }
 0x112   : > { %v2279_v57 = vpop.f32.mrf.mxu1 }
 0x113   : > { %v4787_v60 = vadd.f32 %v2279_v57, %v2206_v56  ;;  %v2208_v63 = vpop.f32.mrf.mxu0 }
 0x114   : > { %v2281_v0 = vpop.f32.mrf.mxu1 }
 0x115   : > { %v4789_v1 = vadd.f32 %v2281_v0, %v2208_v63  ;;  %2649 = vmatmul.mubr.bf16.gmra.mxu0 %v3110_v58  ;;  %v2212_v2 = vpop.f32.mrf.mxu0 }
 0x116   : > { %2722 = vmatmul.mubr.bf16.gmra.mxu1 %v3112_v59  ;;  %v2285_v3 = vpop.f32.mrf.mxu1  ;;  %2658 = vmatprep.mubr.bf16.mxu0 %v3127_v61 }
 0x117   : > { %2731 = vmatprep.mubr.bf16.mxu1 %v3129_v62  ;;  %v4792_v5 = vadd.f32 %v2285_v3, %v2212_v2  ;;  %v2214_v9 = vpop.f32.mrf.mxu0 }
 0x118   : > { %v2287_v10 = vpop.f32.mrf.mxu1 }
 0x119   : > { %v4797_v11 = vadd.f32 %v2287_v10, %v2214_v9  ;;  %v2216_v14 = vpop.f32.mrf.mxu0 }
 0x11a   : > { %v2289_v15 = vpop.f32.mrf.mxu1 }
 0x11b   : > { %v4799_v18 = vadd.f32 %v2289_v15, %v2216_v14  ;;  %v2218_v19 = vpop.f32.mrf.mxu0 }
 0x11c   : > { %v2291_v20 = vpop.f32.mrf.mxu1 }
 0x11d   : > { %v4801_v21 = vadd.f32 %v2291_v20, %v2218_v19  ;;  %2659 = vmatmul.mubr.bf16.gmra.mxu0 %v3126_v12  ;;  %v2222_v22 = vpop.f32.mrf.mxu0 }
 0x11e   : > { %2732 = vmatmul.mubr.bf16.gmra.mxu1 %v3128_v13  ;;  %v2295_v23 = vpop.f32.mrf.mxu1  ;;  %2668 = vmatprep.mubr.bf16.mxu0 %v3143_v16 }
 0x11f   : > { %2741 = vmatprep.mubr.bf16.mxu1 %v3145_v17  ;;  %v4803_v24 = vadd.f32 %v2295_v23, %v2222_v22  ;;  %v2224_v25 = vpop.f32.mrf.mxu0 }
 0x120   : > { %v2297_v26 = vpop.f32.mrf.mxu1 }
 0x121   : > { %v4805_v27 = vadd.f32 %v2297_v26, %v2224_v25  ;;  %v2226_v30 = vpop.f32.mrf.mxu0 }
 0x122   : > { %v2299_v31 = vpop.f32.mrf.mxu1 }
 0x123   : > { %v4807_v32 = vadd.f32 %v2299_v31, %v2226_v30  ;;  %v2228_v33 = vpop.f32.mrf.mxu0 }
 0x124   : > { %v2301_v34 = vpop.f32.mrf.mxu1 }
 0x125   : > { %v4809_v35 = vadd.f32 %v2301_v34, %v2228_v33  ;;  %2669 = vmatmul.mubr.bf16.gmra.mxu0 %v3142_v28  ;;  %v2232_v36 = vpop.f32.mrf.mxu0 }
 0x126   : > { %2742 = vmatmul.mubr.bf16.gmra.mxu1 %v3144_v29  ;;  %v2305_v37 = vpop.f32.mrf.mxu1 }
 0x127   : > { %v4811_v38 = vadd.f32 %v2305_v37, %v2232_v36  ;;  %v2234_v39 = vpop.f32.mrf.mxu0 }
 0x128   : > { %v2307_v40 = vpop.f32.mrf.mxu1 }
 0x129   : > { %v4813_v41 = vadd.f32 %v2307_v40, %v2234_v39  ;;  %v2236_v42 = vpop.f32.mrf.mxu0 }
 0x12a   : > { %v2309_v43 = vpop.f32.mrf.mxu1 }
 0x12b   : > { %v4815_v44 = vadd.f32 %v2309_v43, %v2236_v42  ;;  %v2238_v45 = vpop.f32.mrf.mxu0 }
 0x12c   : > { %v2311_v46 = vpop.f32.mrf.mxu1 }
 0x12d   : > { %5011 = vst [vmem:[#allocation2_spill] sm:$0xff] %v4815_v44  ;;  %v4817_v47 = vadd.f32 %v2311_v46, %v2238_v45 }
 0x12f   : > { %5012 = vst [vmem:[#allocation3_spill] sm:$0xff] %v4817_v47 }
 0x14d   : > { %v2348_v49 = vpop.f32.mrf.mxu0 }
 0x14e   : > { %v2421_v50 = vpop.f32.mrf.mxu1 }
 0x14f   : > { %v2350_v51 = vpop.f32.mrf.mxu0 }
 0x150   : > { %v4819_v52 = vpop.f32.mrf.mxu1 }
 0x151   : > { %v2352_v53 = vpop.f32.mrf.mxu0 }
 0x152   : > { %v4821_v54 = vpop.f32.mrf.mxu1 }
 0x153   : > { %v2354_v56 = vpop.f32.mrf.mxu0 }
 0x154   : > { %v4823_v57 = vpop.f32.mrf.mxu1 }
 0x155   : > { %v2358_v58 = vpop.f32.mrf.mxu0 }
 0x156   : > { %v4825_v59 = vpop.f32.mrf.mxu1 }
 0x157   : > { %v2360_v61 = vpop.f32.mrf.mxu0 }
 0x158   : > { %v4827_v62 = vpop.f32.mrf.mxu1 }
 0x159   : > { %v2362_v63 = vpop.f32.mrf.mxu0 }
 0x15a   : > { %v4829_v0 = vpop.f32.mrf.mxu1 }
 0x15b   : > { %v4831_v2 = vpop.f32.mrf.mxu0 }
 0x15c   : > { %v4833_v3 = vpop.f32.mrf.mxu1 }
 0x15d   : > { %v4835_v4 = vpop.f32.mrf.mxu0 }
 0x15e   : > { %v4837_v6 = vpop.f32.mrf.mxu1 }
 0x15f   : > { %v4839_v7 = vpop.f32.mrf.mxu0 }
 0x160   : > { %v4841_v8 = vpop.f32.mrf.mxu1 }
 0x161   : > { %v4843_v9 = vpop.f32.mrf.mxu0 }
 0x162   : > { %v4845_v10 = vpop.f32.mrf.mxu1 }
 0x163   : > { %v4847_v12 = vpop.f32.mrf.mxu0 }
 0x164   : > { %v4849_v13 = vpop.f32.mrf.mxu1 }
 0x165   : > { %v4851_v14 = vpop.f32.mrf.mxu0 }
 0x166   : > { %v4853_v15 = vpop.f32.mrf.mxu1 }
 0x167   : > { %v4855_v16 = vpop.f32.mrf.mxu0 }
 0x168   : > { %v4857_v17 = vpop.f32.mrf.mxu1 }
 0x169   : > { %5013 = vst [vmem:[#allocation4_spill] sm:$0xff] %v4857_v17  ;;  %v4859_v19 = vpop.f32.mrf.mxu0 }
 0x16a   : > { %5014 = vst [vmem:[#allocation5_spill] sm:$0xff] %v4859_v19  ;;  %v4861_v20 = vpop.f32.mrf.mxu1 }
 0x16b   : > { %5015 = vst [vmem:[#allocation6_spill] sm:$0xff] %v4861_v20  ;;  %v4863_v22 = vpop.f32.mrf.mxu0 }
 0x16c   : > { %5016 = vst [vmem:[#allocation7_spill] sm:$0xff] %v4863_v22  ;;  %v4865_v23 = vpop.f32.mrf.mxu1 }
 0x16d   : > { %5017 = vst [vmem:[#allocation8_spill] sm:$0xff] %v4865_v23 }
 0x18d   : > { %v2494_v25 = vpop.f32.mrf.mxu0 }
 0x18e   : > { %v2567_v26 = vpop.f32.mrf.mxu1 }
 0x18f   : > { %v2496_v28 = vpop.f32.mrf.mxu0 }
 0x190   : > { %v2569_v29 = vpop.f32.mrf.mxu1 }
 0x191   : > { %v2498_v30 = vpop.f32.mrf.mxu0 }
 0x192   : > { %v2571_v31 = vpop.f32.mrf.mxu1 }
 0x193   : > { %v2500_v33 = vpop.f32.mrf.mxu0 }
 0x194   : > { %v4867_v34 = vpop.f32.mrf.mxu1 }
 0x195   : > { %v2504_v36 = vpop.f32.mrf.mxu0 }
 0x196   : > { %v4869_v37 = vpop.f32.mrf.mxu1 }
 0x197   : > { %v4871_v39 = vpop.f32.mrf.mxu0 }
 0x198   : > { %v4873_v40 = vpop.f32.mrf.mxu1 }
 0x199   : > { %5018 = vst [vmem:[#allocation9_spill] sm:$0xff] %v4873_v40  ;;  %v4875_v42 = vpop.f32.mrf.mxu0 }
 0x19a   : > { %v4877_v43 = vpop.f32.mrf.mxu1 }
 0x19b   : > { %5019 = vst [vmem:[#allocation10_spill] sm:$0xff] %v4877_v43  ;;  %v4879_v45 = vpop.f32.mrf.mxu0 }
 0x19c   : > { %5020 = vst [vmem:[#allocation11_spill] sm:$0xff] %v4879_v45  ;;  %v4881_v46 = vpop.f32.mrf.mxu1 }
 0x19d   : > { %5021 = vst [vmem:[#allocation12_spill] sm:$0xff] %v4881_v46  ;;  %v4883_v23 = vpop.f32.mrf.mxu0  ;;  %v2349_v46 = vadd.f32 %v2348_v49, %v4779_v48  ;;  %v2359_v48 = vadd.f32 %v2358_v58, %v4792_v5 }
 0x19e   : > { %5022 = vst [vmem:[#allocation13_spill] sm:$0xff] %v4883_v23  ;;  %v4885_v20 = vpop.f32.mrf.mxu1 }
 0x19f   : > { %5023 = vst [vmem:[#allocation14_spill] sm:$0xff] %v4885_v20  ;;  %v4887_v22 = vpop.f32.mrf.mxu0  ;;  %v2432_v5 = vadd.f32 %v4825_v59, %v2359_v48  ;;  %v2375_v59 = vadd.f32 %v4847_v12, %v4809_v35 }
 0x1a0   : > { %5024 = vst [vmem:[#allocation15_spill] sm:$0xff] %v4887_v22  ;;  %v4889_v47 = vpop.f32.mrf.mxu1  ;;  %v2422_v22 = vadd.f32 %v2421_v50, %v2349_v46  ;;  %v5037_v48 = vld [vmem:[#allocation9_spill] sm:$0xff] }
 0x1a1   : > { %5025 = vst [vmem:[#allocation16_spill] sm:$0xff] %v4889_v47  ;;  %v4891_v17 = vpop.f32.mrf.mxu0  ;;  %v2351_v47 = vadd.f32 %v2350_v51, %v4785_v55  ;;  %v2363_v55 = vadd.f32 %v2362_v63, %v4799_v18 }
 0x1a2   : > { %5026 = vst [vmem:[#allocation17_spill] sm:$0xff] %v4891_v17  ;;  %v4893_v19 = vpop.f32.mrf.mxu1  ;;  %v2353_v17 = vadd.f32 %v2352_v53, %v4787_v60 }
 0x1a3   : > { %5027 = vst [vmem:[#allocation18_spill] sm:$0xff] %v4893_v19  ;;  %v4895_v40 = vpop.f32.mrf.mxu0 }
 0x1a4   : > { %5028 = vst [vmem:[#allocation19_spill] sm:$0xff] %v4895_v40  ;;  %v4897_v44 = vpop.f32.mrf.mxu1  ;;  %v2426_v49 = vadd.f32 %v4821_v54, %v2353_v17  ;;  %v2373_v54 = vadd.f32 %v4843_v9, %v4807_v32 }
 0x1a5   : > { %5029 = vst [vmem:[#allocation20_spill] sm:$0xff] %v4897_v44  ;;  %v4899_v43 = vpop.f32.mrf.mxu0  ;;  %v2424_v44 = vadd.f32 %v4819_v52, %v2351_v47  ;;  %v2365_v47 = vadd.f32 %v4831_v2, %v4801_v21 }
 0x1a6   : > { %5030 = vst [vmem:[#allocation21_spill] sm:$0xff] %v4899_v43  ;;  %v4901_v45 = vpop.f32.mrf.mxu1  ;;  %v2355_v43 = vadd.f32 %v2354_v56, %v4789_v1  ;;  %v2499_v52 = vadd.f32 %v2498_v30, %v2426_v49  ;;  %v2446_v35 = vadd.f32 %v4845_v10, %v2373_v54  ;;  %v5038_v49 = vld [vmem:[#allocation10_spill] sm:$0xff] }
 0x1a7   : > { %5031 = vst [vmem:[#allocation22_spill] sm:$0xff] %v4901_v45  ;;  %v4904_v23 = vpop.f32.mrf.mxu0  ;;  %v2495_v45 = vadd.f32 %v2494_v25, %v2422_v22  ;;  %v2381_v25 = vadd.f32 %v4855_v16, %v4813_v41  ;;  %v5034_v41 = vld [vmem:[#allocation2_spill] sm:$0xff]  ;;  %v5035_v16 = vld [vmem:[#allocation5_spill] sm:$0xff] }
 0x1a8   : > { %5032 = vst [vmem:[#allocation23_spill] sm:$0xff] %v4904_v23  ;;  %v4906_v20 = vpop.f32.mrf.mxu1  ;;  %v2497_v23 = vadd.f32 %v2496_v28, %v2424_v44  ;;  %v2428_v51 = vadd.f32 %v4823_v57, %v2355_v43  ;;  %v2369_v44 = vadd.f32 %v4835_v4, %v4803_v24  ;;  %v2572_v2 = vadd.f32 %v2571_v31, %v2499_v52  ;;  %v5036_v31 = vld [vmem:[#allocation11_spill] sm:$0xff] }
 0x1a9   : > { %5033 = vst [vmem:[#allocation24_spill] sm:$0xff] %v4906_v20  ;;  %v4910_v19 = vpop.f32.mrf.mxu0  ;;  %v2361_v20 = vadd.f32 %v2360_v61, %v4797_v11  ;;  %v2568_v1 = vadd.f32 %v2567_v26, %v2495_v45  ;;  %v2371_v11 = vadd.f32 %v4839_v7, %v4805_v27  ;;  %v2436_v61 = vadd.f32 %v4829_v0, %v2363_v55 }
 0x1aa   : > { %v4912_v40 = vpop.f32.mrf.mxu1  ;;  %v2570_v56 = vadd.f32 %v2569_v29, %v2497_v23  ;;  %v2501_v57 = vadd.f32 %v2500_v33, %v2428_v51  ;;  %v2438_v27 = vadd.f32 %v4833_v3, %v2365_v47  ;;  %v2505_v4 = vadd.f32 %v2504_v36, %v2432_v5  ;;  %v5039_v51 = vld [vmem:[#allocation13_spill] sm:$0xff] }
 0x1ab   : > { %v4920_v50 = vpop.f32.mrf.mxu0  ;;  %v2434_v21 = vadd.f32 %v4827_v62, %v2361_v20  ;;  %v2442_v32 = vadd.f32 %v4837_v6, %v2369_v44  ;;  %v2444_v9 = vadd.f32 %v4841_v8, %v2371_v11  ;;  %v2379_v62 = vadd.f32 %v4851_v14, %v4811_v38 }
 0x1ac   : > { %v4922_v60 = vpop.f32.mrf.mxu1  ;;  %v2574_v12 = vadd.f32 %v4867_v34, %v2501_v57  ;;  %v2448_v23 = vadd.f32 %v4849_v13, %v2375_v59  ;;  %v2509_v8 = vadd.f32 %v4875_v42, %v2436_v61  ;;  %v2578_v14 = vadd.f32 %v4869_v37, %v2505_v4  ;;  %v5042_v57 = vld [vmem:[#allocation7_spill] sm:$0xff] }
 0x1ad   : > { %v2507_v6 = vadd.f32 %v4871_v39, %v2434_v21  ;;  %v2452_v29 = vadd.f32 %v4853_v15, %v2379_v62  ;;  %v2383_v30 = vadd.f32 %v5035_v16, %v5034_v41  ;;  %v2511_v33 = vadd.f32 %v5036_v31, %v2438_v27  ;;  %v5045_v62 = vld [vmem:[#allocation17_spill] sm:$0xff] }
 0x1ae   : > { %v2582_v55 = vadd.f32 %v5038_v49, %v2509_v8  ;;  %v2515_v47 = vadd.f32 %v5039_v51, %v2442_v32  ;;  %v5047_v8 = vld [vmem:[#allocation19_spill] sm:$0xff] }
 0x1af   : > { %v2580_v37 = vadd.f32 %v5037_v48, %v2507_v6 }
 0x1cd   : > { %v2640_v18 = vpop.f32.mrf.mxu0 }
 0x1ce   : > { %v2713_v53 = vpop.f32.mrf.mxu1  ;;  %v2641_v58 = vadd.f32 %v2640_v18, %v2568_v1 }
 0x1cf   : > { %v2642_v24 = vpop.f32.mrf.mxu0 }
 0x1d0   : > { %v2715_v63 = vpop.f32.mrf.mxu1  ;;  %v2643_v7 = vadd.f32 %v2642_v24, %v2570_v56  ;;  %v2714_v17 = vadd.f32 %v2713_v53, %v2641_v58  ;;  %v5040_v53 = vld [vmem:[#allocation4_spill] sm:$0xff]  ;;  %v5041_v56 = vld [vmem:[#allocation3_spill] sm:$0xff] }
 0x1d1   : > { %v2644_v0 = vpop.f32.mrf.mxu0  ;;  %v2454_v54 = vadd.f32 %v5040_v53, %v2381_v25  ;;  %v2385_v58 = vadd.f32 %v5042_v57, %v5041_v56  ;;  %v5046_v25 = vld [vmem:[#allocation14_spill] sm:$0xff]  ;;  %v5053_v56 = vld [vmem:[#allocation20_spill] sm:$0xff] }
 0x1d2   : > { %v2717_v20 = vpop.f32.mrf.mxu1  ;;  %v2716_v22 = vadd.f32 %v2715_v63, %v2643_v7  ;;  %v2645_v3 = vadd.f32 %v2644_v0, %v2572_v2  ;;  %v2857_v34 = vmul.f32 %v2714_v17, %v2714_v17  ;;  %v5043_v63 = vld [vmem:[#allocation12_spill] sm:$0xff]  ;;  %v5044_v2 = vld [vmem:[#allocation15_spill] sm:$0xff]  ;;  %v2588_v6 = vadd.f32 %v5046_v25, %v2515_v47 }
 0x1d3   : > { %v2646_v38 = vpop.f32.mrf.mxu0  ;;  %v2584_v27 = vadd.f32 %v5043_v63, %v2511_v33  ;;  %v2517_v4 = vadd.f32 %v5044_v2, %v2444_v9 }
 0x1d4   : > { %v2719_v10 = vpop.f32.mrf.mxu1  ;;  %v3416_v26 = vpack.c.bf16 %v2716_v22, %v2714_v17  ;;  %v2718_v28 = vadd.f32 %v2717_v20, %v2645_v3  ;;  %v2647_v13 = vadd.f32 %v2646_v38, %v2574_v12  ;;  %v2858_v15 = vmul.f32 %v2716_v22, %v2716_v22 }
 0x1d5   : > { %v2650_v36 = vpop.f32.mrf.mxu0  ;;  %v2521_v38 = vadd.f32 %v5047_v8, %v2448_v23 }
 0x1d6   : > { %v2723_v39 = vpop.f32.mrf.mxu1  ;;  %2800 = vst [vmem:[%s4954_s23] sm:$0xff] %v3416_v26  ;;  %v2808_v42 = vadd.f32 %v2718_v28, %v2714_v17  ;;  %v2859_v43 = vmul.f32 %v2718_v28, %v2718_v28  ;;  %v2720_v45 = vadd.f32 %v2719_v10, %v2647_v13  ;;  %v2651_v46 = vadd.f32 %v2650_v36, %v2578_v14  ;;  %v5048_v36 = vld [vmem:[#allocation16_spill] sm:$0xff] }
 0x1d7   : > { %v2652_v1 = vpop.f32.mrf.mxu0  ;;  %v2519_v17 = vadd.f32 %v5045_v62, %v2446_v35  ;;  %v2594_v57 = vadd.f32 %v5053_v56, %v2521_v38  ;;  %v5056_v38 = vld [vmem:[#allocation24_spill] sm:$0xff] }
 0x1d8   : > { %v2725_v52 = vpop.f32.mrf.mxu1  ;;  %v2873_v5 = vadd.f32 %v2859_v43, %v2857_v34  ;;  %v3417_v44 = vpack.c.bf16 %v2720_v45, %v2718_v28  ;;  %v2821_v11 = vadd.f32 %v2720_v45, %v2716_v22  ;;  %v2860_v18 = vmul.f32 %v2720_v45, %v2720_v45  ;;  %v5050_v45 = vld [vmem:[#allocation21_spill] sm:$0xff] }
 0x1d9   : > { %v2724_v21 = vadd.f32 %v2723_v39, %v2651_v46  ;;  %v2653_v61 = vadd.f32 %v2652_v1, %v2580_v37  ;;  %v2654_v59 = vpop.f32.mrf.mxu0  ;;  %v2590_v39 = vadd.f32 %v5048_v36, %v2517_v4  ;;  %v2525_v46 = vadd.f32 %v5050_v45, %v2452_v29  ;;  %v5054_v29 = vld [vmem:[#allocation23_spill] sm:$0xff] }
 0x1da   : > { %v2727_v24 = vpop.f32.mrf.mxu1  ;;  %2801 = vst [vmem:[%s4954_s23 + $0x8] sm:$0xff] %v3417_v44  ;;  %v2886_v7 = vadd.f32 %v2860_v18, %v2858_v15  ;;  %v2655_v32 = vadd.f32 %v2654_v59, %v2582_v55  ;;  %v5051_v15 = vld [vmem:[#allocation6_spill] sm:$0xff] }
 0x1db   : > { %v2809_v0 = vadd.f32 %v2808_v42, %v2724_v21  ;;  %v2861_v20 = vmul.f32 %v2724_v21, %v2724_v21  ;;  %v2726_v12 = vadd.f32 %v2725_v52, %v2653_v61  ;;  %v2656_v22 = vpop.f32.mrf.mxu0  ;;  %v5049_v42 = vld [vmem:[#allocation18_spill] sm:$0xff]  ;;  %v2456_v1 = vadd.f32 %v5051_v15, %v2383_v30  ;;  %v5052_v52 = vld [vmem:[#allocation8_spill] sm:$0xff] }
 0x1dc   : > { %v2729_v3 = vpop.f32.mrf.mxu1  ;;  %v2728_v10 = vadd.f32 %v2727_v24, %v2655_v32  ;;  %v2657_v14 = vadd.f32 %v2656_v22, %v2584_v27  ;;  %v2592_v43 = vadd.f32 %v5049_v42, %v2519_v17 }
 0x1dd   : > { %v2874_v26 = vadd.f32 %v2873_v5, %v2861_v20  ;;  %v3418_v28 = vpack.c.bf16 %v2726_v12, %v2724_v21  ;;  %v2822_v9 = vadd.f32 %v2821_v11, %v2726_v12  ;;  %v2862_v13 = vmul.f32 %v2726_v12, %v2726_v12  ;;  %v2660_v41 = vpop.f32.mrf.mxu0 }
 0x1de   : > { %v2733_v16 = vpop.f32.mrf.mxu1  ;;  %v2810_v31 = vadd.f32 %v2809_v0, %v2728_v10  ;;  %v2863_v35 = vmul.f32 %v2728_v10, %v2728_v10  ;;  %v2730_v33 = vadd.f32 %v2729_v3, %v2657_v14  ;;  %v2661_v34 = vadd.f32 %v2660_v41, %v2588_v6 }
 0x1df   : > { %2802 = vst [vmem:[%s4954_s23 + $0x10] sm:$0xff] %v3418_v28  ;;  %v2887_v23 = vadd.f32 %v2886_v7, %v2862_v13  ;;  %v2662_v48 = vpop.f32.mrf.mxu0  ;;  %v2458_v5 = vadd.f32 %v5052_v52, %v2385_v58  ;;  %v2527_v21 = vadd.f32 %v5054_v29, %v2454_v54  ;;  %v2529_v24 = vadd.f32 %v4910_v19, %v2456_v1  ;;  %v5055_v7 = vld [vmem:[#allocation22_spill] sm:$0xff] }
 0x1e0   : > { %v2735_v37 = vpop.f32.mrf.mxu1  ;;  %v2875_v49 = vadd.f32 %v2874_v26, %v2863_v35  ;;  %v3419_v55 = vpack.c.bf16 %v2730_v33, %v2728_v10  ;;  %v2823_v51 = vadd.f32 %v2822_v9, %v2730_v33  ;;  %v2864_v47 = vmul.f32 %v2730_v33, %v2730_v33 }
 0x1e1   : > { %v2734_v44 = vadd.f32 %v2733_v16, %v2661_v34  ;;  %v2663_v11 = vadd.f32 %v2662_v48, %v2590_v39  ;;  %v2664_v18 = vpop.f32.mrf.mxu0  ;;  %v2598_v58 = vadd.f32 %v5055_v7, %v2525_v46  ;;  %v2531_v32 = vadd.f32 %v4920_v50, %v2458_v5 }
 0x1e2   : > { %v2737_v53 = vpop.f32.mrf.mxu1  ;;  %2803 = vst [vmem:[%s4954_s23 + $0x18] sm:$0xff] %v3419_v55  ;;  %v2888_v61 = vadd.f32 %v2887_v23, %v2864_v47  ;;  %v2665_v59 = vadd.f32 %v2664_v18, %v2592_v43  ;;  %v2600_v10 = vadd.f32 %v5056_v38, %v2527_v21  ;;  %v2602_v14 = vadd.f32 %v4912_v40, %v2529_v24 }
 0x1e3   : > { %v2811_v63 = vadd.f32 %v2810_v31, %v2734_v44  ;;  %v2865_v27 = vmul.f32 %v2734_v44, %v2734_v44  ;;  %v2736_v2 = vadd.f32 %v2735_v37, %v2663_v11  ;;  %v2666_v4 = vpop.f32.mrf.mxu0  ;;  %v2604_v36 = vadd.f32 %v4922_v60, %v2531_v32 }
 0x1e4   : > { %v2739_v30 = vpop.f32.mrf.mxu1  ;;  %v2738_v62 = vadd.f32 %v2737_v53, %v2665_v59  ;;  %v2667_v17 = vadd.f32 %v2666_v4, %v2594_v57  ;;  %v3857_v21 = vmov 1966171168  }
 0x1e5   : > { %v2876_v0 = vadd.f32 %v2875_v49, %v2865_v27  ;;  %v3420_v20 = vpack.c.bf16 %v2736_v2, %v2734_v44  ;;  %v2824_v54 = vadd.f32 %v2823_v51, %v2736_v2  ;;  %v2866_v12 = vmul.f32 %v2736_v2, %v2736_v2  ;;  %v2670_v22 = vpop.f32.mrf.mxu0 }
 0x1e6   : > { %v2743_v3 = vpop.f32.mrf.mxu1  ;;  %v2812_v25 = vadd.f32 %v2811_v63, %v2738_v62  ;;  %v2867_v19 = vmul.f32 %v2738_v62, %v2738_v62  ;;  %v2740_v6 = vadd.f32 %v2739_v30, %v2667_v17  ;;  %v2671_v8 = vadd.f32 %v2670_v22, %v2598_v58 }
 0x1e7   : > { %2804 = vst [vmem:[%s4954_s23 + $0x20] sm:$0xff] %v3420_v20  ;;  %v2889_v26 = vadd.f32 %v2888_v61, %v2866_v12  ;;  %v2672_v50 = vpop.f32.mrf.mxu0  ;;  %v2838_v61 = vunpack.c.l.s4 %v3857_v21  ;;  %v2840_v2 = vlaneseq }
 0x1e8   : > { %v2745_v28 = vpop.f32.mrf.mxu1  ;;  %v2877_v9 = vadd.f32 %v2876_v0, %v2867_v19  ;;  %v3421_v13 = vpack.c.bf16 %v2740_v6, %v2738_v62  ;;  %v2825_v41 = vadd.f32 %v2824_v54, %v2740_v6  ;;  %v2868_v16 = vmul.f32 %v2740_v6, %v2740_v6 }
 0x1e9   : > { %v2744_v31 = vadd.f32 %v2743_v3, %v2671_v8  ;;  %v2673_v35 = vadd.f32 %v2672_v50, %v2600_v10  ;;  %v2674_v33 = vpop.f32.mrf.mxu0  ;;  %v2839_v32 = vunpack.c.0.s8 %v2838_v61  ;;  %v2841_v54 = vshrl.u32 %v2840_v2, 7 }
 0x1ea   : > { %v2747_v34 = vpop.f32.mrf.mxu1  ;;  %2805 = vst [vmem:[%s4954_s23 + $0x28] sm:$0xff] %v3421_v13  ;;  %v2890_v39 = vadd.f32 %v2889_v26, %v2868_v16  ;;  %v2675_v42 = vadd.f32 %v2674_v33, %v2602_v14  ;;  %vm2854_vm0 = vcmp.lt.s32.totalorder %v2840_v2, 256 }
 0x1eb   : > { %v2813_v43 = vadd.f32 %v2812_v25, %v2744_v31  ;;  %v2869_v40 = vmul.f32 %v2744_v31, %v2744_v31  ;;  %v2746_v45 = vadd.f32 %v2745_v28, %v2673_v35  ;;  %v2676_v46 = vpop.f32.mrf.mxu0  ;;  %v2842_v8 = vsub.s32 %v2839_v32, %v2841_v54 }
 0x1ec   : > { %v2748_v23 = vadd.f32 %v2747_v34, %v2675_v42  ;;  %v2677_v48 = vadd.f32 %v2676_v46, %v2604_v36  ;;  %v2749_v47 = vpop.f32.mrf.mxu1 }
 0x1ed   : > { %v2878_v37 = vadd.f32 %v2877_v9, %v2869_v40  ;;  %v3422_v49 = vpack.c.bf16 %v2746_v45, %v2744_v31  ;;  %v2826_v55 = vadd.f32 %v2825_v41, %v2746_v45  ;;  %v2870_v51 = vmul.f32 %v2746_v45, %v2746_v45 }
 0x1ee   : > { %v2814_v15 = vadd.f32 %v2813_v43, %v2748_v23  ;;  %v2871_v1 = vmul.f32 %v2748_v23, %v2748_v23  ;;  %v2750_v52 = vadd.f32 %v2749_v47, %v2677_v48 }
 0x1ef   : > { %2806 = vst [vmem:[%s4954_s23 + $0x30] sm:$0xff] %v3422_v49  ;;  %v2891_v60 = vadd.f32 %v2890_v39, %v2870_v51 }
 0x1f0   : > { %v2815_v5 = vrot.slane %v2814_v15, 4  ;;  %v2879_v44 = vadd.f32 %v2878_v37, %v2871_v1  ;;  %v3423_v11 = vpack.c.bf16 %v2750_v52, %v2748_v23  ;;  %v2827_v18 = vadd.f32 %v2826_v55, %v2750_v52 }
 0x1f1   : > { %v2872_v53 = vmul.f32 %v2750_v52, %v2750_v52 }
 0x1f2   : > { %v2816_v56 = vadd.f32 %v2815_v5, %v2814_v15  ;;  %v2880_v57 = vrot.slane %v2879_v44, 4  ;;  %2807 = vst [vmem:[%s4954_s23 + $0x38] sm:$0xff] %v3423_v11  ;;  %v2828_v29 = vrot.slane %v2827_v18, 4 }
 0x1f3   : > { %v2892_v59 = vadd.f32 %v2891_v60, %v2872_v53 }
 0x1f4   : > { %v2817_v24 = vrot.slane %v2816_v56, 2  ;;  %v2881_v63 = vadd.f32 %v2880_v57, %v2879_v44  ;;  %v2829_v27 = vadd.f32 %v2828_v29, %v2827_v18 }
 0x1f5   : > { %v2893_v4 = vrot.slane %v2892_v59, 4 }
 0x1f6   : > { %v2818_v30 = vadd.f32 %v2817_v24, %v2816_v56  ;;  %v2882_v7 = vrot.slane %v2881_v63, 2  ;;  %v2830_v58 = vrot.slane %v2829_v27, 2 }
 0x1f7   : > { %v2894_v62 = vadd.f32 %v2893_v4, %v2892_v59 }
 0x1f8   : > { %v2819_v17 = vrot.slane %v2818_v30, 1  ;;  %v2883_v0 = vadd.f32 %v2882_v7, %v2881_v63  ;;  %v2831_v20 = vadd.f32 %v2830_v58, %v2829_v27 }
 0x1f9   : > { %v2895_v12 = vrot.slane %v2894_v62, 2 }
 0x1fa   : > { %v2832_v22 = vrot.slane %v2831_v20, 1  ;;  %v2884_v3 = vrot.slane %v2883_v0, 1  ;;  %v2820_v19 = vadd.f32 %v2819_v17, %v2818_v30 }
 0x1fb   : > { %v2896_v25 = vadd.f32 %v2895_v12, %v2894_v62 }
 0x1fc   : > { %v2833_v6 = vadd.f32 %v2832_v22, %v2831_v20  ;;  %v2885_v14 = vadd.f32 %v2884_v3, %v2883_v0 }
 0x1fd   : > { %v2897_v38 = vrot.slane %v2896_v25, 1 }
 0x1fe   : > { %v2836_v10 = vcombine.low %v2820_v19, %v2833_v6 }
 0x1ff   : > { %v2898_v26 = vadd.f32 %v2897_v38, %v2896_v25 }
 0x200   : > { %v2843_v50 = vrot.slane %v2836_v10, %v2842_v8 }
 0x201   : > { %v2901_v28 = vcombine.low %v2885_v14, %v2898_v26 }
 0x202   : > { %v2850_v9 = vrot.slane %v2843_v50, %v2842_v8 }
 0x203   : > { %v2908_v13 = vrot.slane %v2901_v28, %v2842_v8 }
 0x204   : > { %2856 = vst.msk [vmem:[%s246_s27] ss:$2 sm:$0x3] %vm2854_vm0, %v2850_v9 }
 0x205   : > { %v2915_v41 = vrot.slane %v2908_v13, %v2842_v8 }
 0x207   : > { %3410 = vst.msk [vmem:[%s246_s27 + $0x1] ss:$2 sm:$0x3] %vm2854_vm0, %v2915_v41 }
 0x208 PF: > { %s14_s14 = sadd.s32 1, %s3855_s14   ;;  %s5057_s12 = smov %s3851_s13 }
 0x209   : > { %p11_p6 = scmp.ge.s32.totalorder %s14_s14, 4   ;;  %s5058_s13 = smov %s5060_s15 }
 0x20b   :  { %13 = sbr.rel (!%p11_p6) target bundleno = 2 (0x2), region = 74 }

// kernel: discriminator_forward.7
= control target key start
LH: loop header
LB: loop body
LE: loop exit
PB: predicated region body
PF: predicated region fallthrough
CT: control target
= control target key end

     0   :  { %v57_v0 = vlaneseq  ;;  %v2306_v6 = vmov 1983009808   ;;  %vm2169_vm13 = vcmask 1041408   ;;  %s3464_s0 = inlined_call_operand.vmem [shape: bf16[2,8192], index: 0, kind: input, shape index: {}]   ;;  %s3465_s1 = inlined_call_operand.vmem [shape: f32[1,8192], index: 1, kind: input, shape index: {}]   ;;  %s3466_s2 = inlined_call_operand.vmem [shape: f32[1,8192], index: 2, kind: input, shape index: {}]   ;;  %s3467_s3 = inlined_call_operand.vmem [shape: f32[1,8192], index: 3, kind: input, shape index: {}]   ;;  %s3468_s4 = inlined_call_operand.vmem [shape: f32[2,1], index: 4, kind: output, shape index: {}]  }
   0x1   :  { %v2335_v1 = vld [vmem:[%s3464_s0] sm:$0xff]  ;;  %v2345_v3 = vld [vmem:[%s3464_s0 + $0x28] sm:$0xff]  ;;  %v2350_v4 = vld [vmem:[%s3464_s0 + $0x30] sm:$0xff]  ;;  %v316_v7 = vunpack.c.l.s4 %v2306_v6 }
   0x2   :  { %v2340_v2 = vld [vmem:[%s3464_s0 + $0x20] sm:$0xff]  ;;  %v58_v5 = vshrl.u32 %v57_v0, 7  ;;  %v2355_v8 = vld [vmem:[%s3464_s0 + $0x38] sm:$0xff]  ;;  %v35_v13 = vunpack.c.l.bf16 %v2345_v3  ;;  %v36_v14 = vunpack.c.h.bf16 %v2345_v3  ;;  %v37_v15 = vunpack.c.l.bf16 %v2350_v4  ;;  %v46_v22 = vld [vmem:[%s3465_s1 + $0x28] sm:$0xff] }
   0x3   :  { %v33_v11 = vunpack.c.l.bf16 %v2340_v2  ;;  %v34_v12 = vunpack.c.h.bf16 %v2340_v2  ;;  %v38_v16 = vunpack.c.h.bf16 %v2350_v4  ;;  %v45_v17 = vld [vmem:[%s3465_s1 + $0x20] sm:$0xff]  ;;  %v39_v18 = vunpack.c.l.bf16 %v2355_v8  ;;  %v47_v31 = vld [vmem:[%s3465_s1 + $0x30] sm:$0xff]  ;;  %v48_v44 = vld [vmem:[%s3465_s1 + $0x38] sm:$0xff] }
   0x4   :  { %v2369_v19 = vsub.s32 0, %v58_v5  ;;  %v2371_v20 = vsub.s32 1, %v58_v5  ;;  %v317_v21 = vunpack.c.0.s8 %v316_v7  ;;  %v2376_v23 = vsub.s32 2, %v58_v5 }
   0x5   :  { %v2378_v24 = vsub.s32 3, %v58_v5  ;;  %v2380_v25 = vsub.s32 4, %v58_v5  ;;  %v2382_v26 = vsub.s32 5, %v58_v5  ;;  %v2384_v27 = vsub.s32 6, %v58_v5 }
   0x6   :  { %3503 = vst [vmem:[#allocation2_spill] sm:$0xff] %v2371_v20  ;;  %3504 = vst [vmem:[#allocation3_spill] sm:$0xff] %v2376_v23  ;;  %v2386_v28 = vsub.s32 7, %v58_v5  ;;  %v188_v29 = vrot.slane %v45_v17, %v2369_v19  ;;  %v192_v30 = vrot.slane %v45_v17, %v2371_v20  ;;  %v196_v32 = vrot.slane %v45_v17, %v2376_v23 }
   0x7   :  { %3505 = vst [vmem:[#allocation4_spill] sm:$0xff] %v2378_v24  ;;  %3506 = vst [vmem:[#allocation5_spill] sm:$0xff] %v2380_v25  ;;  %v200_v33 = vrot.slane %v45_v17, %v2378_v24  ;;  %v204_v34 = vrot.slane %v45_v17, %v2380_v25  ;;  %v208_v35 = vrot.slane %v45_v17, %v2382_v26 }
   0x8   :  { %3507 = vst [vmem:[#allocation6_spill] sm:$0xff] %v2382_v26  ;;  %3508 = vst [vmem:[#allocation7_spill] sm:$0xff] %v2384_v27  ;;  %v212_v36 = vrot.slane %v45_v17, %v2384_v27  ;;  %v216_v37 = vrot.slane %v45_v17, %v2386_v28  ;;  %v220_v38 = vrot.slane %v46_v22, %v2369_v19 }
   0x9   :  { %v224_v39 = vrot.slane %v46_v22, %v2371_v20  ;;  %v228_v40 = vrot.slane %v46_v22, %v2376_v23  ;;  %v232_v41 = vrot.slane %v46_v22, %v2378_v24  ;;  %v236_v42 = vrot.slane %v46_v22, %v2380_v25 }
   0xa   :  { %v240_v43 = vrot.slane %v46_v22, %v2382_v26  ;;  %v244_v45 = vrot.slane %v46_v22, %v2384_v27  ;;  %v248_v46 = vrot.slane %v46_v22, %v2386_v28  ;;  %v252_v47 = vrot.slane %v47_v31, %v2369_v19 }
   0xb   :  { %v256_v48 = vrot.slane %v47_v31, %v2371_v20  ;;  %v260_v49 = vrot.slane %v47_v31, %v2376_v23  ;;  %v264_v50 = vrot.slane %v47_v31, %v2378_v24  ;;  %v268_v51 = vrot.slane %v47_v31, %v2380_v25 }
   0xc   :  { %v272_v52 = vrot.slane %v47_v31, %v2382_v26  ;;  %v276_v53 = vrot.slane %v47_v31, %v2384_v27  ;;  %v280_v54 = vrot.slane %v47_v31, %v2386_v28  ;;  %v2418_v55 = vsub.s32 %v317_v21, %v58_v5 }
   0xd   :  { %v449_v56 = vcombine.low %v188_v29, %v192_v30  ;;  %v284_v57 = vrot.slane %v48_v44, %v2369_v19  ;;  %v288_v58 = vrot.slane %v48_v44, %v2371_v20  ;;  %v292_v59 = vrot.slane %v48_v44, %v2376_v23 }
   0xe   :  { %v450_v60 = vcombine.low %v196_v32, %v200_v33  ;;  %v296_v61 = vrot.slane %v48_v44, %v2378_v24  ;;  %v466_v63 = vcombine.low %v204_v34, %v208_v35  ;;  %v467_v0 = vcombine.low %v212_v36, %v216_v37 }
   0xf   :  { %v457_v62 = vrot.slane %v449_v56, %v2418_v55  ;;  %v300_v6 = vrot.slane %v48_v44, %v2380_v25  ;;  %v483_v5 = vcombine.low %v220_v38, %v224_v39  ;;  %v484_v17 = vcombine.low %v228_v40, %v232_v41 }
  0x10   :  { %v464_v7 = vrot.slane %v450_v60, %v2418_v55  ;;  %v304_v21 = vrot.slane %v48_v44, %v2382_v26  ;;  %v308_v22 = vrot.slane %v48_v44, %v2384_v27  ;;  %v312_v29 = vrot.slane %v48_v44, %v2386_v28 }
  0x11   :  { %v500_v30 = vcombine.low %v236_v42, %v240_v43  ;;  %v474_v32 = vrot.slane %v466_v63, %v2418_v55  ;;  %v481_v33 = vrot.slane %v467_v0, %v2418_v55  ;;  %v501_v34 = vcombine.low %v244_v45, %v248_v46  ;;  %v41_v45 = vld [vmem:[%s3465_s1] sm:$0xff] }
  0x12   :  { %v465_v31 = vcombine.low %v457_v62, %v464_v7  ;;  %v491_v35 = vrot.slane %v483_v5, %v2418_v55  ;;  %v498_v36 = vrot.slane %v484_v17, %v2418_v55  ;;  %v517_v37 = vcombine.low %v252_v47, %v256_v48 }
  0x13   :  { %v518_v38 = vcombine.low %v260_v49, %v264_v50  ;;  %v508_v39 = vrot.slane %v500_v30, %v2418_v55  ;;  %v515_v40 = vrot.slane %v501_v34, %v2418_v55  ;;  %v534_v41 = vcombine.low %v268_v51, %v272_v52 }
  0x14   :  { %v535_v56 = vcombine.low %v276_v53, %v280_v54  ;;  %v525_v42 = vrot.slane %v517_v37, %v2418_v55  ;;  %v551_v44 = vcombine.low %v284_v57, %v288_v58  ;;  %v552_v60 = vcombine.low %v292_v59, %v296_v61 }
  0x15   :  { %v532_v43 = vrot.slane %v518_v38, %v2418_v55  ;;  %v482_v46 = vcombine.low %v474_v32, %v481_v33  ;;  %v542_v47 = vrot.slane %v534_v41, %v2418_v55  ;;  %v568_v49 = vcombine.low %v300_v6, %v304_v21  ;;  %v42_v21 = vld [vmem:[%s3465_s1 + $0x8] sm:$0xff] }
  0x16   :  { %v549_v48 = vrot.slane %v535_v56, %v2418_v55  ;;  %v499_v50 = vcombine.low %v491_v35, %v498_v36  ;;  %v559_v51 = vrot.slane %v551_v44, %v2418_v55  ;;  %v566_v52 = vrot.slane %v552_v60, %v2418_v55 }
  0x17   :  { %v569_v53 = vcombine.low %v308_v22, %v312_v29  ;;  %v516_v54 = vcombine.low %v508_v39, %v515_v40  ;;  %v533_v62 = vcombine.low %v525_v42, %v532_v43  ;;  %v576_v58 = vrot.slane %v568_v49, %v2418_v55 }
  0x18   :  { %v550_v57 = vcombine.low %v542_v47, %v549_v48  ;;  %v40_v59 = vunpack.c.h.bf16 %v2355_v8  ;;  %v60_v61 = vrot.slane %v41_v45, %v2369_v19  ;;  %v567_v63 = vcombine.low %v559_v51, %v566_v52 }
  0x19   :  { %v583_v0 = vrot.slane %v569_v53, %v2418_v55  ;;  %v64_v6 = vrot.slane %v41_v45, %v2371_v20  ;;  %v68_v7 = vrot.slane %v41_v45, %v2376_v23  ;;  %v72_v5 = vrot.slane %v41_v45, %v2378_v24 }
  0x1a   :  { %v76_v17 = vrot.slane %v41_v45, %v2380_v25  ;;  %v2458_v29 = vmul.f32 %v465_v31, %v33_v11  ;;  %v2462_v30 = vmul.f32 %v482_v46, %v34_v12  ;;  %v2466_v32 = vmul.f32 %v499_v50, %v35_v13  ;;  %v43_v12 = vld [vmem:[%s3465_s1 + $0x10] sm:$0xff]  ;;  %v44_v31 = vld [vmem:[%s3465_s1 + $0x18] sm:$0xff] }
  0x1b   :  { %v584_v22 = vcombine.low %v576_v58, %v583_v0  ;;  %v2470_v33 = vmul.f32 %v516_v54, %v36_v14  ;;  %v2474_v34 = vmul.f32 %v533_v62, %v37_v15  ;;  %v2478_v11 = vmul.f32 %v550_v57, %v38_v16 }
  0x1c   :  { %v2482_v2 = vmul.f32 %v567_v63, %v39_v18  ;;  %v80_v3 = vrot.slane %v41_v45, %v2382_v26  ;;  %v84_v13 = vrot.slane %v41_v45, %v2384_v27  ;;  %v88_v14 = vrot.slane %v41_v45, %v2386_v28 }
  0x1d   :  { %v2490_v15 = vmul.f32 %v584_v22, %v40_v59  ;;  %v92_v4 = vrot.slane %v42_v21, %v2369_v19  ;;  %v96_v16 = vrot.slane %v42_v21, %v2371_v20  ;;  %v100_v8 = vrot.slane %v42_v21, %v2376_v23 }
  0x1e   :  { %v104_v18 = vrot.slane %v42_v21, %v2378_v24  ;;  %v108_v35 = vrot.slane %v42_v21, %v2380_v25  ;;  %v112_v36 = vrot.slane %v42_v21, %v2382_v26  ;;  %v116_v37 = vrot.slane %v42_v21, %v2384_v27 }
  0x1f   :  { %v120_v38 = vrot.slane %v42_v21, %v2386_v28  ;;  %v124_v39 = vrot.slane %v43_v12, %v2369_v19  ;;  %v128_v40 = vrot.slane %v43_v12, %v2371_v20  ;;  %v132_v41 = vrot.slane %v43_v12, %v2376_v23 }
  0x20   :  { %v136_v56 = vrot.slane %v43_v12, %v2378_v24  ;;  %v140_v42 = vrot.slane %v43_v12, %v2380_v25  ;;  %v144_v43 = vrot.slane %v43_v12, %v2382_v26  ;;  %v148_v44 = vrot.slane %v43_v12, %v2384_v27 }
  0x21   :  { %v152_v60 = vrot.slane %v43_v12, %v2386_v28  ;;  %v156_v45 = vrot.slane %v44_v31, %v2369_v19  ;;  %v160_v46 = vrot.slane %v44_v31, %v2371_v20  ;;  %v164_v47 = vrot.slane %v44_v31, %v2376_v23 }
  0x22   :  { %v168_v48 = vrot.slane %v44_v31, %v2378_v24  ;;  %v313_v49 = vcombine.low %v60_v61, %v64_v6  ;;  %v314_v50 = vcombine.low %v68_v7, %v72_v5  ;;  %v330_v51 = vcombine.low %v76_v17, %v80_v3  ;;  %v2526_v17 = vld [vmem:[%s3464_s0 + $0x8] sm:$0xff]  ;;  %v2531_v3 = vld [vmem:[%s3464_s0 + $0x10] sm:$0xff] }
  0x23   :  { %v331_v52 = vcombine.low %v84_v13, %v88_v14  ;;  %v347_v53 = vcombine.low %v92_v4, %v96_v16  ;;  %v348_v54 = vcombine.low %v100_v8, %v104_v18  ;;  %v364_v62 = vcombine.low %v108_v35, %v112_v36  ;;  %3509 = vst [vmem:[#allocation8_spill] sm:$0xff] %v2531_v3  ;;  %v2540_v8 = vld [vmem:[%s3464_s0 + $0x18] sm:$0xff] }
  0x24   :  { %v365_v57 = vcombine.low %v116_v37, %v120_v38  ;;  %v172_v58 = vrot.slane %v44_v31, %v2380_v25  ;;  %v381_v59 = vcombine.low %v124_v39, %v128_v40  ;;  %v382_v63 = vcombine.low %v132_v41, %v136_v56  ;;  %3510 = vst [vmem:[#allocation9_spill] sm:$0xff] %v2540_v8 }
  0x25   :  { %v398_v0 = vcombine.low %v140_v42, %v144_v43  ;;  %v176_v21 = vrot.slane %v44_v31, %v2382_v26  ;;  %v180_v22 = vrot.slane %v44_v31, %v2384_v27  ;;  %v184_v12 = vrot.slane %v44_v31, %v2386_v28 }
  0x26   :  { %v399_v10 = vcombine.low %v148_v44, %v152_v60  ;;  %v321_v61 = vrot.slane %v313_v49, %v2418_v55  ;;  %v328_v6 = vrot.slane %v314_v50, %v2418_v55  ;;  %v338_v7 = vrot.slane %v330_v51, %v2418_v55 }
  0x27   :  { %v345_v5 = vrot.slane %v331_v52, %v2418_v55  ;;  %v355_v13 = vrot.slane %v347_v53, %v2418_v55  ;;  %v362_v14 = vrot.slane %v348_v54, %v2418_v55  ;;  %v372_v4 = vrot.slane %v364_v62, %v2418_v55 }
  0x28   :  { %v379_v16 = vrot.slane %v365_v57, %v2418_v55  ;;  %v389_v18 = vrot.slane %v381_v59, %v2418_v55  ;;  %v396_v31 = vrot.slane %v382_v63, %v2418_v55  ;;  %v406_v35 = vrot.slane %v398_v0, %v2418_v55  ;;  %v622_v57 = vld [vmem:[%s3466_s2 + $0x28] sm:$0xff] }
  0x29   :  { %v2545_v36 = vcombine.low %v156_v45, %v160_v46  ;;  %v413_v37 = vrot.slane %v399_v10, %v2418_v55  ;;  %v2548_v38 = vcombine.low %v164_v47, %v168_v48  ;;  %v2550_v39 = vcombine.low %v172_v58, %v176_v21  ;;  %v2567_v46 = vld [vmem:[%s3466_s2] sm:$0xff]  ;;  %v623_v21 = vld [vmem:[%s3466_s2 + $0x30] sm:$0xff] }
  0x2a   :  { %v2552_v40 = vcombine.low %v180_v22, %v184_v12  ;;  %v2560_v45 = vcombine.low %v321_v61, %v328_v6  ;;  %v2562_v10 = vcombine.low %v338_v7, %v345_v5  ;;  %v621_v47 = vld [vmem:[%s3466_s2 + $0x20] sm:$0xff]  ;;  %v2572_v48 = vcombine.low %v355_v13, %v362_v14 }
  0x2b   :  { %3511 = vst [vmem:[#allocation10_spill] sm:$0xff] %v2550_v39  ;;  %v2574_v49 = vcombine.low %v372_v4, %v379_v16  ;;  %v2576_v50 = vcombine.low %v389_v18, %v396_v31  ;;  %v2580_v52 = vcombine.low %v406_v35, %v413_v37  ;;  %v764_v0 = vrot.slane %v621_v47, %v2369_v19  ;;  %v624_v35 = vld [vmem:[%s3466_s2 + $0x38] sm:$0xff] }
  0x2c   :  { %3512 = vst [vmem:[#allocation11_spill] sm:$0xff] %v2552_v40  ;;  %3513 = vst [vmem:[#allocation12_spill] sm:$0xff] %v2572_v48  ;;  %v768_v22 = vrot.slane %v621_v47, %v2371_v20  ;;  %v772_v12 = vrot.slane %v621_v47, %v2376_v23  ;;  %v776_v61 = vrot.slane %v621_v47, %v2378_v24 }
  0x2d   :  { %3514 = vst [vmem:[#allocation13_spill] sm:$0xff] %v2574_v49  ;;  %3515 = vst [vmem:[#allocation14_spill] sm:$0xff] %v2576_v50  ;;  %v780_v6 = vrot.slane %v621_v47, %v2380_v25  ;;  %v784_v7 = vrot.slane %v621_v47, %v2382_v26  ;;  %v788_v5 = vrot.slane %v621_v47, %v2384_v27 }
  0x2e   :  { %3516 = vst [vmem:[#allocation15_spill] sm:$0xff] %v2580_v52  ;;  %v792_v13 = vrot.slane %v621_v47, %v2386_v28  ;;  %v796_v14 = vrot.slane %v622_v57, %v2369_v19  ;;  %v800_v4 = vrot.slane %v622_v57, %v2371_v20  ;;  %v804_v16 = vrot.slane %v622_v57, %v2376_v23 }
  0x2f   :  { %v808_v18 = vrot.slane %v622_v57, %v2378_v24  ;;  %v812_v31 = vrot.slane %v622_v57, %v2380_v25  ;;  %v816_v37 = vrot.slane %v622_v57, %v2382_v26  ;;  %v820_v60 = vrot.slane %v622_v57, %v2384_v27 }
  0x30   :  { %v824_v47 = vrot.slane %v622_v57, %v2386_v28  ;;  %v828_v54 = vrot.slane %v623_v21, %v2369_v19  ;;  %v832_v62 = vrot.slane %v623_v21, %v2371_v20  ;;  %v836_v44 = vrot.slane %v623_v21, %v2376_v23 }
  0x31   :  { %v840_v43 = vrot.slane %v623_v21, %v2378_v24  ;;  %v844_v42 = vrot.slane %v623_v21, %v2380_v25  ;;  %v848_v56 = vrot.slane %v623_v21, %v2382_v26  ;;  %v852_v41 = vrot.slane %v623_v21, %v2384_v27 }
  0x32   :  { %v856_v63 = vrot.slane %v623_v21, %v2386_v28  ;;  %v1025_v58 = vcombine.low %v764_v0, %v768_v22  ;;  %v860_v59 = vrot.slane %v624_v35, %v2369_v19  ;;  %v864_v57 = vrot.slane %v624_v35, %v2371_v20 }
  0x33   :  { %v868_v9 = vrot.slane %v624_v35, %v2376_v23  ;;  %v1026_v51 = vcombine.low %v772_v12, %v776_v61  ;;  %v872_v53 = vrot.slane %v624_v35, %v2378_v24  ;;  %v1042_v40 = vcombine.low %v780_v6, %v784_v7 }
  0x34   :  { %v1033_v39 = vrot.slane %v1025_v58, %v2418_v55  ;;  %v1043_v8 = vcombine.low %v788_v5, %v792_v13  ;;  %v876_v52 = vrot.slane %v624_v35, %v2380_v25  ;;  %v1059_v3 = vcombine.low %v796_v14, %v800_v4 }
  0x35   :  { %v1040_v50 = vrot.slane %v1026_v51, %v2418_v55  ;;  %v1060_v21 = vcombine.low %v804_v16, %v808_v18  ;;  %v880_v0 = vrot.slane %v624_v35, %v2382_v26  ;;  %v884_v22 = vrot.slane %v624_v35, %v2384_v27 }
  0x36   :  { %v888_v49 = vrot.slane %v624_v35, %v2386_v28  ;;  %v1076_v48 = vcombine.low %v812_v31, %v816_v37  ;;  %v1050_v61 = vrot.slane %v1042_v40, %v2418_v55  ;;  %v1057_v58 = vrot.slane %v1043_v8, %v2418_v55 }
  0x37   :  { %v1041_v12 = vcombine.low %v1033_v39, %v1040_v50  ;;  %v1077_v6 = vcombine.low %v820_v60, %v824_v47  ;;  %v1067_v7 = vrot.slane %v1059_v3, %v2418_v55  ;;  %v1074_v5 = vrot.slane %v1060_v21, %v2418_v55 }
  0x38   :  { %v1093_v51 = vcombine.low %v828_v54, %v832_v62  ;;  %v1094_v13 = vcombine.low %v836_v44, %v840_v43  ;;  %v1084_v14 = vrot.slane %v1076_v48, %v2418_v55  ;;  %v1110_v16 = vcombine.low %v844_v42, %v848_v56  ;;  %v618_v43 = vld [vmem:[%s3466_s2 + $0x8] sm:$0xff] }
  0x39   :  { %v1091_v4 = vrot.slane %v1077_v6, %v2418_v55  ;;  %v1111_v18 = vcombine.low %v852_v41, %v856_v63  ;;  %v1127_v40 = vcombine.low %v860_v59, %v864_v57  ;;  %v1128_v50 = vcombine.low %v868_v9, %v872_v53 }
  0x3a   :  { %v1101_v31 = vrot.slane %v1093_v51, %v2418_v55  ;;  %v1108_v39 = vrot.slane %v1094_v13, %v2418_v55  ;;  %v1058_v8 = vcombine.low %v1050_v61, %v1057_v58  ;;  %v1118_v60 = vrot.slane %v1110_v16, %v2418_v55  ;;  %v619_v58 = vld [vmem:[%s3466_s2 + $0x10] sm:$0xff] }
  0x3b   :  { %v1125_v3 = vrot.slane %v1111_v18, %v2418_v55  ;;  %v1144_v35 = vcombine.low %v876_v52, %v880_v0  ;;  %v1075_v44 = vcombine.low %v1067_v7, %v1074_v5  ;;  %v1135_v56 = vrot.slane %v1127_v40, %v2418_v55 }
  0x3c   :  { %v1142_v41 = vrot.slane %v1128_v50, %v2418_v55  ;;  %v1145_v42 = vcombine.low %v884_v22, %v888_v49  ;;  %v1092_v48 = vcombine.low %v1084_v14, %v1091_v4  ;;  %v1109_v54 = vcombine.low %v1101_v31, %v1108_v39 }
  0x3d   :  { %v1126_v62 = vcombine.low %v1118_v60, %v1125_v3  ;;  %v1152_v9 = vrot.slane %v1144_v35, %v2418_v55  ;;  %v648_v53 = vrot.slane %v2567_v46, %v2378_v24  ;;  %v652_v52 = vrot.slane %v2567_v46, %v2380_v25 }
  0x3e   :  { %v1143_v59 = vcombine.low %v1135_v56, %v1142_v41  ;;  %v1159_v63 = vrot.slane %v1145_v42, %v2418_v55  ;;  %v656_v37 = vrot.slane %v2567_v46, %v2382_v26  ;;  %v660_v49 = vrot.slane %v2567_v46, %v2384_v27  ;;  %v3525_v42 = vld [vmem:[#allocation12_spill] sm:$0xff] }
  0x3f   :  { %v664_v47 = vrot.slane %v2567_v46, %v2386_v28  ;;  %v668_v57 = vrot.slane %v618_v43, %v2369_v19  ;;  %v2666_v0 = vadd.f32 %v1041_v12, %v2458_v29  ;;  %v2669_v22 = vadd.f32 %v1058_v8, %v2462_v30 }
  0x40   :  { %v1160_v21 = vcombine.low %v1152_v9, %v1159_v63  ;;  %v2672_v61 = vadd.f32 %v1075_v44, %v2466_v32  ;;  %v2678_v6 = vadd.f32 %v1092_v48, %v2470_v33  ;;  %v2681_v7 = vadd.f32 %v1109_v54, %v2474_v34 }
  0x41   :  { %v2684_v5 = vadd.f32 %v1126_v62, %v2478_v11  ;;  %v2687_v29 = vadd.f32 %v1143_v59, %v2482_v2  ;;  %v672_v30 = vrot.slane %v618_v43, %v2371_v20  ;;  %v676_v32 = vrot.slane %v618_v43, %v2376_v23 }
  0x42   :  { %v680_v12 = vrot.slane %v618_v43, %v2378_v24  ;;  %v2693_v51 = vadd.f32 %v1160_v21, %v2490_v15  ;;  %v3517_v33 = vrot.slane %v2548_v38, %v2418_v55  ;;  %v3518_v34 = vrot.slane %v2545_v36, %v2418_v55 }
  0x43   :  { %v3519_v13 = vunpack.c.l.bf16 %v2335_v1  ;;  %v684_v14 = vrot.slane %v618_v43, %v2380_v25  ;;  %v688_v4 = vrot.slane %v618_v43, %v2382_v26  ;;  %v692_v16 = vrot.slane %v618_v43, %v2384_v27 }
  0x44   :  { %v431_v11 = vcombine.low %v3518_v34, %v3517_v33  ;;  %v696_v15 = vrot.slane %v618_v43, %v2386_v28  ;;  %v700_v18 = vrot.slane %v619_v58, %v2369_v19  ;;  %v704_v38 = vrot.slane %v619_v58, %v2371_v20 }
  0x45   :  { %v601_v2 = vmul.f32 %v2560_v45, %v3519_v13  ;;  %v708_v31 = vrot.slane %v619_v58, %v2376_v23  ;;  %v712_v36 = vrot.slane %v619_v58, %v2378_v24  ;;  %v3520_v39 = vrot.slane %v2567_v46, %v2371_v20 }
  0x46   :  { %v3521_v45 = vrot.slane %v2567_v46, %v2369_v19  ;;  %v3522_v50 = vrot.slane %v2567_v46, %v2376_v23  ;;  %v906_v60 = vcombine.low %v652_v52, %v656_v37  ;;  %v907_v3 = vcombine.low %v660_v49, %v664_v47  ;;  %v2732_v46 = vld [vmem:[%s3466_s2 + $0x18] sm:$0xff] }
  0x47   :  { %v923_v35 = vcombine.low %v668_v57, %v672_v30  ;;  %v924_v43 = vcombine.low %v676_v32, %v680_v12  ;;  %v3523_v44 = vunpack.c.h.bf16 %v2335_v1  ;;  %v3524_v41 = vunpack.c.l.bf16 %v2526_v17  ;;  %3526 = vst [vmem:[#allocation12_spill] sm:$0xff] %v2732_v46  ;;  %v3528_v32 = vld [vmem:[#allocation13_spill] sm:$0xff] }
  0x48   :  { %v889_v40 = vcombine.low %v3521_v45, %v3520_v39  ;;  %v890_v8 = vcombine.low %v3522_v50, %v648_v53  ;;  %v716_v54 = vrot.slane %v619_v58, %v2380_v25  ;;  %v720_v62 = vrot.slane %v619_v58, %v2382_v26  ;;  %v3533_v39 = vld [vmem:[#allocation14_spill] sm:$0xff]  ;;  %v3535_v50 = vld [vmem:[#allocation15_spill] sm:$0xff] }
  0x49   :  { %v602_v56 = vmul.f32 %v2562_v10, %v3523_v44  ;;  %v603_v48 = vmul.f32 %v3525_v42, %v3524_v41  ;;  %v724_v9 = vrot.slane %v619_v58, %v2384_v27  ;;  %v728_v53 = vrot.slane %v619_v58, %v2386_v28 }
  0x4a   :  { %v940_v1 = vcombine.low %v684_v14, %v688_v4  ;;  %v941_v52 = vcombine.low %v692_v16, %v696_v15  ;;  %v897_v10 = vrot.slane %v889_v40, %v2418_v55  ;;  %v904_v59 = vrot.slane %v890_v8, %v2418_v55 }
  0x4b   :  { %v957_v63 = vcombine.low %v700_v18, %v704_v38  ;;  %v958_v37 = vcombine.low %v708_v31, %v712_v36  ;;  %v914_v49 = vrot.slane %v906_v60, %v2418_v55  ;;  %v921_v47 = vrot.slane %v907_v3, %v2418_v55  ;;  %v3531_v31 = vld [vmem:[#allocation8_spill] sm:$0xff] }
  0x4c   :  { %v931_v57 = vrot.slane %v923_v35, %v2418_v55  ;;  %v938_v21 = vrot.slane %v924_v43, %v2418_v55  ;;  %v3527_v30 = vunpack.c.h.bf16 %v2526_v17  ;;  %v732_v12 = vrot.slane %v2732_v46, %v2369_v19  ;;  %v3537_v35 = vld [vmem:[#allocation9_spill] sm:$0xff] }
  0x4d   :  { %v736_v33 = vrot.slane %v2732_v46, %v2371_v20  ;;  %v740_v34 = vrot.slane %v2732_v46, %v2376_v23  ;;  %v744_v13 = vrot.slane %v2732_v46, %v2378_v24  ;;  %v948_v14 = vrot.slane %v940_v1, %v2418_v55 }
  0x4e   :  { %v604_v58 = vmul.f32 %v3528_v32, %v3527_v30  ;;  %v955_v4 = vrot.slane %v941_v52, %v2418_v55  ;;  %v2755_v16 = vcombine.low %v716_v54, %v720_v62  ;;  %v905_v17 = vcombine.low %v897_v10, %v904_v59  ;;  %v1247_v62 = vld [vmem:[%s3467_s3 + $0x30] sm:$0xff] }
  0x4f   :  { %v965_v15 = vrot.slane %v957_v63, %v2418_v55  ;;  %v972_v18 = vrot.slane %v958_v37, %v2418_v55  ;;  %v2759_v38 = vcombine.low %v724_v9, %v728_v53  ;;  %v3532_v36 = vunpack.c.l.bf16 %v3531_v31 }
  0x50   :  { %3529 = vst [vmem:[#allocation13_spill] sm:$0xff] %v2755_v16  ;;  %v3534_v40 = vunpack.c.h.bf16 %v3531_v31  ;;  %v922_v60 = vcombine.low %v914_v49, %v921_v47  ;;  %v939_v3 = vcombine.low %v931_v57, %v938_v21  ;;  %v3538_v43 = vunpack.c.l.bf16 %v3537_v35 }
  0x51   :  { %3530 = vst [vmem:[#allocation16_spill] sm:$0xff] %v2759_v38  ;;  %v605_v45 = vmul.f32 %v3533_v39, %v3532_v36  ;;  %v956_v9 = vcombine.low %v948_v14, %v955_v4  ;;  %v2783_v1 = vcombine.low %v732_v12, %v736_v33  ;;  %v2787_v10 = vcombine.low %v740_v34, %v744_v13 }
  0x52   :  { %v2767_v8 = vmul.f32 %v3535_v50, %v3534_v40  ;;  %v2771_v44 = vmul.f32 %v431_v11, %v3538_v43  ;;  %v973_v11 = vcombine.low %v965_v15, %v972_v18  ;;  %v2789_v59 = vadd.f32 %v905_v17, %v601_v2  ;;  %v2804_v2 = vld [vmem:[%s3467_s3] sm:$0xff]  ;;  %v2849_v18 = vld [vmem:[%s3467_s3 + $0x8] sm:$0xff] }
  0x53   :  { %3540 = vst [vmem:[#allocation15_spill] sm:$0xff] %v2783_v1  ;;  %3541 = vst [vmem:[#allocation17_spill] sm:$0xff] %v2787_v10  ;;  %v2791_v63 = vadd.f32 %v922_v60, %v602_v56  ;;  %v2793_v37 = vadd.f32 %v939_v3, %v603_v48  ;;  %vm1201_vm0 = vcmp.ge.f32.partialorder %v2666_v0, 0.0  ;;  %vm1202_vm1 = vcmp.ge.f32.partialorder %v2669_v22, 0.0 }
  0x54   :  { %3536 = vst [vmem:[#allocation8_spill] sm:$0xff] %v2767_v8  ;;  %3539 = vst [vmem:[#allocation14_spill] sm:$0xff] %v2771_v44  ;;  %vm1203_vm2 = vcmp.ge.f32.partialorder %v2672_v61, 0.0  ;;  %vm1204_vm3 = vcmp.ge.f32.partialorder %v2678_v6, 0.0  ;;  %vm1205_vm4 = vcmp.ge.f32.partialorder %v2681_v7, 0.0  ;;  %v2806_v56 = vadd.f32 %v956_v9, %v604_v58 }
  0x55   :  { %3542 = vst [vmem:[#allocation18_spill] sm:$0xff] %v2793_v37  ;;  %v1217_v49 = vmul.f32 0.2, %v2666_v0  ;;  %v1218_v48 = vmul.f32 0.2, %v2669_v22  ;;  %v2811_v21 = vadd.f32 %v973_v11, %v605_v45  ;;  %vm1206_vm5 = vcmp.ge.f32.partialorder %v2684_v5, 0.0 }
  0x56   :  { %3543 = vst [vmem:[#allocation19_spill] sm:$0xff] %v2806_v56  ;;  %v1219_v47 = vmul.f32 0.2, %v2672_v61  ;;  %v1220_v57 = vmul.f32 0.2, %v2678_v6  ;;  %vm1207_vm6 = vcmp.ge.f32.partialorder %v2687_v29, 0.0  ;;  %v1264_v31 = vrot.slane %v2804_v2, %v2371_v20 }
  0x57   :  { %3544 = vst [vmem:[#allocation20_spill] sm:$0xff] %v2811_v21  ;;  %v1221_v30 = vmul.f32 0.2, %v2681_v7  ;;  %v1222_v32 = vmul.f32 0.2, %v2684_v5  ;;  %vm1208_vm7 = vcmp.ge.f32.partialorder %v2693_v51, 0.0  ;;  %v2834_v4 = vsel %vm1201_vm0, %v2666_v0, %v1217_v49 }
  0x58   :  { %v1223_v12 = vmul.f32 0.2, %v2687_v29  ;;  %v1224_v58 = vmul.f32 0.2, %v2693_v51  ;;  %v2821_v33 = vmul.f32 0.2, %v2789_v59  ;;  %v2839_v17 = vsel %vm1202_vm1, %v2669_v22, %v1218_v48 }
  0x59   :  { %v2824_v34 = vmul.f32 0.2, %v2791_v63  ;;  %v2827_v13 = vmul.f32 0.2, %v2793_v37  ;;  %3548 = vst [vmem:[#allocation24_spill] sm:$0xff] %v2834_v4  ;;  %3549 = vst [vmem:[#allocation25_spill] sm:$0xff] %v2839_v17  ;;  %v2844_v15 = vsel %vm1203_vm2, %v2672_v61, %v1219_v47  ;;  %v2856_v0 = vsel %vm1204_vm3, %v2678_v6, %v1220_v57 }
  0x5a   :  { %3545 = vst [vmem:[#allocation21_spill] sm:$0xff] %v2821_v33  ;;  %3550 = vst [vmem:[#allocation26_spill] sm:$0xff] %v2844_v15  ;;  %v2861_v22 = vsel %vm1205_vm4, %v2681_v7, %v1221_v30  ;;  %v2864_v61 = vsel %vm1206_vm5, %v2684_v5, %v1222_v32  ;;  %v2867_v36 = vsel %vm1207_vm6, %v2687_v29, %v1223_v12  ;;  %v2875_v45 = vld [vmem:[%s3467_s3 + $0x10] sm:$0xff]  ;;  %v1245_v29 = vld [vmem:[%s3467_s3 + $0x20] sm:$0xff]  ;;  %vm1193_vm8 = vcmp.ge.f32.partialorder %v2789_v59, 0.0 }
  0x5b   :  { %3546 = vst [vmem:[#allocation22_spill] sm:$0xff] %v2824_v34  ;;  %3547 = vst [vmem:[#allocation23_spill] sm:$0xff] %v2827_v13  ;;  %v2870_v39 = vsel %vm1208_vm7, %v2693_v51, %v1224_v58  ;;  %v1268_v6 = vrot.slane %v2804_v2, %v2376_v23  ;;  %v1272_v7 = vrot.slane %v2804_v2, %v2378_v24  ;;  %v2905_v49 = vld [vmem:[%s3467_s3 + $0x28] sm:$0xff]  ;;  %v2937_v47 = vld [vmem:[%s3467_s3 + $0x38] sm:$0xff]  ;;  %vm1194_vm9 = vcmp.ge.f32.partialorder %v2791_v63, 0.0 }
  0x5c   :  { %3551 = vst [vmem:[#allocation27_spill] sm:$0xff] %v2856_v0  ;;  %3552 = vst [vmem:[#allocation28_spill] sm:$0xff] %v2861_v22  ;;  %v1276_v5 = vrot.slane %v2804_v2, %v2380_v25  ;;  %v1280_v51 = vrot.slane %v2804_v2, %v2382_v26  ;;  %v1284_v40 = vrot.slane %v2804_v2, %v2384_v27  ;;  %vm2299_vm1 = vcmask 1024  }
  0x5d   :  { %3553 = vst [vmem:[#allocation29_spill] sm:$0xff] %v2864_v61  ;;  %3554 = vst [vmem:[#allocation30_spill] sm:$0xff] %v2867_v36  ;;  %v1288_v50 = vrot.slane %v2804_v2, %v2386_v28  ;;  %v1292_v60 = vrot.slane %v2849_v18, %v2369_v19  ;;  %v1296_v3 = vrot.slane %v2849_v18, %v2371_v20 }
  0x5e   :  { %3555 = vst [vmem:[#allocation31_spill] sm:$0xff] %v2870_v39  ;;  %3556 = vst [vmem:[#allocation32_spill] sm:$0xff] %v2875_v45  ;;  %v1300_v43 = vrot.slane %v2849_v18, %v2376_v23  ;;  %v1304_v9 = vrot.slane %v2849_v18, %v2378_v24  ;;  %v1308_v11 = vrot.slane %v2849_v18, %v2380_v25 }
  0x5f   :  { %v1312_v48 = vrot.slane %v2849_v18, %v2382_v26  ;;  %v1388_v54 = vrot.slane %v1245_v29, %v2369_v19  ;;  %v1392_v41 = vrot.slane %v1245_v29, %v2371_v20  ;;  %v1396_v42 = vrot.slane %v1245_v29, %v2376_v23 }
  0x60   :  { %v1400_v30 = vrot.slane %v1245_v29, %v2378_v24  ;;  %v1404_v32 = vrot.slane %v1245_v29, %v2380_v25  ;;  %v1408_v53 = vrot.slane %v1245_v29, %v2382_v26  ;;  %v1412_v12 = vrot.slane %v1245_v29, %v2384_v27 }
  0x61   :  { %v1416_v58 = vrot.slane %v1245_v29, %v2386_v28  ;;  %v1420_v52 = vrot.slane %v2905_v49, %v2369_v19  ;;  %v1424_v57 = vrot.slane %v2905_v49, %v2371_v20  ;;  %v1428_v14 = vrot.slane %v2905_v49, %v2376_v23 }
  0x62   :  { %v1432_v35 = vrot.slane %v2905_v49, %v2378_v24  ;;  %v1436_v29 = vrot.slane %v2905_v49, %v2380_v25  ;;  %v1440_v44 = vrot.slane %v2905_v49, %v2382_v26  ;;  %v1444_v8 = vrot.slane %v2905_v49, %v2384_v27 }
  0x63   :  { %v1448_v10 = vrot.slane %v2905_v49, %v2386_v28  ;;  %v1452_v1 = vrot.slane %v1247_v62, %v2369_v19  ;;  %v1456_v13 = vrot.slane %v1247_v62, %v2371_v20  ;;  %v1460_v34 = vrot.slane %v1247_v62, %v2376_v23 }
  0x64   :  { %v1464_v33 = vrot.slane %v1247_v62, %v2378_v24  ;;  %v1468_v21 = vrot.slane %v1247_v62, %v2380_v25  ;;  %v1472_v45 = vrot.slane %v1247_v62, %v2382_v26  ;;  %v1476_v37 = vrot.slane %v1247_v62, %v2384_v27 }
  0x65   :  { %v1480_v46 = vrot.slane %v1247_v62, %v2386_v28  ;;  %v1484_v16 = vrot.slane %v2937_v47, %v2369_v19  ;;  %v1488_v49 = vrot.slane %v2937_v47, %v2371_v20  ;;  %v1492_v38 = vrot.slane %v2937_v47, %v2376_v23 }
  0x66   :  { %v1496_v39 = vrot.slane %v2937_v47, %v2378_v24  ;;  %v1500_v56 = vrot.slane %v2937_v47, %v2380_v25  ;;  %v1504_v36 = vrot.slane %v2937_v47, %v2382_v26  ;;  %v1508_v62 = vrot.slane %v2937_v47, %v2384_v27 }
  0x67   :  { %v3557_v61 = vrot.slane %v2804_v2, %v2369_v19  ;;  %v1649_v20 = vcombine.low %v1388_v54, %v1392_v41  ;;  %v1512_v23 = vrot.slane %v2937_v47, %v2386_v28  ;;  %v2982_v0 = vcombine.low %v1268_v6, %v1272_v7 }
  0x68   :  { %v2984_v24 = vcombine.low %v1276_v5, %v1280_v51  ;;  %v1650_v25 = vcombine.low %v1396_v42, %v1400_v30  ;;  %v2986_v15 = vcombine.low %v1284_v40, %v1288_v50  ;;  %v1666_v17 = vcombine.low %v1404_v32, %v1408_v53 }
  0x69   :  { %v2978_v22 = vcombine.low %v3557_v61, %v1264_v31  ;;  %v1657_v26 = vrot.slane %v1649_v20, %v2418_v55  ;;  %v1667_v4 = vcombine.low %v1412_v12, %v1416_v58  ;;  %v2989_v27 = vcombine.low %v1292_v60, %v1296_v3  ;;  %v3563_v12 = vld [vmem:[#allocation26_spill] sm:$0xff] }
  0x6a   :  { %v1664_v2 = vrot.slane %v1650_v25, %v2418_v55  ;;  %v1683_v31 = vcombine.low %v1420_v52, %v1424_v57  ;;  %v1684_v41 = vcombine.low %v1428_v14, %v1432_v35  ;;  %v2994_v61 = vcombine.low %v1300_v43, %v1304_v9  ;;  %v3561_v57 = vld [vmem:[#allocation24_spill] sm:$0xff] }
  0x6b   :  { %v1521_v54 = vrot.slane %v2978_v22, %v2418_v55  ;;  %v2996_v6 = vcombine.low %v1308_v11, %v1312_v48  ;;  %v1700_v42 = vcombine.low %v1436_v29, %v1440_v44  ;;  %v1674_v5 = vrot.slane %v1666_v17, %v2418_v55 }
  0x6c   :  { %v1665_v7 = vcombine.low %v1657_v26, %v1664_v2  ;;  %v1681_v20 = vrot.slane %v1667_v4, %v2418_v55  ;;  %v1701_v53 = vcombine.low %v1444_v8, %v1448_v10  ;;  %v1691_v51 = vrot.slane %v1683_v31, %v2418_v55  ;;  %v3567_v2 = vld [vmem:[#allocation30_spill] sm:$0xff] }
  0x6d   :  { %v1698_v25 = vrot.slane %v1684_v41, %v2418_v55  ;;  %v1717_v52 = vcombine.low %v1452_v1, %v1456_v13  ;;  %v1718_v35 = vcombine.low %v1460_v34, %v1464_v33  ;;  %v1708_v14 = vrot.slane %v1700_v42, %v2418_v55  ;;  %v3568_v41 = vld [vmem:[#allocation19_spill] sm:$0xff] }
  0x6e   :  { %v1715_v22 = vrot.slane %v1701_v53, %v2418_v55  ;;  %v1734_v40 = vcombine.low %v1468_v21, %v1472_v45  ;;  %v1735_v50 = vcombine.low %v1476_v37, %v1480_v46  ;;  %v1751_v44 = vcombine.low %v1484_v16, %v1488_v49  ;;  %v3570_v53 = vld [vmem:[#allocation16_spill] sm:$0xff] }
  0x6f   :  { %v1725_v26 = vrot.slane %v1717_v52, %v2418_v55  ;;  %v1732_v8 = vrot.slane %v1718_v35, %v2418_v55  ;;  %v1752_v10 = vcombine.low %v1492_v38, %v1496_v39  ;;  %v1682_v4 = vcombine.low %v1674_v5, %v1681_v20  ;;  %v3559_v39 = vld [vmem:[#allocation7_spill] sm:$0xff] }
  0x70   :  { %v1742_v1 = vrot.slane %v1734_v40, %v2418_v55  ;;  %v1749_v33 = vrot.slane %v1735_v50, %v2418_v55  ;;  %v1768_v34 = vcombine.low %v1500_v56, %v1504_v36  ;;  %v1699_v13 = vcombine.low %v1691_v51, %v1698_v25  ;;  %v3569_v5 = vld [vmem:[#allocation31_spill] sm:$0xff]  ;;  %v3572_v25 = vld [vmem:[#allocation13_spill] sm:$0xff] }
  0x71   :  { %v1759_v21 = vrot.slane %v1751_v44, %v2418_v55  ;;  %v1766_v46 = vrot.slane %v1752_v10, %v2418_v55  ;;  %v1769_v37 = vcombine.low %v1508_v62, %v1512_v23  ;;  %v1716_v17 = vcombine.low %v1708_v14, %v1715_v22  ;;  %v3574_v14 = vld [vmem:[#allocation12_spill] sm:$0xff]  ;;  %v3575_v22 = vld [vmem:[#allocation6_spill] sm:$0xff]  ;;  %v3577_v50 = vld [vmem:[#allocation5_spill] sm:$0xff] }
  0x72   :  { %v1733_v45 = vcombine.low %v1725_v26, %v1732_v8  ;;  %v1750_v60 = vcombine.low %v1742_v1, %v1749_v33  ;;  %v1776_v3 = vrot.slane %v1768_v34, %v2418_v55  ;;  %v1528_v16 = vrot.slane %v2982_v0, %v2418_v55  ;;  %v3581_v1 = vld [vmem:[#allocation2_spill] sm:$0xff] }
  0x73   :  { %v3558_v38 = vrot.slane %v2849_v18, %v2386_v28  ;;  %v3560_v56 = vrot.slane %v2849_v18, %v3559_v39  ;;  %v1767_v43 = vcombine.low %v1759_v21, %v1766_v46  ;;  %v1783_v9 = vrot.slane %v1769_v37, %v2418_v55  ;;  %v3562_v18 = vld [vmem:[#allocation25_spill] sm:$0xff]  ;;  %v3584_v21 = vld [vmem:[#allocation4_spill] sm:$0xff]  ;;  %v3586_v37 = vld [vmem:[#allocation3_spill] sm:$0xff] }
  0x74   :  { %v1538_v23 = vrot.slane %v2984_v24, %v2418_v55  ;;  %v1545_v11 = vrot.slane %v2986_v15, %v2418_v55  ;;  %v1555_v48 = vrot.slane %v2989_v27, %v2418_v55  ;;  %v1562_v0 = vrot.slane %v2994_v61, %v2418_v55  ;;  %v3564_v24 = vld [vmem:[#allocation27_spill] sm:$0xff]  ;;  %v3565_v15 = vld [vmem:[#allocation28_spill] sm:$0xff]  ;;  %v3566_v27 = vld [vmem:[#allocation29_spill] sm:$0xff] }
  0x75   :  { %v1565_v36 = vcombine.low %v3560_v56, %v3558_v38  ;;  %v1784_v47 = vcombine.low %v1776_v3, %v1783_v9  ;;  %v3031_v30 = vmul.f32 %v1665_v7, %v3561_v57  ;;  %v3034_v32 = vmul.f32 %v1682_v4, %v3562_v18  ;;  %v3580_v4 = vld [vmem:[#allocation32_spill] sm:$0xff]  ;;  %v3589_v3 = vld [vmem:[#allocation21_spill] sm:$0xff] }
  0x76   :  { %v3037_v58 = vmul.f32 %v1699_v13, %v3563_v12  ;;  %v3040_v29 = vmul.f32 %v1716_v17, %v3564_v24  ;;  %v3043_v49 = vmul.f32 %v1733_v45, %v3565_v15  ;;  %v3046_v62 = vmul.f32 %v1750_v60, %v3566_v27  ;;  %v3588_v60 = vld [vmem:[#allocation20_spill] sm:$0xff]  ;;  %v3592_v15 = vld [vmem:[#allocation15_spill] sm:$0xff] }
  0x77   :  { %v3049_v31 = vmul.f32 %v1767_v43, %v3567_v2  ;;  %v1212_v61 = vmul.f32 0.2, %v3568_v41  ;;  %v1572_v42 = vrot.slane %v2996_v6, %v2418_v55  ;;  %v1579_v7 = vrot.slane %v1565_v36, %v2418_v55  ;;  %v3579_v6 = vld [vmem:[#allocation18_spill] sm:$0xff]  ;;  %v3591_v43 = vld [vmem:[#allocation23_spill] sm:$0xff]  ;;  %v3593_v2 = vld [vmem:[#allocation17_spill] sm:$0xff] }
  0x78   :  { %v3056_v20 = vmul.f32 %v1784_v47, %v3569_v5  ;;  %v3571_v51 = vrot.slane %v3570_v53, %v2418_v55  ;;  %v3573_v52 = vrot.slane %v3572_v25, %v2418_v55  ;;  %v3576_v40 = vrot.slane %v3574_v14, %v3575_v22 }
  0x79   :  { %v3578_v26 = vrot.slane %v3574_v14, %v3577_v50  ;;  %vm1195_vm10 = vcmp.ge.f32.partialorder %v3579_v6, 0.0  ;;  %vm1196_vm11 = vcmp.ge.f32.partialorder %v3568_v41, 0.0  ;;  %v1529_v44 = vcombine.low %v1521_v54, %v1528_v16  ;;  %v3590_v16 = vld [vmem:[#allocation22_spill] sm:$0xff] }
  0x7a   :  { %v990_v35 = vcombine.low %v3573_v52, %v3571_v51  ;;  %v1546_v10 = vcombine.low %v1538_v23, %v1545_v11  ;;  %v3582_v33 = vrot.slane %v3580_v4, %v3581_v1  ;;  %v3583_v34 = vrot.slane %v3580_v4, %v2369_v19 }
  0x7b   :  { %v3070_v8 = vcombine.low %v3578_v26, %v3576_v40  ;;  %v3585_v46 = vrot.slane %v3580_v4, %v3584_v21  ;;  %v3587_v17 = vrot.slane %v3580_v4, %v3586_v37  ;;  %vm1197_vm12 = vcmp.ge.f32.partialorder %v3588_v60, 0.0 }
  0x7c   :  { %v1581_v13 = vcombine.low %v3583_v34, %v3582_v33  ;;  %v1225_v54 = vsel %vm1193_vm8, %v2789_v59, %v3589_v3  ;;  %v1226_v38 = vsel %vm1194_vm9, %v2791_v63, %v3590_v16  ;;  %v1563_v56 = vcombine.low %v1555_v48, %v1562_v0  ;;  %v3110_v48 = vld [vmem:[%s3467_s3 + $0x18] sm:$0xff] }
  0x7d   :  { %v1582_v45 = vcombine.low %v3587_v17, %v3585_v46  ;;  %v1213_v36 = vmul.f32 0.2, %v3588_v60  ;;  %v1227_v9 = vsel %vm1195_vm10, %v3579_v6, %v3591_v43  ;;  %v1228_v23 = vsel %vm1196_vm11, %v3568_v41, %v1212_v61  ;;  %v3594_v61 = vld [vmem:[#allocation8_spill] sm:$0xff] }
  0x7e   :  { %v1580_v11 = vcombine.low %v1572_v42, %v1579_v7  ;;  %v1340_v47 = vrot.slane %v3580_v4, %v3577_v50  ;;  %v1344_v59 = vrot.slane %v3580_v4, %v3575_v22  ;;  %v1348_v57 = vrot.slane %v3580_v4, %v3559_v39 }
  0x7f   :  { %v1352_v63 = vrot.slane %v3580_v4, %v2386_v28  ;;  %v1589_v0 = vrot.slane %v1581_v13, %v2418_v55  ;;  %v1596_v18 = vrot.slane %v1582_v45, %v2418_v55  ;;  %v1801_v12 = vmul.f32 %v1529_v44, %v1225_v54 }
  0x80   :  { %v1802_v24 = vmul.f32 %v1546_v10, %v1226_v38  ;;  %v3119_v42 = vadd.f32 %v990_v35, %v3594_v61  ;;  %v1803_v7 = vmul.f32 %v1563_v56, %v1227_v9  ;;  %v1229_v5 = vsel %vm1197_vm12, %v3588_v60, %v1213_v36 }
  0x81   :  { %v1804_v53 = vmul.f32 %v1580_v11, %v1228_v23  ;;  %v1833_v51 = vcombine.high %v1801_v12, %v1801_v12  ;;  %v3126_v40 = vcombine.low %v1340_v47, %v1344_v59  ;;  %v3128_v26 = vcombine.low %v1348_v57, %v1352_v63 }
  0x82   :  { %v1850_v25 = vcombine.high %v1802_v24, %v1802_v24  ;;  %v1867_v6 = vcombine.high %v1803_v7, %v1803_v7  ;;  %v1597_v10 = vcombine.low %v1589_v0, %v1596_v18  ;;  %v1840_v4 = vrot.slane %v1801_v12, %v2418_v55 }
  0x83   :  { %v3136_v33 = vrot.slane %v1802_v24, %v2418_v55  ;;  %v3139_v34 = vrot.slane %v1803_v7, %v2418_v55  ;;  %v1884_v13 = vcombine.high %v1804_v53, %v1804_v53  ;;  %v1969_v46 = vcombine.high %v3031_v30, %v3031_v30 }
  0x84   :  { %v1847_v45 = vrot.slane %v1833_v51, %v2418_v55  ;;  %v3147_v60 = vrot.slane %v1850_v25, %v2418_v55  ;;  %v3150_v3 = vrot.slane %v1804_v53, %v2418_v55  ;;  %v3157_v38 = vrot.slane %v1867_v6, %v2418_v55 }
  0x85   :  { %v3161_v56 = vrot.slane %v3031_v30, %v2418_v55  ;;  %v3163_v36 = vmul.f32 %v1597_v10, %v1229_v5  ;;  %v1848_v43 = vcombine.high %v1840_v4, %v1840_v4  ;;  %v1986_v9 = vcombine.high %v3034_v32, %v3034_v32 }
  0x86   :  { %v3169_v23 = vrot.slane %v3034_v32, %v2418_v55  ;;  %v1865_v11 = vcombine.high %v3136_v33, %v3136_v33  ;;  %v1882_v47 = vcombine.high %v3139_v34, %v3139_v34  ;;  %v3176_v59 = vrot.slane %v1884_v13, %v2418_v55 }
  0x87   :  { %3595 = vst [vmem:[#allocation7_spill] sm:$0xff] %v3161_v56  ;;  %3596 = vst [vmem:[#allocation24_spill] sm:$0xff] %v3163_v36  ;;  %v1983_v30 = vrot.slane %v1969_v46, %v2418_v55  ;;  %v1849_v57 = vcombine.high %v1847_v45, %v1847_v45  ;;  %v1866_v63 = vcombine.high %v3147_v60, %v3147_v60  ;;  %v2171_v46 = vsel %vm2169_vm13, %v1848_v43, 0.0 }
  0x88   :  { %v2003_v32 = vcombine.high %v3037_v58, %v3037_v58  ;;  %v1984_v12 = vcombine.high %v3161_v56, %v3161_v56  ;;  %v2010_v24 = vrot.slane %v3037_v58, %v2418_v55  ;;  %v2020_v61 = vcombine.high %v3040_v29, %v3040_v29 }
  0x89   :  { %v2000_v7 = vrot.slane %v1986_v9, %v2418_v55  ;;  %v2001_v5 = vcombine.high %v3169_v23, %v3169_v23  ;;  %v2037_v53 = vcombine.high %v3043_v49, %v3043_v49  ;;  %v1985_v51 = vcombine.high %v1983_v30, %v1983_v30 }
  0x8a   :  { %v2054_v25 = vcombine.high %v3046_v62, %v3046_v62  ;;  %v2071_v6 = vcombine.high %v3049_v31, %v3049_v31  ;;  %v2170_v58 = vsel %vm2169_vm13, %v1840_v4, 0.0  ;;  %v2017_v10 = vrot.slane %v2003_v32, %v2418_v55 }
  0x8b   :  { %v2088_v13 = vcombine.high %v3056_v20, %v3056_v20  ;;  %v2173_v9 = vsel %vm2169_vm13, %v1847_v45, 0.0  ;;  %v2018_v0 = vcombine.high %v2010_v24, %v2010_v24  ;;  %v2027_v44 = vrot.slane %v3040_v29, %v2418_v55 }
  0x8c   :  { %v2034_v17 = vrot.slane %v2020_v61, %v2418_v55  ;;  %v2172_v52 = vadd.f32 %v2171_v46, %v2170_v58  ;;  %v2044_v35 = vrot.slane %v3043_v49, %v2418_v55  ;;  %v2051_v4 = vrot.slane %v2037_v53, %v2418_v55 }
  0x8d   :  { %v2061_v32 = vrot.slane %v3046_v62, %v2418_v55  ;;  %v2175_v54 = vsel %vm2169_vm13, %v1849_v57, 0.0  ;;  %v2068_v43 = vrot.slane %v2054_v25, %v2418_v55  ;;  %v2078_v45 = vrot.slane %v3049_v31, %v2418_v55 }
  0x8e   :  { %v2085_v29 = vrot.slane %v2071_v6, %v2418_v55  ;;  %v2174_v16 = vadd.f32 %v2173_v9, %v2172_v52  ;;  %v2002_v61 = vcombine.high %v2000_v7, %v2000_v7  ;;  %v2095_v58 = vrot.slane %v3056_v20, %v2418_v55 }
  0x8f   :  { %v2102_v49 = vrot.slane %v2088_v13, %v2418_v55  ;;  %v2177_v53 = vsel %vm2169_vm13, %v3136_v33, 0.0  ;;  %v2019_v62 = vcombine.high %v2017_v10, %v2017_v10  ;;  %v2035_v46 = vcombine.high %v2027_v44, %v2027_v44 }
  0x90   :  { %v2036_v57 = vcombine.high %v2034_v17, %v2034_v17  ;;  %v2176_v27 = vadd.f32 %v2175_v54, %v2174_v16  ;;  %v2052_v25 = vcombine.high %v2044_v35, %v2044_v35  ;;  %v2053_v41 = vcombine.high %v2051_v4, %v2051_v4 }
  0x91   :  { %v2069_v18 = vcombine.high %v2061_v32, %v2061_v32  ;;  %v2179_v31 = vsel %vm2169_vm13, %v1865_v11, 0.0  ;;  %v2070_v6 = vcombine.high %v2068_v43, %v2068_v43  ;;  %v2086_v52 = vcombine.high %v2078_v45, %v2078_v45 }
  0x92   :  { %v2087_v9 = vcombine.high %v2085_v29, %v2085_v29  ;;  %v2178_v56 = vadd.f32 %v2177_v53, %v2176_v27  ;;  %v2103_v22 = vcombine.high %v2095_v58, %v2095_v58  ;;  %v2104_v20 = vcombine.high %v2102_v49, %v2102_v49 }
  0x93   :  { %v2181_v13 = vsel %vm2169_vm13, %v3147_v60, 0.0  ;;  %v2183_v33 = vsel %vm2169_vm13, %v1866_v63, 0.0  ;;  %v2185_v54 = vsel %vm2169_vm13, %v3139_v34, 0.0  ;;  %v2187_v16 = vsel %vm2169_vm13, %v1882_v47, 0.0 }
  0x94   :  { %v2180_v50 = vadd.f32 %v2179_v31, %v2178_v56  ;;  %v2189_v11 = vsel %vm2169_vm13, %v3157_v38, 0.0  ;;  %v3236_v36 = vsel %vm2169_vm13, %v1984_v12, 0.0  ;;  %v3239_v27 = vsel %vm2169_vm13, %v1983_v30, 0.0 }
  0x95   :  { %v3242_v53 = vsel %vm2169_vm13, %v1985_v51, 0.0  ;;  %v3246_v60 = vsel %vm2169_vm13, %v3169_v23, 0.0  ;;  %v3249_v34 = vsel %vm2169_vm13, %v2001_v5, 0.0  ;;  %v3252_v47 = vsel %vm2169_vm13, %v2000_v7, 0.0 }
  0x96   :  { %v2182_v56 = vadd.f32 %v2181_v13, %v2180_v50  ;;  %v3255_v63 = vsel %vm2169_vm13, %v2002_v61, 0.0  ;;  %v3258_v30 = vsel %vm2169_vm13, %v2010_v24, 0.0  ;;  %v3261_v12 = vsel %vm2169_vm13, %v2018_v0, 0.0 }
  0x97   :  { %v3264_v51 = vsel %vm2169_vm13, %v2017_v10, 0.0  ;;  %v3267_v50 = vsel %vm2169_vm13, %v2019_v62, 0.0  ;;  %v3270_v5 = vsel %vm2169_vm13, %v2027_v44, 0.0  ;;  %v3273_v7 = vsel %vm2169_vm13, %v2035_v46, 0.0 }
  0x98   :  { %v2184_v23 = vadd.f32 %v2183_v33, %v2182_v56  ;;  %v3276_v61 = vsel %vm2169_vm13, %v2034_v17, 0.0  ;;  %v3279_v24 = vsel %vm2169_vm13, %v2036_v57, 0.0  ;;  %v3282_v0 = vsel %vm2169_vm13, %v2044_v35, 0.0  ;;  %v3604_v56 = vld [vmem:[#allocation11_spill] sm:$0xff] }
  0x99   :  { %v3285_v10 = vsel %vm2169_vm13, %v2052_v25, 0.0  ;;  %v3288_v62 = vsel %vm2169_vm13, %v2051_v4, 0.0  ;;  %v3291_v31 = vsel %vm2169_vm13, %v2053_v41, 0.0  ;;  %v3294_v46 = vsel %vm2169_vm13, %v2061_v32, 0.0 }
  0x9a   :  { %v2186_v44 = vadd.f32 %v2185_v54, %v2184_v23  ;;  %v3297_v17 = vsel %vm2169_vm13, %v2069_v18, 0.0  ;;  %v3300_v57 = vsel %vm2169_vm13, %v2068_v43, 0.0  ;;  %v3303_v35 = vsel %vm2169_vm13, %v2070_v6, 0.0  ;;  %v3606_v23 = vld [vmem:[#allocation10_spill] sm:$0xff] }
  0x9b   :  { %v3306_v25 = vsel %vm2169_vm13, %v2078_v45, 0.0  ;;  %v3309_v4 = vsel %vm2169_vm13, %v2086_v52, 0.0  ;;  %v3312_v13 = vsel %vm2169_vm13, %v2085_v29, 0.0  ;;  %v3315_v32 = vsel %vm2169_vm13, %v2087_v9, 0.0 }
  0x9c   :  { %v2188_v41 = vadd.f32 %v2187_v16, %v2186_v44  ;;  %v3318_v18 = vsel %vm2169_vm13, %v2095_v58, 0.0  ;;  %v3597_v43 = vcombine.high %v3157_v38, %v3157_v38  ;;  %v3325_v45 = vsel %vm2169_vm13, %v2103_v22, 0.0 }
  0x9d   :  { %v3328_v52 = vsel %vm2169_vm13, %v2102_v49, 0.0  ;;  %v3331_v29 = vsel %vm2169_vm13, %v2104_v20, 0.0  ;;  %v3600_v9 = vrot.slane %v3593_v2, %v2418_v55  ;;  %v3601_v58 = vrot.slane %v3592_v15, %v2418_v55 }
  0x9e   :  { %v2191_v6 = vsel %vm2169_vm13, %v3597_v43, 0.0  ;;  %3598 = vst [vmem:[#allocation25_spill] sm:$0xff] %v3328_v52  ;;  %3599 = vst [vmem:[#allocation26_spill] sm:$0xff] %v3331_v29  ;;  %v3602_v38 = vrot.slane %v3574_v14, %v2386_v28  ;;  %v3603_v22 = vrot.slane %v3574_v14, %v3559_v39  ;;  %v1214_v49 = vmul.f32 0.2, %v3119_v42 }
  0x9f   :  { %v1007_v33 = vcombine.low %v3601_v58, %v3600_v9  ;;  %v2190_v16 = vadd.f32 %v2189_v11, %v2188_v41  ;;  %v3605_v20 = vrot.slane %v3604_v56, %v2418_v55  ;;  %v3607_v2 = vrot.slane %v3606_v23, %v2418_v55 }
  0xa0   :  { %v1009_v54 = vcombine.low %v3603_v22, %v3602_v38  ;;  %v1016_v15 = vrot.slane %v3070_v8, %v2418_v55  ;;  %vm1198_vm14 = vcmp.ge.f32.partialorder %v3119_v42, 0.0  ;;  %v2193_v43 = vsel %vm2169_vm13, %v3150_v3, 0.0 }
  0xa1   :  { %v448_v44 = vcombine.low %v3607_v2, %v3605_v20  ;;  %v3608_v14 = vrot.slane %v3128_v26, %v2418_v55  ;;  %v3609_v11 = vrot.slane %v3126_v40, %v2418_v55  ;;  %v3610_v9 = vrot.slane %v3110_v48, %v3581_v1  ;;  %v3614_v40 = vld [vmem:[#allocation24_spill] sm:$0xff] }
  0xa2   :  { %v3611_v58 = vrot.slane %v3110_v48, %v2369_v19  ;;  %v3612_v8 = vrot.slane %v3110_v48, %v3584_v21  ;;  %v3613_v22 = vrot.slane %v3110_v48, %v3586_v37  ;;  %v2192_v20 = vadd.f32 %v2191_v6, %v2190_v16 }
  0xa3   :  { %v1614_v41 = vcombine.low %v3609_v11, %v3608_v14  ;;  %v1900_v26 = vcombine.high %v3176_v59, %v3176_v59  ;;  %v1901_v23 = vcombine.high %v3614_v40, %v3614_v40  ;;  %v1908_v1 = vrot.slane %v3614_v40, %v2418_v55  ;;  %v3616_v14 = vld [vmem:[#allocation14_spill] sm:$0xff]  ;;  %v3617_v11 = vld [vmem:[#allocation5_spill] sm:$0xff] }
  0xa4   :  { %v1615_v38 = vcombine.low %v3611_v58, %v3610_v9  ;;  %v1616_v56 = vcombine.low %v3613_v22, %v3612_v8  ;;  %v3615_v19 = vcombine.high %v3150_v3, %v3150_v3  ;;  %v1023_v21 = vrot.slane %v1009_v54, %v2418_v55  ;;  %v3618_v58 = vld [vmem:[#allocation6_spill] sm:$0xff] }
  0xa5   :  { %v1183_v37 = vadd.f32 %v1007_v33, %v3616_v14  ;;  %v1230_v6 = vsel %vm1198_vm14, %v3119_v42, %v1214_v49  ;;  %v2194_v16 = vadd.f32 %v2193_v43, %v2192_v20  ;;  %v1372_v9 = vrot.slane %v3110_v48, %v3617_v11  ;;  %v3619_v14 = vld [vmem:[#allocation9_spill] sm:$0xff] }
  0xa6   :  { %v2195_v2 = vsel %vm2169_vm13, %v3615_v19, 0.0  ;;  %v1376_v8 = vrot.slane %v3110_v48, %v3618_v58  ;;  %v1380_v22 = vrot.slane %v3110_v48, %v3559_v39  ;;  %v2197_v3 = vsel %vm2169_vm13, %v3176_v59, 0.0 }
  0xa7   :  { %v1384_v54 = vrot.slane %v3110_v48, %v2386_v28  ;;  %v1623_v33 = vrot.slane %v1615_v38, %v2418_v55  ;;  %v1630_v42 = vrot.slane %v1616_v56, %v2418_v55  ;;  %v2196_v49 = vadd.f32 %v2195_v2, %v2194_v16 }
  0xa8   :  { %v1806_v43 = vmul.f32 %v1614_v41, %v1230_v6  ;;  %v1915_v20 = vrot.slane %v1901_v23, %v2418_v55  ;;  %v1916_v40 = vcombine.high %v1908_v1, %v1908_v1  ;;  %v2199_v19 = vsel %vm2169_vm13, %v1900_v26, 0.0 }
  0xa9   :  { %v3620_v11 = vunpack.c.h.bf16 %v3619_v14  ;;  %v1024_v58 = vcombine.low %v1016_v15, %v1023_v21  ;;  %v1215_v29 = vmul.f32 0.2, %v1183_v37  ;;  %v2198_v59 = vadd.f32 %v2197_v3, %v2196_v49 }
  0xaa   :  { %vm1199_vm15 = vcmp.ge.f32.partialorder %v1183_v37, 0.0  ;;  %v2201_v28 = vsel %vm2169_vm13, %v1908_v1, 0.0  ;;  %v1631_v48 = vcombine.low %v1623_v33, %v1630_v42  ;;  %v1632_v38 = vcombine.low %v1372_v9, %v1376_v8 }
  0xab   :  { %v608_v39 = vmul.f32 %v448_v44, %v3620_v11  ;;  %v1633_v52 = vcombine.low %v1380_v22, %v1384_v54  ;;  %v2200_v56 = vadd.f32 %v2199_v19, %v2198_v59  ;;  %v1917_v2 = vcombine.high %v1915_v20, %v1915_v20 }
  0xac   :  { %v1918_v41 = vcombine.high %v1806_v43, %v1806_v43  ;;  %v1925_v23 = vrot.slane %v1806_v43, %v2418_v55  ;;  %v2203_v6 = vsel %vm2169_vm13, %v1916_v40, 0.0  ;;  %v1231_v16 = vsel %vm1199_vm15, %v1183_v37, %v1215_v29 }
  0xad   :  { %v1184_v26 = vadd.f32 %v1024_v58, %v608_v39  ;;  %v2202_v14 = vadd.f32 %v2201_v28, %v2200_v56  ;;  %v2205_v44 = vsel %vm2169_vm13, %v1915_v20, 0.0  ;;  %v1640_v15 = vrot.slane %v1632_v38, %v2418_v55 }
  0xae   :  { %v1647_v21 = vrot.slane %v1633_v52, %v2418_v55  ;;  %v1807_v3 = vmul.f32 %v1631_v48, %v1231_v16  ;;  %v1932_v9 = vrot.slane %v1918_v41, %v2418_v55  ;;  %v1933_v8 = vcombine.high %v1925_v23, %v1925_v23 }
  0xaf   :  { %v2204_v1 = vadd.f32 %v2203_v6, %v2202_v14  ;;  %v2207_v22 = vsel %vm2169_vm13, %v1917_v2, 0.0  ;;  %v1216_v54 = vmul.f32 0.2, %v1184_v26  ;;  %vm1200_vm0 = vcmp.ge.f32.partialorder %v1184_v26, 0.0 }
  0xb0   :  { %v2209_v42 = vsel %vm2169_vm13, %v1925_v23, 0.0  ;;  %v1648_v29 = vcombine.low %v1640_v15, %v1647_v21  ;;  %v1934_v49 = vcombine.high %v1932_v9, %v1932_v9  ;;  %v1935_v43 = vcombine.high %v1807_v3, %v1807_v3 }
  0xb1   :  { %v2206_v33 = vadd.f32 %v2205_v44, %v2204_v1  ;;  %v1942_v20 = vrot.slane %v1807_v3, %v2418_v55  ;;  %v2211_v52 = vsel %vm2169_vm13, %v1933_v8, 0.0  ;;  %v1232_v40 = vsel %vm1200_vm0, %v1184_v26, %v1216_v54 }
  0xb2   :  { %v2213_v11 = vsel %vm2169_vm13, %v1932_v9, 0.0  ;;  %v1808_v58 = vmul.f32 %v1648_v29, %v1232_v40  ;;  %v1949_v59 = vrot.slane %v1935_v43, %v2418_v55  ;;  %v2215_v48 = vsel %vm2169_vm13, %v1934_v49, 0.0  ;;  %v3621_v43 = vld [vmem:[#allocation7_spill] sm:$0xff] }
  0xb3   :  { %v2208_v37 = vadd.f32 %v2207_v22, %v2206_v33  ;;  %v1950_v28 = vcombine.high %v1942_v20, %v1942_v20  ;;  %v2217_v56 = vsel %vm2169_vm13, %v1942_v20, 0.0 }
  0xb4   :  { %v1951_v41 = vcombine.high %v1949_v59, %v1949_v59  ;;  %v1952_v23 = vcombine.high %v1808_v58, %v1808_v58  ;;  %v1959_v6 = vrot.slane %v1808_v58, %v2418_v55  ;;  %v2221_v14 = vsel %vm2169_vm13, %v1949_v59, 0.0 }
  0xb5   :  { %v2210_v19 = vadd.f32 %v2209_v42, %v2208_v37  ;;  %v2219_v26 = vsel %vm2169_vm13, %v1950_v28, 0.0 }
  0xb6   :  { %v1966_v15 = vrot.slane %v1952_v23, %v2418_v55  ;;  %v1967_v21 = vcombine.high %v1959_v6, %v1959_v6  ;;  %v2223_v1 = vsel %vm2169_vm13, %v1951_v41, 0.0  ;;  %v2225_v9 = vsel %vm2169_vm13, %v1959_v6, 0.0  ;;  %v3623_v41 = vld [vmem:[#allocation26_spill] sm:$0xff] }
  0xb7   :  { %v2212_v39 = vadd.f32 %v2211_v52, %v2210_v19  ;;  %v2233_v55 = vsel %vm2169_vm13, %v3621_v43, 0.0 }
  0xb8   :  { %v1968_v22 = vcombine.high %v1966_v15, %v1966_v15  ;;  %v2227_v54 = vsel %vm2169_vm13, %v1967_v21, 0.0  ;;  %v2229_v42 = vsel %vm2169_vm13, %v1966_v15, 0.0 }
  0xb9   :  { %v2214_v38 = vadd.f32 %v2213_v11, %v2212_v39 }
  0xba   :  { %v2231_v37 = vsel %vm2169_vm13, %v1968_v22, 0.0 }
  0xbb   :  { %v2216_v2 = vadd.f32 %v2215_v48, %v2214_v38 }
  0xbd   :  { %v2218_v16 = vadd.f32 %v2217_v56, %v2216_v2  ;;  %v3622_v2 = vld [vmem:[#allocation25_spill] sm:$0xff] }
  0xbf   :  { %v2220_v44 = vadd.f32 %v2219_v26, %v2218_v16 }
  0xc1   :  { %v2222_v3 = vadd.f32 %v2221_v14, %v2220_v44 }
  0xc3   :  { %v2224_v8 = vadd.f32 %v2223_v1, %v2222_v3 }
  0xc5   :  { %v2226_v33 = vadd.f32 %v2225_v9, %v2224_v8 }
  0xc7   :  { %v2228_v29 = vadd.f32 %v2227_v54, %v2226_v33 }
  0xc9   :  { %v2230_v49 = vadd.f32 %v2229_v42, %v2228_v29 }
  0xcb   :  { %v2232_v20 = vadd.f32 %v2231_v37, %v2230_v49 }
  0xcd   :  { %v2234_v52 = vadd.f32 %v2233_v55, %v2232_v20 }
  0xcf   :  { %v2236_v40 = vadd.f32 %v3236_v36, %v2234_v52 }
  0xd1   :  { %v2238_v19 = vadd.f32 %v3239_v27, %v2236_v40 }
  0xd3   :  { %v2240_v11 = vadd.f32 %v3242_v53, %v2238_v19 }
  0xd5   :  { %v2242_v39 = vadd.f32 %v3246_v60, %v2240_v11 }
  0xd7   :  { %v2244_v58 = vadd.f32 %v3249_v34, %v2242_v39 }
  0xd9   :  { %v2246_v59 = vadd.f32 %v3252_v47, %v2244_v58 }
  0xdb   :  { %v2248_v28 = vadd.f32 %v3255_v63, %v2246_v59 }
  0xdd   :  { %v2250_v48 = vadd.f32 %v3258_v30, %v2248_v28 }
  0xdf   :  { %v2252_v38 = vadd.f32 %v3261_v12, %v2250_v48 }
  0xe1   :  { %v2254_v56 = vadd.f32 %v3264_v51, %v2252_v38 }
  0xe3   :  { %v2256_v36 = vadd.f32 %v3267_v50, %v2254_v56 }
  0xe5   :  { %v2258_v27 = vadd.f32 %v3270_v5, %v2256_v36 }
  0xe7   :  { %v2260_v53 = vadd.f32 %v3273_v7, %v2258_v27 }
  0xe9   :  { %v2262_v60 = vadd.f32 %v3276_v61, %v2260_v53 }
  0xeb   :  { %v2264_v34 = vadd.f32 %v3279_v24, %v2262_v60 }
  0xed   :  { %v2266_v47 = vadd.f32 %v3282_v0, %v2264_v34 }
  0xef   :  { %v2268_v63 = vadd.f32 %v3285_v10, %v2266_v47 }
  0xf1   :  { %v2270_v30 = vadd.f32 %v3288_v62, %v2268_v63 }
  0xf3   :  { %v2272_v12 = vadd.f32 %v3291_v31, %v2270_v30 }
  0xf5   :  { %v2274_v51 = vadd.f32 %v3294_v46, %v2272_v12 }
  0xf7   :  { %v2276_v50 = vadd.f32 %v3297_v17, %v2274_v51 }
  0xf9   :  { %v2278_v5 = vadd.f32 %v3300_v57, %v2276_v50 }
  0xfb   :  { %v2280_v7 = vadd.f32 %v3303_v35, %v2278_v5 }
  0xfd   :  { %v2282_v61 = vadd.f32 %v3306_v25, %v2280_v7 }
  0xff   :  { %v2284_v24 = vadd.f32 %v3309_v4, %v2282_v61 }
 0x101   :  { %v2286_v0 = vadd.f32 %v3312_v13, %v2284_v24 }
 0x103   :  { %v2288_v10 = vadd.f32 %v3315_v32, %v2286_v0 }
 0x105   :  { %v2290_v62 = vadd.f32 %v3318_v18, %v2288_v10 }
 0x107   :  { %v2292_v31 = vadd.f32 %v3325_v45, %v2290_v62 }
 0x109   :  { %v2294_v46 = vadd.f32 %v3622_v2, %v2292_v31 }
 0x10b   :  { %v2296_v17 = vadd.f32 %v3623_v41, %v2294_v46 }
 0x10d   :  { %2297 = vadd.xlane.f32.xlu0 %v2296_v17 }
 0x196   :  { %v2298_v57 = vpop.xlane.xlu0 %2297 }
 0x197   :  { %2300 = vst.msk [vmem:[%s3468_s4] sm:$0x3] %vm2299_vm1, %v2298_v57 }

// kernel: discriminator_forward.6
= control target key start
LH: loop header
LB: loop body
LE: loop exit
PB: predicated region body
PF: predicated region fallthrough
CT: control target
= control target key end

     0   :  { %s11580_s18 = smov 0   ;;  %s11582_s19 = smov 0   ;;  %s15286_s0 = inlined_call_operand.vmem [shape: bf16[32,4096], index: 0, kind: input, shape index: {}]   ;;  %s15287_s1 = inlined_call_operand.vmem [shape: f32[1,4096], index: 1, kind: input, shape index: {}]   ;;  %s15288_s2 = inlined_call_operand.vmem [shape: f32[1,4096], index: 2, kind: input, shape index: {}]   ;;  %s15289_s3 = inlined_call_operand.vmem [shape: bf16[4096,512], index: 3, kind: input, shape index: {}]   ;;  %s15290_s4 = inlined_call_operand.vmem [shape: bf16[32,512], index: 4, kind: output, shape index: {0}]   ;;  %s15291_s5 = inlined_call_operand.vmem [shape: f32[2,2,512], index: 5, kind: output, shape index: {1}]  }
   0x1   :  { %s11584_s20 = smov 0  }
   0x2 LB: > { %s28_s21 = sadd.s32 1, %s11543_s19  ;;  %p8917_p0 = scmp.ge.s32.totalorder %s11547_s20, 1  ;;  %s11547_s20 = sphi %s11584_s20, %s16_s20   ;;  %s11543_s19 = sphi %s11582_s19, %s15313_s19   ;;  %s11539_s18 = sphi %s11580_s18, %s15312_s18  }
   0x3   : > { %p30_p1 = scmp.ge.s32.totalorder %s28_s21, 2  ;;  %p219_p2 = scmp.lt.s32.totalorder %s11547_s20, 3 }
   0x5   : > { %s15315_s21 = smov (%p30_p1, %s28_s21), 0  ;;  %p220_p3 = pnand %p8917_p0, %p219_p2 }
   0x7   : > { %223 = sbr.rel (%p220_p3) target bundleno = 1266 (0x4f2), region = 36 }
   0xc   : > { %v9989_v0 = vld [vmem:[%s15289_s3 + $0xe4] ss:$16 sps:$4 sm:$0xff]   ;;  %v9993_v2 = vld [vmem:[%s15289_s3 + $0xe0] ss:$16 sps:$4 sm:$0xff]   ;;  %s8918_s15 = sshll.u32 %s11539_s18, 1  ;;  %v15292_v36 = vlaneseq  ;;  %p293_p5 = scmp.lt.s32.totalorder %s11539_s18, 1 }
   0xd   : > { %v9991_v1 = vld [vmem:[%s15289_s3 + $0x2e4] ss:$16 sps:$4 sm:$0xff]   ;;  %7230 = vmatprep.subr.bf16.mxu0 %v9989_v0  ;;  %v9994_v3 = vld [vmem:[%s15289_s3 + $0x2e0] ss:$16 sps:$4 sm:$0xff]   ;;  %p268_p4 = scmp.lt.s32.totalorder %s8918_s15, 3 }
   0xe   : > { %7273 = vmatprep.subr.bf16.mxu1 %v9991_v1  ;;  %v9995_v4 = vld [vmem:[%s15289_s3 + $0xc4] ss:$16 sps:$4 sm:$0xff]   ;;  %7231 = vmatpush1.bf16.msra.mxu0 %v9993_v2  ;;  %v9999_v6 = vld [vmem:[%s15289_s3 + $0xc0] ss:$16 sps:$4 sm:$0xff]   ;;  %v11721_v40 = vshrl.u32 %v15292_v36, 7  ;;  %s15319_s18 = smov (!%p293_p5, %s11539_s18), 1 }
   0xf   : > { %7274 = vmatpush1.bf16.msra.mxu1 %v9994_v3  ;;  %v9997_v5 = vld [vmem:[%s15289_s3 + $0x2c4] ss:$16 sps:$4 sm:$0xff]   ;;  %7232 = vmatprep.subr.bf16.mxu0 %v9995_v4  ;;  %v10000_v7 = vld [vmem:[%s15289_s3 + $0x2c0] ss:$16 sps:$4 sm:$0xff]   ;;  %s15317_s15 = smov (!%p268_p4, %s8918_s15), 3 }
  0x10   : > { %7275 = vmatprep.subr.bf16.mxu1 %v9997_v5  ;;  %v10001_v8 = vld [vmem:[%s15289_s3 + $0xa4] ss:$16 sps:$4 sm:$0xff]   ;;  %v10005_v10 = vld [vmem:[%s15289_s3 + $0xa0] ss:$16 sps:$4 sm:$0xff]   ;;  %15299 = vst [vmem:[#allocation2_spill] sm:$0xff] %v11721_v40  ;;  %s9957_s22 = sshll.u32 %s15317_s15, 7 }
  0x11   : > { %v10003_v9 = vld [vmem:[%s15289_s3 + $0x2a4] ss:$16 sps:$4 sm:$0xff]   ;;  %v10006_v11 = vld [vmem:[%s15289_s3 + $0x2a0] ss:$16 sps:$4 sm:$0xff]   ;;  %s11742_s6 = scalar_lea.vmem %s15286_s0, %s9957_s22  ;;  %v11748_v47 = vsub.s32 1, %v11721_v40  ;;  %v11761_v52 = vsub.s32 3, %v11721_v40 }
  0x12   : > { %7233 = vmatpush1.bf16.msra.mxu0 %v9999_v6  ;;  %v10007_v12 = vld [vmem:[%s15289_s3 + $0x84] ss:$16 sps:$4 sm:$0xff]   ;;  %v10011_v14 = vld [vmem:[%s15289_s3 + $0x80] ss:$16 sps:$4 sm:$0xff]   ;;  %v11775_v57 = vsub.s32 0, %v11721_v40  ;;  %v11778_v58 = vsub.s32 2, %v11721_v40 }
  0x13   : > { %7276 = vmatpush1.bf16.msra.mxu1 %v10000_v7  ;;  %7234 = vmatprep.subr.bf16.mxu0 %v10001_v8  ;;  %v10009_v13 = vld [vmem:[%s15289_s3 + $0x284] ss:$16 sps:$4 sm:$0xff]   ;;  %v10012_v15 = vld [vmem:[%s15289_s3 + $0x280] ss:$16 sps:$4 sm:$0xff]   ;;  %v303_v62 = vld [vmem:[%s11742_s6 + $0x8] sm:$0xff]  ;;  %s9958_s23 = sshll.u32 %s15317_s15, 4 }
  0x14   : > { %7277 = vmatprep.subr.bf16.mxu1 %v10003_v9  ;;  %v10013_v16 = vld [vmem:[%s15289_s3 + $0x64] ss:$16 sps:$4 sm:$0xff]   ;;  %v10017_v18 = vld [vmem:[%s15289_s3 + $0x60] ss:$16 sps:$4 sm:$0xff]   ;;  %v11786_v63 = vld [vmem:[%s11742_s6 + $0x88] sm:$0xff]  ;;  %v337_v4 = vunpack.c.h.bf16 %v303_v62  ;;  %s14304_s29 = scalar_lea.vmem %s15290_s4, %s9958_s23 }
  0x15   : > { %v10015_v17 = vld [vmem:[%s15289_s3 + $0x264] ss:$16 sps:$4 sm:$0xff]   ;;  %v10018_v19 = vld [vmem:[%s15289_s3 + $0x260] ss:$16 sps:$4 sm:$0xff]   ;;  %v369_v5 = vunpack.c.h.bf16 %v11786_v63 }
  0x16   : > { %7235 = vmatpush1.bf16.msra.mxu0 %v10005_v10  ;;  %v10019_v20 = vld [vmem:[%s15289_s3 + $0x44] ss:$16 sps:$4 sm:$0xff]   ;;  %v10023_v22 = vld [vmem:[%s15289_s3 + $0x40] ss:$16 sps:$4 sm:$0xff]  }
  0x17   : > { %7278 = vmatpush1.bf16.msra.mxu1 %v10006_v11  ;;  %7236 = vmatprep.subr.bf16.mxu0 %v10007_v12  ;;  %v10021_v21 = vld [vmem:[%s15289_s3 + $0x244] ss:$16 sps:$4 sm:$0xff]   ;;  %v10024_v23 = vld [vmem:[%s15289_s3 + $0x240] ss:$16 sps:$4 sm:$0xff]  }
  0x18   : > { %7279 = vmatprep.subr.bf16.mxu1 %v10009_v13  ;;  %v10025_v24 = vld [vmem:[%s15289_s3 + $0x24] ss:$16 sps:$4 sm:$0xff]   ;;  %v10029_v26 = vld [vmem:[%s15289_s3 + $0x20] ss:$16 sps:$4 sm:$0xff]  }
  0x19   : > { %v10027_v25 = vld [vmem:[%s15289_s3 + $0x224] ss:$16 sps:$4 sm:$0xff]   ;;  %v10030_v27 = vld [vmem:[%s15289_s3 + $0x220] ss:$16 sps:$4 sm:$0xff]  }
  0x1a   : > { %7237 = vmatpush1.bf16.msra.mxu0 %v10011_v14  ;;  %v10031_v28 = vld [vmem:[%s15289_s3 + $0x4] ss:$16 sps:$4 sm:$0xff]   ;;  %v10035_v30 = vld [vmem:[%s15289_s3] ss:$16 sps:$4 sm:$0xff]  }
  0x1b   : > { %7280 = vmatpush1.bf16.msra.mxu1 %v10012_v15  ;;  %7238 = vmatprep.subr.bf16.mxu0 %v10013_v16  ;;  %v10033_v29 = vld [vmem:[%s15289_s3 + $0x204] ss:$16 sps:$4 sm:$0xff]   ;;  %v10036_v31 = vld [vmem:[%s15289_s3 + $0x200] ss:$16 sps:$4 sm:$0xff]  }
  0x1c   : > { %7281 = vmatprep.subr.bf16.mxu1 %v10015_v17  ;;  %v10037_v32 = vld [vmem:[%s15289_s3 + $0x1e4] ss:$16 sps:$4 sm:$0xff]   ;;  %v10041_v34 = vld [vmem:[%s15289_s3 + $0x1e0] ss:$16 sps:$4 sm:$0xff]  }
  0x1d   : > { %v10039_v33 = vld [vmem:[%s15289_s3 + $0x3e4] ss:$16 sps:$4 sm:$0xff]   ;;  %v10042_v35 = vld [vmem:[%s15289_s3 + $0x3e0] ss:$16 sps:$4 sm:$0xff]  }
  0x1e   : > { %7239 = vmatpush1.bf16.msra.mxu0 %v10017_v18  ;;  %v10043_v37 = vld [vmem:[%s15289_s3 + $0x1c4] ss:$16 sps:$4 sm:$0xff]   ;;  %v10047_v39 = vld [vmem:[%s15289_s3 + $0x1c0] ss:$16 sps:$4 sm:$0xff]   ;;  %v336_v18 = vunpack.c.l.bf16 %v303_v62 }
  0x1f   : > { %7282 = vmatpush1.bf16.msra.mxu1 %v10018_v19  ;;  %7240 = vmatprep.subr.bf16.mxu0 %v10019_v20  ;;  %v10045_v38 = vld [vmem:[%s15289_s3 + $0x3c4] ss:$16 sps:$4 sm:$0xff]   ;;  %v10048_v41 = vld [vmem:[%s15289_s3 + $0x3c0] ss:$16 sps:$4 sm:$0xff]  }
  0x20   : > { %7283 = vmatprep.subr.bf16.mxu1 %v10021_v21  ;;  %v10049_v42 = vld [vmem:[%s15289_s3 + $0x1a4] ss:$16 sps:$4 sm:$0xff]   ;;  %v10053_v44 = vld [vmem:[%s15289_s3 + $0x1a0] ss:$16 sps:$4 sm:$0xff]  }
  0x21   : > { %v10051_v43 = vld [vmem:[%s15289_s3 + $0x3a4] ss:$16 sps:$4 sm:$0xff]   ;;  %v10054_v45 = vld [vmem:[%s15289_s3 + $0x3a0] ss:$16 sps:$4 sm:$0xff]  }
  0x22   : > { %7241 = vmatpush1.bf16.msra.mxu0 %v10023_v22  ;;  %v10055_v46 = vld [vmem:[%s15289_s3 + $0x184] ss:$16 sps:$4 sm:$0xff]   ;;  %v10059_v49 = vld [vmem:[%s15289_s3 + $0x180] ss:$16 sps:$4 sm:$0xff]   ;;  %v368_v22 = vunpack.c.l.bf16 %v11786_v63 }
  0x23   : > { %7284 = vmatpush1.bf16.msra.mxu1 %v10024_v23  ;;  %7242 = vmatprep.subr.bf16.mxu0 %v10025_v24  ;;  %v10057_v48 = vld [vmem:[%s15289_s3 + $0x384] ss:$16 sps:$4 sm:$0xff]   ;;  %v10060_v50 = vld [vmem:[%s15289_s3 + $0x380] ss:$16 sps:$4 sm:$0xff]  }
  0x24   : > { %7285 = vmatprep.subr.bf16.mxu1 %v10027_v25  ;;  %v302_v51 = vld [vmem:[%s11742_s6] sm:$0xff] }
  0x25   : > { %v318_v53 = vld [vmem:[%s11742_s6 + $0x80] sm:$0xff]  ;;  %v335_v54 = vunpack.c.h.bf16 %v302_v51  ;;  %v334_v2 = vunpack.c.l.bf16 %v302_v51 }
  0x26   : > { %7243 = vmatpush1.bf16.msra.mxu0 %v10029_v26  ;;  %v11767_v55 = vld [vmem:[%s15287_s1] sm:$0xff]  ;;  %v367_v59 = vunpack.c.h.bf16 %v318_v53  ;;  %v366_v3 = vunpack.c.l.bf16 %v318_v53 }
  0x27   : > { %7286 = vmatpush1.bf16.msra.mxu1 %v10030_v27  ;;  %7244 = vmatprep.subr.bf16.mxu0 %v10031_v28  ;;  %v11772_v56 = vld [vmem:[%s15288_s2] sm:$0xff]  ;;  %v413_v60 = vrot.slane %v11767_v55, %v11748_v47  ;;  %v421_v8 = vrot.slane %v11767_v55, %v11761_v52  ;;  %v409_v10 = vrot.slane %v11767_v55, %v11775_v57 }
  0x28   : > { %7287 = vmatprep.subr.bf16.mxu1 %v10033_v29  ;;  %v645_v61 = vrot.slane %v11772_v56, %v11748_v47  ;;  %v10061_v0 = vld [vmem:[%s15289_s3 + $0x164] ss:$16 sps:$4 sm:$0xff]   ;;  %v653_v9 = vrot.slane %v11772_v56, %v11761_v52  ;;  %v641_v11 = vrot.slane %v11772_v56, %v11775_v57  ;;  %v417_v12 = vrot.slane %v11767_v55, %v11778_v58  ;;  %v10065_v14 = vld [vmem:[%s15289_s3 + $0x160] ss:$16 sps:$4 sm:$0xff]  }
  0x29   : > { %v10063_v1 = vld [vmem:[%s15289_s3 + $0x364] ss:$16 sps:$4 sm:$0xff]   ;;  %v567_v6 = vmul.f32 %v413_v60, %v335_v54  ;;  %v599_v7 = vmul.f32 %v413_v60, %v367_v59  ;;  %v649_v13 = vrot.slane %v11772_v56, %v11778_v58  ;;  %v10066_v15 = vld [vmem:[%s15289_s3 + $0x360] ss:$16 sps:$4 sm:$0xff]   ;;  %v569_v19 = vmul.f32 %v421_v8, %v337_v4 }
  0x2a   : > { %7245 = vmatpush1.bf16.msra.mxu0 %v10035_v30  ;;  %v10067_v20 = vld [vmem:[%s15289_s3 + $0x144] ss:$16 sps:$4 sm:$0xff]   ;;  %v601_v23 = vmul.f32 %v421_v8, %v369_v5  ;;  %v566_v24 = vmul.f32 %v409_v10, %v334_v2  ;;  %v598_v25 = vmul.f32 %v409_v10, %v366_v3  ;;  %v10071_v26 = vld [vmem:[%s15289_s3 + $0x140] ss:$16 sps:$4 sm:$0xff]  }
  0x2b   : > { %7288 = vmatpush1.bf16.msra.mxu1 %v10036_v31  ;;  %7246 = vmatprep.subr.bf16.mxu0 %v10037_v32  ;;  %v799_v16 = vadd.f32 %v645_v61, %v567_v6  ;;  %v831_v17 = vadd.f32 %v645_v61, %v599_v7  ;;  %v10069_v21 = vld [vmem:[%s15289_s3 + $0x344] ss:$16 sps:$4 sm:$0xff]   ;;  %v10072_v29 = vld [vmem:[%s15289_s3 + $0x340] ss:$16 sps:$4 sm:$0xff]   ;;  %v801_v30 = vadd.f32 %v653_v9, %v569_v19 }
  0x2c   : > { %7289 = vmatprep.subr.bf16.mxu1 %v10039_v33  ;;  %v833_v31 = vadd.f32 %v653_v9, %v601_v23  ;;  %v798_v32 = vadd.f32 %v641_v11, %v566_v24  ;;  %v830_v33 = vadd.f32 %v641_v11, %v598_v25  ;;  %v10081_v59 = vld [vmem:[%s15289_s3 + $0x304] ss:$16 sps:$4 sm:$0xff]   ;;  %v10083_v63 = vld [vmem:[%s15289_s3 + $0x100] ss:$16 sps:$4 sm:$0xff]  }
  0x2d   : > { %vm863_vm0 = vcmp.ge.f32.partialorder %v799_v16, 0.0  ;;  %vm895_vm1 = vcmp.ge.f32.partialorder %v831_v17, 0.0  ;;  %v927_v27 = vmul.f32 0.2, %v799_v16  ;;  %v959_v28 = vmul.f32 0.2, %v831_v17 }
  0x2e   : > { %7247 = vmatpush2.bf16.msra.mxu0 %v10041_v34  ;;  %v10073_v34 = vld [vmem:[%s15289_s3 + $0x124] ss:$16 sps:$4 sm:$0xff]   ;;  %vm865_vm2 = vcmp.ge.f32.partialorder %v801_v30, 0.0  ;;  %vm897_vm3 = vcmp.ge.f32.partialorder %v833_v31, 0.0  ;;  %vm862_vm4 = vcmp.ge.f32.partialorder %v798_v32, 0.0  ;;  %vm894_vm5 = vcmp.ge.f32.partialorder %v830_v33, 0.0 }
  0x2f   : > { %7290 = vmatpush2.bf16.msra.mxu1 %v10042_v35  ;;  %7248 = vmatprep.subr.bf16.mxu0 %v10043_v37  ;;  %v991_v35 = vsel %vm863_vm0, %v799_v16, %v927_v27  ;;  %v1023_v37 = vsel %vm895_vm1, %v831_v17, %v959_v28  ;;  %v926_v53 = vmul.f32 0.2, %v798_v32  ;;  %v958_v54 = vmul.f32 0.2, %v830_v33  ;;  %v10087_v5 = vld [vmem:[%s15289_s3 + $0x4e4] ss:$16 sps:$4 sm:$0xff]  }
  0x30   : > { %7291 = vmatprep.subr.bf16.mxu1 %v10045_v38  ;;  %v568_v38 = vmul.f32 %v417_v12, %v336_v18  ;;  %v10090_v7 = vld [vmem:[%s15289_s3 + $0x6e4] ss:$16 sps:$4 sm:$0xff]   ;;  %v10085_v10 = vld [vmem:[%s15289_s3 + $0x4e0] ss:$16 sps:$4 sm:$0xff]  }
  0x31   : > { %v990_v2 = vsel %vm862_vm4, %v798_v32, %v926_v53  ;;  %v1022_v3 = vsel %vm894_vm5, %v830_v33, %v958_v54  ;;  %v10088_v11 = vld [vmem:[%s15289_s3 + $0x6e0] ss:$16 sps:$4 sm:$0xff]   ;;  %v10099_v16 = vld [vmem:[%s15289_s3 + $0x4a4] ss:$16 sps:$4 sm:$0xff]   ;;  %v11939_v33 = vsub.s32 5, %v11721_v40 }
  0x32   : > { %7249 = vmatpush2.bf16.msra.mxu0 %v10047_v39  ;;  %v10075_v39 = vld [vmem:[%s15289_s3 + $0x324] ss:$16 sps:$4 sm:$0xff]   ;;  %v11863_v8 = vpack.c.bf16 %v1022_v3, %v990_v2  ;;  %v10097_v18 = vld [vmem:[%s15289_s3 + $0x4a0] ss:$16 sps:$4 sm:$0xff]   ;;  %v305_v3 = vld [vmem:[%s11742_s6 + $0x18] sm:$0xff] }
  0x33   : > { %7292 = vmatpush2.bf16.msra.mxu1 %v10048_v41  ;;  %7250 = vmatprep.subr.bf16.mxu0 %v10049_v42  ;;  %v11832_v41 = vpack.c.bf16 %v1023_v37, %v991_v35  ;;  %v929_v42 = vmul.f32 0.2, %v801_v30  ;;  %v10102_v17 = vld [vmem:[%s15289_s3 + $0x6a4] ss:$16 sps:$4 sm:$0xff]   ;;  %v10100_v19 = vld [vmem:[%s15289_s3 + $0x6a0] ss:$16 sps:$4 sm:$0xff]  }
  0x34   : > { %7293 = vmatprep.subr.bf16.mxu1 %v10051_v43  ;;  %v10077_v43 = vld [vmem:[%s15289_s3 + $0x120] ss:$16 sps:$4 sm:$0xff]   ;;  %v10111_v24 = vld [vmem:[%s15289_s3 + $0x464] ss:$16 sps:$4 sm:$0xff]   ;;  %v11945_v35 = vsub.s32 7, %v11721_v40  ;;  %v11948_v37 = vsub.s32 4, %v11721_v40 }
  0x35   : > { %7262 = vmatprep.mubr.bf16.mxu0 %v11832_v41  ;;  %v10106_v23 = vld [vmem:[%s15289_s3 + $0x680] ss:$16 sps:$4 sm:$0xff]   ;;  %v10114_v25 = vld [vmem:[%s15289_s3 + $0x664] ss:$16 sps:$4 sm:$0xff]  }
  0x36   : > { %7251 = vmatpush2.bf16.msra.mxu0 %v10053_v44  ;;  %v10078_v44 = vld [vmem:[%s15289_s3 + $0x320] ss:$16 sps:$4 sm:$0xff]   ;;  %v10117_v28 = vld [vmem:[%s15289_s3 + $0x444] ss:$16 sps:$4 sm:$0xff]   ;;  %v669_v54 = vrot.slane %v11772_v56, %v11945_v35 }
  0x37   : > { %7294 = vmatpush2.bf16.msra.mxu1 %v10054_v45  ;;  %7252 = vmatprep.subr.bf16.mxu0 %v10055_v46  ;;  %v961_v45 = vmul.f32 0.2, %v833_v31  ;;  %v10079_v46 = vld [vmem:[%s15289_s3 + $0x104] ss:$16 sps:$4 sm:$0xff]   ;;  %v10112_v27 = vld [vmem:[%s15289_s3 + $0x660] ss:$16 sps:$4 sm:$0xff]  }
  0x38   : > { %7295 = vmatprep.subr.bf16.mxu1 %v10057_v48  ;;  %v993_v48 = vsel %vm865_vm2, %v801_v30, %v929_v42  ;;  %v10115_v30 = vld [vmem:[%s15289_s3 + $0x440] ss:$16 sps:$4 sm:$0xff]   ;;  %v10123_v32 = vld [vmem:[%s15289_s3 + $0x424] ss:$16 sps:$4 sm:$0xff]  }
  0x39   : > { %v1025_v51 = vsel %vm897_vm3, %v833_v31, %v961_v45  ;;  %v10118_v31 = vld [vmem:[%s15289_s3 + $0x640] ss:$16 sps:$4 sm:$0xff]   ;;  %v10132_v45 = vld [vmem:[%s15289_s3 + $0x604] ss:$16 sps:$4 sm:$0xff]  }
  0x3a   : > { %7253 = vmatpush2.bf16.msra.mxu0 %v10059_v49  ;;  %v600_v49 = vmul.f32 %v417_v12, %v368_v22  ;;  %v11847_v60 = vpack.c.bf16 %v1025_v51, %v993_v48  ;;  %v10093_v12 = vld [vmem:[%s15289_s3 + $0x4c4] ss:$16 sps:$4 sm:$0xff]   ;;  %v10103_v22 = vld [vmem:[%s15289_s3 + $0x480] ss:$16 sps:$4 sm:$0xff]   ;;  %v437_v48 = vrot.slane %v11767_v55, %v11945_v35 }
  0x3b   : > { %7296 = vmatpush2.bf16.msra.mxu1 %v10060_v50  ;;  %7254 = vmatprep.subr.bf16.mxu0 %v10061_v0  ;;  %v800_v50 = vadd.f32 %v649_v13, %v568_v38  ;;  %v11951_v38 = vsub.s32 6, %v11721_v40  ;;  %v10124_v42 = vld [vmem:[%s15289_s3 + $0x620] ss:$16 sps:$4 sm:$0xff]  }
  0x3c   : > { %7297 = vmatprep.subr.bf16.mxu1 %v10063_v1  ;;  %v832_v61 = vadd.f32 %v649_v13, %v600_v49  ;;  %7305 = vmatprep.mubr.bf16.mxu1 %v11847_v60  ;;  %v10084_v1 = vld [vmem:[%s15289_s3 + $0x300] ss:$16 sps:$4 sm:$0xff]   ;;  %v10096_v13 = vld [vmem:[%s15289_s3 + $0x6c4] ss:$16 sps:$4 sm:$0xff]   ;;  %v425_v49 = vrot.slane %v11767_v55, %v11948_v37 }
  0x3d   : > { %vm864_vm6 = vcmp.ge.f32.partialorder %v800_v50, 0.0  ;;  %v928_v62 = vmul.f32 0.2, %v800_v50  ;;  %v304_v51 = vld [vmem:[%s11742_s6 + $0x10] sm:$0xff] }
  0x3e   : > { %7255 = vmatpush2.bf16.msra.mxu0 %v10065_v14  ;;  %vm896_vm7 = vcmp.ge.f32.partialorder %v832_v61, 0.0  ;;  %v960_v0 = vmul.f32 0.2, %v832_v61  ;;  %v10091_v14 = vld [vmem:[%s15289_s3 + $0x4c0] ss:$16 sps:$4 sm:$0xff]  }
  0x3f   : > { %7298 = vmatpush2.bf16.msra.mxu1 %v10066_v15  ;;  %7256 = vmatprep.subr.bf16.mxu0 %v10067_v20  ;;  %v992_v4 = vsel %vm864_vm6, %v800_v50, %v928_v62  ;;  %v10094_v15 = vld [vmem:[%s15289_s3 + $0x6c0] ss:$16 sps:$4 sm:$0xff]   ;;  %v10105_v20 = vld [vmem:[%s15289_s3 + $0x484] ss:$16 sps:$4 sm:$0xff]   ;;  %v11986_v62 = vrot.slane %v11772_v56, %v11951_v38 }
  0x40   : > { %7299 = vmatprep.subr.bf16.mxu1 %v10069_v21  ;;  %v1024_v6 = vsel %vm896_vm7, %v832_v61, %v960_v0  ;;  %v10108_v21 = vld [vmem:[%s15289_s3 + $0x684] ss:$16 sps:$4 sm:$0xff]   ;;  %v10127_v50 = vld [vmem:[%s15289_s3 + $0x400] ss:$16 sps:$4 sm:$0xff]   ;;  %v433_v61 = vrot.slane %v11767_v55, %v11951_v38  ;;  %v339_v0 = vunpack.c.h.bf16 %v304_v51 }
  0x41   : > { %v11865_v9 = vpack.c.bf16 %v1024_v6, %v992_v4  ;;  %v320_v53 = vld [vmem:[%s11742_s6 + $0x90] sm:$0xff]  ;;  %v321_v4 = vld [vmem:[%s11742_s6 + $0x98] sm:$0xff]  ;;  %v340_v6 = vunpack.c.l.bf16 %v305_v3 }
  0x42   : > { %7257 = vmatpush2.bf16.msra.mxu0 %v10071_v26  ;;  %v10109_v26 = vld [vmem:[%s15289_s3 + $0x460] ss:$16 sps:$4 sm:$0xff]   ;;  %v371_v2 = vunpack.c.h.bf16 %v320_v53 }
  0x43   : > { %7300 = vmatpush2.bf16.msra.mxu1 %v10072_v29  ;;  %7258 = vmatprep.subr.bf16.mxu0 %v10073_v34  ;;  %v10120_v29 = vld [vmem:[%s15289_s3 + $0x644] ss:$16 sps:$4 sm:$0xff]  }
  0x44   : > { %7301 = vmatprep.subr.bf16.mxu1 %v10075_v39  ;;  %v10126_v34 = vld [vmem:[%s15289_s3 + $0x624] ss:$16 sps:$4 sm:$0xff]   ;;  %v10121_v39 = vld [vmem:[%s15289_s3 + $0x420] ss:$16 sps:$4 sm:$0xff]  }
  0x46   : > { %7259 = vmatpush2.bf16.msra.mxu0 %v10077_v43  ;;  %v10129_v43 = vld [vmem:[%s15289_s3 + $0x404] ss:$16 sps:$4 sm:$0xff]  }
  0x47   : > { %7302 = vmatpush2.bf16.msra.mxu1 %v10078_v44  ;;  %7260 = vmatprep.subr.bf16.mxu0 %v10079_v46  ;;  %v429_v44 = vrot.slane %v11767_v55, %v11939_v33  ;;  %v661_v46 = vrot.slane %v11772_v56, %v11939_v33  ;;  %v10135_v55 = vld [vmem:[%s15289_s3 + $0x5e4] ss:$16 sps:$4 sm:$0xff]  }
  0x48   : > { %7303 = vmatprep.subr.bf16.mxu1 %v10081_v59  ;;  %v657_v59 = vrot.slane %v11772_v56, %v11948_v37  ;;  %v372_v56 = vunpack.c.l.bf16 %v321_v4 }
  0x4a   : > { %7261 = vmatpush2.bf16.msra.mxu0 %v10083_v63  ;;  %v338_v63 = vunpack.c.l.bf16 %v304_v51  ;;  %v10150_v51 = vld [vmem:[%s15289_s3 + $0x7a4] ss:$16 sps:$4 sm:$0xff]  }
  0x4b   : > { %7304 = vmatpush2.bf16.msra.mxu1 %v10084_v1  ;;  %7316 = vmatprep.subr.bf16.mxu0 %v10087_v5  ;;  %v370_v1 = vunpack.c.l.bf16 %v320_v53  ;;  %v10130_v5 = vld [vmem:[%s15289_s3 + $0x600] ss:$16 sps:$4 sm:$0xff]  }
  0x4c   : > { %7359 = vmatprep.subr.bf16.mxu1 %v10090_v7  ;;  %v341_v7 = vunpack.c.h.bf16 %v305_v3 }
  0x4d   : > { %7263 = vmatmul.mubr.bf16.vlgmr.msra.gmra.mxu0 %v11863_v8 }
  0x4e   : > { %7306 = vmatmul.mubr.bf16.vlgmr.msra.gmra.mxu1 %v11865_v9  ;;  %7317 = vmatpush1.bf16.msra.mxu0 %v10085_v10  ;;  %v373_v10 = vunpack.c.h.bf16 %v321_v4 }
  0x4f   : > { %7360 = vmatpush1.bf16.msra.mxu1 %v10088_v11  ;;  %7318 = vmatprep.subr.bf16.mxu0 %v10093_v12  ;;  %v10138_v11 = vld [vmem:[%s15289_s3 + $0x7e4] ss:$16 sps:$4 sm:$0xff]   ;;  %v571_v12 = vmul.f32 %v429_v44, %v339_v0 }
  0x50   : > { %7361 = vmatprep.subr.bf16.mxu1 %v10096_v13  ;;  %v603_v13 = vmul.f32 %v429_v44, %v371_v2  ;;  %v10142_v44 = vld [vmem:[%s15289_s3 + $0x7c0] ss:$16 sps:$4 sm:$0xff]  }
  0x52   : > { %7319 = vmatpush1.bf16.msra.mxu0 %v10091_v14  ;;  %v570_v14 = vmul.f32 %v425_v49, %v338_v63  ;;  %v10145_v63 = vld [vmem:[%s15289_s3 + $0x5a0] ss:$16 sps:$4 sm:$0xff]  }
  0x53   : > { %7362 = vmatpush1.bf16.msra.mxu1 %v10094_v15  ;;  %7320 = vmatprep.subr.bf16.mxu0 %v10099_v16  ;;  %v573_v15 = vmul.f32 %v437_v48, %v341_v7  ;;  %v605_v16 = vmul.f32 %v437_v48, %v373_v10  ;;  %v10154_v10 = vld [vmem:[%s15289_s3 + $0x780] ss:$16 sps:$4 sm:$0xff]  }
  0x54   : > { %7363 = vmatprep.subr.bf16.mxu1 %v10102_v17  ;;  %v602_v17 = vmul.f32 %v425_v49, %v370_v1  ;;  %v10148_v1 = vld [vmem:[%s15289_s3 + $0x7a0] ss:$16 sps:$4 sm:$0xff]  }
  0x56   : > { %7321 = vmatpush1.bf16.msra.mxu0 %v10097_v18  ;;  %v572_v18 = vmul.f32 %v433_v61, %v340_v6 }
  0x57   : > { %7364 = vmatpush1.bf16.msra.mxu1 %v10100_v19  ;;  %7322 = vmatprep.subr.bf16.mxu0 %v10105_v20  ;;  %v10133_v19 = vld [vmem:[%s15289_s3 + $0x5e0] ss:$16 sps:$4 sm:$0xff]  }
  0x58   : > { %7365 = vmatprep.subr.bf16.mxu1 %v10108_v21  ;;  %v10136_v20 = vld [vmem:[%s15289_s3 + $0x7e0] ss:$16 sps:$4 sm:$0xff]   ;;  %v803_v21 = vadd.f32 %v661_v46, %v571_v12  ;;  %v10159_v12 = vld [vmem:[%s15289_s3 + $0x564] ss:$16 sps:$4 sm:$0xff]  }
  0x5a   : > { %7323 = vmatpush1.bf16.msra.mxu0 %v10103_v22  ;;  %v835_v22 = vadd.f32 %v661_v46, %v603_v13  ;;  %vm867_vm8 = vcmp.ge.f32.partialorder %v803_v21, 0.0  ;;  %v10162_v13 = vld [vmem:[%s15289_s3 + $0x764] ss:$16 sps:$4 sm:$0xff]  }
  0x5b   : > { %7366 = vmatpush1.bf16.msra.mxu1 %v10106_v23  ;;  %7324 = vmatprep.subr.bf16.mxu0 %v10111_v24  ;;  %v802_v23 = vadd.f32 %v657_v59, %v570_v14  ;;  %v604_v24 = vmul.f32 %v433_v61, %v372_v56  ;;  %v10151_v56 = vld [vmem:[%s15289_s3 + $0x580] ss:$16 sps:$4 sm:$0xff]  }
  0x5c   : > { %7367 = vmatprep.subr.bf16.mxu1 %v10114_v25  ;;  %v10141_v25 = vld [vmem:[%s15289_s3 + $0x5c4] ss:$16 sps:$4 sm:$0xff]   ;;  %vm899_vm9 = vcmp.ge.f32.partialorder %v835_v22, 0.0  ;;  %v10157_v14 = vld [vmem:[%s15289_s3 + $0x560] ss:$16 sps:$4 sm:$0xff]  }
  0x5d   : > { %vm866_vm12 = vcmp.ge.f32.partialorder %v802_v23, 0.0  ;;  %v930_v49 = vmul.f32 0.2, %v802_v23  ;;  %v836_v61 = vadd.f32 %v11986_v62, %v604_v24  ;;  %v10177_v24 = vld [vmem:[%s15289_s3 + $0x504] ss:$16 sps:$4 sm:$0xff]  }
  0x5e   : > { %7325 = vmatpush1.bf16.msra.mxu0 %v10109_v26  ;;  %v10144_v26 = vld [vmem:[%s15289_s3 + $0x7c4] ss:$16 sps:$4 sm:$0xff]  }
  0x5f   : > { %7368 = vmatpush1.bf16.msra.mxu1 %v10112_v27  ;;  %7326 = vmatprep.subr.bf16.mxu0 %v10117_v28  ;;  %v805_v27 = vadd.f32 %v669_v54, %v573_v15  ;;  %v837_v28 = vadd.f32 %v669_v54, %v605_v16  ;;  %v994_v0 = vsel %vm866_vm12, %v802_v23, %v930_v49  ;;  %vm900_vm15 = vcmp.ge.f32.partialorder %v836_v61, 0.0  ;;  %v10160_v15 = vld [vmem:[%s15289_s3 + $0x760] ss:$16 sps:$4 sm:$0xff]   ;;  %v10165_v16 = vld [vmem:[%s15289_s3 + $0x544] ss:$16 sps:$4 sm:$0xff]  }
  0x60   : > { %7369 = vmatprep.subr.bf16.mxu1 %v10120_v29  ;;  %v834_v29 = vadd.f32 %v657_v59, %v602_v17  ;;  %v804_v59 = vadd.f32 %v11986_v62, %v572_v18  ;;  %v10153_v62 = vld [vmem:[%s15289_s3 + $0x584] ss:$16 sps:$4 sm:$0xff]   ;;  %v10163_v18 = vld [vmem:[%s15289_s3 + $0x540] ss:$16 sps:$4 sm:$0xff]  }
  0x61   : > { %vm869_vm10 = vcmp.ge.f32.partialorder %v805_v27, 0.0  ;;  %vm901_vm11 = vcmp.ge.f32.partialorder %v837_v28, 0.0  ;;  %v10168_v17 = vld [vmem:[%s15289_s3 + $0x744] ss:$16 sps:$4 sm:$0xff]   ;;  %v10172_v23 = vld [vmem:[%s15289_s3 + $0x720] ss:$16 sps:$4 sm:$0xff]  }
  0x62   : > { %7327 = vmatpush1.bf16.msra.mxu0 %v10115_v30  ;;  %v931_v30 = vmul.f32 0.2, %v803_v21  ;;  %vm898_vm13 = vcmp.ge.f32.partialorder %v834_v29, 0.0  ;;  %v962_v54 = vmul.f32 0.2, %v834_v29  ;;  %vm868_vm14 = vcmp.ge.f32.partialorder %v804_v59, 0.0 }
  0x63   : > { %7370 = vmatpush1.bf16.msra.mxu1 %v10118_v31  ;;  %7328 = vmatprep.subr.bf16.mxu0 %v10123_v32  ;;  %v963_v31 = vmul.f32 0.2, %v835_v22  ;;  %v933_v32 = vmul.f32 0.2, %v805_v27  ;;  %v932_v3 = vmul.f32 0.2, %v804_v59 }
  0x64   : > { %7371 = vmatprep.subr.bf16.mxu1 %v10126_v34  ;;  %v965_v34 = vmul.f32 0.2, %v837_v28  ;;  %v1026_v2 = vsel %vm898_vm13, %v834_v29, %v962_v54  ;;  %v10186_v29 = vld [vmem:[%s15289_s3 + $0xae4] ss:$16 sps:$4 sm:$0xff]  }
  0x65   : > { %v997_v46 = vsel %vm869_vm10, %v805_v27, %v933_v32  ;;  %v12042_v4 = vpack.c.bf16 %v1026_v2, %v994_v0  ;;  %v996_v6 = vsel %vm868_vm14, %v804_v59, %v932_v3  ;;  %v10178_v27 = vld [vmem:[%s15289_s3 + $0x700] ss:$16 sps:$4 sm:$0xff]   ;;  %v10189_v32 = vld [vmem:[%s15289_s3 + $0x8c4] ss:$16 sps:$4 sm:$0xff]   ;;  %v12163_v0 = vld [vmem:[%s15288_s2 + $0x8] sm:$0xff] }
  0x66   : > { %7329 = vmatpush1.bf16.msra.mxu0 %v10121_v39  ;;  %v10139_v39 = vld [vmem:[%s15289_s3 + $0x5c0] ss:$16 sps:$4 sm:$0xff]   ;;  %v1029_v48 = vsel %vm901_vm11, %v837_v28, %v965_v34  ;;  %v10183_v28 = vld [vmem:[%s15289_s3 + $0x8e4] ss:$16 sps:$4 sm:$0xff]   ;;  %v677_v3 = vrot.slane %v12163_v0, %v11748_v47 }
  0x67   : > { %7372 = vmatpush1.bf16.msra.mxu1 %v10124_v42  ;;  %7330 = vmatprep.subr.bf16.mxu0 %v10129_v43  ;;  %v995_v42 = vsel %vm867_vm8, %v803_v21, %v931_v30  ;;  %v1027_v43 = vsel %vm899_vm9, %v835_v22, %v963_v31  ;;  %v12025_v53 = vpack.c.bf16 %v1029_v48, %v997_v46  ;;  %v10174_v21 = vld [vmem:[%s15289_s3 + $0x724] ss:$16 sps:$4 sm:$0xff]   ;;  %v10169_v22 = vld [vmem:[%s15289_s3 + $0x520] ss:$16 sps:$4 sm:$0xff]  }
  0x68   : > { %7373 = vmatprep.subr.bf16.mxu1 %v10132_v45  ;;  %v12017_v45 = vpack.c.bf16 %v1027_v43, %v995_v42  ;;  %v10181_v30 = vld [vmem:[%s15289_s3 + $0x8e0] ss:$16 sps:$4 sm:$0xff]   ;;  %v10192_v34 = vld [vmem:[%s15289_s3 + $0xac4] ss:$16 sps:$4 sm:$0xff]  }
  0x69   : > { %7391 = vmatprep.mubr.bf16.mxu1 %v12025_v53  ;;  %v10184_v31 = vld [vmem:[%s15289_s3 + $0xae0] ss:$16 sps:$4 sm:$0xff]   ;;  %v10195_v43 = vld [vmem:[%s15289_s3 + $0x8a4] ss:$16 sps:$4 sm:$0xff]  }
  0x6a   : > { %7331 = vmatpush1.bf16.msra.mxu0 %v10127_v50  ;;  %v10147_v50 = vld [vmem:[%s15289_s3 + $0x5a4] ss:$16 sps:$4 sm:$0xff]   ;;  %7348 = vmatprep.mubr.bf16.mxu0 %v12017_v45  ;;  %v10190_v42 = vld [vmem:[%s15289_s3 + $0xac0] ss:$16 sps:$4 sm:$0xff]  }
  0x6b   : > { %7374 = vmatpush1.bf16.msra.mxu1 %v10130_v5  ;;  %7332 = vmatprep.subr.bf16.mxu0 %v10135_v55  ;;  %v964_v5 = vmul.f32 0.2, %v836_v61  ;;  %v10156_v55 = vld [vmem:[%s15289_s3 + $0x784] ss:$16 sps:$4 sm:$0xff]   ;;  %v10193_v46 = vld [vmem:[%s15289_s3 + $0x8a0] ss:$16 sps:$4 sm:$0xff]  }
  0x6c   : > { %7375 = vmatprep.subr.bf16.mxu1 %v10138_v11  ;;  %v10196_v48 = vld [vmem:[%s15289_s3 + $0xaa0] ss:$16 sps:$4 sm:$0xff]   ;;  %v10201_v49 = vld [vmem:[%s15289_s3 + $0x884] ss:$16 sps:$4 sm:$0xff]  }
  0x6d   : > { %v1028_v7 = vsel %vm900_vm15, %v836_v61, %v964_v5  ;;  %v12151_v54 = vld [vmem:[%s11742_s6 + $0xa0] sm:$0xff] }
  0x6e   : > { %7333 = vmatpush2.bf16.msra.mxu0 %v10133_v19  ;;  %v12053_v11 = vpack.c.bf16 %v1028_v7, %v996_v6  ;;  %v10166_v19 = vld [vmem:[%s15289_s3 + $0x740] ss:$16 sps:$4 sm:$0xff]   ;;  %v375_v61 = vunpack.c.h.bf16 %v12151_v54 }
  0x6f   : > { %7376 = vmatpush2.bf16.msra.mxu1 %v10136_v20  ;;  %7334 = vmatprep.subr.bf16.mxu0 %v10141_v25  ;;  %v10171_v20 = vld [vmem:[%s15289_s3 + $0x524] ss:$16 sps:$4 sm:$0xff]   ;;  %v10202_v6 = vld [vmem:[%s15289_s3 + $0xa80] ss:$16 sps:$4 sm:$0xff]  }
  0x70   : > { %7377 = vmatprep.subr.bf16.mxu1 %v10144_v26  ;;  %v10180_v25 = vld [vmem:[%s15289_s3 + $0x704] ss:$16 sps:$4 sm:$0xff]   ;;  %v10175_v26 = vld [vmem:[%s15289_s3 + $0x500] ss:$16 sps:$4 sm:$0xff]  }
  0x72   : > { %7335 = vmatpush2.bf16.msra.mxu0 %v10139_v39  ;;  %v10187_v39 = vld [vmem:[%s15289_s3 + $0x8c0] ss:$16 sps:$4 sm:$0xff]  }
  0x73   : > { %7378 = vmatpush2.bf16.msra.mxu1 %v10142_v44  ;;  %7336 = vmatprep.subr.bf16.mxu0 %v10147_v50  ;;  %v10198_v44 = vld [vmem:[%s15289_s3 + $0xaa4] ss:$16 sps:$4 sm:$0xff]  }
  0x74   : > { %7379 = vmatprep.subr.bf16.mxu1 %v10150_v51  ;;  %v10204_v50 = vld [vmem:[%s15289_s3 + $0xa84] ss:$16 sps:$4 sm:$0xff]  }
  0x75   : > { %v12148_v51 = vld [vmem:[%s11742_s6 + $0x20] sm:$0xff] }
  0x76   : > { %7337 = vmatpush2.bf16.msra.mxu0 %v10145_v63  ;;  %v343_v59 = vunpack.c.h.bf16 %v12148_v51  ;;  %v12158_v63 = vld [vmem:[%s15287_s1 + $0x8] sm:$0xff] }
  0x77   : > { %7380 = vmatpush2.bf16.msra.mxu1 %v10148_v1  ;;  %7338 = vmatprep.subr.bf16.mxu0 %v10153_v62  ;;  %v12166_v1 = vld [vmem:[%s11742_s6 + $0x28] sm:$0xff]  ;;  %v445_v2 = vrot.slane %v12158_v63, %v11748_v47 }
  0x78   : > { %7381 = vmatprep.subr.bf16.mxu1 %v10156_v55  ;;  %v12173_v62 = vld [vmem:[%s11742_s6 + $0xa8] sm:$0xff]  ;;  %v345_v5 = vunpack.c.h.bf16 %v12166_v1  ;;  %v10199_v55 = vld [vmem:[%s15289_s3 + $0x880] ss:$16 sps:$4 sm:$0xff]  }
  0x79   : > { %v377_v7 = vunpack.c.h.bf16 %v12173_v62 }
  0x7a   : > { %7339 = vmatpush2.bf16.msra.mxu0 %v10151_v56  ;;  %v453_v56 = vrot.slane %v12158_v63, %v11761_v52 }
  0x7b   : > { %7382 = vmatpush2.bf16.msra.mxu1 %v10154_v10  ;;  %7340 = vmatprep.subr.bf16.mxu0 %v10159_v12  ;;  %v685_v10 = vrot.slane %v12163_v0, %v11761_v52  ;;  %v10207_v12 = vld [vmem:[%s15289_s3 + $0x864] ss:$16 sps:$4 sm:$0xff]  }
  0x7c   : > { %7383 = vmatprep.subr.bf16.mxu1 %v10162_v13  ;;  %v10210_v13 = vld [vmem:[%s15289_s3 + $0xa64] ss:$16 sps:$4 sm:$0xff]  }
  0x7e   : > { %7341 = vmatpush2.bf16.msra.mxu0 %v10157_v14  ;;  %v575_v14 = vmul.f32 %v445_v2, %v343_v59  ;;  %v10225_v59 = vld [vmem:[%s15289_s3 + $0x804] ss:$16 sps:$4 sm:$0xff]  }
  0x7f   : > { %7384 = vmatpush2.bf16.msra.mxu1 %v10160_v15  ;;  %7342 = vmatprep.subr.bf16.mxu0 %v10165_v16  ;;  %v607_v15 = vmul.f32 %v445_v2, %v375_v61  ;;  %v10205_v16 = vld [vmem:[%s15289_s3 + $0x860] ss:$16 sps:$4 sm:$0xff]   ;;  %v10228_v61 = vld [vmem:[%s15289_s3 + $0xa04] ss:$16 sps:$4 sm:$0xff]  }
  0x80   : > { %7385 = vmatprep.subr.bf16.mxu1 %v10168_v17  ;;  %v577_v17 = vmul.f32 %v453_v56, %v345_v5  ;;  %v10223_v2 = vld [vmem:[%s15289_s3 + $0x800] ss:$16 sps:$4 sm:$0xff]   ;;  %v10231_v5 = vld [vmem:[%s15289_s3 + $0x9e4] ss:$16 sps:$4 sm:$0xff]  }
  0x82   : > { %7343 = vmatpush2.bf16.msra.mxu0 %v10163_v18  ;;  %v609_v18 = vmul.f32 %v453_v56, %v377_v7  ;;  %v10232_v7 = vld [vmem:[%s15289_s3 + $0xbe0] ss:$16 sps:$4 sm:$0xff]   ;;  %v10237_v56 = vld [vmem:[%s15289_s3 + $0x9c4] ss:$16 sps:$4 sm:$0xff]  }
  0x83   : > { %7386 = vmatpush2.bf16.msra.mxu1 %v10166_v19  ;;  %7344 = vmatprep.subr.bf16.mxu0 %v10171_v20  ;;  %v10208_v19 = vld [vmem:[%s15289_s3 + $0xa60] ss:$16 sps:$4 sm:$0xff]   ;;  %v807_v20 = vadd.f32 %v677_v3, %v575_v14  ;;  %v10243_v14 = vld [vmem:[%s15289_s3 + $0x9a4] ss:$16 sps:$4 sm:$0xff]  }
  0x84   : > { %7387 = vmatprep.subr.bf16.mxu1 %v10174_v21  ;;  %v839_v21 = vadd.f32 %v677_v3, %v607_v15  ;;  %v10226_v3 = vld [vmem:[%s15289_s3 + $0xa00] ss:$16 sps:$4 sm:$0xff]   ;;  %v10246_v15 = vld [vmem:[%s15289_s3 + $0xba4] ss:$16 sps:$4 sm:$0xff]  }
  0x85   : > { %vm871_vm0 = vcmp.ge.f32.partialorder %v807_v20, 0.0 }
  0x86   : > { %7345 = vmatpush2.bf16.msra.mxu0 %v10169_v22  ;;  %v10213_v22 = vld [vmem:[%s15289_s3 + $0x844] ss:$16 sps:$4 sm:$0xff]   ;;  %vm903_vm1 = vcmp.ge.f32.partialorder %v839_v21, 0.0 }
  0x87   : > { %7388 = vmatpush2.bf16.msra.mxu1 %v10172_v23  ;;  %7346 = vmatprep.subr.bf16.mxu0 %v10177_v24  ;;  %v10216_v23 = vld [vmem:[%s15289_s3 + $0xa44] ss:$16 sps:$4 sm:$0xff]   ;;  %v809_v24 = vadd.f32 %v685_v10, %v577_v17  ;;  %v441_v17 = vrot.slane %v12158_v63, %v11775_v57 }
  0x88   : > { %7389 = vmatprep.subr.bf16.mxu1 %v10180_v25  ;;  %v841_v25 = vadd.f32 %v685_v10, %v609_v18  ;;  %v10240_v10 = vld [vmem:[%s15289_s3 + $0xbc4] ss:$16 sps:$4 sm:$0xff]   ;;  %v374_v18 = vunpack.c.l.bf16 %v12151_v54 }
  0x89   : > { %vm873_vm2 = vcmp.ge.f32.partialorder %v809_v24, 0.0  ;;  %v10249_v54 = vld [vmem:[%s15289_s3 + $0x984] ss:$16 sps:$4 sm:$0xff]  }
  0x8a   : > { %7347 = vmatpush2.bf16.msra.mxu0 %v10175_v26  ;;  %v935_v26 = vmul.f32 0.2, %v807_v20  ;;  %vm905_vm3 = vcmp.ge.f32.partialorder %v841_v25, 0.0 }
  0x8b   : > { %7390 = vmatpush2.bf16.msra.mxu1 %v10178_v27  ;;  %7402 = vmatprep.subr.bf16.mxu0 %v10183_v28  ;;  %v967_v27 = vmul.f32 0.2, %v839_v21  ;;  %v937_v28 = vmul.f32 0.2, %v809_v24 }
  0x8c   : > { %7445 = vmatprep.subr.bf16.mxu1 %v10186_v29  ;;  %v969_v29 = vmul.f32 0.2, %v841_v25 }
  0x8d   : > { %7349 = vmatmul.mubr.bf16.vlgmr.msra.gmra.mxu0 %v12042_v4 }
  0x8e   : > { %7392 = vmatmul.mubr.bf16.vlgmr.msra.gmra.mxu1 %v12053_v11  ;;  %7403 = vmatpush1.bf16.msra.mxu0 %v10181_v30  ;;  %v10211_v30 = vld [vmem:[%s15289_s3 + $0x840] ss:$16 sps:$4 sm:$0xff]  }
  0x8f   : > { %7446 = vmatpush1.bf16.msra.mxu1 %v10184_v31  ;;  %7404 = vmatprep.subr.bf16.mxu0 %v10189_v32  ;;  %v999_v31 = vsel %vm871_vm0, %v807_v20, %v935_v26  ;;  %v1031_v32 = vsel %vm903_vm1, %v839_v21, %v967_v27  ;;  %v344_v20 = vunpack.c.l.bf16 %v12166_v1  ;;  %v376_v21 = vunpack.c.l.bf16 %v12173_v62  ;;  %v10252_v1 = vld [vmem:[%s15289_s3 + $0xb84] ss:$16 sps:$4 sm:$0xff]  }
  0x90   : > { %7447 = vmatprep.subr.bf16.mxu1 %v10192_v34  ;;  %v10214_v34 = vld [vmem:[%s15289_s3 + $0xa40] ss:$16 sps:$4 sm:$0xff]  }
  0x92   : > { %7405 = vmatpush1.bf16.msra.mxu0 %v10187_v39  ;;  %v12211_v39 = vpack.c.bf16 %v1031_v32, %v999_v31  ;;  %v10258_v31 = vld [vmem:[%s15289_s3 + $0xb64] ss:$16 sps:$4 sm:$0xff]  }
  0x93   : > { %7448 = vmatpush1.bf16.msra.mxu1 %v10190_v42  ;;  %7406 = vmatprep.subr.bf16.mxu0 %v10195_v43  ;;  %v1001_v42 = vsel %vm873_vm2, %v809_v24, %v937_v28  ;;  %v1033_v43 = vsel %vm905_vm3, %v841_v25, %v969_v29  ;;  %v606_v24 = vmul.f32 %v441_v17, %v374_v18  ;;  %v10247_v25 = vld [vmem:[%s15289_s3 + $0x980] ss:$16 sps:$4 sm:$0xff]  }
  0x94   : > { %7449 = vmatprep.subr.bf16.mxu1 %v10198_v44  ;;  %v10219_v44 = vld [vmem:[%s15289_s3 + $0x824] ss:$16 sps:$4 sm:$0xff]   ;;  %7434 = vmatprep.mubr.bf16.mxu0 %v12211_v39  ;;  %v681_v28 = vrot.slane %v12163_v0, %v11778_v58  ;;  %v10250_v29 = vld [vmem:[%s15289_s3 + $0xb80] ss:$16 sps:$4 sm:$0xff]   ;;  %v469_v18 = vrot.slane %v12158_v63, %v11945_v35 }
  0x96   : > { %7407 = vmatpush1.bf16.msra.mxu0 %v10193_v46  ;;  %v10222_v46 = vld [vmem:[%s15289_s3 + $0xa24] ss:$16 sps:$4 sm:$0xff]  }
  0x97   : > { %7450 = vmatpush1.bf16.msra.mxu1 %v10196_v48  ;;  %7408 = vmatprep.subr.bf16.mxu0 %v10201_v49  ;;  %v12219_v48 = vpack.c.bf16 %v1033_v43, %v1001_v42  ;;  %v10217_v49 = vld [vmem:[%s15289_s3 + $0x820] ss:$16 sps:$4 sm:$0xff]  }
  0x98   : > { %7451 = vmatprep.subr.bf16.mxu1 %v10204_v50  ;;  %v10220_v50 = vld [vmem:[%s15289_s3 + $0xa20] ss:$16 sps:$4 sm:$0xff]  }
  0x99   : > { %7477 = vmatprep.mubr.bf16.mxu1 %v12219_v48  ;;  %v10253_v42 = vld [vmem:[%s15289_s3 + $0x960] ss:$16 sps:$4 sm:$0xff]  }
  0x9a   : > { %7409 = vmatpush1.bf16.msra.mxu0 %v10199_v55  ;;  %v10234_v55 = vld [vmem:[%s15289_s3 + $0xbe4] ss:$16 sps:$4 sm:$0xff]  }
  0x9b   : > { %7452 = vmatpush1.bf16.msra.mxu1 %v10202_v6  ;;  %7410 = vmatprep.subr.bf16.mxu0 %v10207_v12  ;;  %v10229_v6 = vld [vmem:[%s15289_s3 + $0x9e0] ss:$16 sps:$4 sm:$0xff]  }
  0x9c   : > { %7453 = vmatprep.subr.bf16.mxu1 %v10210_v13  ;;  %v10235_v12 = vld [vmem:[%s15289_s3 + $0x9c0] ss:$16 sps:$4 sm:$0xff]  }
  0x9d   : > { %v10238_v13 = vld [vmem:[%s15289_s3 + $0xbc0] ss:$16 sps:$4 sm:$0xff]  }
  0x9e   : > { %7411 = vmatpush1.bf16.msra.mxu0 %v10205_v16  ;;  %v342_v16 = vunpack.c.l.bf16 %v12148_v51  ;;  %v10244_v51 = vld [vmem:[%s15289_s3 + $0xba0] ss:$16 sps:$4 sm:$0xff]  }
  0x9f   : > { %7454 = vmatpush1.bf16.msra.mxu1 %v10208_v19  ;;  %7412 = vmatprep.subr.bf16.mxu0 %v10213_v22  ;;  %v10241_v19 = vld [vmem:[%s15289_s3 + $0x9a0] ss:$16 sps:$4 sm:$0xff]   ;;  %v449_v22 = vrot.slane %v12158_v63, %v11778_v58 }
  0xa0   : > { %7455 = vmatprep.subr.bf16.mxu1 %v10216_v23  ;;  %v574_v62 = vmul.f32 %v441_v17, %v342_v16  ;;  %v673_v23 = vrot.slane %v12163_v0, %v11775_v57  ;;  %v693_v16 = vrot.slane %v12163_v0, %v11939_v33  ;;  %v10268_v17 = vld [vmem:[%s15289_s3 + $0xb20] ss:$16 sps:$4 sm:$0xff]  }
  0xa1   : > { %v576_v26 = vmul.f32 %v449_v22, %v344_v20  ;;  %v608_v27 = vmul.f32 %v449_v22, %v376_v21  ;;  %v457_v20 = vrot.slane %v12158_v63, %v11948_v37  ;;  %v10273_v21 = vld [vmem:[%s15289_s3 + $0x904] ss:$16 sps:$4 sm:$0xff]  }
  0xa2   : > { %7413 = vmatpush1.bf16.msra.mxu0 %v10211_v30  ;;  %v10255_v30 = vld [vmem:[%s15289_s3 + $0x964] ss:$16 sps:$4 sm:$0xff]   ;;  %v806_v32 = vadd.f32 %v673_v23, %v574_v62  ;;  %v465_v62 = vrot.slane %v12158_v63, %v11951_v38 }
  0xa3   : > { %7456 = vmatpush1.bf16.msra.mxu1 %v10214_v34  ;;  %7414 = vmatprep.subr.bf16.mxu0 %v10219_v44  ;;  %v838_v34 = vadd.f32 %v673_v23, %v606_v24  ;;  %v808_v43 = vadd.f32 %v681_v28, %v576_v26  ;;  %v840_v44 = vadd.f32 %v681_v28, %v608_v27  ;;  %v10276_v22 = vld [vmem:[%s15289_s3 + $0xb04] ss:$16 sps:$4 sm:$0xff]   ;;  %v309_v27 = vld [vmem:[%s11742_s6 + $0x38] sm:$0xff] }
  0xa4   : > { %7457 = vmatprep.subr.bf16.mxu1 %v10222_v46  ;;  %v10256_v46 = vld [vmem:[%s15289_s3 + $0xb60] ss:$16 sps:$4 sm:$0xff]   ;;  %vm870_vm4 = vcmp.ge.f32.partialorder %v806_v32, 0.0  ;;  %v325_v28 = vld [vmem:[%s11742_s6 + $0xb8] sm:$0xff] }
  0xa5   : > { %vm902_vm5 = vcmp.ge.f32.partialorder %v838_v34, 0.0  ;;  %vm872_vm6 = vcmp.ge.f32.partialorder %v808_v43, 0.0  ;;  %vm904_vm7 = vcmp.ge.f32.partialorder %v840_v44, 0.0  ;;  %v324_v24 = vld [vmem:[%s11742_s6 + $0xb0] sm:$0xff] }
  0xa6   : > { %7415 = vmatpush1.bf16.msra.mxu0 %v10217_v49  ;;  %v10261_v49 = vld [vmem:[%s15289_s3 + $0x944] ss:$16 sps:$4 sm:$0xff]  }
  0xa7   : > { %7458 = vmatpush1.bf16.msra.mxu1 %v10220_v50  ;;  %7416 = vmatprep.subr.bf16.mxu0 %v10225_v59  ;;  %v10264_v50 = vld [vmem:[%s15289_s3 + $0xb44] ss:$16 sps:$4 sm:$0xff]   ;;  %v10259_v59 = vld [vmem:[%s15289_s3 + $0x940] ss:$16 sps:$4 sm:$0xff]  }
  0xa8   : > { %7459 = vmatprep.subr.bf16.mxu1 %v10228_v61  ;;  %v934_v61 = vmul.f32 0.2, %v806_v32 }
  0xaa   : > { %7417 = vmatpush1.bf16.msra.mxu0 %v10223_v2  ;;  %v966_v2 = vmul.f32 0.2, %v838_v34 }
  0xab   : > { %7460 = vmatpush1.bf16.msra.mxu1 %v10226_v3  ;;  %7418 = vmatprep.subr.bf16.mxu0 %v10231_v5  ;;  %v936_v3 = vmul.f32 0.2, %v808_v43  ;;  %v968_v5 = vmul.f32 0.2, %v840_v44 }
  0xac   : > { %7461 = vmatprep.subr.bf16.mxu1 %v10234_v55  ;;  %v10262_v55 = vld [vmem:[%s15289_s3 + $0xb40] ss:$16 sps:$4 sm:$0xff]  }
  0xae   : > { %7419 = vmatpush2.bf16.msra.mxu0 %v10229_v6  ;;  %v10267_v6 = vld [vmem:[%s15289_s3 + $0x924] ss:$16 sps:$4 sm:$0xff]  }
  0xaf   : > { %7462 = vmatpush2.bf16.msra.mxu1 %v10232_v7  ;;  %7420 = vmatprep.subr.bf16.mxu0 %v10237_v56  ;;  %v10270_v7 = vld [vmem:[%s15289_s3 + $0xb24] ss:$16 sps:$4 sm:$0xff]   ;;  %v998_v56 = vsel %vm870_vm4, %v806_v32, %v934_v61  ;;  %v379_v32 = vunpack.c.h.bf16 %v324_v24 }
  0xb0   : > { %7463 = vmatprep.subr.bf16.mxu1 %v10240_v10  ;;  %v1030_v10 = vsel %vm902_vm5, %v838_v34, %v966_v2  ;;  %v348_v34 = vunpack.c.l.bf16 %v309_v27 }
  0xb2   : > { %7421 = vmatpush2.bf16.msra.mxu0 %v10235_v12  ;;  %v10265_v12 = vld [vmem:[%s15289_s3 + $0x920] ss:$16 sps:$4 sm:$0xff]  }
  0xb3   : > { %7464 = vmatpush2.bf16.msra.mxu1 %v10238_v13  ;;  %7422 = vmatprep.subr.bf16.mxu0 %v10243_v14  ;;  %v1000_v13 = vsel %vm872_vm6, %v808_v43, %v936_v3  ;;  %v1032_v14 = vsel %vm904_vm7, %v840_v44, %v968_v5  ;;  %v380_v44 = vunpack.c.l.bf16 %v325_v28  ;;  %v10277_v3 = vld [vmem:[%s15289_s3 + $0xce0] ss:$16 sps:$4 sm:$0xff]  }
  0xb4   : > { %7465 = vmatprep.subr.bf16.mxu1 %v10246_v15  ;;  %v461_v15 = vrot.slane %v12158_v63, %v11939_v33  ;;  %v12361_v23 = vpack.c.bf16 %v1032_v14, %v1000_v13  ;;  %v10274_v63 = vld [vmem:[%s15289_s3 + $0xb00] ss:$16 sps:$4 sm:$0xff]  }
  0xb5   : > { %v10280_v5 = vld [vmem:[%s15289_s3 + $0xee0] ss:$16 sps:$4 sm:$0xff]  }
  0xb6   : > { %7423 = vmatpush2.bf16.msra.mxu0 %v10241_v19  ;;  %v701_v19 = vrot.slane %v12163_v0, %v11945_v35 }
  0xb7   : > { %7466 = vmatpush2.bf16.msra.mxu1 %v10244_v51  ;;  %7424 = vmatprep.subr.bf16.mxu0 %v10249_v54  ;;  %v12354_v51 = vpack.c.bf16 %v1030_v10, %v998_v56  ;;  %v308_v54 = vld [vmem:[%s11742_s6 + $0x30] sm:$0xff]  ;;  %v580_v56 = vmul.f32 %v465_v62, %v348_v34 }
  0xb8   : > { %7467 = vmatprep.subr.bf16.mxu1 %v10252_v1  ;;  %v689_v1 = vrot.slane %v12163_v0, %v11948_v37  ;;  %v347_v26 = vunpack.c.h.bf16 %v308_v54  ;;  %v10285_v10 = vld [vmem:[%s15289_s3 + $0xcc4] ss:$16 sps:$4 sm:$0xff]  }
  0xba   : > { %7425 = vmatpush2.bf16.msra.mxu0 %v10247_v25  ;;  %v346_v25 = vunpack.c.l.bf16 %v308_v54  ;;  %v579_v43 = vmul.f32 %v461_v15, %v347_v26  ;;  %v10286_v26 = vld [vmem:[%s15289_s3 + $0xec0] ss:$16 sps:$4 sm:$0xff]  }
  0xbb   : > { %7468 = vmatpush2.bf16.msra.mxu1 %v10250_v29  ;;  %7426 = vmatprep.subr.bf16.mxu0 %v10255_v30  ;;  %v12368_v29 = vrot.slane %v12163_v0, %v11951_v38  ;;  %v10271_v30 = vld [vmem:[%s15289_s3 + $0x900] ss:$16 sps:$4 sm:$0xff]   ;;  %v10279_v0 = vld [vmem:[%s15289_s3 + $0xce4] ss:$16 sps:$4 sm:$0xff]  }
  0xbc   : > { %7469 = vmatprep.subr.bf16.mxu1 %v10258_v31  ;;  %v378_v31 = vunpack.c.l.bf16 %v324_v24 }
  0xbe   : > { %7427 = vmatpush2.bf16.msra.mxu0 %v10253_v42  ;;  %v349_v42 = vunpack.c.h.bf16 %v309_v27  ;;  %v610_v2 = vmul.f32 %v457_v20, %v378_v31  ;;  %v10291_v31 = vld [vmem:[%s15289_s3 + $0xca4] ss:$16 sps:$4 sm:$0xff]  }
  0xbf   : > { %7470 = vmatpush2.bf16.msra.mxu1 %v10256_v46  ;;  %7428 = vmatprep.subr.bf16.mxu0 %v10261_v49  ;;  %v381_v46 = vunpack.c.h.bf16 %v325_v28  ;;  %v578_v49 = vmul.f32 %v457_v20, %v346_v25 }
  0xc0   : > { %7471 = vmatprep.subr.bf16.mxu1 %v10264_v50  ;;  %v10282_v50 = vld [vmem:[%s15289_s3 + $0xee4] ss:$16 sps:$4 sm:$0xff]   ;;  %v581_v61 = vmul.f32 %v469_v18, %v349_v42  ;;  %v842_v14 = vadd.f32 %v689_v1, %v610_v2 }
  0xc2   : > { %7429 = vmatpush2.bf16.msra.mxu0 %v10259_v59  ;;  %v611_v59 = vmul.f32 %v461_v15, %v379_v32  ;;  %v813_v13 = vadd.f32 %v701_v19, %v581_v61  ;;  %v612_v15 = vmul.f32 %v465_v62, %v380_v44  ;;  %vm906_vm13 = vcmp.ge.f32.partialorder %v842_v14, 0.0  ;;  %v10294_v32 = vld [vmem:[%s15289_s3 + $0xea4] ss:$16 sps:$4 sm:$0xff]  }
  0xc3   : > { %7472 = vmatpush2.bf16.msra.mxu1 %v10262_v55  ;;  %7430 = vmatprep.subr.bf16.mxu0 %v10267_v6  ;;  %v811_v55 = vadd.f32 %v693_v16, %v579_v43  ;;  %v613_v6 = vmul.f32 %v469_v18, %v381_v46  ;;  %v970_v25 = vmul.f32 0.2, %v842_v14  ;;  %v10300_v61 = vld [vmem:[%s15289_s3 + $0xe84] ss:$16 sps:$4 sm:$0xff]  }
  0xc4   : > { %7473 = vmatprep.subr.bf16.mxu1 %v10270_v7  ;;  %v810_v7 = vadd.f32 %v689_v1, %v578_v49  ;;  %vm877_vm11 = vcmp.ge.f32.partialorder %v813_v13, 0.0  ;;  %v10283_v1 = vld [vmem:[%s15289_s3 + $0xcc0] ss:$16 sps:$4 sm:$0xff]   ;;  %v844_v44 = vadd.f32 %v12368_v29, %v612_v15 }
  0xc5   : > { %vm875_vm8 = vcmp.ge.f32.partialorder %v811_v55, 0.0  ;;  %v939_v20 = vmul.f32 0.2, %v811_v55  ;;  %v10289_v49 = vld [vmem:[%s15289_s3 + $0xca0] ss:$16 sps:$4 sm:$0xff]  }
  0xc6   : > { %7431 = vmatpush2.bf16.msra.mxu0 %v10265_v12  ;;  %v843_v12 = vadd.f32 %v693_v16, %v611_v59  ;;  %vm874_vm9 = vcmp.ge.f32.partialorder %v810_v7, 0.0  ;;  %v938_v24 = vmul.f32 0.2, %v810_v7  ;;  %vm908_vm15 = vcmp.ge.f32.partialorder %v844_v44, 0.0  ;;  %v10310_v15 = vld [vmem:[%s15289_s3 + $0xe40] ss:$16 sps:$4 sm:$0xff]  }
  0xc7   : > { %7474 = vmatpush2.bf16.msra.mxu1 %v10268_v17  ;;  %7432 = vmatprep.subr.bf16.mxu0 %v10273_v21  ;;  %v10288_v17 = vld [vmem:[%s15289_s3 + $0xec4] ss:$16 sps:$4 sm:$0xff]   ;;  %v845_v21 = vadd.f32 %v701_v19, %v613_v6  ;;  %v1003_v16 = vsel %vm875_vm8, %v811_v55, %v939_v20  ;;  %v10298_v55 = vld [vmem:[%s15289_s3 + $0xe80] ss:$16 sps:$4 sm:$0xff]  }
  0xc8   : > { %7475 = vmatprep.subr.bf16.mxu1 %v10276_v22  ;;  %vm907_vm10 = vcmp.ge.f32.partialorder %v843_v12, 0.0  ;;  %v971_v18 = vmul.f32 0.2, %v843_v12  ;;  %v941_v22 = vmul.f32 0.2, %v813_v13  ;;  %v1002_v42 = vsel %vm874_vm9, %v810_v7, %v938_v24 }
  0xc9   : > { %vm909_vm12 = vcmp.ge.f32.partialorder %v845_v21, 0.0  ;;  %v973_v54 = vmul.f32 0.2, %v845_v21  ;;  %v10303_v6 = vld [vmem:[%s15289_s3 + $0xc64] ss:$16 sps:$4 sm:$0xff]  }
  0xca   : > { %7433 = vmatpush2.bf16.msra.mxu0 %v10271_v30  ;;  %v1035_v19 = vsel %vm907_vm10, %v843_v12, %v971_v18  ;;  %v1005_v62 = vsel %vm877_vm11, %v813_v13, %v941_v22  ;;  %v812_v30 = vadd.f32 %v12368_v29, %v580_v56  ;;  %v10297_v29 = vld [vmem:[%s15289_s3 + $0xc84] ss:$16 sps:$4 sm:$0xff]   ;;  %v10301_v56 = vld [vmem:[%s15289_s3 + $0xc60] ss:$16 sps:$4 sm:$0xff]  }
  0xcb   : > { %7476 = vmatpush2.bf16.msra.mxu1 %v10274_v63  ;;  %7488 = vmatprep.subr.bf16.mxu0 %v10279_v0  ;;  %v12402_v27 = vpack.c.bf16 %v1035_v19, %v1003_v16  ;;  %v1037_v28 = vsel %vm909_vm12, %v845_v21, %v973_v54  ;;  %v1034_v63 = vsel %vm906_vm13, %v842_v14, %v970_v25  ;;  %v10292_v0 = vld [vmem:[%s15289_s3 + $0xea0] ss:$16 sps:$4 sm:$0xff]   ;;  %v10306_v7 = vld [vmem:[%s15289_s3 + $0xe64] ss:$16 sps:$4 sm:$0xff]  }
  0xcc   : > { %7531 = vmatprep.subr.bf16.mxu1 %v10282_v50  ;;  %v12411_v34 = vpack.c.bf16 %v1037_v28, %v1005_v62  ;;  %v12416_v43 = vpack.c.bf16 %v1034_v63, %v1002_v42  ;;  %vm876_vm14 = vcmp.ge.f32.partialorder %v812_v30, 0.0  ;;  %v940_v46 = vmul.f32 0.2, %v812_v30  ;;  %v10309_v12 = vld [vmem:[%s15289_s3 + $0xc44] ss:$16 sps:$4 sm:$0xff]  }
  0xcd   : > { %7435 = vmatmul.mubr.bf16.vlgmr.msra.gmra.mxu0 %v12354_v51  ;;  %v972_v50 = vmul.f32 0.2, %v844_v44  ;;  %v10312_v13 = vld [vmem:[%s15289_s3 + $0xe44] ss:$16 sps:$4 sm:$0xff]   ;;  %v10307_v14 = vld [vmem:[%s15289_s3 + $0xc40] ss:$16 sps:$4 sm:$0xff]  }
  0xce   : > { %7478 = vmatmul.mubr.bf16.vlgmr.msra.gmra.mxu1 %v12361_v23  ;;  %7489 = vmatpush1.bf16.msra.mxu0 %v10277_v3  ;;  %v1004_v59 = vsel %vm876_vm14, %v812_v30, %v940_v46  ;;  %v10295_v3 = vld [vmem:[%s15289_s3 + $0xc80] ss:$16 sps:$4 sm:$0xff]   ;;  %v10318_v20 = vld [vmem:[%s15289_s3 + $0xe24] ss:$16 sps:$4 sm:$0xff]  }
  0xcf   : > { %7532 = vmatpush1.bf16.msra.mxu1 %v10280_v5  ;;  %7490 = vmatprep.subr.bf16.mxu0 %v10285_v10  ;;  %v1036_v2 = vsel %vm908_vm15, %v844_v44, %v972_v50  ;;  %v10304_v10 = vld [vmem:[%s15289_s3 + $0xe60] ss:$16 sps:$4 sm:$0xff]   ;;  %v10321_v22 = vld [vmem:[%s15289_s3 + $0xc04] ss:$16 sps:$4 sm:$0xff]  }
  0xd0   : > { %7533 = vmatprep.subr.bf16.mxu1 %v10288_v17  ;;  %7520 = vmatprep.mubr.bf16.mxu0 %v12402_v27  ;;  %v12435_v5 = vpack.c.bf16 %v1036_v2, %v1004_v59  ;;  %v10315_v17 = vld [vmem:[%s15289_s3 + $0xc24] ss:$16 sps:$4 sm:$0xff]   ;;  %v10313_v21 = vld [vmem:[%s15289_s3 + $0xc20] ss:$16 sps:$4 sm:$0xff]   ;;  %v12548_v2 = vld [vmem:[%s11742_s6 + $0x48] sm:$0xff] }
  0xd1   : > { %7563 = vmatprep.mubr.bf16.mxu1 %v12411_v34  ;;  %v10316_v18 = vld [vmem:[%s15289_s3 + $0xe20] ss:$16 sps:$4 sm:$0xff]   ;;  %v10324_v16 = vld [vmem:[%s15289_s3 + $0xe04] ss:$16 sps:$4 sm:$0xff]  }
  0xd2   : > { %7491 = vmatpush1.bf16.msra.mxu0 %v10283_v1  ;;  %v10319_v54 = vld [vmem:[%s15289_s3 + $0xc00] ss:$16 sps:$4 sm:$0xff]   ;;  %v10327_v19 = vld [vmem:[%s15289_s3 + $0xde4] ss:$16 sps:$4 sm:$0xff]  }
  0xd3   : > { %7534 = vmatpush1.bf16.msra.mxu1 %v10286_v26  ;;  %7492 = vmatprep.subr.bf16.mxu0 %v10291_v31  ;;  %v10322_v1 = vld [vmem:[%s15289_s3 + $0xe00] ss:$16 sps:$4 sm:$0xff]   ;;  %v10330_v62 = vld [vmem:[%s15289_s3 + $0xfe4] ss:$16 sps:$4 sm:$0xff]  }
  0xd4   : > { %7535 = vmatprep.subr.bf16.mxu1 %v10294_v32  ;;  %v10325_v24 = vld [vmem:[%s15289_s3 + $0xde0] ss:$16 sps:$4 sm:$0xff]   ;;  %v10333_v26 = vld [vmem:[%s15289_s3 + $0xdc4] ss:$16 sps:$4 sm:$0xff]  }
  0xd5   : > { %v10328_v25 = vld [vmem:[%s15289_s3 + $0xfe0] ss:$16 sps:$4 sm:$0xff]   ;;  %v10336_v28 = vld [vmem:[%s15289_s3 + $0xfc4] ss:$16 sps:$4 sm:$0xff]  }
  0xd6   : > { %7493 = vmatpush1.bf16.msra.mxu0 %v10289_v49  ;;  %v10331_v30 = vld [vmem:[%s15289_s3 + $0xdc0] ss:$16 sps:$4 sm:$0xff]   ;;  %v10339_v32 = vld [vmem:[%s15289_s3 + $0xda4] ss:$16 sps:$4 sm:$0xff]  }
  0xd7   : > { %7536 = vmatpush1.bf16.msra.mxu1 %v10292_v0  ;;  %7494 = vmatprep.subr.bf16.mxu0 %v10297_v29  ;;  %v10334_v31 = vld [vmem:[%s15289_s3 + $0xfc0] ss:$16 sps:$4 sm:$0xff]   ;;  %v10342_v42 = vld [vmem:[%s15289_s3 + $0xfa4] ss:$16 sps:$4 sm:$0xff]  }
  0xd8   : > { %7537 = vmatprep.subr.bf16.mxu1 %v10300_v61  ;;  %v10337_v63 = vld [vmem:[%s15289_s3 + $0xda0] ss:$16 sps:$4 sm:$0xff]   ;;  %v10345_v46 = vld [vmem:[%s15289_s3 + $0xd84] ss:$16 sps:$4 sm:$0xff]  }
  0xd9   : > { %v10340_v44 = vld [vmem:[%s15289_s3 + $0xfa0] ss:$16 sps:$4 sm:$0xff]   ;;  %v10348_v49 = vld [vmem:[%s15289_s3 + $0xf84] ss:$16 sps:$4 sm:$0xff]  }
  0xda   : > { %7495 = vmatpush1.bf16.msra.mxu0 %v10295_v3  ;;  %v10343_v0 = vld [vmem:[%s15289_s3 + $0xd80] ss:$16 sps:$4 sm:$0xff]   ;;  %v12551_v3 = vld [vmem:[%s11742_s6 + $0xc8] sm:$0xff] }
  0xdb   : > { %7538 = vmatpush1.bf16.msra.mxu1 %v10298_v55  ;;  %7496 = vmatprep.subr.bf16.mxu0 %v10303_v6  ;;  %v10346_v50 = vld [vmem:[%s15289_s3 + $0xf80] ss:$16 sps:$4 sm:$0xff]   ;;  %v10351_v55 = vld [vmem:[%s15289_s3 + $0xd64] ss:$16 sps:$4 sm:$0xff]  }
  0xdc   : > { %7539 = vmatprep.subr.bf16.mxu1 %v10306_v7  ;;  %v12537_v59 = vld [vmem:[%s11742_s6 + $0x40] sm:$0xff]  ;;  %v12545_v61 = vld [vmem:[%s15287_s1 + $0x10] sm:$0xff] }
  0xdd   : > { %v12540_v29 = vld [vmem:[%s11742_s6 + $0xc0] sm:$0xff] }
  0xde   : > { %7497 = vmatpush1.bf16.msra.mxu0 %v10301_v56  ;;  %v10354_v6 = vld [vmem:[%s15289_s3 + $0xf64] ss:$16 sps:$4 sm:$0xff]   ;;  %v10349_v7 = vld [vmem:[%s15289_s3 + $0xd60] ss:$16 sps:$4 sm:$0xff]   ;;  %v351_v56 = vunpack.c.h.bf16 %v12537_v59 }
  0xdf   : > { %7540 = vmatpush1.bf16.msra.mxu1 %v10304_v10  ;;  %7498 = vmatprep.subr.bf16.mxu0 %v10309_v12  ;;  %v383_v10 = vunpack.c.h.bf16 %v12540_v29  ;;  %v477_v12 = vrot.slane %v12545_v61, %v11748_v47 }
  0xe0   : > { %7541 = vmatprep.subr.bf16.mxu1 %v10312_v13  ;;  %v12569_v13 = vld [vmem:[%s15288_s2 + $0x10] sm:$0xff] }
  0xe2   : > { %7499 = vmatpush1.bf16.msra.mxu0 %v10307_v14  ;;  %v353_v14 = vunpack.c.h.bf16 %v12548_v2 }
  0xe3   : > { %7542 = vmatpush1.bf16.msra.mxu1 %v10310_v15  ;;  %7500 = vmatprep.subr.bf16.mxu0 %v10315_v17  ;;  %v385_v15 = vunpack.c.h.bf16 %v12551_v3  ;;  %v485_v17 = vrot.slane %v12545_v61, %v11761_v52 }
  0xe4   : > { %7543 = vmatprep.subr.bf16.mxu1 %v10318_v20  ;;  %v10352_v20 = vld [vmem:[%s15289_s3 + $0xf60] ss:$16 sps:$4 sm:$0xff]  }
  0xe6   : > { %7501 = vmatpush1.bf16.msra.mxu0 %v10313_v21  ;;  %v10357_v21 = vld [vmem:[%s15289_s3 + $0xd44] ss:$16 sps:$4 sm:$0xff]  }
  0xe7   : > { %7544 = vmatpush1.bf16.msra.mxu1 %v10316_v18  ;;  %7502 = vmatprep.subr.bf16.mxu0 %v10321_v22  ;;  %v10360_v18 = vld [vmem:[%s15289_s3 + $0xf44] ss:$16 sps:$4 sm:$0xff]   ;;  %v583_v22 = vmul.f32 %v477_v12, %v351_v56 }
  0xe8   : > { %7545 = vmatprep.subr.bf16.mxu1 %v10324_v16  ;;  %v615_v16 = vmul.f32 %v477_v12, %v383_v10  ;;  %v10378_v12 = vld [vmem:[%s15289_s3 + $0x12e4] ss:$16 sps:$4 sm:$0xff]  }
  0xea   : > { %7503 = vmatpush1.bf16.msra.mxu0 %v10319_v54  ;;  %v709_v54 = vrot.slane %v12569_v13, %v11748_v47 }
  0xeb   : > { %7546 = vmatpush1.bf16.msra.mxu1 %v10322_v1  ;;  %7504 = vmatprep.subr.bf16.mxu0 %v10327_v19  ;;  %v10355_v1 = vld [vmem:[%s15289_s3 + $0xd40] ss:$16 sps:$4 sm:$0xff]   ;;  %v585_v19 = vmul.f32 %v485_v17, %v353_v14 }
  0xec   : > { %7547 = vmatprep.subr.bf16.mxu1 %v10330_v62  ;;  %v617_v62 = vmul.f32 %v485_v17, %v385_v15  ;;  %v10373_v14 = vld [vmem:[%s15289_s3 + $0x10e0] ss:$16 sps:$4 sm:$0xff]  }
  0xed   : > { %v10376_v15 = vld [vmem:[%s15289_s3 + $0x12e0] ss:$16 sps:$4 sm:$0xff]  }
  0xee   : > { %7505 = vmatpush2.bf16.msra.mxu0 %v10325_v24  ;;  %v717_v24 = vrot.slane %v12569_v13, %v11761_v52 }
  0xef   : > { %7548 = vmatpush2.bf16.msra.mxu1 %v10328_v25  ;;  %7506 = vmatprep.subr.bf16.mxu0 %v10333_v26  ;;  %v10358_v25 = vld [vmem:[%s15289_s3 + $0xf40] ss:$16 sps:$4 sm:$0xff]   ;;  %v10363_v26 = vld [vmem:[%s15289_s3 + $0xd24] ss:$16 sps:$4 sm:$0xff]  }
  0xf0   : > { %7549 = vmatprep.subr.bf16.mxu1 %v10336_v28  ;;  %v10366_v28 = vld [vmem:[%s15289_s3 + $0xf24] ss:$16 sps:$4 sm:$0xff]  }
  0xf2   : > { %7507 = vmatpush2.bf16.msra.mxu0 %v10331_v30  ;;  %v815_v30 = vadd.f32 %v709_v54, %v583_v22  ;;  %v10381_v22 = vld [vmem:[%s15289_s3 + $0x10c4] ss:$16 sps:$4 sm:$0xff]  }
  0xf3   : > { %7550 = vmatpush2.bf16.msra.mxu1 %v10334_v31  ;;  %7508 = vmatprep.subr.bf16.mxu0 %v10339_v32  ;;  %v847_v31 = vadd.f32 %v709_v54, %v615_v16  ;;  %v10361_v32 = vld [vmem:[%s15289_s3 + $0xd20] ss:$16 sps:$4 sm:$0xff]   ;;  %v10384_v16 = vld [vmem:[%s15289_s3 + $0x12c4] ss:$16 sps:$4 sm:$0xff]  }
  0xf4   : > { %7551 = vmatprep.subr.bf16.mxu1 %v10342_v42  ;;  %v817_v42 = vadd.f32 %v717_v24, %v585_v19  ;;  %vm879_vm0 = vcmp.ge.f32.partialorder %v815_v30, 0.0  ;;  %v10379_v19 = vld [vmem:[%s15289_s3 + $0x10c0] ss:$16 sps:$4 sm:$0xff]  }
  0xf5   : > { %vm911_vm1 = vcmp.ge.f32.partialorder %v847_v31, 0.0 }
  0xf6   : > { %7509 = vmatpush2.bf16.msra.mxu0 %v10337_v63  ;;  %v849_v63 = vadd.f32 %v717_v24, %v617_v62  ;;  %v945_v56 = vmul.f32 0.2, %v817_v42  ;;  %vm881_vm2 = vcmp.ge.f32.partialorder %v817_v42, 0.0  ;;  %v10382_v62 = vld [vmem:[%s15289_s3 + $0x12c0] ss:$16 sps:$4 sm:$0xff]  }
  0xf7   : > { %7552 = vmatpush2.bf16.msra.mxu1 %v10340_v44  ;;  %7510 = vmatprep.subr.bf16.mxu0 %v10345_v46  ;;  %v10364_v44 = vld [vmem:[%s15289_s3 + $0xf20] ss:$16 sps:$4 sm:$0xff]   ;;  %v10369_v46 = vld [vmem:[%s15289_s3 + $0xd04] ss:$16 sps:$4 sm:$0xff]  }
  0xf8   : > { %7553 = vmatprep.subr.bf16.mxu1 %v10348_v49  ;;  %v10372_v49 = vld [vmem:[%s15289_s3 + $0xf04] ss:$16 sps:$4 sm:$0xff]   ;;  %v977_v10 = vmul.f32 0.2, %v849_v63  ;;  %vm913_vm3 = vcmp.ge.f32.partialorder %v849_v63, 0.0 }
  0xf9   : > { %v10387_v24 = vld [vmem:[%s15289_s3 + $0x10a4] ss:$16 sps:$4 sm:$0xff]  }
  0xfa   : > { %7511 = vmatpush2.bf16.msra.mxu0 %v10343_v0  ;;  %v10367_v0 = vld [vmem:[%s15289_s3 + $0xd00] ss:$16 sps:$4 sm:$0xff]  }
  0xfb   : > { %7554 = vmatpush2.bf16.msra.mxu1 %v10346_v50  ;;  %7512 = vmatprep.subr.bf16.mxu0 %v10351_v55  ;;  %v10370_v50 = vld [vmem:[%s15289_s3 + $0xf00] ss:$16 sps:$4 sm:$0xff]   ;;  %v943_v55 = vmul.f32 0.2, %v815_v30 }
  0xfc   : > { %7555 = vmatprep.subr.bf16.mxu1 %v10354_v6  ;;  %v975_v6 = vmul.f32 0.2, %v847_v31 }
  0xfd   : > { %v1007_v17 = vsel %vm879_vm0, %v815_v30, %v943_v55  ;;  %v10393_v30 = vld [vmem:[%s15289_s3 + $0x1084] ss:$16 sps:$4 sm:$0xff]   ;;  %v10403_v55 = vld [vmem:[%s15289_s3 + $0x1040] ss:$16 sps:$4 sm:$0xff]  }
  0xfe   : > { %7513 = vmatpush2.bf16.msra.mxu0 %v10349_v7  ;;  %v10375_v7 = vld [vmem:[%s15289_s3 + $0x10e4] ss:$16 sps:$4 sm:$0xff]  }
  0xff   : > { %7556 = vmatpush2.bf16.msra.mxu1 %v10352_v20  ;;  %7514 = vmatprep.subr.bf16.mxu0 %v10357_v21  ;;  %v1039_v20 = vsel %vm911_vm1, %v847_v31, %v975_v6  ;;  %v1009_v21 = vsel %vm881_vm2, %v817_v42, %v945_v56  ;;  %v10396_v31 = vld [vmem:[%s15289_s3 + $0x1284] ss:$16 sps:$4 sm:$0xff]   ;;  %v10394_v42 = vld [vmem:[%s15289_s3 + $0x1280] ss:$16 sps:$4 sm:$0xff]  }
 0x100   : > { %7557 = vmatprep.subr.bf16.mxu1 %v10360_v18  ;;  %v1041_v18 = vsel %vm913_vm3, %v849_v63, %v977_v10  ;;  %v12636_v54 = vpack.c.bf16 %v1039_v20, %v1007_v17  ;;  %v10399_v63 = vld [vmem:[%s15289_s3 + $0x1064] ss:$16 sps:$4 sm:$0xff]   ;;  %v10406_v6 = vld [vmem:[%s15289_s3 + $0x1240] ss:$16 sps:$4 sm:$0xff]   ;;  %v725_v20 = vrot.slane %v12569_v13, %v11939_v33 }
 0x101   : > { %v10414_v56 = vld [vmem:[%s15289_s3 + $0x1224] ss:$16 sps:$4 sm:$0xff]   ;;  %v10409_v10 = vld [vmem:[%s15289_s3 + $0x1020] ss:$16 sps:$4 sm:$0xff]  }
 0x102   : > { %7515 = vmatpush2.bf16.msra.mxu0 %v10355_v1  ;;  %v12638_v1 = vpack.c.bf16 %v1041_v18, %v1009_v21  ;;  %v10417_v17 = vld [vmem:[%s15289_s3 + $0x1004] ss:$16 sps:$4 sm:$0xff]   ;;  %v733_v21 = vrot.slane %v12569_v13, %v11945_v35  ;;  %v489_v18 = vrot.slane %v12545_v61, %v11948_v37 }
 0x103   : > { %7558 = vmatpush2.bf16.msra.mxu1 %v10358_v25  ;;  %7516 = vmatprep.subr.bf16.mxu0 %v10363_v26  ;;  %v10390_v25 = vld [vmem:[%s15289_s3 + $0x12a4] ss:$16 sps:$4 sm:$0xff]   ;;  %v10385_v26 = vld [vmem:[%s15289_s3 + $0x10a0] ss:$16 sps:$4 sm:$0xff]  }
 0x104   : > { %7559 = vmatprep.subr.bf16.mxu1 %v10366_v28  ;;  %v10388_v28 = vld [vmem:[%s15289_s3 + $0x12a0] ss:$16 sps:$4 sm:$0xff]  }
 0x106   : > { %7517 = vmatpush2.bf16.msra.mxu0 %v10361_v32  ;;  %v10391_v32 = vld [vmem:[%s15289_s3 + $0x1080] ss:$16 sps:$4 sm:$0xff]  }
 0x107   : > { %7560 = vmatpush2.bf16.msra.mxu1 %v10364_v44  ;;  %7518 = vmatprep.subr.bf16.mxu0 %v10369_v46  ;;  %v10402_v44 = vld [vmem:[%s15289_s3 + $0x1264] ss:$16 sps:$4 sm:$0xff]   ;;  %v10397_v46 = vld [vmem:[%s15289_s3 + $0x1060] ss:$16 sps:$4 sm:$0xff]  }
 0x108   : > { %7561 = vmatprep.subr.bf16.mxu1 %v10372_v49  ;;  %v10400_v49 = vld [vmem:[%s15289_s3 + $0x1260] ss:$16 sps:$4 sm:$0xff]  }
 0x10a   : > { %7519 = vmatpush2.bf16.msra.mxu0 %v10367_v0  ;;  %v10405_v0 = vld [vmem:[%s15289_s3 + $0x1044] ss:$16 sps:$4 sm:$0xff]  }
 0x10b   : > { %7562 = vmatpush2.bf16.msra.mxu1 %v10370_v50  ;;  %7574 = vmatprep.subr.bf16.mxu0 %v10375_v7  ;;  %v10408_v50 = vld [vmem:[%s15289_s3 + $0x1244] ss:$16 sps:$4 sm:$0xff]  }
 0x10c   : > { %7617 = vmatprep.subr.bf16.mxu1 %v10378_v12  ;;  %v10411_v7 = vld [vmem:[%s15289_s3 + $0x1024] ss:$16 sps:$4 sm:$0xff]   ;;  %v10412_v12 = vld [vmem:[%s15289_s3 + $0x1220] ss:$16 sps:$4 sm:$0xff]  }
 0x10d   : > { %7521 = vmatmul.mubr.bf16.vlgmr.msra.gmra.mxu0 %v12416_v43 }
 0x10e   : > { %7564 = vmatmul.mubr.bf16.vlgmr.msra.gmra.mxu1 %v12435_v5  ;;  %7575 = vmatpush1.bf16.msra.mxu0 %v10373_v14  ;;  %v493_v14 = vrot.slane %v12545_v61, %v11939_v33 }
 0x10f   : > { %7618 = vmatpush1.bf16.msra.mxu1 %v10376_v15  ;;  %7576 = vmatprep.subr.bf16.mxu0 %v10381_v22  ;;  %v501_v15 = vrot.slane %v12545_v61, %v11945_v35  ;;  %v10420_v22 = vld [vmem:[%s15289_s3 + $0x1204] ss:$16 sps:$4 sm:$0xff]  }
 0x110   : > { %7619 = vmatprep.subr.bf16.mxu1 %v10384_v16  ;;  %7606 = vmatprep.mubr.bf16.mxu0 %v12636_v54  ;;  %v312_v16 = vld [vmem:[%s11742_s6 + $0x50] sm:$0xff] }
 0x111   : > { %7649 = vmatprep.mubr.bf16.mxu1 %v12638_v1 }
 0x112   : > { %7577 = vmatpush1.bf16.msra.mxu0 %v10379_v19  ;;  %v328_v19 = vld [vmem:[%s11742_s6 + $0xd0] sm:$0xff] }
 0x113   : > { %7620 = vmatpush1.bf16.msra.mxu1 %v10382_v62  ;;  %7578 = vmatprep.subr.bf16.mxu0 %v10387_v24  ;;  %v721_v62 = vrot.slane %v12569_v13, %v11948_v37  ;;  %v497_v24 = vrot.slane %v12545_v61, %v11951_v38 }
 0x114   : > { %7621 = vmatprep.subr.bf16.mxu1 %v10390_v25  ;;  %v12734_v25 = vrot.slane %v12569_v13, %v11951_v38 }
 0x116   : > { %7579 = vmatpush1.bf16.msra.mxu0 %v10385_v26  ;;  %v354_v26 = vunpack.c.l.bf16 %v312_v16 }
 0x117   : > { %7622 = vmatpush1.bf16.msra.mxu1 %v10388_v28  ;;  %7580 = vmatprep.subr.bf16.mxu0 %v10393_v30  ;;  %v355_v28 = vunpack.c.h.bf16 %v312_v16  ;;  %v386_v30 = vunpack.c.l.bf16 %v328_v19  ;;  %v10426_v16 = vld [vmem:[%s15289_s3 + $0x13e4] ss:$16 sps:$4 sm:$0xff]  }
 0x118   : > { %7623 = vmatprep.subr.bf16.mxu1 %v10396_v31  ;;  %v387_v31 = vunpack.c.h.bf16 %v328_v19 }
 0x11a   : > { %7581 = vmatpush1.bf16.msra.mxu0 %v10391_v32  ;;  %v313_v32 = vld [vmem:[%s11742_s6 + $0x58] sm:$0xff] }
 0x11b   : > { %7624 = vmatpush1.bf16.msra.mxu1 %v10394_v42  ;;  %7582 = vmatprep.subr.bf16.mxu0 %v10399_v63  ;;  %v329_v42 = vld [vmem:[%s11742_s6 + $0xd8] sm:$0xff]  ;;  %v10415_v63 = vld [vmem:[%s15289_s3 + $0x1000] ss:$16 sps:$4 sm:$0xff]  }
 0x11c   : > { %7625 = vmatprep.subr.bf16.mxu1 %v10402_v44  ;;  %v10418_v44 = vld [vmem:[%s15289_s3 + $0x1200] ss:$16 sps:$4 sm:$0xff]  }
 0x11e   : > { %7583 = vmatpush1.bf16.msra.mxu0 %v10397_v46  ;;  %v356_v46 = vunpack.c.l.bf16 %v313_v32 }
 0x11f   : > { %7626 = vmatpush1.bf16.msra.mxu1 %v10400_v49  ;;  %7584 = vmatprep.subr.bf16.mxu0 %v10405_v0  ;;  %v357_v49 = vunpack.c.h.bf16 %v313_v32  ;;  %v388_v0 = vunpack.c.l.bf16 %v329_v42  ;;  %v618_v32 = vmul.f32 %v489_v18, %v386_v30 }
 0x120   : > { %7627 = vmatprep.subr.bf16.mxu1 %v10408_v50  ;;  %v389_v50 = vunpack.c.h.bf16 %v329_v42 }
 0x121   : > { %v589_v19 = vmul.f32 %v501_v15, %v357_v49  ;;  %v620_v42 = vmul.f32 %v497_v24, %v388_v0  ;;  %v10435_v0 = vld [vmem:[%s15289_s3 + $0x11a4] ss:$16 sps:$4 sm:$0xff]  }
 0x122   : > { %7585 = vmatpush1.bf16.msra.mxu0 %v10403_v55  ;;  %v10423_v55 = vld [vmem:[%s15289_s3 + $0x11e4] ss:$16 sps:$4 sm:$0xff]   ;;  %v621_v36 = vmul.f32 %v501_v15, %v389_v50 }
 0x123   : > { %7628 = vmatpush1.bf16.msra.mxu1 %v10406_v6  ;;  %7586 = vmatprep.subr.bf16.mxu0 %v10411_v7  ;;  %v587_v6 = vmul.f32 %v493_v14, %v355_v28  ;;  %v619_v7 = vmul.f32 %v493_v14, %v387_v31  ;;  %v10432_v15 = vld [vmem:[%s15289_s3 + $0x13c4] ss:$16 sps:$4 sm:$0xff]   ;;  %v850_v31 = vadd.f32 %v721_v62, %v618_v32 }
 0x124   : > { %7629 = vmatprep.subr.bf16.mxu1 %v10414_v56  ;;  %v586_v56 = vmul.f32 %v489_v18, %v354_v26  ;;  %v821_v18 = vadd.f32 %v733_v21, %v589_v19  ;;  %v853_v30 = vadd.f32 %v733_v21, %v621_v36  ;;  %v10427_v36 = vld [vmem:[%s15289_s3 + $0x11c0] ss:$16 sps:$4 sm:$0xff]   ;;  %v852_v19 = vadd.f32 %v12734_v25, %v620_v42  ;;  %v10438_v32 = vld [vmem:[%s15289_s3 + $0x13a4] ss:$16 sps:$4 sm:$0xff]  }
 0x125   : > { %v819_v28 = vadd.f32 %v725_v20, %v587_v6  ;;  %v851_v14 = vadd.f32 %v725_v20, %v619_v7  ;;  %vm914_vm9 = vcmp.ge.f32.partialorder %v850_v31, 0.0  ;;  %v473_v42 = vrot.slane %v12545_v61, %v11775_v57 }
 0x126   : > { %7587 = vmatpush1.bf16.msra.mxu0 %v10409_v10  ;;  %v10421_v10 = vld [vmem:[%s15289_s3 + $0x11e0] ss:$16 sps:$4 sm:$0xff]   ;;  %v818_v26 = vadd.f32 %v721_v62, %v586_v56  ;;  %vm885_vm6 = vcmp.ge.f32.partialorder %v821_v18, 0.0  ;;  %vm917_vm7 = vcmp.ge.f32.partialorder %v853_v30, 0.0  ;;  %v981_v50 = vmul.f32 0.2, %v853_v30 }
 0x127   : > { %7630 = vmatpush1.bf16.msra.mxu1 %v10412_v12  ;;  %7588 = vmatprep.subr.bf16.mxu0 %v10417_v17  ;;  %v10424_v12 = vld [vmem:[%s15289_s3 + $0x13e0] ss:$16 sps:$4 sm:$0xff]   ;;  %v588_v17 = vmul.f32 %v497_v24, %v356_v46  ;;  %vm883_vm4 = vcmp.ge.f32.partialorder %v819_v28, 0.0  ;;  %vm915_vm5 = vcmp.ge.f32.partialorder %v851_v14, 0.0  ;;  %v947_v49 = vmul.f32 0.2, %v819_v28 }
 0x128   : > { %7631 = vmatprep.subr.bf16.mxu1 %v10420_v22  ;;  %v10429_v22 = vld [vmem:[%s15289_s3 + $0x11c4] ss:$16 sps:$4 sm:$0xff]   ;;  %v979_v20 = vmul.f32 0.2, %v851_v14  ;;  %v949_v46 = vmul.f32 0.2, %v821_v18  ;;  %v1045_v24 = vsel %vm917_vm7, %v853_v30, %v981_v50 }
 0x129   : > { %v1011_v6 = vsel %vm883_vm4, %v819_v28, %v947_v49  ;;  %vm882_vm8 = vcmp.ge.f32.partialorder %v818_v26, 0.0  ;;  %v978_v56 = vmul.f32 0.2, %v850_v31  ;;  %vm916_vm11 = vcmp.ge.f32.partialorder %v852_v19, 0.0  ;;  %v10442_v50 = vld [vmem:[%s15289_s3 + $0x1380] ss:$16 sps:$4 sm:$0xff]  }
 0x12a   : > { %7589 = vmatpush1.bf16.msra.mxu0 %v10415_v63  ;;  %v1043_v7 = vsel %vm915_vm5, %v851_v14, %v979_v20  ;;  %v1013_v62 = vsel %vm885_vm6, %v821_v18, %v949_v46  ;;  %v946_v63 = vmul.f32 0.2, %v818_v26  ;;  %v10433_v14 = vld [vmem:[%s15289_s3 + $0x11a0] ss:$16 sps:$4 sm:$0xff]   ;;  %v10444_v18 = vld [vmem:[%s15289_s3 + $0x1384] ss:$16 sps:$4 sm:$0xff]   ;;  %v382_v46 = vunpack.c.l.bf16 %v12540_v29 }
 0x12b   : > { %7632 = vmatpush1.bf16.msra.mxu1 %v10418_v44  ;;  %7590 = vmatprep.subr.bf16.mxu0 %v10423_v55  ;;  %v12765_v21 = vpack.c.bf16 %v1043_v7, %v1011_v6  ;;  %v10430_v44 = vld [vmem:[%s15289_s3 + $0x13c0] ss:$16 sps:$4 sm:$0xff]   ;;  %v12773_v55 = vpack.c.bf16 %v1045_v24, %v1013_v62  ;;  %v352_v6 = vunpack.c.l.bf16 %v12548_v2  ;;  %v481_v7 = vrot.slane %v12545_v61, %v11778_v58  ;;  %v10450_v29 = vld [vmem:[%s15289_s3 + $0x1364] ss:$16 sps:$4 sm:$0xff]  }
 0x12c   : > { %7633 = vmatprep.subr.bf16.mxu1 %v10426_v16  ;;  %v820_v16 = vadd.f32 %v12734_v25, %v588_v17  ;;  %v980_v25 = vmul.f32 0.2, %v852_v19  ;;  %v10439_v20 = vld [vmem:[%s15289_s3 + $0x1180] ss:$16 sps:$4 sm:$0xff]   ;;  %v705_v24 = vrot.slane %v12569_v13, %v11775_v57 }
 0x12d   : > { %v10445_v2 = vld [vmem:[%s15289_s3 + $0x1160] ss:$16 sps:$4 sm:$0xff]  }
 0x12e   : > { %7591 = vmatpush2.bf16.msra.mxu0 %v10421_v10  ;;  %v1010_v10 = vsel %vm882_vm8, %v818_v26, %v946_v63  ;;  %vm884_vm10 = vcmp.ge.f32.partialorder %v820_v16, 0.0  ;;  %v948_v28 = vmul.f32 0.2, %v820_v16  ;;  %v10441_v26 = vld [vmem:[%s15289_s3 + $0x1184] ss:$16 sps:$4 sm:$0xff]   ;;  %v1044_v30 = vsel %vm916_vm11, %v852_v19, %v980_v25 }
 0x12f   : > { %7634 = vmatpush2.bf16.msra.mxu1 %v10424_v12  ;;  %7592 = vmatprep.subr.bf16.mxu0 %v10429_v22  ;;  %v1042_v12 = vsel %vm914_vm9, %v850_v31, %v978_v56  ;;  %v10436_v22 = vld [vmem:[%s15289_s3 + $0x13a0] ss:$16 sps:$4 sm:$0xff]   ;;  %v350_v31 = vunpack.c.l.bf16 %v12537_v59  ;;  %v384_v59 = vunpack.c.l.bf16 %v12551_v3  ;;  %v614_v3 = vmul.f32 %v473_v42, %v382_v46  ;;  %v10453_v56 = vld [vmem:[%s15289_s3 + $0x1144] ss:$16 sps:$4 sm:$0xff]  }
 0x130   : > { %7635 = vmatprep.subr.bf16.mxu1 %v10432_v15  ;;  %v12785_v17 = vpack.c.bf16 %v1042_v12, %v1010_v10  ;;  %v1012_v15 = vsel %vm884_vm10, %v820_v16, %v948_v28  ;;  %v10448_v61 = vld [vmem:[%s15289_s3 + $0x1360] ss:$16 sps:$4 sm:$0xff]   ;;  %v584_v63 = vmul.f32 %v481_v7, %v352_v6  ;;  %v10456_v16 = vld [vmem:[%s15289_s3 + $0x1344] ss:$16 sps:$4 sm:$0xff]  }
 0x131   : > { %v12799_v49 = vpack.c.bf16 %v1044_v30, %v1012_v15  ;;  %v582_v62 = vmul.f32 %v473_v42, %v350_v31  ;;  %v846_v10 = vadd.f32 %v705_v24, %v614_v3  ;;  %v10462_v25 = vld [vmem:[%s15289_s3 + $0x1324] ss:$16 sps:$4 sm:$0xff]   ;;  %v10460_v15 = vld [vmem:[%s15289_s3 + $0x1320] ss:$16 sps:$4 sm:$0xff]  }
 0x132   : > { %7593 = vmatpush2.bf16.msra.mxu0 %v10427_v36  ;;  %v10447_v36 = vld [vmem:[%s15289_s3 + $0x1164] ss:$16 sps:$4 sm:$0xff]   ;;  %v10463_v46 = vld [vmem:[%s15289_s3 + $0x1100] ss:$16 sps:$4 sm:$0xff]  }
 0x133   : > { %7636 = vmatpush2.bf16.msra.mxu1 %v10430_v44  ;;  %7594 = vmatprep.subr.bf16.mxu0 %v10435_v0  ;;  %v616_v44 = vmul.f32 %v481_v7, %v384_v59  ;;  %v713_v0 = vrot.slane %v12569_v13, %v11778_v58  ;;  %v814_v19 = vadd.f32 %v705_v24, %v582_v62  ;;  %v10454_v13 = vld [vmem:[%s15289_s3 + $0x1340] ss:$16 sps:$4 sm:$0xff]   ;;  %v974_v30 = vmul.f32 0.2, %v846_v10  ;;  %v10474_v62 = vld [vmem:[%s15289_s3 + $0x16e4] ss:$16 sps:$4 sm:$0xff]  }
 0x134   : > { %7637 = vmatprep.subr.bf16.mxu1 %v10438_v32  ;;  %v10451_v32 = vld [vmem:[%s15289_s3 + $0x1140] ss:$16 sps:$4 sm:$0xff]   ;;  %vm910_vm13 = vcmp.ge.f32.partialorder %v846_v10, 0.0 }
 0x135   : > { %v816_v12 = vadd.f32 %v713_v0, %v584_v63  ;;  %v848_v28 = vadd.f32 %v713_v0, %v616_v44  ;;  %vm878_vm12 = vcmp.ge.f32.partialorder %v814_v19, 0.0  ;;  %v10466_v6 = vld [vmem:[%s15289_s3 + $0x1300] ss:$16 sps:$4 sm:$0xff]   ;;  %v1038_v59 = vsel %vm910_vm13, %v846_v10, %v974_v30  ;;  %v10477_v63 = vld [vmem:[%s15289_s3 + $0x14c4] ss:$16 sps:$4 sm:$0xff]  }
 0x136   : > { %7595 = vmatpush2.bf16.msra.mxu0 %v10433_v14  ;;  %v10459_v14 = vld [vmem:[%s15289_s3 + $0x1124] ss:$16 sps:$4 sm:$0xff]   ;;  %v10469_v3 = vld [vmem:[%s15289_s3 + $0x14e0] ss:$16 sps:$4 sm:$0xff]  }
 0x137   : > { %7638 = vmatpush2.bf16.msra.mxu1 %v10436_v22  ;;  %7596 = vmatprep.subr.bf16.mxu0 %v10441_v26  ;;  %v10457_v22 = vld [vmem:[%s15289_s3 + $0x1120] ss:$16 sps:$4 sm:$0xff]   ;;  %v10465_v26 = vld [vmem:[%s15289_s3 + $0x1104] ss:$16 sps:$4 sm:$0xff]   ;;  %v944_v31 = vmul.f32 0.2, %v816_v12 }
 0x138   : > { %7639 = vmatprep.subr.bf16.mxu1 %v10444_v18  ;;  %v942_v18 = vmul.f32 0.2, %v814_v19  ;;  %v976_v42 = vmul.f32 0.2, %v848_v28  ;;  %vm880_vm14 = vcmp.ge.f32.partialorder %v816_v12, 0.0  ;;  %vm912_vm15 = vcmp.ge.f32.partialorder %v848_v28, 0.0 }
 0x139   : > { %v1008_v7 = vsel %vm880_vm14, %v816_v12, %v944_v31  ;;  %v10480_v44 = vld [vmem:[%s15289_s3 + $0x16c4] ss:$16 sps:$4 sm:$0xff]   ;;  %v10475_v0 = vld [vmem:[%s15289_s3 + $0x14c0] ss:$16 sps:$4 sm:$0xff]  }
 0x13a   : > { %7597 = vmatpush2.bf16.msra.mxu0 %v10439_v20  ;;  %v10468_v20 = vld [vmem:[%s15289_s3 + $0x1304] ss:$16 sps:$4 sm:$0xff]   ;;  %v10484_v10 = vld [vmem:[%s15289_s3 + $0x16a0] ss:$16 sps:$4 sm:$0xff]  }
 0x13b   : > { %7640 = vmatpush2.bf16.msra.mxu1 %v10442_v50  ;;  %7598 = vmatprep.subr.bf16.mxu0 %v10447_v36  ;;  %v1006_v50 = vsel %vm878_vm12, %v814_v19, %v942_v18  ;;  %v1040_v36 = vsel %vm912_vm15, %v848_v28, %v976_v42  ;;  %v10486_v19 = vld [vmem:[%s15289_s3 + $0x16a4] ss:$16 sps:$4 sm:$0xff]   ;;  %v10487_v28 = vld [vmem:[%s15289_s3 + $0x1480] ss:$16 sps:$4 sm:$0xff]  }
 0x13c   : > { %7641 = vmatprep.subr.bf16.mxu1 %v10450_v29  ;;  %v10471_v29 = vld [vmem:[%s15289_s3 + $0x14e4] ss:$16 sps:$4 sm:$0xff]   ;;  %v12870_v24 = vpack.c.bf16 %v1038_v59, %v1006_v50  ;;  %v10499_v31 = vld [vmem:[%s15289_s3 + $0x1440] ss:$16 sps:$4 sm:$0xff]  }
 0x13d   : > { %v10492_v12 = vld [vmem:[%s15289_s3 + $0x1684] ss:$16 sps:$4 sm:$0xff]   ;;  %v10502_v42 = vld [vmem:[%s15289_s3 + $0x1640] ss:$16 sps:$4 sm:$0xff]  }
 0x13e   : > { %7599 = vmatpush2.bf16.msra.mxu0 %v10445_v2  ;;  %v12872_v2 = vpack.c.bf16 %v1040_v36, %v1008_v7  ;;  %v10501_v18 = vld [vmem:[%s15289_s3 + $0x1444] ss:$16 sps:$4 sm:$0xff]   ;;  %v10505_v50 = vld [vmem:[%s15289_s3 + $0x1420] ss:$16 sps:$4 sm:$0xff]  }
 0x13f   : > { %7642 = vmatpush2.bf16.msra.mxu1 %v10448_v61  ;;  %7600 = vmatprep.subr.bf16.mxu0 %v10453_v56  ;;  %v10472_v61 = vld [vmem:[%s15289_s3 + $0x16e0] ss:$16 sps:$4 sm:$0xff]   ;;  %v10504_v30 = vld [vmem:[%s15289_s3 + $0x1644] ss:$16 sps:$4 sm:$0xff]  }
 0x140   : > { %7643 = vmatprep.subr.bf16.mxu1 %v10456_v16  ;;  %v10478_v56 = vld [vmem:[%s15289_s3 + $0x16c0] ss:$16 sps:$4 sm:$0xff]   ;;  %v10483_v16 = vld [vmem:[%s15289_s3 + $0x14a4] ss:$16 sps:$4 sm:$0xff]  }
 0x141   : > { %v10513_v59 = vld [vmem:[%s15289_s3 + $0x1404] ss:$16 sps:$4 sm:$0xff]   ;;  %v10511_v36 = vld [vmem:[%s15289_s3 + $0x1400] ss:$16 sps:$4 sm:$0xff]  }
 0x142   : > { %7601 = vmatpush2.bf16.msra.mxu0 %v10451_v32  ;;  %v10481_v32 = vld [vmem:[%s15289_s3 + $0x14a0] ss:$16 sps:$4 sm:$0xff]   ;;  %v10516_v7 = vld [vmem:[%s15289_s3 + $0x1604] ss:$16 sps:$4 sm:$0xff]  }
 0x143   : > { %7644 = vmatpush2.bf16.msra.mxu1 %v10454_v13  ;;  %7602 = vmatprep.subr.bf16.mxu0 %v10459_v14  ;;  %v10489_v13 = vld [vmem:[%s15289_s3 + $0x1484] ss:$16 sps:$4 sm:$0xff]   ;;  %v10490_v14 = vld [vmem:[%s15289_s3 + $0x1680] ss:$16 sps:$4 sm:$0xff]  }
 0x144   : > { %7645 = vmatprep.subr.bf16.mxu1 %v10462_v25  ;;  %v10495_v25 = vld [vmem:[%s15289_s3 + $0x1464] ss:$16 sps:$4 sm:$0xff]  }
 0x146   : > { %7603 = vmatpush2.bf16.msra.mxu0 %v10457_v22  ;;  %v10498_v22 = vld [vmem:[%s15289_s3 + $0x1664] ss:$16 sps:$4 sm:$0xff]  }
 0x147   : > { %7646 = vmatpush2.bf16.msra.mxu1 %v10460_v15  ;;  %7604 = vmatprep.subr.bf16.mxu0 %v10465_v26  ;;  %v10493_v15 = vld [vmem:[%s15289_s3 + $0x1460] ss:$16 sps:$4 sm:$0xff]  }
 0x148   : > { %7647 = vmatprep.subr.bf16.mxu1 %v10468_v20  ;;  %v10496_v26 = vld [vmem:[%s15289_s3 + $0x1660] ss:$16 sps:$4 sm:$0xff]   ;;  %v10507_v20 = vld [vmem:[%s15289_s3 + $0x1424] ss:$16 sps:$4 sm:$0xff]  }
 0x14a   : > { %7605 = vmatpush2.bf16.msra.mxu0 %v10463_v46  ;;  %v10510_v46 = vld [vmem:[%s15289_s3 + $0x1624] ss:$16 sps:$4 sm:$0xff]  }
 0x14b   : > { %7648 = vmatpush2.bf16.msra.mxu1 %v10466_v6  ;;  %7660 = vmatprep.subr.bf16.mxu0 %v10471_v29  ;;  %v10508_v6 = vld [vmem:[%s15289_s3 + $0x1620] ss:$16 sps:$4 sm:$0xff]  }
 0x14c   : > { %7703 = vmatprep.subr.bf16.mxu1 %v10474_v62  ;;  %v10514_v29 = vld [vmem:[%s15289_s3 + $0x1600] ss:$16 sps:$4 sm:$0xff]   ;;  %v10519_v62 = vld [vmem:[%s15289_s3 + $0x15e4] ss:$16 sps:$4 sm:$0xff]  }
 0x14d   : > { %7607 = vmatmul.mubr.bf16.vlgmr.msra.gmra.mxu0 %v12870_v24 }
 0x14e   : > { %7650 = vmatmul.mubr.bf16.vlgmr.msra.gmra.mxu1 %v12872_v2  ;;  %7661 = vmatpush1.bf16.msra.mxu0 %v10469_v3  ;;  %v10522_v3 = vld [vmem:[%s15289_s3 + $0x17e4] ss:$16 sps:$4 sm:$0xff]  }
 0x14f   : > { %7704 = vmatpush1.bf16.msra.mxu1 %v10472_v61  ;;  %7662 = vmatprep.subr.bf16.mxu0 %v10477_v63  ;;  %v12975_v61 = vld [vmem:[%s11742_s6 + $0x60] sm:$0xff] }
 0x150   : > { %7705 = vmatprep.subr.bf16.mxu1 %v10480_v44  ;;  %7692 = vmatprep.mubr.bf16.mxu0 %v12765_v21  ;;  %v12978_v63 = vld [vmem:[%s11742_s6 + $0xe0] sm:$0xff] }
 0x151   : > { %7735 = vmatprep.mubr.bf16.mxu1 %v12773_v55  ;;  %v10517_v44 = vld [vmem:[%s15289_s3 + $0x15e0] ss:$16 sps:$4 sm:$0xff]  }
 0x152   : > { %7663 = vmatpush1.bf16.msra.mxu0 %v10475_v0  ;;  %v12986_v0 = vld [vmem:[%s15287_s1 + $0x18] sm:$0xff] }
 0x153   : > { %7706 = vmatpush1.bf16.msra.mxu1 %v10478_v56  ;;  %7664 = vmatprep.subr.bf16.mxu0 %v10483_v16  ;;  %v12989_v56 = vld [vmem:[%s11742_s6 + $0x68] sm:$0xff]  ;;  %v10520_v16 = vld [vmem:[%s15289_s3 + $0x17e0] ss:$16 sps:$4 sm:$0xff]  }
 0x154   : > { %7707 = vmatprep.subr.bf16.mxu1 %v10486_v19  ;;  %v12995_v19 = vld [vmem:[%s11742_s6 + $0xe8] sm:$0xff] }
 0x156   : > { %7665 = vmatpush1.bf16.msra.mxu0 %v10481_v32  ;;  %v10525_v32 = vld [vmem:[%s15289_s3 + $0x15c4] ss:$16 sps:$4 sm:$0xff]  }
 0x157   : > { %7708 = vmatpush1.bf16.msra.mxu1 %v10484_v10  ;;  %7666 = vmatprep.subr.bf16.mxu0 %v10489_v13  ;;  %v10528_v10 = vld [vmem:[%s15289_s3 + $0x17c4] ss:$16 sps:$4 sm:$0xff]   ;;  %v359_v13 = vunpack.c.h.bf16 %v12975_v61 }
 0x158   : > { %7709 = vmatprep.subr.bf16.mxu1 %v10492_v12  ;;  %v391_v12 = vunpack.c.h.bf16 %v12978_v63 }
 0x15a   : > { %7667 = vmatpush1.bf16.msra.mxu0 %v10487_v28  ;;  %v509_v28 = vrot.slane %v12986_v0, %v11748_v47 }
 0x15b   : > { %7710 = vmatpush1.bf16.msra.mxu1 %v10490_v14  ;;  %7668 = vmatprep.subr.bf16.mxu0 %v10495_v25  ;;  %v13010_v14 = vld [vmem:[%s15288_s2 + $0x18] sm:$0xff]  ;;  %v361_v25 = vunpack.c.h.bf16 %v12989_v56 }
 0x15c   : > { %7711 = vmatprep.subr.bf16.mxu1 %v10498_v22  ;;  %v517_v22 = vrot.slane %v12986_v0, %v11761_v52 }
 0x15e   : > { %7669 = vmatpush1.bf16.msra.mxu0 %v10493_v15  ;;  %v393_v15 = vunpack.c.h.bf16 %v12995_v19 }
 0x15f   : > { %7712 = vmatpush1.bf16.msra.mxu1 %v10496_v26  ;;  %7670 = vmatprep.subr.bf16.mxu0 %v10501_v18  ;;  %v10523_v26 = vld [vmem:[%s15289_s3 + $0x15c0] ss:$16 sps:$4 sm:$0xff]  }
 0x160   : > { %7713 = vmatprep.subr.bf16.mxu1 %v10504_v30  ;;  %v10526_v18 = vld [vmem:[%s15289_s3 + $0x17c0] ss:$16 sps:$4 sm:$0xff]   ;;  %v10531_v30 = vld [vmem:[%s15289_s3 + $0x15a4] ss:$16 sps:$4 sm:$0xff]  }
 0x162   : > { %7671 = vmatpush1.bf16.msra.mxu0 %v10499_v31  ;;  %v10534_v31 = vld [vmem:[%s15289_s3 + $0x17a4] ss:$16 sps:$4 sm:$0xff]  }
 0x163   : > { %7714 = vmatpush1.bf16.msra.mxu1 %v10502_v42  ;;  %7672 = vmatprep.subr.bf16.mxu0 %v10507_v20  ;;  %v591_v42 = vmul.f32 %v509_v28, %v359_v13  ;;  %v623_v20 = vmul.f32 %v509_v28, %v391_v12  ;;  %v10546_v13 = vld [vmem:[%s15289_s3 + $0x1764] ss:$16 sps:$4 sm:$0xff]  }
 0x164   : > { %7715 = vmatprep.subr.bf16.mxu1 %v10510_v46  ;;  %v741_v46 = vrot.slane %v13010_v14, %v11748_v47  ;;  %v10537_v47 = vld [vmem:[%s15289_s3 + $0x1584] ss:$16 sps:$4 sm:$0xff]  }
 0x166   : > { %7673 = vmatpush1.bf16.msra.mxu0 %v10505_v50  ;;  %v593_v50 = vmul.f32 %v517_v22, %v361_v25  ;;  %v10541_v25 = vld [vmem:[%s15289_s3 + $0x1560] ss:$16 sps:$4 sm:$0xff]  }
 0x167   : > { %7716 = vmatpush1.bf16.msra.mxu1 %v10508_v6  ;;  %7674 = vmatprep.subr.bf16.mxu0 %v10513_v59  ;;  %v749_v6 = vrot.slane %v13010_v14, %v11761_v52  ;;  %v625_v59 = vmul.f32 %v517_v22, %v393_v15  ;;  %v10540_v52 = vld [vmem:[%s15289_s3 + $0x1784] ss:$16 sps:$4 sm:$0xff]   ;;  %v10544_v22 = vld [vmem:[%s15289_s3 + $0x1760] ss:$16 sps:$4 sm:$0xff]  }
 0x168   : > { %7717 = vmatprep.subr.bf16.mxu1 %v10516_v7  ;;  %v10529_v7 = vld [vmem:[%s15289_s3 + $0x15a0] ss:$16 sps:$4 sm:$0xff]  }
 0x16a   : > { %7675 = vmatpush1.bf16.msra.mxu0 %v10511_v36  ;;  %v10532_v36 = vld [vmem:[%s15289_s3 + $0x17a0] ss:$16 sps:$4 sm:$0xff]  }
 0x16b   : > { %7718 = vmatpush1.bf16.msra.mxu1 %v10514_v29  ;;  %7676 = vmatprep.subr.bf16.mxu0 %v10519_v62  ;;  %v823_v29 = vadd.f32 %v741_v46, %v591_v42  ;;  %v855_v62 = vadd.f32 %v741_v46, %v623_v20 }
 0x16c   : > { %7719 = vmatprep.subr.bf16.mxu1 %v10522_v3  ;;  %v10535_v3 = vld [vmem:[%s15289_s3 + $0x1580] ss:$16 sps:$4 sm:$0xff]  }
 0x16d   : > { %v951_v12 = vmul.f32 0.2, %v823_v29  ;;  %v983_v28 = vmul.f32 0.2, %v855_v62  ;;  %vm887_vm0 = vcmp.ge.f32.partialorder %v823_v29, 0.0  ;;  %vm919_vm1 = vcmp.ge.f32.partialorder %v855_v62, 0.0 }
 0x16e   : > { %7677 = vmatpush2.bf16.msra.mxu0 %v10517_v44  ;;  %v825_v44 = vadd.f32 %v749_v6, %v593_v50  ;;  %v10547_v50 = vld [vmem:[%s15289_s3 + $0x1540] ss:$16 sps:$4 sm:$0xff]  }
 0x16f   : > { %7720 = vmatpush2.bf16.msra.mxu1 %v10520_v16  ;;  %7678 = vmatprep.subr.bf16.mxu0 %v10525_v32  ;;  %v10538_v16 = vld [vmem:[%s15289_s3 + $0x1780] ss:$16 sps:$4 sm:$0xff]   ;;  %v857_v32 = vadd.f32 %v749_v6, %v625_v59  ;;  %v1047_v42 = vsel %vm919_vm1, %v855_v62, %v983_v28  ;;  %v10555_v59 = vld [vmem:[%s15289_s3 + $0x1524] ss:$16 sps:$4 sm:$0xff]   ;;  %v317_v62 = vld [vmem:[%s11742_s6 + $0x78] sm:$0xff] }
 0x170   : > { %7721 = vmatprep.subr.bf16.mxu1 %v10528_v10  ;;  %v10543_v10 = vld [vmem:[%s15289_s3 + $0x1564] ss:$16 sps:$4 sm:$0xff]   ;;  %v953_v15 = vmul.f32 0.2, %v825_v44  ;;  %vm889_vm2 = vcmp.ge.f32.partialorder %v825_v44, 0.0 }
 0x171   : > { %vm921_vm3 = vcmp.ge.f32.partialorder %v857_v32, 0.0  ;;  %v10550_v6 = vld [vmem:[%s15289_s3 + $0x1740] ss:$16 sps:$4 sm:$0xff]  }
 0x172   : > { %7679 = vmatpush2.bf16.msra.mxu0 %v10523_v26  ;;  %v985_v26 = vmul.f32 0.2, %v857_v32  ;;  %v1017_v20 = vsel %vm889_vm2, %v825_v44, %v953_v15 }
 0x173   : > { %7722 = vmatpush2.bf16.msra.mxu1 %v10526_v18  ;;  %7680 = vmatprep.subr.bf16.mxu0 %v10531_v30  ;;  %v10549_v18 = vld [vmem:[%s15289_s3 + $0x1544] ss:$16 sps:$4 sm:$0xff]  }
 0x174   : > { %7723 = vmatprep.subr.bf16.mxu1 %v10534_v31  ;;  %v10552_v30 = vld [vmem:[%s15289_s3 + $0x1744] ss:$16 sps:$4 sm:$0xff]   ;;  %v1015_v31 = vsel %vm887_vm0, %v823_v29, %v951_v12  ;;  %v1049_v46 = vsel %vm921_vm3, %v857_v32, %v985_v26  ;;  %v333_v32 = vld [vmem:[%s11742_s6 + $0xf8] sm:$0xff]  ;;  %v10556_v12 = vld [vmem:[%s15289_s3 + $0x1720] ss:$16 sps:$4 sm:$0xff]  }
 0x175   : > { %v332_v29 = vld [vmem:[%s11742_s6 + $0xf0] sm:$0xff]  ;;  %v396_v15 = vunpack.c.l.bf16 %v333_v32 }
 0x176   : > { %7681 = vmatpush2.bf16.msra.mxu0 %v10529_v7  ;;  %v10558_v7 = vld [vmem:[%s15289_s3 + $0x1724] ss:$16 sps:$4 sm:$0xff]   ;;  %v395_v44 = vunpack.c.h.bf16 %v332_v29 }
 0x177   : > { %7724 = vmatpush2.bf16.msra.mxu1 %v10532_v36  ;;  %7682 = vmatprep.subr.bf16.mxu0 %v10537_v47  ;;  %v13080_v36 = vpack.c.bf16 %v1047_v42, %v1015_v31  ;;  %v13082_v47 = vpack.c.bf16 %v1049_v46, %v1017_v20  ;;  %v10561_v26 = vld [vmem:[%s15289_s3 + $0x1504] ss:$16 sps:$4 sm:$0xff]   ;;  %v757_v42 = vrot.slane %v13010_v14, %v11939_v33  ;;  %v397_v20 = vunpack.c.h.bf16 %v333_v32 }
 0x178   : > { %7725 = vmatprep.subr.bf16.mxu1 %v10540_v52  ;;  %v316_v52 = vld [vmem:[%s11742_s6 + $0x70] sm:$0xff]  ;;  %v533_v46 = vrot.slane %v12986_v0, %v11945_v35 }
 0x179   : > { %v362_v28 = vunpack.c.l.bf16 %v316_v52 }
 0x17a   : > { %7683 = vmatpush2.bf16.msra.mxu0 %v10535_v3  ;;  %v363_v3 = vunpack.c.h.bf16 %v316_v52 }
 0x17b   : > { %7726 = vmatpush2.bf16.msra.mxu1 %v10538_v16  ;;  %7684 = vmatprep.subr.bf16.mxu0 %v10543_v10  ;;  %v525_v16 = vrot.slane %v12986_v0, %v11939_v33  ;;  %v365_v10 = vunpack.c.h.bf16 %v317_v62  ;;  %v761_v33 = vrot.slane %v13010_v14, %v11951_v38 }
 0x17c   : > { %7727 = vmatprep.subr.bf16.mxu1 %v10546_v13  ;;  %v10553_v13 = vld [vmem:[%s15289_s3 + $0x1520] ss:$16 sps:$4 sm:$0xff]  }
 0x17d   : > { %v627_v31 = vmul.f32 %v525_v16, %v395_v44 }
 0x17e   : > { %7685 = vmatpush2.bf16.msra.mxu0 %v10541_v25  ;;  %v394_v25 = vunpack.c.l.bf16 %v332_v29  ;;  %v529_v29 = vrot.slane %v12986_v0, %v11951_v38  ;;  %v10570_v38 = vld [vmem:[%s15289_s3 + $0x1ae4] ss:$16 sps:$4 sm:$0xff]  }
 0x17f   : > { %7728 = vmatpush2.bf16.msra.mxu1 %v10544_v22  ;;  %7686 = vmatprep.subr.bf16.mxu0 %v10549_v18  ;;  %v364_v22 = vunpack.c.l.bf16 %v317_v62  ;;  %v10564_v18 = vld [vmem:[%s15289_s3 + $0x1704] ss:$16 sps:$4 sm:$0xff]   ;;  %v859_v52 = vadd.f32 %v757_v42, %v627_v31  ;;  %v10562_v62 = vld [vmem:[%s15289_s3 + $0x1700] ss:$16 sps:$4 sm:$0xff]  }
 0x180   : > { %7729 = vmatprep.subr.bf16.mxu1 %v10552_v30  ;;  %v595_v30 = vmul.f32 %v525_v16, %v363_v3  ;;  %v597_v3 = vmul.f32 %v533_v46, %v365_v10  ;;  %v10567_v16 = vld [vmem:[%s15289_s3 + $0x18e4] ss:$16 sps:$4 sm:$0xff]   ;;  %v10565_v10 = vld [vmem:[%s15289_s3 + $0x18e0] ss:$16 sps:$4 sm:$0xff]  }
 0x181   : > { %vm923_vm5 = vcmp.ge.f32.partialorder %v859_v52, 0.0  ;;  %v10573_v31 = vld [vmem:[%s15289_s3 + $0x18c4] ss:$16 sps:$4 sm:$0xff]  }
 0x182   : > { %7687 = vmatpush2.bf16.msra.mxu0 %v10547_v50  ;;  %v765_v50 = vrot.slane %v13010_v14, %v11945_v35  ;;  %v10559_v35 = vld [vmem:[%s15289_s3 + $0x1500] ss:$16 sps:$4 sm:$0xff]  }
 0x183   : > { %7730 = vmatpush2.bf16.msra.mxu1 %v10550_v6  ;;  %7688 = vmatprep.subr.bf16.mxu0 %v10555_v59  ;;  %v521_v6 = vrot.slane %v12986_v0, %v11948_v37  ;;  %v753_v59 = vrot.slane %v13010_v14, %v11948_v37  ;;  %v629_v37 = vmul.f32 %v533_v46, %v397_v20 }
 0x184   : > { %7731 = vmatprep.subr.bf16.mxu1 %v10558_v7  ;;  %v827_v7 = vadd.f32 %v757_v42, %v595_v30  ;;  %v628_v30 = vmul.f32 %v529_v29, %v396_v15 }
 0x185   : > { %v594_v44 = vmul.f32 %v521_v6, %v362_v28  ;;  %v10568_v28 = vld [vmem:[%s15289_s3 + $0x1ae0] ss:$16 sps:$4 sm:$0xff]  }
 0x186   : > { %7689 = vmatpush2.bf16.msra.mxu0 %v10553_v13  ;;  %v955_v32 = vmul.f32 0.2, %v827_v7  ;;  %v626_v13 = vmul.f32 %v521_v6, %v394_v25  ;;  %vm891_vm4 = vcmp.ge.f32.partialorder %v827_v7, 0.0  ;;  %v861_v25 = vadd.f32 %v765_v50, %v629_v37 }
 0x187   : > { %7732 = vmatpush2.bf16.msra.mxu1 %v10556_v12  ;;  %7690 = vmatprep.subr.bf16.mxu0 %v10561_v26  ;;  %v596_v12 = vmul.f32 %v529_v29, %v364_v22  ;;  %v987_v26 = vmul.f32 0.2, %v859_v52  ;;  %v826_v22 = vadd.f32 %v753_v59, %v594_v44  ;;  %v10576_v29 = vld [vmem:[%s15289_s3 + $0x1ac4] ss:$16 sps:$4 sm:$0xff]   ;;  %v10574_v44 = vld [vmem:[%s15289_s3 + $0x1ac0] ss:$16 sps:$4 sm:$0xff]  }
 0x188   : > { %7733 = vmatprep.subr.bf16.mxu1 %v10564_v18  ;;  %v829_v18 = vadd.f32 %v765_v50, %v597_v3  ;;  %v1019_v42 = vsel %vm891_vm4, %v827_v7, %v955_v32  ;;  %v858_v15 = vadd.f32 %v753_v59, %v626_v13  ;;  %vm925_vm7 = vcmp.ge.f32.partialorder %v861_v25, 0.0 }
 0x189   : > { %v1051_v20 = vsel %vm923_vm5, %v859_v52, %v987_v26  ;;  %v828_v6 = vadd.f32 %v761_v33, %v596_v12  ;;  %v989_v40 = vmul.f32 0.2, %v861_v25  ;;  %vm890_vm8 = vcmp.ge.f32.partialorder %v826_v22, 0.0  ;;  %v10571_v52 = vld [vmem:[%s15289_s3 + $0x18c0] ss:$16 sps:$4 sm:$0xff]  }
 0x18a   : > { %7691 = vmatpush2.bf16.msra.mxu0 %v10559_v35  ;;  %vm893_vm6 = vcmp.ge.f32.partialorder %v829_v18, 0.0  ;;  %v957_v46 = vmul.f32 0.2, %v829_v18  ;;  %v13140_v3 = vpack.c.bf16 %v1051_v20, %v1019_v42  ;;  %vm922_vm9 = vcmp.ge.f32.partialorder %v858_v15, 0.0  ;;  %v10588_v42 = vld [vmem:[%s15289_s3 + $0x1a84] ss:$16 sps:$4 sm:$0xff]  }
 0x18b   : > { %7734 = vmatpush2.bf16.msra.mxu1 %v10562_v62  ;;  %7746 = vmatprep.subr.bf16.mxu0 %v10567_v16  ;;  %v954_v59 = vmul.f32 0.2, %v826_v22  ;;  %v986_v7 = vmul.f32 0.2, %v858_v15  ;;  %v1053_v35 = vsel %vm925_vm7, %v861_v25, %v989_v40  ;;  %v860_v62 = vadd.f32 %v761_v33, %v628_v30  ;;  %v10579_v16 = vld [vmem:[%s15289_s3 + $0x18a4] ss:$16 sps:$4 sm:$0xff]  }
 0x18c   : > { %7789 = vmatprep.subr.bf16.mxu1 %v10570_v38  ;;  %15300 = vst [vmem:[#allocation3_spill] sm:$0xff] %v13140_v3  ;;  %v1021_v50 = vsel %vm893_vm6, %v829_v18, %v957_v46  ;;  %vm892_vm10 = vcmp.ge.f32.partialorder %v828_v6, 0.0  ;;  %v956_v37 = vmul.f32 0.2, %v828_v6  ;;  %v10582_v40 = vld [vmem:[%s15289_s3 + $0x1aa4] ss:$16 sps:$4 sm:$0xff]  }
 0x18d   : > { %7693 = vmatmul.mubr.bf16.vlgmr.msra.gmra.mxu0 %v12785_v17  ;;  %v13153_v38 = vpack.c.bf16 %v1053_v35, %v1021_v50  ;;  %v1018_v32 = vsel %vm890_vm8, %v826_v22, %v954_v59  ;;  %v1050_v33 = vsel %vm922_vm9, %v858_v15, %v986_v7  ;;  %vm924_vm11 = vcmp.ge.f32.partialorder %v860_v62, 0.0  ;;  %v10577_v30 = vld [vmem:[%s15289_s3 + $0x18a0] ss:$16 sps:$4 sm:$0xff]   ;;  %v10591_v15 = vld [vmem:[%s15289_s3 + $0x1864] ss:$16 sps:$4 sm:$0xff]  }
 0x18e   : > { %7736 = vmatmul.mubr.bf16.vlgmr.msra.gmra.mxu1 %v12799_v49  ;;  %7747 = vmatpush1.bf16.msra.mxu0 %v10565_v10  ;;  %v988_v13 = vmul.f32 0.2, %v860_v62  ;;  %v1020_v12 = vsel %vm892_vm10, %v828_v6, %v956_v37  ;;  %v10580_v10 = vld [vmem:[%s15289_s3 + $0x1aa0] ss:$16 sps:$4 sm:$0xff]   ;;  %v10594_v20 = vld [vmem:[%s15289_s3 + $0x1a64] ss:$16 sps:$4 sm:$0xff]  }
 0x18f   : > { %7790 = vmatpush1.bf16.msra.mxu1 %v10568_v28  ;;  %15301 = vst [vmem:[#allocation4_spill] sm:$0xff] %v13153_v38  ;;  %7748 = vmatprep.subr.bf16.mxu0 %v10573_v31  ;;  %v13168_v28 = vpack.c.bf16 %v1050_v33, %v1018_v32  ;;  %v10585_v31 = vld [vmem:[%s15289_s3 + $0x1884] ss:$16 sps:$4 sm:$0xff]   ;;  %v10583_v25 = vld [vmem:[%s15289_s3 + $0x1880] ss:$16 sps:$4 sm:$0xff]  }
 0x190   : > { %7791 = vmatprep.subr.bf16.mxu1 %v10576_v29  ;;  %7778 = vmatprep.mubr.bf16.mxu0 %v13080_v36  ;;  %v1052_v26 = vsel %vm924_vm11, %v860_v62, %v988_v13  ;;  %v10586_v22 = vld [vmem:[%s15289_s3 + $0x1a80] ss:$16 sps:$4 sm:$0xff]   ;;  %v10597_v29 = vld [vmem:[%s15289_s3 + $0x1844] ss:$16 sps:$4 sm:$0xff]  }
 0x191   : > { %7821 = vmatprep.mubr.bf16.mxu1 %v13082_v47  ;;  %15302 = vst [vmem:[#allocation5_spill] sm:$0xff] %v13168_v28  ;;  %v13170_v18 = vpack.c.bf16 %v1052_v26, %v1020_v12  ;;  %v10589_v46 = vld [vmem:[%s15289_s3 + $0x1860] ss:$16 sps:$4 sm:$0xff]   ;;  %v10600_v50 = vld [vmem:[%s15289_s3 + $0x1a44] ss:$16 sps:$4 sm:$0xff]  }
 0x192   : > { %7749 = vmatpush1.bf16.msra.mxu0 %v10571_v52  ;;  %v10592_v6 = vld [vmem:[%s15289_s3 + $0x1a60] ss:$16 sps:$4 sm:$0xff]   ;;  %v10603_v52 = vld [vmem:[%s15289_s3 + $0x1824] ss:$16 sps:$4 sm:$0xff]  }
 0x193   : > { %7792 = vmatpush1.bf16.msra.mxu1 %v10574_v44  ;;  %15303 = vst [vmem:[#allocation6_spill] sm:$0xff] %v13170_v18  ;;  %7750 = vmatprep.subr.bf16.mxu0 %v10579_v16  ;;  %v10595_v59 = vld [vmem:[%s15289_s3 + $0x1840] ss:$16 sps:$4 sm:$0xff]   ;;  %v10606_v35 = vld [vmem:[%s15289_s3 + $0x1a24] ss:$16 sps:$4 sm:$0xff]  }
 0x194   : > { %7793 = vmatprep.subr.bf16.mxu1 %v10582_v40  ;;  %v10598_v7 = vld [vmem:[%s15289_s3 + $0x1a40] ss:$16 sps:$4 sm:$0xff]   ;;  %v10609_v44 = vld [vmem:[%s15289_s3 + $0x1804] ss:$16 sps:$4 sm:$0xff]  }
 0x195   : > { %v10601_v62 = vld [vmem:[%s15289_s3 + $0x1820] ss:$16 sps:$4 sm:$0xff]   ;;  %v10612_v16 = vld [vmem:[%s15289_s3 + $0x1a04] ss:$16 sps:$4 sm:$0xff]  }
 0x196   : > { %7751 = vmatpush1.bf16.msra.mxu0 %v10577_v30  ;;  %v10604_v37 = vld [vmem:[%s15289_s3 + $0x1a20] ss:$16 sps:$4 sm:$0xff]   ;;  %v10615_v33 = vld [vmem:[%s15289_s3 + $0x19e4] ss:$16 sps:$4 sm:$0xff]  }
 0x197   : > { %7794 = vmatpush1.bf16.msra.mxu1 %v10580_v10  ;;  %7752 = vmatprep.subr.bf16.mxu0 %v10585_v31  ;;  %v10607_v32 = vld [vmem:[%s15289_s3 + $0x1800] ss:$16 sps:$4 sm:$0xff]   ;;  %v10618_v13 = vld [vmem:[%s15289_s3 + $0x1be4] ss:$16 sps:$4 sm:$0xff]  }
 0x198   : > { %7795 = vmatprep.subr.bf16.mxu1 %v10588_v42  ;;  %v10610_v40 = vld [vmem:[%s15289_s3 + $0x1a00] ss:$16 sps:$4 sm:$0xff]   ;;  %v10621_v10 = vld [vmem:[%s15289_s3 + $0x19c4] ss:$16 sps:$4 sm:$0xff]  }
 0x199   : > { %v10613_v12 = vld [vmem:[%s15289_s3 + $0x19e0] ss:$16 sps:$4 sm:$0xff]   ;;  %v10624_v26 = vld [vmem:[%s15289_s3 + $0x1bc4] ss:$16 sps:$4 sm:$0xff]  }
 0x19a   : > { %7753 = vmatpush1.bf16.msra.mxu0 %v10583_v25  ;;  %v10616_v30 = vld [vmem:[%s15289_s3 + $0x1be0] ss:$16 sps:$4 sm:$0xff]   ;;  %v10627_v25 = vld [vmem:[%s15289_s3 + $0x19a4] ss:$16 sps:$4 sm:$0xff]  }
 0x19b   : > { %7796 = vmatpush1.bf16.msra.mxu1 %v10586_v22  ;;  %7754 = vmatprep.subr.bf16.mxu0 %v10591_v15  ;;  %v10619_v31 = vld [vmem:[%s15289_s3 + $0x19c0] ss:$16 sps:$4 sm:$0xff]   ;;  %v10630_v22 = vld [vmem:[%s15289_s3 + $0x1ba4] ss:$16 sps:$4 sm:$0xff]  }
 0x19c   : > { %7797 = vmatprep.subr.bf16.mxu1 %v10594_v20  ;;  %v10622_v42 = vld [vmem:[%s15289_s3 + $0x1bc0] ss:$16 sps:$4 sm:$0xff]  }
 0x19d   : > { %v10625_v15 = vld [vmem:[%s15289_s3 + $0x19a0] ss:$16 sps:$4 sm:$0xff]  }
 0x19e   : > { %7755 = vmatpush1.bf16.msra.mxu0 %v10589_v46  ;;  %v10628_v20 = vld [vmem:[%s15289_s3 + $0x1ba0] ss:$16 sps:$4 sm:$0xff]   ;;  %v10633_v46 = vld [vmem:[%s15289_s3 + $0x1984] ss:$16 sps:$4 sm:$0xff]  }
 0x19f   : > { %7798 = vmatpush1.bf16.msra.mxu1 %v10592_v6  ;;  %7756 = vmatprep.subr.bf16.mxu0 %v10597_v29  ;;  %v10636_v6 = vld [vmem:[%s15289_s3 + $0x1b84] ss:$16 sps:$4 sm:$0xff]   ;;  %v358_v29 = vunpack.c.l.bf16 %v12975_v61  ;;  %v513_v61 = vrot.slane %v12986_v0, %v11778_v58 }
 0x1a0   : > { %7799 = vmatprep.subr.bf16.mxu1 %v10600_v50  ;;  %v505_v50 = vrot.slane %v12986_v0, %v11775_v57  ;;  %v10637_v0 = vld [vmem:[%s15289_s3 + $0x1960] ss:$16 sps:$4 sm:$0xff]  }
 0x1a2   : > { %7757 = vmatpush1.bf16.msra.mxu0 %v10595_v59  ;;  %v390_v59 = vunpack.c.l.bf16 %v12978_v63  ;;  %v10639_v63 = vld [vmem:[%s15289_s3 + $0x1964] ss:$16 sps:$4 sm:$0xff]  }
 0x1a3   : > { %7800 = vmatpush1.bf16.msra.mxu1 %v10598_v7  ;;  %7758 = vmatprep.subr.bf16.mxu0 %v10603_v52  ;;  %v10631_v7 = vld [vmem:[%s15289_s3 + $0x1980] ss:$16 sps:$4 sm:$0xff]  }
 0x1a4   : > { %7801 = vmatprep.subr.bf16.mxu1 %v10606_v35  ;;  %v10634_v52 = vld [vmem:[%s15289_s3 + $0x1b80] ss:$16 sps:$4 sm:$0xff]   ;;  %v360_v35 = vunpack.c.l.bf16 %v12989_v56  ;;  %v622_v56 = vmul.f32 %v505_v50, %v390_v59 }
 0x1a6   : > { %7759 = vmatpush1.bf16.msra.mxu0 %v10601_v62  ;;  %v392_v62 = vunpack.c.l.bf16 %v12995_v19  ;;  %v10640_v19 = vld [vmem:[%s15289_s3 + $0x1b60] ss:$16 sps:$4 sm:$0xff]  }
 0x1a7   : > { %7802 = vmatpush1.bf16.msra.mxu1 %v10604_v37  ;;  %7760 = vmatprep.subr.bf16.mxu0 %v10609_v44  ;;  %v10642_v37 = vld [vmem:[%s15289_s3 + $0x1b64] ss:$16 sps:$4 sm:$0xff]   ;;  %v590_v44 = vmul.f32 %v505_v50, %v358_v29 }
 0x1a8   : > { %7803 = vmatprep.subr.bf16.mxu1 %v10612_v16  ;;  %v737_v16 = vrot.slane %v13010_v14, %v11775_v57  ;;  %v10645_v57 = vld [vmem:[%s15289_s3 + $0x1944] ss:$16 sps:$4 sm:$0xff]  }
 0x1a9   : > { %v10660_v50 = vld [vmem:[%s15289_s3 + $0x1b04] ss:$16 sps:$4 sm:$0xff]  }
 0x1aa   : > { %7761 = vmatpush1.bf16.msra.mxu0 %v10607_v32  ;;  %v592_v32 = vmul.f32 %v513_v61, %v360_v35 }
 0x1ab   : > { %7804 = vmatpush1.bf16.msra.mxu1 %v10610_v40  ;;  %7762 = vmatprep.subr.bf16.mxu0 %v10615_v33  ;;  %v624_v40 = vmul.f32 %v513_v61, %v392_v62  ;;  %v745_v33 = vrot.slane %v13010_v14, %v11778_v58  ;;  %v10646_v58 = vld [vmem:[%s15289_s3 + $0x1b40] ss:$16 sps:$4 sm:$0xff]  }
 0x1ac   : > { %7805 = vmatprep.subr.bf16.mxu1 %v10618_v13  ;;  %v10648_v13 = vld [vmem:[%s15289_s3 + $0x1b44] ss:$16 sps:$4 sm:$0xff]  }
 0x1ad   : > { %v824_v14 = vadd.f32 %v745_v33, %v592_v32  ;;  %v10672_v32 = vld [vmem:[%s15289_s3 + $0x1ec4] ss:$16 sps:$4 sm:$0xff]  }
 0x1ae   : > { %7763 = vmatpush2.bf16.msra.mxu0 %v10613_v12  ;;  %v822_v12 = vadd.f32 %v737_v16, %v590_v44  ;;  %v10661_v44 = vld [vmem:[%s15289_s3 + $0x1ce0] ss:$16 sps:$4 sm:$0xff]  }
 0x1af   : > { %7806 = vmatpush2.bf16.msra.mxu1 %v10616_v30  ;;  %7764 = vmatprep.subr.bf16.mxu0 %v10621_v10  ;;  %v854_v30 = vadd.f32 %v737_v16, %v622_v56  ;;  %v10643_v10 = vld [vmem:[%s15289_s3 + $0x1940] ss:$16 sps:$4 sm:$0xff]   ;;  %vm888_vm14 = vcmp.ge.f32.partialorder %v824_v14, 0.0 }
 0x1b0   : > { %7807 = vmatprep.subr.bf16.mxu1 %v10624_v26  ;;  %v856_v26 = vadd.f32 %v745_v33, %v624_v40  ;;  %vm886_vm12 = vcmp.ge.f32.partialorder %v822_v12, 0.0  ;;  %v10664_v16 = vld [vmem:[%s15289_s3 + $0x1ee0] ss:$16 sps:$4 sm:$0xff]  }
 0x1b1   : > { %vm918_vm13 = vcmp.ge.f32.partialorder %v854_v30, 0.0  ;;  %v10667_v40 = vld [vmem:[%s15289_s3 + $0x1cc0] ss:$16 sps:$4 sm:$0xff]  }
 0x1b2   : > { %7765 = vmatpush2.bf16.msra.mxu0 %v10619_v31  ;;  %v10651_v31 = vld [vmem:[%s15289_s3 + $0x1924] ss:$16 sps:$4 sm:$0xff]   ;;  %v984_v29 = vmul.f32 0.2, %v856_v26  ;;  %vm920_vm15 = vcmp.ge.f32.partialorder %v856_v26, 0.0 }
 0x1b3   : > { %7808 = vmatpush2.bf16.msra.mxu1 %v10622_v42  ;;  %7766 = vmatprep.subr.bf16.mxu0 %v10627_v25  ;;  %v10654_v42 = vld [vmem:[%s15289_s3 + $0x1b24] ss:$16 sps:$4 sm:$0xff]   ;;  %v10649_v25 = vld [vmem:[%s15289_s3 + $0x1920] ss:$16 sps:$4 sm:$0xff]  }
 0x1b4   : > { %7809 = vmatprep.subr.bf16.mxu1 %v10630_v22  ;;  %v10652_v22 = vld [vmem:[%s15289_s3 + $0x1b20] ss:$16 sps:$4 sm:$0xff]   ;;  %v1048_v61 = vsel %vm920_vm15, %v856_v26, %v984_v29  ;;  %v10699_v29 = vld [vmem:[%s15289_s3 + $0x1c24] ss:$16 sps:$4 sm:$0xff]  }
 0x1b5   : > { %v10670_v33 = vld [vmem:[%s15289_s3 + $0x1ec0] ss:$16 sps:$4 sm:$0xff]  }
 0x1b6   : > { %7767 = vmatpush2.bf16.msra.mxu0 %v10625_v15  ;;  %v950_v15 = vmul.f32 0.2, %v822_v12  ;;  %v10682_v26 = vld [vmem:[%s15289_s3 + $0x1e80] ss:$16 sps:$4 sm:$0xff]  }
 0x1b7   : > { %7810 = vmatpush2.bf16.msra.mxu1 %v10628_v20  ;;  %7768 = vmatprep.subr.bf16.mxu0 %v10633_v46  ;;  %v10657_v20 = vld [vmem:[%s15289_s3 + $0x1904] ss:$16 sps:$4 sm:$0xff]   ;;  %v982_v46 = vmul.f32 0.2, %v854_v30 }
 0x1b8   : > { %7811 = vmatprep.subr.bf16.mxu1 %v10636_v6  ;;  %v952_v6 = vmul.f32 0.2, %v824_v14  ;;  %v1014_v59 = vsel %vm886_vm12, %v822_v12, %v950_v15  ;;  %v10673_v12 = vld [vmem:[%s15289_s3 + $0x1ca0] ss:$16 sps:$4 sm:$0xff]   ;;  %v10693_v15 = vld [vmem:[%s15289_s3 + $0x1c44] ss:$16 sps:$4 sm:$0xff]  }
 0x1b9   : > { %v1046_v35 = vsel %vm918_vm13, %v854_v30, %v982_v46  ;;  %v10676_v30 = vld [vmem:[%s15289_s3 + $0x1ea0] ss:$16 sps:$4 sm:$0xff]  }
 0x1ba   : > { %7769 = vmatpush2.bf16.msra.mxu0 %v10631_v7  ;;  %v10655_v7 = vld [vmem:[%s15289_s3 + $0x1900] ss:$16 sps:$4 sm:$0xff]   ;;  %v1016_v62 = vsel %vm888_vm14, %v824_v14, %v952_v6  ;;  %v13352_v56 = vpack.c.bf16 %v1046_v35, %v1014_v59  ;;  %v10708_v35 = vld [vmem:[%s15289_s3 + $0x1e04] ss:$16 sps:$4 sm:$0xff]  }
 0x1bb   : > { %7812 = vmatpush2.bf16.msra.mxu1 %v10634_v52  ;;  %7770 = vmatprep.subr.bf16.mxu0 %v10639_v63  ;;  %v10658_v52 = vld [vmem:[%s15289_s3 + $0x1b00] ss:$16 sps:$4 sm:$0xff]   ;;  %v10663_v63 = vld [vmem:[%s15289_s3 + $0x1ce4] ss:$16 sps:$4 sm:$0xff]  }
 0x1bc   : > { %7813 = vmatprep.subr.bf16.mxu1 %v10642_v37  ;;  %v10666_v37 = vld [vmem:[%s15289_s3 + $0x1ee4] ss:$16 sps:$4 sm:$0xff]   ;;  %v10679_v14 = vld [vmem:[%s15289_s3 + $0x1c80] ss:$16 sps:$4 sm:$0xff]  }
 0x1bd   : > { %v10691_v46 = vld [vmem:[%s15289_s3 + $0x1c40] ss:$16 sps:$4 sm:$0xff]  }
 0x1be   : > { %7771 = vmatpush2.bf16.msra.mxu0 %v10637_v0  ;;  %v13354_v0 = vpack.c.bf16 %v1048_v61, %v1016_v62  ;;  %v10694_v6 = vld [vmem:[%s15289_s3 + $0x1e40] ss:$16 sps:$4 sm:$0xff]  }
 0x1bf   : > { %7814 = vmatpush2.bf16.msra.mxu1 %v10640_v19  ;;  %7772 = vmatprep.subr.bf16.mxu0 %v10645_v57  ;;  %v10669_v19 = vld [vmem:[%s15289_s3 + $0x1cc4] ss:$16 sps:$4 sm:$0xff]   ;;  %v10697_v59 = vld [vmem:[%s15289_s3 + $0x1c20] ss:$16 sps:$4 sm:$0xff]  }
 0x1c0   : > { %7815 = vmatprep.subr.bf16.mxu1 %v10648_v13  ;;  %15304 = vst [vmem:[#allocation7_spill] sm:$0xff] %v13354_v0  ;;  %v10675_v57 = vld [vmem:[%s15289_s3 + $0x1ca4] ss:$16 sps:$4 sm:$0xff]   ;;  %v10703_v62 = vld [vmem:[%s15289_s3 + $0x1c00] ss:$16 sps:$4 sm:$0xff]  }
 0x1c1   : > { %v10678_v13 = vld [vmem:[%s15289_s3 + $0x1ea4] ss:$16 sps:$4 sm:$0xff]   ;;  %v10706_v61 = vld [vmem:[%s15289_s3 + $0x1e00] ss:$16 sps:$4 sm:$0xff]  }
 0x1c2   : > { %7773 = vmatpush2.bf16.msra.mxu0 %v10643_v10  ;;  %v10681_v10 = vld [vmem:[%s15289_s3 + $0x1c84] ss:$16 sps:$4 sm:$0xff]  }
 0x1c3   : > { %7816 = vmatpush2.bf16.msra.mxu1 %v10646_v58  ;;  %7774 = vmatprep.subr.bf16.mxu0 %v10651_v31  ;;  %v10684_v58 = vld [vmem:[%s15289_s3 + $0x1e84] ss:$16 sps:$4 sm:$0xff]  }
 0x1c4   : > { %7817 = vmatprep.subr.bf16.mxu1 %v10654_v42  ;;  %v10687_v31 = vld [vmem:[%s15289_s3 + $0x1c64] ss:$16 sps:$4 sm:$0xff]  }
 0x1c5   : > { %v10690_v42 = vld [vmem:[%s15289_s3 + $0x1e64] ss:$16 sps:$4 sm:$0xff]  }
 0x1c6   : > { %7775 = vmatpush2.bf16.msra.mxu0 %v10649_v25  ;;  %v10685_v25 = vld [vmem:[%s15289_s3 + $0x1c60] ss:$16 sps:$4 sm:$0xff]  }
 0x1c7   : > { %7818 = vmatpush2.bf16.msra.mxu1 %v10652_v22  ;;  %7776 = vmatprep.subr.bf16.mxu0 %v10657_v20  ;;  %v10688_v22 = vld [vmem:[%s15289_s3 + $0x1e60] ss:$16 sps:$4 sm:$0xff]   ;;  %v10696_v20 = vld [vmem:[%s15289_s3 + $0x1e44] ss:$16 sps:$4 sm:$0xff]  }
 0x1c8   : > { %7819 = vmatprep.subr.bf16.mxu1 %v10660_v50  ;;  %v10702_v50 = vld [vmem:[%s15289_s3 + $0x1e24] ss:$16 sps:$4 sm:$0xff]  }
 0x1ca   : > { %7777 = vmatpush2.bf16.msra.mxu0 %v10655_v7  ;;  %v10700_v7 = vld [vmem:[%s15289_s3 + $0x1e20] ss:$16 sps:$4 sm:$0xff]  }
 0x1cb   : > { %7820 = vmatpush2.bf16.msra.mxu1 %v10658_v52  ;;  %7832 = vmatprep.subr.bf16.mxu0 %v10663_v63  ;;  %v10705_v52 = vld [vmem:[%s15289_s3 + $0x1c04] ss:$16 sps:$4 sm:$0xff]  }
 0x1cc   : > { %7875 = vmatprep.subr.bf16.mxu1 %v10666_v37  ;;  %v10711_v63 = vld [vmem:[%s15289_s3 + $0x1de4] ss:$16 sps:$4 sm:$0xff]  }
 0x1cd   : > { %7779 = vmatmul.mubr.bf16.vlgmr.msra.gmra.mxu0 %v13352_v56  ;;  %v10714_v37 = vld [vmem:[%s15289_s3 + $0x1fe4] ss:$16 sps:$4 sm:$0xff]  }
 0x1ce   : > { %7822 = vmatmul.mubr.bf16.vlgmr.msra.gmra.mxu1 %v13354_v0  ;;  %7833 = vmatpush1.bf16.msra.mxu0 %v10661_v44  ;;  %v10709_v44 = vld [vmem:[%s15289_s3 + $0x1de0] ss:$16 sps:$4 sm:$0xff]  }
 0x1cf   : > { %7876 = vmatpush1.bf16.msra.mxu1 %v10664_v16  ;;  %7834 = vmatprep.subr.bf16.mxu0 %v10669_v19  ;;  %v10712_v16 = vld [vmem:[%s15289_s3 + $0x1fe0] ss:$16 sps:$4 sm:$0xff]   ;;  %v10717_v19 = vld [vmem:[%s15289_s3 + $0x1dc4] ss:$16 sps:$4 sm:$0xff]  }
 0x1d0   : > { %7877 = vmatprep.subr.bf16.mxu1 %v10672_v32  ;;  %7864 = vmatprep.mubr.bf16.mxu0 %v13140_v3  ;;  %v10720_v32 = vld [vmem:[%s15289_s3 + $0x1fc4] ss:$16 sps:$4 sm:$0xff]  }
 0x1d1   : > { %7907 = vmatprep.mubr.bf16.mxu1 %v13153_v38 }
 0x1d2   : > { %7835 = vmatpush1.bf16.msra.mxu0 %v10667_v40  ;;  %v10715_v40 = vld [vmem:[%s15289_s3 + $0x1dc0] ss:$16 sps:$4 sm:$0xff]  }
 0x1d3   : > { %7878 = vmatpush1.bf16.msra.mxu1 %v10670_v33  ;;  %7836 = vmatprep.subr.bf16.mxu0 %v10675_v57  ;;  %v10718_v33 = vld [vmem:[%s15289_s3 + $0x1fc0] ss:$16 sps:$4 sm:$0xff]   ;;  %v10723_v57 = vld [vmem:[%s15289_s3 + $0x1da4] ss:$16 sps:$4 sm:$0xff]  }
 0x1d4   : > { %7879 = vmatprep.subr.bf16.mxu1 %v10678_v13  ;;  %v10726_v13 = vld [vmem:[%s15289_s3 + $0x1fa4] ss:$16 sps:$4 sm:$0xff]  }
 0x1d6   : > { %7837 = vmatpush1.bf16.msra.mxu0 %v10673_v12  ;;  %v10721_v12 = vld [vmem:[%s15289_s3 + $0x1da0] ss:$16 sps:$4 sm:$0xff]  }
 0x1d7   : > { %7880 = vmatpush1.bf16.msra.mxu1 %v10676_v30  ;;  %7838 = vmatprep.subr.bf16.mxu0 %v10681_v10  ;;  %v10724_v30 = vld [vmem:[%s15289_s3 + $0x1fa0] ss:$16 sps:$4 sm:$0xff]   ;;  %v10729_v10 = vld [vmem:[%s15289_s3 + $0x1d84] ss:$16 sps:$4 sm:$0xff]  }
 0x1d8   : > { %7881 = vmatprep.subr.bf16.mxu1 %v10684_v58  ;;  %v10732_v58 = vld [vmem:[%s15289_s3 + $0x1f84] ss:$16 sps:$4 sm:$0xff]  }
 0x1da   : > { %7839 = vmatpush1.bf16.msra.mxu0 %v10679_v14  ;;  %v10727_v14 = vld [vmem:[%s15289_s3 + $0x1d80] ss:$16 sps:$4 sm:$0xff]  }
 0x1db   : > { %7882 = vmatpush1.bf16.msra.mxu1 %v10682_v26  ;;  %7840 = vmatprep.subr.bf16.mxu0 %v10687_v31  ;;  %v10730_v26 = vld [vmem:[%s15289_s3 + $0x1f80] ss:$16 sps:$4 sm:$0xff]   ;;  %v10735_v31 = vld [vmem:[%s15289_s3 + $0x1d64] ss:$16 sps:$4 sm:$0xff]  }
 0x1dc   : > { %7883 = vmatprep.subr.bf16.mxu1 %v10690_v42  ;;  %v10738_v42 = vld [vmem:[%s15289_s3 + $0x1f64] ss:$16 sps:$4 sm:$0xff]  }
 0x1de   : > { %7841 = vmatpush1.bf16.msra.mxu0 %v10685_v25  ;;  %v10733_v25 = vld [vmem:[%s15289_s3 + $0x1d60] ss:$16 sps:$4 sm:$0xff]  }
 0x1df   : > { %7884 = vmatpush1.bf16.msra.mxu1 %v10688_v22  ;;  %7842 = vmatprep.subr.bf16.mxu0 %v10693_v15  ;;  %v10736_v22 = vld [vmem:[%s15289_s3 + $0x1f60] ss:$16 sps:$4 sm:$0xff]   ;;  %v10741_v15 = vld [vmem:[%s15289_s3 + $0x1d44] ss:$16 sps:$4 sm:$0xff]  }
 0x1e0   : > { %7885 = vmatprep.subr.bf16.mxu1 %v10696_v20  ;;  %v10744_v20 = vld [vmem:[%s15289_s3 + $0x1f44] ss:$16 sps:$4 sm:$0xff]  }
 0x1e2   : > { %7843 = vmatpush1.bf16.msra.mxu0 %v10691_v46  ;;  %v10739_v46 = vld [vmem:[%s15289_s3 + $0x1d40] ss:$16 sps:$4 sm:$0xff]  }
 0x1e3   : > { %7886 = vmatpush1.bf16.msra.mxu1 %v10694_v6  ;;  %7844 = vmatprep.subr.bf16.mxu0 %v10699_v29  ;;  %v10742_v6 = vld [vmem:[%s15289_s3 + $0x1f40] ss:$16 sps:$4 sm:$0xff]   ;;  %v10747_v29 = vld [vmem:[%s15289_s3 + $0x1d24] ss:$16 sps:$4 sm:$0xff]  }
 0x1e4   : > { %7887 = vmatprep.subr.bf16.mxu1 %v10702_v50  ;;  %v10750_v50 = vld [vmem:[%s15289_s3 + $0x1f24] ss:$16 sps:$4 sm:$0xff]  }
 0x1e6   : > { %7845 = vmatpush1.bf16.msra.mxu0 %v10697_v59  ;;  %v10745_v59 = vld [vmem:[%s15289_s3 + $0x1d20] ss:$16 sps:$4 sm:$0xff]  }
 0x1e7   : > { %7888 = vmatpush1.bf16.msra.mxu1 %v10700_v7  ;;  %7846 = vmatprep.subr.bf16.mxu0 %v10705_v52  ;;  %v10748_v7 = vld [vmem:[%s15289_s3 + $0x1f20] ss:$16 sps:$4 sm:$0xff]   ;;  %v10753_v52 = vld [vmem:[%s15289_s3 + $0x1d04] ss:$16 sps:$4 sm:$0xff]  }
 0x1e8   : > { %7889 = vmatprep.subr.bf16.mxu1 %v10708_v35  ;;  %v10756_v35 = vld [vmem:[%s15289_s3 + $0x1f04] ss:$16 sps:$4 sm:$0xff]  }
 0x1ea   : > { %7847 = vmatpush1.bf16.msra.mxu0 %v10703_v62  ;;  %v10751_v62 = vld [vmem:[%s15289_s3 + $0x1d00] ss:$16 sps:$4 sm:$0xff]  }
 0x1eb   : > { %7890 = vmatpush1.bf16.msra.mxu1 %v10706_v61  ;;  %7848 = vmatprep.subr.bf16.mxu0 %v10711_v63  ;;  %v10754_v61 = vld [vmem:[%s15289_s3 + $0x1f00] ss:$16 sps:$4 sm:$0xff]   ;;  %v10759_v63 = vld [vmem:[%s15289_s3 + $0xec] ss:$16 sps:$4 sm:$0xff]  }
 0x1ec   : > { %7891 = vmatprep.subr.bf16.mxu1 %v10714_v37  ;;  %v10762_v37 = vld [vmem:[%s15289_s3 + $0x2ec] ss:$16 sps:$4 sm:$0xff]  }
 0x1ee   : > { %7849 = vmatpush2.bf16.msra.mxu0 %v10709_v44  ;;  %v10757_v44 = vld [vmem:[%s15289_s3 + $0xe8] ss:$16 sps:$4 sm:$0xff]  }
 0x1ef   : > { %7892 = vmatpush2.bf16.msra.mxu1 %v10712_v16  ;;  %7850 = vmatprep.subr.bf16.mxu0 %v10717_v19  ;;  %v10760_v16 = vld [vmem:[%s15289_s3 + $0x2e8] ss:$16 sps:$4 sm:$0xff]   ;;  %v10765_v19 = vld [vmem:[%s15289_s3 + $0xcc] ss:$16 sps:$4 sm:$0xff]  }
 0x1f0   : > { %7893 = vmatprep.subr.bf16.mxu1 %v10720_v32  ;;  %v10768_v32 = vld [vmem:[%s15289_s3 + $0x2cc] ss:$16 sps:$4 sm:$0xff]  }
 0x1f2   : > { %7851 = vmatpush2.bf16.msra.mxu0 %v10715_v40  ;;  %v10763_v40 = vld [vmem:[%s15289_s3 + $0xc8] ss:$16 sps:$4 sm:$0xff]  }
 0x1f3   : > { %7894 = vmatpush2.bf16.msra.mxu1 %v10718_v33  ;;  %7852 = vmatprep.subr.bf16.mxu0 %v10723_v57  ;;  %v10766_v33 = vld [vmem:[%s15289_s3 + $0x2c8] ss:$16 sps:$4 sm:$0xff]   ;;  %v10771_v57 = vld [vmem:[%s15289_s3 + $0xac] ss:$16 sps:$4 sm:$0xff]  }
 0x1f4   : > { %7895 = vmatprep.subr.bf16.mxu1 %v10726_v13  ;;  %v10774_v13 = vld [vmem:[%s15289_s3 + $0x2ac] ss:$16 sps:$4 sm:$0xff]  }
 0x1f6   : > { %7853 = vmatpush2.bf16.msra.mxu0 %v10721_v12  ;;  %v10769_v12 = vld [vmem:[%s15289_s3 + $0xa8] ss:$16 sps:$4 sm:$0xff]  }
 0x1f7   : > { %7896 = vmatpush2.bf16.msra.mxu1 %v10724_v30  ;;  %7854 = vmatprep.subr.bf16.mxu0 %v10729_v10  ;;  %v10772_v30 = vld [vmem:[%s15289_s3 + $0x2a8] ss:$16 sps:$4 sm:$0xff]   ;;  %v10777_v10 = vld [vmem:[%s15289_s3 + $0x8c] ss:$16 sps:$4 sm:$0xff]  }
 0x1f8   : > { %7897 = vmatprep.subr.bf16.mxu1 %v10732_v58  ;;  %v10780_v58 = vld [vmem:[%s15289_s3 + $0x28c] ss:$16 sps:$4 sm:$0xff]  }
 0x1fa   : > { %7855 = vmatpush2.bf16.msra.mxu0 %v10727_v14  ;;  %v10783_v14 = vld [vmem:[%s15289_s3 + $0x6c] ss:$16 sps:$4 sm:$0xff]  }
 0x1fb   : > { %7898 = vmatpush2.bf16.msra.mxu1 %v10730_v26  ;;  %7856 = vmatprep.subr.bf16.mxu0 %v10735_v31  ;;  %v10786_v26 = vld [vmem:[%s15289_s3 + $0x26c] ss:$16 sps:$4 sm:$0xff]   ;;  %v10781_v31 = vld [vmem:[%s15289_s3 + $0x68] ss:$16 sps:$4 sm:$0xff]  }
 0x1fc   : > { %7899 = vmatprep.subr.bf16.mxu1 %v10738_v42  ;;  %v10784_v42 = vld [vmem:[%s15289_s3 + $0x268] ss:$16 sps:$4 sm:$0xff]  }
 0x1fe   : > { %7857 = vmatpush2.bf16.msra.mxu0 %v10733_v25  ;;  %v10789_v25 = vld [vmem:[%s15289_s3 + $0x4c] ss:$16 sps:$4 sm:$0xff]  }
 0x1ff   : > { %7900 = vmatpush2.bf16.msra.mxu1 %v10736_v22  ;;  %7858 = vmatprep.subr.bf16.mxu0 %v10741_v15  ;;  %v10792_v22 = vld [vmem:[%s15289_s3 + $0x24c] ss:$16 sps:$4 sm:$0xff]   ;;  %v10787_v15 = vld [vmem:[%s15289_s3 + $0x48] ss:$16 sps:$4 sm:$0xff]  }
 0x200   : > { %7901 = vmatprep.subr.bf16.mxu1 %v10744_v20  ;;  %v10790_v20 = vld [vmem:[%s15289_s3 + $0x248] ss:$16 sps:$4 sm:$0xff]  }
 0x202   : > { %7859 = vmatpush2.bf16.msra.mxu0 %v10739_v46  ;;  %v10795_v46 = vld [vmem:[%s15289_s3 + $0x2c] ss:$16 sps:$4 sm:$0xff]  }
 0x203   : > { %7902 = vmatpush2.bf16.msra.mxu1 %v10742_v6  ;;  %7860 = vmatprep.subr.bf16.mxu0 %v10747_v29  ;;  %v10798_v6 = vld [vmem:[%s15289_s3 + $0x22c] ss:$16 sps:$4 sm:$0xff]   ;;  %v10793_v29 = vld [vmem:[%s15289_s3 + $0x28] ss:$16 sps:$4 sm:$0xff]  }
 0x204   : > { %7903 = vmatprep.subr.bf16.mxu1 %v10750_v50  ;;  %v10796_v50 = vld [vmem:[%s15289_s3 + $0x228] ss:$16 sps:$4 sm:$0xff]  }
 0x206   : > { %7861 = vmatpush2.bf16.msra.mxu0 %v10745_v59  ;;  %v10801_v59 = vld [vmem:[%s15289_s3 + $0xc] ss:$16 sps:$4 sm:$0xff]  }
 0x207   : > { %7904 = vmatpush2.bf16.msra.mxu1 %v10748_v7  ;;  %7862 = vmatprep.subr.bf16.mxu0 %v10753_v52  ;;  %v10804_v7 = vld [vmem:[%s15289_s3 + $0x20c] ss:$16 sps:$4 sm:$0xff]   ;;  %v10799_v52 = vld [vmem:[%s15289_s3 + $0x8] ss:$16 sps:$4 sm:$0xff]  }
 0x208   : > { %7905 = vmatprep.subr.bf16.mxu1 %v10756_v35  ;;  %v10802_v35 = vld [vmem:[%s15289_s3 + $0x208] ss:$16 sps:$4 sm:$0xff]  }
 0x20a   : > { %7863 = vmatpush2.bf16.msra.mxu0 %v10751_v62  ;;  %v10807_v62 = vld [vmem:[%s15289_s3 + $0x1ec] ss:$16 sps:$4 sm:$0xff]  }
 0x20b   : > { %7906 = vmatpush2.bf16.msra.mxu1 %v10754_v61  ;;  %7918 = vmatprep.subr.bf16.mxu0 %v10759_v63  ;;  %v10810_v61 = vld [vmem:[%s15289_s3 + $0x3ec] ss:$16 sps:$4 sm:$0xff]   ;;  %v10805_v63 = vld [vmem:[%s15289_s3 + $0x1e8] ss:$16 sps:$4 sm:$0xff]  }
 0x20c   : > { %7961 = vmatprep.subr.bf16.mxu1 %v10762_v37  ;;  %v10808_v37 = vld [vmem:[%s15289_s3 + $0x3e8] ss:$16 sps:$4 sm:$0xff]  }
 0x20d   : > { %7865 = vmatmul.mubr.bf16.vlgmr.msra.gmra.mxu0 %v13168_v28 }
 0x20e   : > { %7908 = vmatmul.mubr.bf16.vlgmr.msra.gmra.mxu1 %v13170_v18  ;;  %7919 = vmatpush1.bf16.msra.mxu0 %v10757_v44  ;;  %v10813_v44 = vld [vmem:[%s15289_s3 + $0x1cc] ss:$16 sps:$4 sm:$0xff]  }
 0x20f   : > { %7962 = vmatpush1.bf16.msra.mxu1 %v10760_v16  ;;  %7920 = vmatprep.subr.bf16.mxu0 %v10765_v19  ;;  %v10816_v16 = vld [vmem:[%s15289_s3 + $0x3cc] ss:$16 sps:$4 sm:$0xff]   ;;  %v10811_v19 = vld [vmem:[%s15289_s3 + $0x1c8] ss:$16 sps:$4 sm:$0xff]  }
 0x210   : > { %7963 = vmatprep.subr.bf16.mxu1 %v10768_v32  ;;  %7950 = vmatprep.mubr.bf16.mxu0 %v11832_v41  ;;  %v10775_v41 = vld [vmem:[%s15289_s3 + $0x88] ss:$16 sps:$4 sm:$0xff]   ;;  %v10999_v18 = vld [vmem:[%s15289_s3 + $0x9ec] ss:$16 sps:$4 sm:$0xff]  }
 0x211   : > { %7993 = vmatprep.mubr.bf16.mxu1 %v11847_v60  ;;  %v10778_v60 = vld [vmem:[%s15289_s3 + $0x288] ss:$16 sps:$4 sm:$0xff]  }
 0x212   : > { %7921 = vmatpush1.bf16.msra.mxu0 %v10763_v40  ;;  %v10814_v32 = vld [vmem:[%s15289_s3 + $0x3c8] ss:$16 sps:$4 sm:$0xff]   ;;  %v10819_v40 = vld [vmem:[%s15289_s3 + $0x1ac] ss:$16 sps:$4 sm:$0xff]  }
 0x213   : > { %7964 = vmatpush1.bf16.msra.mxu1 %v10766_v33  ;;  %7922 = vmatprep.subr.bf16.mxu0 %v10771_v57  ;;  %v10822_v33 = vld [vmem:[%s15289_s3 + $0x3ac] ss:$16 sps:$4 sm:$0xff]   ;;  %v10817_v57 = vld [vmem:[%s15289_s3 + $0x1a8] ss:$16 sps:$4 sm:$0xff]  }
 0x214   : > { %7965 = vmatprep.subr.bf16.mxu1 %v10774_v13  ;;  %v10820_v13 = vld [vmem:[%s15289_s3 + $0x3a8] ss:$16 sps:$4 sm:$0xff]  }
 0x216   : > { %7923 = vmatpush1.bf16.msra.mxu0 %v10769_v12  ;;  %v10825_v12 = vld [vmem:[%s15289_s3 + $0x18c] ss:$16 sps:$4 sm:$0xff]  }
 0x217   : > { %7966 = vmatpush1.bf16.msra.mxu1 %v10772_v30  ;;  %7924 = vmatprep.subr.bf16.mxu0 %v10777_v10  ;;  %v10828_v30 = vld [vmem:[%s15289_s3 + $0x38c] ss:$16 sps:$4 sm:$0xff]   ;;  %v10823_v10 = vld [vmem:[%s15289_s3 + $0x188] ss:$16 sps:$4 sm:$0xff]  }
 0x218   : > { %7967 = vmatprep.subr.bf16.mxu1 %v10780_v58  ;;  %v10826_v58 = vld [vmem:[%s15289_s3 + $0x388] ss:$16 sps:$4 sm:$0xff]  }
 0x21a   : > { %7925 = vmatpush1.bf16.msra.mxu0 %v10775_v41  ;;  %v10831_v41 = vld [vmem:[%s15289_s3 + $0x16c] ss:$16 sps:$4 sm:$0xff]  }
 0x21b   : > { %7968 = vmatpush1.bf16.msra.mxu1 %v10778_v60  ;;  %7926 = vmatprep.subr.bf16.mxu0 %v10783_v14  ;;  %v10834_v60 = vld [vmem:[%s15289_s3 + $0x36c] ss:$16 sps:$4 sm:$0xff]   ;;  %v10829_v14 = vld [vmem:[%s15289_s3 + $0x168] ss:$16 sps:$4 sm:$0xff]  }
 0x21c   : > { %7969 = vmatprep.subr.bf16.mxu1 %v10786_v26  ;;  %v10832_v26 = vld [vmem:[%s15289_s3 + $0x368] ss:$16 sps:$4 sm:$0xff]  }
 0x21e   : > { %7927 = vmatpush1.bf16.msra.mxu0 %v10781_v31  ;;  %v10837_v31 = vld [vmem:[%s15289_s3 + $0x14c] ss:$16 sps:$4 sm:$0xff]  }
 0x21f   : > { %7970 = vmatpush1.bf16.msra.mxu1 %v10784_v42  ;;  %7928 = vmatprep.subr.bf16.mxu0 %v10789_v25  ;;  %v10840_v42 = vld [vmem:[%s15289_s3 + $0x34c] ss:$16 sps:$4 sm:$0xff]   ;;  %v10835_v25 = vld [vmem:[%s15289_s3 + $0x148] ss:$16 sps:$4 sm:$0xff]  }
 0x220   : > { %7971 = vmatprep.subr.bf16.mxu1 %v10792_v22  ;;  %v10838_v22 = vld [vmem:[%s15289_s3 + $0x348] ss:$16 sps:$4 sm:$0xff]  }
 0x222   : > { %7929 = vmatpush1.bf16.msra.mxu0 %v10787_v15  ;;  %v10843_v15 = vld [vmem:[%s15289_s3 + $0x12c] ss:$16 sps:$4 sm:$0xff]  }
 0x223   : > { %7972 = vmatpush1.bf16.msra.mxu1 %v10790_v20  ;;  %7930 = vmatprep.subr.bf16.mxu0 %v10795_v46  ;;  %v10846_v20 = vld [vmem:[%s15289_s3 + $0x32c] ss:$16 sps:$4 sm:$0xff]   ;;  %v10841_v46 = vld [vmem:[%s15289_s3 + $0x128] ss:$16 sps:$4 sm:$0xff]  }
 0x224   : > { %7973 = vmatprep.subr.bf16.mxu1 %v10798_v6  ;;  %v10844_v6 = vld [vmem:[%s15289_s3 + $0x328] ss:$16 sps:$4 sm:$0xff]  }
 0x226   : > { %7931 = vmatpush1.bf16.msra.mxu0 %v10793_v29  ;;  %v10849_v29 = vld [vmem:[%s15289_s3 + $0x10c] ss:$16 sps:$4 sm:$0xff]  }
 0x227   : > { %7974 = vmatpush1.bf16.msra.mxu1 %v10796_v50  ;;  %7932 = vmatprep.subr.bf16.mxu0 %v10801_v59  ;;  %v10852_v50 = vld [vmem:[%s15289_s3 + $0x30c] ss:$16 sps:$4 sm:$0xff]   ;;  %v10847_v59 = vld [vmem:[%s15289_s3 + $0x108] ss:$16 sps:$4 sm:$0xff]  }
 0x228   : > { %7975 = vmatprep.subr.bf16.mxu1 %v10804_v7  ;;  %v10850_v7 = vld [vmem:[%s15289_s3 + $0x308] ss:$16 sps:$4 sm:$0xff]  }
 0x22a   : > { %7933 = vmatpush1.bf16.msra.mxu0 %v10799_v52  ;;  %v10855_v52 = vld [vmem:[%s15289_s3 + $0x4ec] ss:$16 sps:$4 sm:$0xff]  }
 0x22b   : > { %7976 = vmatpush1.bf16.msra.mxu1 %v10802_v35  ;;  %7934 = vmatprep.subr.bf16.mxu0 %v10807_v62  ;;  %v10858_v35 = vld [vmem:[%s15289_s3 + $0x6ec] ss:$16 sps:$4 sm:$0xff]   ;;  %v10853_v62 = vld [vmem:[%s15289_s3 + $0x4e8] ss:$16 sps:$4 sm:$0xff]  }
 0x22c   : > { %7977 = vmatprep.subr.bf16.mxu1 %v10810_v61  ;;  %v10856_v61 = vld [vmem:[%s15289_s3 + $0x6e8] ss:$16 sps:$4 sm:$0xff]  }
 0x22e   : > { %7935 = vmatpush2.bf16.msra.mxu0 %v10805_v63  ;;  %v10861_v63 = vld [vmem:[%s15289_s3 + $0x4cc] ss:$16 sps:$4 sm:$0xff]  }
 0x22f   : > { %7978 = vmatpush2.bf16.msra.mxu1 %v10808_v37  ;;  %7936 = vmatprep.subr.bf16.mxu0 %v10813_v44  ;;  %v10864_v37 = vld [vmem:[%s15289_s3 + $0x6cc] ss:$16 sps:$4 sm:$0xff]   ;;  %v10859_v44 = vld [vmem:[%s15289_s3 + $0x4c8] ss:$16 sps:$4 sm:$0xff]  }
 0x230   : > { %7979 = vmatprep.subr.bf16.mxu1 %v10816_v16  ;;  %v10862_v16 = vld [vmem:[%s15289_s3 + $0x6c8] ss:$16 sps:$4 sm:$0xff]  }
 0x232   : > { %7937 = vmatpush2.bf16.msra.mxu0 %v10811_v19  ;;  %v10867_v19 = vld [vmem:[%s15289_s3 + $0x4ac] ss:$16 sps:$4 sm:$0xff]  }
 0x233   : > { %7980 = vmatpush2.bf16.msra.mxu1 %v10814_v32  ;;  %7938 = vmatprep.subr.bf16.mxu0 %v10819_v40  ;;  %v10870_v32 = vld [vmem:[%s15289_s3 + $0x6ac] ss:$16 sps:$4 sm:$0xff]   ;;  %v10865_v40 = vld [vmem:[%s15289_s3 + $0x4a8] ss:$16 sps:$4 sm:$0xff]  }
 0x234   : > { %7981 = vmatprep.subr.bf16.mxu1 %v10822_v33  ;;  %v10876_v33 = vld [vmem:[%s15289_s3 + $0x68c] ss:$16 sps:$4 sm:$0xff]  }
 0x236   : > { %7939 = vmatpush2.bf16.msra.mxu0 %v10817_v57  ;;  %v10871_v57 = vld [vmem:[%s15289_s3 + $0x488] ss:$16 sps:$4 sm:$0xff]  }
 0x237   : > { %7982 = vmatpush2.bf16.msra.mxu1 %v10820_v13  ;;  %7940 = vmatprep.subr.bf16.mxu0 %v10825_v12  ;;  %v10882_v13 = vld [vmem:[%s15289_s3 + $0x66c] ss:$16 sps:$4 sm:$0xff]   ;;  %v10877_v12 = vld [vmem:[%s15289_s3 + $0x468] ss:$16 sps:$4 sm:$0xff]  }
 0x238   : > { %7983 = vmatprep.subr.bf16.mxu1 %v10828_v30  ;;  %v10880_v30 = vld [vmem:[%s15289_s3 + $0x668] ss:$16 sps:$4 sm:$0xff]  }
 0x23a   : > { %7941 = vmatpush2.bf16.msra.mxu0 %v10823_v10  ;;  %v10885_v10 = vld [vmem:[%s15289_s3 + $0x44c] ss:$16 sps:$4 sm:$0xff]  }
 0x23b   : > { %7984 = vmatpush2.bf16.msra.mxu1 %v10826_v58  ;;  %7942 = vmatprep.subr.bf16.mxu0 %v10831_v41  ;;  %v10888_v58 = vld [vmem:[%s15289_s3 + $0x64c] ss:$16 sps:$4 sm:$0xff]   ;;  %v10883_v41 = vld [vmem:[%s15289_s3 + $0x448] ss:$16 sps:$4 sm:$0xff]  }
 0x23c   : > { %7985 = vmatprep.subr.bf16.mxu1 %v10834_v60  ;;  %v10886_v60 = vld [vmem:[%s15289_s3 + $0x648] ss:$16 sps:$4 sm:$0xff]  }
 0x23e   : > { %7943 = vmatpush2.bf16.msra.mxu0 %v10829_v14  ;;  %v10891_v14 = vld [vmem:[%s15289_s3 + $0x42c] ss:$16 sps:$4 sm:$0xff]  }
 0x23f   : > { %7986 = vmatpush2.bf16.msra.mxu1 %v10832_v26  ;;  %7944 = vmatprep.subr.bf16.mxu0 %v10837_v31  ;;  %v10894_v26 = vld [vmem:[%s15289_s3 + $0x62c] ss:$16 sps:$4 sm:$0xff]   ;;  %v10889_v31 = vld [vmem:[%s15289_s3 + $0x428] ss:$16 sps:$4 sm:$0xff]  }
 0x240   : > { %7987 = vmatprep.subr.bf16.mxu1 %v10840_v42  ;;  %v10892_v42 = vld [vmem:[%s15289_s3 + $0x628] ss:$16 sps:$4 sm:$0xff]  }
 0x242   : > { %7945 = vmatpush2.bf16.msra.mxu0 %v10835_v25  ;;  %v10897_v25 = vld [vmem:[%s15289_s3 + $0x40c] ss:$16 sps:$4 sm:$0xff]  }
 0x243   : > { %7988 = vmatpush2.bf16.msra.mxu1 %v10838_v22  ;;  %7946 = vmatprep.subr.bf16.mxu0 %v10843_v15  ;;  %v10900_v22 = vld [vmem:[%s15289_s3 + $0x60c] ss:$16 sps:$4 sm:$0xff]   ;;  %v10895_v15 = vld [vmem:[%s15289_s3 + $0x408] ss:$16 sps:$4 sm:$0xff]  }
 0x244   : > { %7989 = vmatprep.subr.bf16.mxu1 %v10846_v20  ;;  %v10898_v20 = vld [vmem:[%s15289_s3 + $0x608] ss:$16 sps:$4 sm:$0xff]  }
 0x246   : > { %7947 = vmatpush2.bf16.msra.mxu0 %v10841_v46  ;;  %v10903_v46 = vld [vmem:[%s15289_s3 + $0x5ec] ss:$16 sps:$4 sm:$0xff]  }
 0x247   : > { %7990 = vmatpush2.bf16.msra.mxu1 %v10844_v6  ;;  %7948 = vmatprep.subr.bf16.mxu0 %v10849_v29  ;;  %v10906_v6 = vld [vmem:[%s15289_s3 + $0x7ec] ss:$16 sps:$4 sm:$0xff]   ;;  %v10901_v29 = vld [vmem:[%s15289_s3 + $0x5e8] ss:$16 sps:$4 sm:$0xff]  }
 0x248   : > { %7991 = vmatprep.subr.bf16.mxu1 %v10852_v50  ;;  %v10904_v50 = vld [vmem:[%s15289_s3 + $0x7e8] ss:$16 sps:$4 sm:$0xff]  }
 0x24a   : > { %7949 = vmatpush2.bf16.msra.mxu0 %v10847_v59  ;;  %v13848_v59 = vpop.f32.mrf.mxu0 }
 0x24b   : > { %7992 = vmatpush2.bf16.msra.mxu1 %v10850_v7  ;;  %8004 = vmatprep.subr.bf16.mxu0 %v10855_v52  ;;  %v13850_v7 = vpop.f32.mrf.mxu1  ;;  %v10909_v52 = vld [vmem:[%s15289_s3 + $0x5cc] ss:$16 sps:$4 sm:$0xff]  }
 0x24c   : > { %8047 = vmatprep.subr.bf16.mxu1 %v10858_v35  ;;  %v10912_v35 = vld [vmem:[%s15289_s3 + $0x7cc] ss:$16 sps:$4 sm:$0xff]  }
 0x24d   : > { %7951 = vmatmul.mubr.bf16.vlgmr.msra.gmra.mxu0 %v11863_v8  ;;  %v10868_v8 = vld [vmem:[%s15289_s3 + $0x6a8] ss:$16 sps:$4 sm:$0xff]  }
 0x24e   : > { %7994 = vmatmul.mubr.bf16.vlgmr.msra.gmra.mxu1 %v11865_v9  ;;  %8005 = vmatpush1.bf16.msra.mxu0 %v10853_v62  ;;  %v10873_v9 = vld [vmem:[%s15289_s3 + $0x48c] ss:$16 sps:$4 sm:$0xff]   ;;  %v10907_v62 = vld [vmem:[%s15289_s3 + $0x5c8] ss:$16 sps:$4 sm:$0xff]  }
 0x24f   : > { %8048 = vmatpush1.bf16.msra.mxu1 %v10856_v61  ;;  %8006 = vmatprep.subr.bf16.mxu0 %v10861_v63  ;;  %v10910_v61 = vld [vmem:[%s15289_s3 + $0x7c8] ss:$16 sps:$4 sm:$0xff]   ;;  %v13864_v63 = vpop.f32.mrf.mxu0 }
 0x250   : > { %8049 = vmatprep.subr.bf16.mxu1 %v10864_v37  ;;  %8036 = vmatprep.mubr.bf16.mxu0 %v12017_v45  ;;  %v10874_v45 = vld [vmem:[%s15289_s3 + $0x688] ss:$16 sps:$4 sm:$0xff]   ;;  %v13866_v37 = vpop.f32.mrf.mxu1 }
 0x251   : > { %8079 = vmatprep.mubr.bf16.mxu1 %v12025_v53  ;;  %v10879_v53 = vld [vmem:[%s15289_s3 + $0x46c] ss:$16 sps:$4 sm:$0xff]   ;;  %v7310_v28 = vadd.f32 %v13866_v37, %v13864_v63 }
 0x252   : > { %8007 = vmatpush1.bf16.msra.mxu0 %v10859_v44  ;;  %v10915_v44 = vld [vmem:[%s15289_s3 + $0x5ac] ss:$16 sps:$4 sm:$0xff]  }
 0x253   : > { %8050 = vmatpush1.bf16.msra.mxu1 %v10862_v16  ;;  %8008 = vmatprep.subr.bf16.mxu0 %v10867_v19  ;;  %v10918_v16 = vld [vmem:[%s15289_s3 + $0x7ac] ss:$16 sps:$4 sm:$0xff]   ;;  %v10913_v19 = vld [vmem:[%s15289_s3 + $0x5a8] ss:$16 sps:$4 sm:$0xff]  }
 0x254   : > { %8051 = vmatprep.subr.bf16.mxu1 %v10870_v32  ;;  %v10916_v32 = vld [vmem:[%s15289_s3 + $0x7a8] ss:$16 sps:$4 sm:$0xff]  }
 0x256   : > { %8009 = vmatpush1.bf16.msra.mxu0 %v10865_v40  ;;  %v13880_v40 = vpop.f32.mrf.mxu0 }
 0x257   : > { %8052 = vmatpush1.bf16.msra.mxu1 %v10868_v8  ;;  %8010 = vmatprep.subr.bf16.mxu0 %v10873_v9  ;;  %v13882_v8 = vpop.f32.mrf.mxu1  ;;  %v10921_v9 = vld [vmem:[%s15289_s3 + $0x58c] ss:$16 sps:$4 sm:$0xff]  }
 0x258   : > { %8053 = vmatprep.subr.bf16.mxu1 %v10876_v33  ;;  %v10924_v33 = vld [vmem:[%s15289_s3 + $0x78c] ss:$16 sps:$4 sm:$0xff]   ;;  %v7312_v63 = vadd.f32 %v13882_v8, %v13880_v40 }
 0x259   : > { %v11014_v8 = vld [vmem:[%s15289_s3 + $0xbac] ss:$16 sps:$4 sm:$0xff]  }
 0x25a   : > { %8011 = vmatpush1.bf16.msra.mxu0 %v10871_v57  ;;  %v10919_v57 = vld [vmem:[%s15289_s3 + $0x588] ss:$16 sps:$4 sm:$0xff]  }
 0x25b   : > { %8054 = vmatpush1.bf16.msra.mxu1 %v10874_v45  ;;  %8012 = vmatprep.subr.bf16.mxu0 %v10879_v53  ;;  %v10922_v45 = vld [vmem:[%s15289_s3 + $0x788] ss:$16 sps:$4 sm:$0xff]   ;;  %v13896_v53 = vpop.f32.mrf.mxu0 }
 0x25c   : > { %8055 = vmatprep.subr.bf16.mxu1 %v10882_v13  ;;  %v13898_v13 = vpop.f32.mrf.mxu1 }
 0x25e   : > { %8013 = vmatpush1.bf16.msra.mxu0 %v10877_v12  ;;  %v10927_v12 = vld [vmem:[%s15289_s3 + $0x56c] ss:$16 sps:$4 sm:$0xff]  }
 0x25f   : > { %8056 = vmatpush1.bf16.msra.mxu1 %v10880_v30  ;;  %8014 = vmatprep.subr.bf16.mxu0 %v10885_v10  ;;  %v10930_v30 = vld [vmem:[%s15289_s3 + $0x76c] ss:$16 sps:$4 sm:$0xff]   ;;  %v13906_v10 = vpop.f32.mrf.mxu0 }
 0x260   : > { %8057 = vmatprep.subr.bf16.mxu1 %v10888_v58  ;;  %v13908_v58 = vpop.f32.mrf.mxu1 }
 0x262   : > { %8015 = vmatpush1.bf16.msra.mxu0 %v10883_v41  ;;  %v10925_v41 = vld [vmem:[%s15289_s3 + $0x568] ss:$16 sps:$4 sm:$0xff]  }
 0x263   : > { %8058 = vmatpush1.bf16.msra.mxu1 %v10886_v60  ;;  %8016 = vmatprep.subr.bf16.mxu0 %v10891_v14  ;;  %v10928_v60 = vld [vmem:[%s15289_s3 + $0x768] ss:$16 sps:$4 sm:$0xff]   ;;  %v10933_v14 = vld [vmem:[%s15289_s3 + $0x54c] ss:$16 sps:$4 sm:$0xff]  }
 0x264   : > { %8059 = vmatprep.subr.bf16.mxu1 %v10894_v26  ;;  %v10936_v26 = vld [vmem:[%s15289_s3 + $0x74c] ss:$16 sps:$4 sm:$0xff]  }
 0x266   : > { %8017 = vmatpush1.bf16.msra.mxu0 %v10889_v31  ;;  %v13922_v31 = vpop.f32.mrf.mxu0 }
 0x267   : > { %8060 = vmatpush1.bf16.msra.mxu1 %v10892_v42  ;;  %8018 = vmatprep.subr.bf16.mxu0 %v10897_v25  ;;  %v13924_v42 = vpop.f32.mrf.mxu1  ;;  %v10931_v25 = vld [vmem:[%s15289_s3 + $0x548] ss:$16 sps:$4 sm:$0xff]   ;;  %v7353_v37 = vadd.f32 %v13922_v31, %v7310_v28 }
 0x268   : > { %8061 = vmatprep.subr.bf16.mxu1 %v10900_v22  ;;  %v10934_v22 = vld [vmem:[%s15289_s3 + $0x748] ss:$16 sps:$4 sm:$0xff]  }
 0x26a   : > { %8019 = vmatpush1.bf16.msra.mxu0 %v10895_v15  ;;  %v10939_v15 = vld [vmem:[%s15289_s3 + $0x52c] ss:$16 sps:$4 sm:$0xff]  }
 0x26b   : > { %8062 = vmatpush1.bf16.msra.mxu1 %v10898_v20  ;;  %8020 = vmatprep.subr.bf16.mxu0 %v10903_v46  ;;  %v10942_v20 = vld [vmem:[%s15289_s3 + $0x72c] ss:$16 sps:$4 sm:$0xff]   ;;  %v13938_v46 = vpop.f32.mrf.mxu0 }
 0x26c   : > { %8063 = vmatprep.subr.bf16.mxu1 %v10906_v6  ;;  %v13940_v6 = vpop.f32.mrf.mxu1 }
 0x26e   : > { %8021 = vmatpush2.bf16.msra.mxu0 %v10901_v29  ;;  %v10937_v29 = vld [vmem:[%s15289_s3 + $0x528] ss:$16 sps:$4 sm:$0xff]  }
 0x26f   : > { %8064 = vmatpush2.bf16.msra.mxu1 %v10904_v50  ;;  %8022 = vmatprep.subr.bf16.mxu0 %v10909_v52  ;;  %v10940_v50 = vld [vmem:[%s15289_s3 + $0x728] ss:$16 sps:$4 sm:$0xff]   ;;  %v10945_v52 = vld [vmem:[%s15289_s3 + $0x50c] ss:$16 sps:$4 sm:$0xff]  }
 0x270   : > { %8065 = vmatprep.subr.bf16.mxu1 %v10912_v35  ;;  %v10948_v35 = vld [vmem:[%s15289_s3 + $0x70c] ss:$16 sps:$4 sm:$0xff]  }
 0x272   : > { %8023 = vmatpush2.bf16.msra.mxu0 %v10907_v62  ;;  %v13954_v62 = vpop.f32.mrf.mxu0 }
 0x273   : > { %8066 = vmatpush2.bf16.msra.mxu1 %v10910_v61  ;;  %8024 = vmatprep.subr.bf16.mxu0 %v10915_v44  ;;  %v13956_v61 = vpop.f32.mrf.mxu1  ;;  %v10943_v44 = vld [vmem:[%s15289_s3 + $0x508] ss:$16 sps:$4 sm:$0xff]  }
 0x274   : > { %8067 = vmatprep.subr.bf16.mxu1 %v10918_v16  ;;  %v10946_v16 = vld [vmem:[%s15289_s3 + $0x708] ss:$16 sps:$4 sm:$0xff]  }
 0x276   : > { %8025 = vmatpush2.bf16.msra.mxu0 %v10913_v19  ;;  %v13964_v19 = vpop.f32.mrf.mxu0 }
 0x277   : > { %8068 = vmatpush2.bf16.msra.mxu1 %v10916_v32  ;;  %8026 = vmatprep.subr.bf16.mxu0 %v10921_v9  ;;  %v13966_v32 = vpop.f32.mrf.mxu1  ;;  %v10951_v9 = vld [vmem:[%s15289_s3 + $0x8ec] ss:$16 sps:$4 sm:$0xff]  }
 0x278   : > { %8069 = vmatprep.subr.bf16.mxu1 %v10924_v33  ;;  %v10954_v33 = vld [vmem:[%s15289_s3 + $0xaec] ss:$16 sps:$4 sm:$0xff]  }
 0x27a   : > { %8027 = vmatpush2.bf16.msra.mxu0 %v10919_v57  ;;  %v10949_v57 = vld [vmem:[%s15289_s3 + $0x8e8] ss:$16 sps:$4 sm:$0xff]  }
 0x27b   : > { %8070 = vmatpush2.bf16.msra.mxu1 %v10922_v45  ;;  %8028 = vmatprep.subr.bf16.mxu0 %v10927_v12  ;;  %v10952_v45 = vld [vmem:[%s15289_s3 + $0xae8] ss:$16 sps:$4 sm:$0xff]   ;;  %v13980_v12 = vpop.f32.mrf.mxu0 }
 0x27c   : > { %8071 = vmatprep.subr.bf16.mxu1 %v10930_v30  ;;  %v13982_v30 = vpop.f32.mrf.mxu1 }
 0x27e   : > { %8029 = vmatpush2.bf16.msra.mxu0 %v10925_v41  ;;  %v10957_v41 = vld [vmem:[%s15289_s3 + $0x8cc] ss:$16 sps:$4 sm:$0xff]  }
 0x27f   : > { %8072 = vmatpush2.bf16.msra.mxu1 %v10928_v60  ;;  %8030 = vmatprep.subr.bf16.mxu0 %v10933_v14  ;;  %v10960_v60 = vld [vmem:[%s15289_s3 + $0xacc] ss:$16 sps:$4 sm:$0xff]   ;;  %v10955_v14 = vld [vmem:[%s15289_s3 + $0x8c8] ss:$16 sps:$4 sm:$0xff]  }
 0x280   : > { %8073 = vmatprep.subr.bf16.mxu1 %v10936_v26  ;;  %v10958_v26 = vld [vmem:[%s15289_s3 + $0xac8] ss:$16 sps:$4 sm:$0xff]  }
 0x282   : > { %8031 = vmatpush2.bf16.msra.mxu0 %v10931_v25  ;;  %v13998_v25 = vpop.f32.mrf.mxu0 }
 0x283   : > { %8074 = vmatpush2.bf16.msra.mxu1 %v10934_v22  ;;  %8032 = vmatprep.subr.bf16.mxu0 %v10939_v15  ;;  %v14000_v22 = vpop.f32.mrf.mxu1  ;;  %v10961_v15 = vld [vmem:[%s15289_s3 + $0x8a8] ss:$16 sps:$4 sm:$0xff]  }
 0x284   : > { %8075 = vmatprep.subr.bf16.mxu1 %v10942_v20  ;;  %v10964_v20 = vld [vmem:[%s15289_s3 + $0xaa8] ss:$16 sps:$4 sm:$0xff]  }
 0x286   : > { %8033 = vmatpush2.bf16.msra.mxu0 %v10937_v29  ;;  %v14016_v29 = vpop.f32.mrf.mxu0 }
 0x287   : > { %8076 = vmatpush2.bf16.msra.mxu1 %v10940_v50  ;;  %8034 = vmatprep.subr.bf16.mxu0 %v10945_v52  ;;  %v14018_v50 = vpop.f32.mrf.mxu1 }
 0x288   : > { %8077 = vmatprep.subr.bf16.mxu1 %v10948_v35  ;;  %v14026_v52 = vpop.f32.mrf.mxu0 }
 0x289   : > { %v14028_v35 = vpop.f32.mrf.mxu1 }
 0x28a   : > { %8035 = vmatpush2.bf16.msra.mxu0 %v10943_v44  ;;  %v10967_v44 = vld [vmem:[%s15289_s3 + $0x888] ss:$16 sps:$4 sm:$0xff]  }
 0x28b   : > { %8078 = vmatpush2.bf16.msra.mxu1 %v10946_v16  ;;  %8090 = vmatprep.subr.bf16.mxu0 %v10951_v9  ;;  %v10970_v16 = vld [vmem:[%s15289_s3 + $0xa88] ss:$16 sps:$4 sm:$0xff]   ;;  %v10975_v9 = vld [vmem:[%s15289_s3 + $0x86c] ss:$16 sps:$4 sm:$0xff]  }
 0x28c   : > { %8133 = vmatprep.subr.bf16.mxu1 %v10954_v33  ;;  %v10978_v33 = vld [vmem:[%s15289_s3 + $0xa6c] ss:$16 sps:$4 sm:$0xff]  }
 0x28d   : > { %8037 = vmatmul.mubr.bf16.vlgmr.msra.gmra.mxu0 %v12042_v4  ;;  %v10963_v4 = vld [vmem:[%s15289_s3 + $0x8ac] ss:$16 sps:$4 sm:$0xff]  }
 0x28e   : > { %8080 = vmatmul.mubr.bf16.vlgmr.msra.gmra.mxu1 %v12053_v11  ;;  %8091 = vmatpush1.bf16.msra.mxu0 %v10949_v57  ;;  %v10966_v11 = vld [vmem:[%s15289_s3 + $0xaac] ss:$16 sps:$4 sm:$0xff]   ;;  %v14042_v57 = vpop.f32.mrf.mxu0 }
 0x28f   : > { %8134 = vmatpush1.bf16.msra.mxu1 %v10952_v45  ;;  %8092 = vmatprep.subr.bf16.mxu0 %v10957_v41  ;;  %v14044_v45 = vpop.f32.mrf.mxu1  ;;  %v10973_v41 = vld [vmem:[%s15289_s3 + $0x868] ss:$16 sps:$4 sm:$0xff]  }
 0x290   : > { %8135 = vmatprep.subr.bf16.mxu1 %v10960_v60  ;;  %8122 = vmatprep.mubr.bf16.mxu0 %v12211_v39  ;;  %v10969_v39 = vld [vmem:[%s15289_s3 + $0x88c] ss:$16 sps:$4 sm:$0xff]   ;;  %v10976_v60 = vld [vmem:[%s15289_s3 + $0xa68] ss:$16 sps:$4 sm:$0xff]  }
 0x291   : > { %8165 = vmatprep.mubr.bf16.mxu1 %v12219_v48  ;;  %v10972_v48 = vld [vmem:[%s15289_s3 + $0xa8c] ss:$16 sps:$4 sm:$0xff]  }
 0x292   : > { %8093 = vmatpush1.bf16.msra.mxu0 %v10955_v14  ;;  %v10981_v14 = vld [vmem:[%s15289_s3 + $0x84c] ss:$16 sps:$4 sm:$0xff]  }
 0x293   : > { %8136 = vmatpush1.bf16.msra.mxu1 %v10958_v26  ;;  %8094 = vmatprep.subr.bf16.mxu0 %v10963_v4  ;;  %v10984_v26 = vld [vmem:[%s15289_s3 + $0xa4c] ss:$16 sps:$4 sm:$0xff]   ;;  %v14058_v4 = vpop.f32.mrf.mxu0 }
 0x294   : > { %8137 = vmatprep.subr.bf16.mxu1 %v10966_v11  ;;  %v14060_v11 = vpop.f32.mrf.mxu1 }
 0x296   : > { %8095 = vmatpush1.bf16.msra.mxu0 %v10961_v15  ;;  %v10979_v15 = vld [vmem:[%s15289_s3 + $0x848] ss:$16 sps:$4 sm:$0xff]  }
 0x297   : > { %8138 = vmatpush1.bf16.msra.mxu1 %v10964_v20  ;;  %8096 = vmatprep.subr.bf16.mxu0 %v10969_v39  ;;  %v10982_v20 = vld [vmem:[%s15289_s3 + $0xa48] ss:$16 sps:$4 sm:$0xff]   ;;  %v10987_v39 = vld [vmem:[%s15289_s3 + $0x82c] ss:$16 sps:$4 sm:$0xff]  }
 0x298   : > { %8139 = vmatprep.subr.bf16.mxu1 %v10972_v48  ;;  %v10990_v48 = vld [vmem:[%s15289_s3 + $0xa2c] ss:$16 sps:$4 sm:$0xff]  }
 0x29a   : > { %8097 = vmatpush1.bf16.msra.mxu0 %v10967_v44  ;;  %v14074_v44 = vpop.f32.mrf.mxu0 }
 0x29b   : > { %8140 = vmatpush1.bf16.msra.mxu1 %v10970_v16  ;;  %8098 = vmatprep.subr.bf16.mxu0 %v10975_v9  ;;  %v14076_v16 = vpop.f32.mrf.mxu1  ;;  %v10985_v9 = vld [vmem:[%s15289_s3 + $0x828] ss:$16 sps:$4 sm:$0xff]  }
 0x29c   : > { %8141 = vmatprep.subr.bf16.mxu1 %v10978_v33  ;;  %v10988_v33 = vld [vmem:[%s15289_s3 + $0xa28] ss:$16 sps:$4 sm:$0xff]  }
 0x29e   : > { %8099 = vmatpush1.bf16.msra.mxu0 %v10973_v41  ;;  %v14084_v41 = vpop.f32.mrf.mxu0 }
 0x29f   : > { %8142 = vmatpush1.bf16.msra.mxu1 %v10976_v60  ;;  %8100 = vmatprep.subr.bf16.mxu0 %v10981_v14  ;;  %v14086_v60 = vpop.f32.mrf.mxu1  ;;  %v10993_v14 = vld [vmem:[%s15289_s3 + $0x80c] ss:$16 sps:$4 sm:$0xff]  }
 0x2a0   : > { %8143 = vmatprep.subr.bf16.mxu1 %v10984_v26  ;;  %v10996_v26 = vld [vmem:[%s15289_s3 + $0xa0c] ss:$16 sps:$4 sm:$0xff]  }
 0x2a2   : > { %8101 = vmatpush1.bf16.msra.mxu0 %v10979_v15  ;;  %v10991_v15 = vld [vmem:[%s15289_s3 + $0x808] ss:$16 sps:$4 sm:$0xff]  }
 0x2a3   : > { %8144 = vmatpush1.bf16.msra.mxu1 %v10982_v20  ;;  %8102 = vmatprep.subr.bf16.mxu0 %v10987_v39  ;;  %v10994_v20 = vld [vmem:[%s15289_s3 + $0xa08] ss:$16 sps:$4 sm:$0xff]   ;;  %v14100_v39 = vpop.f32.mrf.mxu0 }
 0x2a4   : > { %8145 = vmatprep.subr.bf16.mxu1 %v10990_v48  ;;  %v14102_v48 = vpop.f32.mrf.mxu1 }
 0x2a5   : > { %v14121_v3 = vpop.f32.mrf.mxu0 }
 0x2a6   : > { %8103 = vmatpush1.bf16.msra.mxu0 %v10985_v9  ;;  %v11002_v9 = vld [vmem:[%s15289_s3 + $0xbec] ss:$16 sps:$4 sm:$0xff]   ;;  %v14123_v0 = vpop.f32.mrf.mxu1 }
 0x2a7   : > { %8146 = vmatpush1.bf16.msra.mxu1 %v10988_v33  ;;  %8104 = vmatprep.subr.bf16.mxu0 %v10993_v14  ;;  %v7308_v33 = vadd.f32 %v13850_v7, %v13848_v59  ;;  %v10997_v14 = vld [vmem:[%s15289_s3 + $0x9e8] ss:$16 sps:$4 sm:$0xff]   ;;  %v11005_v59 = vld [vmem:[%s15289_s3 + $0x9cc] ss:$16 sps:$4 sm:$0xff]   ;;  %v14144_v40 = vpop.f32.mrf.mxu0 }
 0x2a8   : > { %8147 = vmatprep.subr.bf16.mxu1 %v10996_v26  ;;  %v11000_v26 = vld [vmem:[%s15289_s3 + $0xbe8] ss:$16 sps:$4 sm:$0xff]   ;;  %v11008_v7 = vld [vmem:[%s15289_s3 + $0xbcc] ss:$16 sps:$4 sm:$0xff]   ;;  %v14146_v28 = vpop.f32.mrf.mxu1 }
 0x2a9   : > { %v7351_v38 = vadd.f32 %v13906_v10, %v7308_v33  ;;  %v7314_v10 = vadd.f32 %v13898_v13, %v13896_v53  ;;  %v7396_v53 = vadd.f32 %v13924_v42, %v7353_v37  ;;  %v14157_v31 = vpop.f32.mrf.mxu0  ;;  %v11012_v42 = vld [vmem:[%s15289_s3 + $0xba8] ss:$16 sps:$4 sm:$0xff]  }
 0x2aa   : > { %8105 = vmatpush1.bf16.msra.mxu0 %v10991_v15 }
 0x2ab   : > { %8148 = vmatpush1.bf16.msra.mxu1 %v10994_v20  ;;  %8106 = vmatprep.subr.bf16.mxu0 %v10999_v18  ;;  %v7394_v15 = vadd.f32 %v13908_v58, %v7351_v38  ;;  %v7355_v18 = vadd.f32 %v13938_v46, %v7312_v63  ;;  %v11003_v20 = vld [vmem:[%s15289_s3 + $0x9c8] ss:$16 sps:$4 sm:$0xff]   ;;  %v11011_v38 = vld [vmem:[%s15289_s3 + $0x9ac] ss:$16 sps:$4 sm:$0xff]   ;;  %v7357_v13 = vadd.f32 %v13954_v62, %v7314_v10  ;;  %v14159_v46 = vpop.f32.mrf.mxu1 }
 0x2ac   : > { %8149 = vmatprep.subr.bf16.mxu1 %v11002_v9  ;;  %v11006_v9 = vld [vmem:[%s15289_s3 + $0xbc8] ss:$16 sps:$4 sm:$0xff]   ;;  %v11017_v62 = vld [vmem:[%s15289_s3 + $0x98c] ss:$16 sps:$4 sm:$0xff]  }
 0x2ad   : > { %v7437_v58 = vadd.f32 %v13964_v19, %v7394_v15  ;;  %v7398_v33 = vadd.f32 %v13940_v6, %v7355_v18  ;;  %v11020_v6 = vld [vmem:[%s15289_s3 + $0xb8c] ss:$16 sps:$4 sm:$0xff]   ;;  %v7400_v19 = vadd.f32 %v13956_v61, %v7357_v13  ;;  %v14178_v63 = vpop.f32.mrf.mxu1  ;;  %v11015_v18 = vld [vmem:[%s15289_s3 + $0x988] ss:$16 sps:$4 sm:$0xff]  }
 0x2ae   : > { %8107 = vmatpush2.bf16.msra.mxu0 %v10997_v14  ;;  %v7439_v14 = vadd.f32 %v13980_v12, %v7396_v53  ;;  %v11018_v61 = vld [vmem:[%s15289_s3 + $0xb88] ss:$16 sps:$4 sm:$0xff]  }
 0x2af   : > { %8150 = vmatpush2.bf16.msra.mxu1 %v11000_v26  ;;  %8108 = vmatprep.subr.bf16.mxu0 %v11005_v59  ;;  %v11009_v26 = vld [vmem:[%s15289_s3 + $0x9a8] ss:$16 sps:$4 sm:$0xff]   ;;  %v7480_v12 = vadd.f32 %v13966_v32, %v7437_v58  ;;  %v7441_v59 = vadd.f32 %v13998_v25, %v7398_v33  ;;  %v7443_v10 = vadd.f32 %v14016_v29, %v7400_v19  ;;  %v11023_v32 = vld [vmem:[%s15289_s3 + $0x96c] ss:$16 sps:$4 sm:$0xff]  }
 0x2b0   : > { %8151 = vmatprep.subr.bf16.mxu1 %v11008_v7  ;;  %v7696_v7 = vpop.f32.mrf.mxu0  ;;  %v7482_v37 = vadd.f32 %v13982_v30, %v7439_v14  ;;  %v11026_v30 = vld [vmem:[%s15289_s3 + $0xb6c] ss:$16 sps:$4 sm:$0xff]   ;;  %v11021_v53 = vld [vmem:[%s15289_s3 + $0x968] ss:$16 sps:$4 sm:$0xff]  }
 0x2b1   : > { %v7523_v15 = vadd.f32 %v14026_v52, %v7480_v12  ;;  %v7484_v25 = vadd.f32 %v14000_v22, %v7441_v59  ;;  %v11024_v22 = vld [vmem:[%s15289_s3 + $0xb68] ss:$16 sps:$4 sm:$0xff]  }
 0x2b2   : > { %8109 = vmatpush2.bf16.msra.mxu0 %v11003_v20  ;;  %v7525_v29 = vadd.f32 %v14042_v57, %v7482_v37  ;;  %v7698_v52 = vpop.f32.mrf.mxu0  ;;  %v14197_v20 = vpop.f32.mrf.mxu1 }
 0x2b3   : > { %8152 = vmatpush2.bf16.msra.mxu1 %v11006_v9  ;;  %8110 = vmatprep.subr.bf16.mxu0 %v11011_v38  ;;  %v7486_v9 = vadd.f32 %v14018_v50, %v7443_v10  ;;  %v7566_v38 = vadd.f32 %v14028_v35, %v7523_v15  ;;  %v11029_v50 = vld [vmem:[%s15289_s3 + $0x94c] ss:$16 sps:$4 sm:$0xff]   ;;  %v11033_v10 = vld [vmem:[%s15289_s3 + $0x928] ss:$16 sps:$4 sm:$0xff]  }
 0x2b4   : > { %8153 = vmatprep.subr.bf16.mxu1 %v11014_v8  ;;  %v7527_v8 = vadd.f32 %v14058_v4, %v7484_v25  ;;  %v11032_v35 = vld [vmem:[%s15289_s3 + $0xb4c] ss:$16 sps:$4 sm:$0xff]   ;;  %v7568_v57 = vadd.f32 %v14044_v45, %v7525_v29  ;;  %v7700_v58 = vpop.f32.mrf.mxu0  ;;  %v7743_v33 = vpop.f32.mrf.mxu1  ;;  %v11030_v45 = vld [vmem:[%s15289_s3 + $0xb48] ss:$16 sps:$4 sm:$0xff]  }
 0x2b5   : > { %v7529_v4 = vadd.f32 %v14074_v44, %v7486_v9  ;;  %v7609_v13 = vadd.f32 %v14084_v41, %v7566_v38  ;;  %v11038_v41 = vld [vmem:[%s15289_s3 + $0xb2c] ss:$16 sps:$4 sm:$0xff]   ;;  %v11042_v25 = vld [vmem:[%s15289_s3 + $0xb08] ss:$16 sps:$4 sm:$0xff]  }
 0x2b6   : > { %8111 = vmatpush2.bf16.msra.mxu0 %v11009_v26  ;;  %v7570_v14 = vadd.f32 %v14060_v11, %v7527_v8  ;;  %v7611_v26 = vadd.f32 %v14100_v39, %v7568_v57  ;;  %v7823_v44 = vpop.f32.mrf.mxu1  ;;  %v11035_v11 = vld [vmem:[%s15289_s3 + $0x92c] ss:$16 sps:$4 sm:$0xff]  }
 0x2b7   : > { %8154 = vmatpush2.bf16.msra.mxu1 %v11012_v42  ;;  %8112 = vmatprep.subr.bf16.mxu0 %v11017_v62  ;;  %v11027_v42 = vld [vmem:[%s15289_s3 + $0x948] ss:$16 sps:$4 sm:$0xff]   ;;  %v7780_v62 = vpop.f32.mrf.mxu0  ;;  %v7572_v39 = vadd.f32 %v14076_v16, %v7529_v4 }
 0x2b8   : > { %8155 = vmatprep.subr.bf16.mxu1 %v11020_v6  ;;  %v7652_v6 = vadd.f32 %v14086_v60, %v7609_v13  ;;  %v7613_v19 = vadd.f32 %v14121_v3, %v7570_v14  ;;  %v7654_v12 = vadd.f32 %v14102_v48, %v7611_v26  ;;  %v11036_v16 = vld [vmem:[%s15289_s3 + $0xb28] ss:$16 sps:$4 sm:$0xff]   ;;  %v7825_v60 = vpop.f32.mrf.mxu1  ;;  %v11041_v3 = vld [vmem:[%s15289_s3 + $0x90c] ss:$16 sps:$4 sm:$0xff]  }
 0x2b9   : > { %v7615_v59 = vadd.f32 %v14144_v40, %v7572_v39  ;;  %v7782_v15 = vpop.f32.mrf.mxu0  ;;  %v11044_v48 = vld [vmem:[%s15289_s3 + $0xb0c] ss:$16 sps:$4 sm:$0xff]  }
 0x2ba   : > { %8113 = vmatpush2.bf16.msra.mxu0 %v11015_v18  ;;  %v7695_v37 = vadd.f32 %v14157_v31, %v7652_v6  ;;  %v7656_v40 = vadd.f32 %v14123_v0, %v7613_v19  ;;  %v7697_v31 = vadd.f32 %v7696_v7, %v7654_v12  ;;  %v7827_v9 = vpop.f32.mrf.mxu1  ;;  %v11047_v0 = vld [vmem:[%s15289_s3 + $0xcec] ss:$16 sps:$4 sm:$0xff]  }
 0x2bb   : > { %8156 = vmatpush2.bf16.msra.mxu1 %v11018_v61  ;;  %8114 = vmatprep.subr.bf16.mxu0 %v11023_v32  ;;  %v7658_v18 = vadd.f32 %v14146_v28, %v7615_v59  ;;  %v7784_v29 = vpop.f32.mrf.mxu0  ;;  %v11050_v28 = vld [vmem:[%s15289_s3 + $0xeec] ss:$16 sps:$4 sm:$0xff]  }
 0x2bc   : > { %8157 = vmatprep.subr.bf16.mxu1 %v11026_v30  ;;  %v7738_v61 = vadd.f32 %v14159_v46, %v7695_v37  ;;  %v7699_v32 = vadd.f32 %v7698_v52, %v7656_v40  ;;  %v11039_v30 = vld [vmem:[%s15289_s3 + $0x908] ss:$16 sps:$4 sm:$0xff]   ;;  %v7740_v46 = vadd.f32 %v14178_v63, %v7697_v31  ;;  %v11053_v63 = vld [vmem:[%s15289_s3 + $0xccc] ss:$16 sps:$4 sm:$0xff]  }
 0x2bd   : > { %v7701_v7 = vadd.f32 %v7700_v58, %v7658_v18 }
 0x2be   : > { %8115 = vmatpush2.bf16.msra.mxu0 %v11021_v53  ;;  %v7781_v52 = vadd.f32 %v7780_v62, %v7738_v61  ;;  %v7742_v38 = vadd.f32 %v14197_v20, %v7699_v32  ;;  %v7783_v8 = vadd.f32 %v7782_v15, %v7740_v46  ;;  %v11045_v53 = vld [vmem:[%s15289_s3 + $0xce8] ss:$16 sps:$4 sm:$0xff]   ;;  %v11056_v20 = vld [vmem:[%s15289_s3 + $0xecc] ss:$16 sps:$4 sm:$0xff]  }
 0x2bf   : > { %8158 = vmatpush2.bf16.msra.mxu1 %v11024_v22  ;;  %8116 = vmatprep.subr.bf16.mxu0 %v11029_v50  ;;  %v11048_v22 = vld [vmem:[%s15289_s3 + $0xee8] ss:$16 sps:$4 sm:$0xff]   ;;  %v7786_v50 = vpop.f32.mrf.mxu0  ;;  %v7744_v57 = vadd.f32 %v7743_v33, %v7701_v7 }
 0x2c0   : > { %8159 = vmatprep.subr.bf16.mxu1 %v11032_v35  ;;  %v7829_v35 = vpop.f32.mrf.mxu1  ;;  %v7824_v4 = vadd.f32 %v7823_v44, %v7781_v52  ;;  %v7785_v13 = vadd.f32 %v7784_v29, %v7742_v38  ;;  %v7826_v26 = vadd.f32 %v7825_v60, %v7783_v8  ;;  %v11051_v62 = vld [vmem:[%s15289_s3 + $0xcc8] ss:$16 sps:$4 sm:$0xff]   ;;  %v11068_v60 = vld [vmem:[%s15289_s3 + $0xe8c] ss:$16 sps:$4 sm:$0xff]  }
 0x2c1   : > { %v11054_v33 = vld [vmem:[%s15289_s3 + $0xec8] ss:$16 sps:$4 sm:$0xff]  }
 0x2c2   : > { %8117 = vmatpush2.bf16.msra.mxu0 %v11027_v42  ;;  %v7787_v42 = vadd.f32 %v7786_v50, %v7744_v57  ;;  %v11060_v15 = vld [vmem:[%s15289_s3 + $0xea8] ss:$16 sps:$4 sm:$0xff]   ;;  %v11077_v57 = vld [vmem:[%s15289_s3 + $0xc4c] ss:$16 sps:$4 sm:$0xff]  }
 0x2c3   : > { %8160 = vmatpush2.bf16.msra.mxu1 %v11030_v45  ;;  %8118 = vmatprep.subr.bf16.mxu0 %v11035_v11  ;;  %v11066_v29 = vld [vmem:[%s15289_s3 + $0xe88] ss:$16 sps:$4 sm:$0xff]  }
 0x2c4   : > { %8161 = vmatprep.subr.bf16.mxu1 %v11038_v41  ;;  %v7828_v41 = vadd.f32 %v7827_v9, %v7785_v13  ;;  %v7830_v59 = vadd.f32 %v7829_v35, %v7787_v42  ;;  %v11071_v9 = vld [vmem:[%s15289_s3 + $0xc6c] ss:$16 sps:$4 sm:$0xff]   ;;  %v11069_v35 = vld [vmem:[%s15289_s3 + $0xc68] ss:$16 sps:$4 sm:$0xff]  }
 0x2c6   : > { %8119 = vmatpush2.bf16.msra.mxu0 %v11033_v10 }
 0x2c7   : > { %8162 = vmatpush2.bf16.msra.mxu1 %v11036_v16  ;;  %8120 = vmatprep.subr.bf16.mxu0 %v11041_v3  ;;  %v11057_v16 = vld [vmem:[%s15289_s3 + $0xca8] ss:$16 sps:$4 sm:$0xff]  }
 0x2c8   : > { %8163 = vmatprep.subr.bf16.mxu1 %v11044_v48 }
 0x2ca   : > { %8121 = vmatpush2.bf16.msra.mxu0 %v11039_v30 }
 0x2cb   : > { %8164 = vmatpush2.bf16.msra.mxu1 %v11042_v25  ;;  %8176 = vmatprep.subr.bf16.mxu0 %v11047_v0  ;;  %v11063_v25 = vld [vmem:[%s15289_s3 + $0xc88] ss:$16 sps:$4 sm:$0xff]   ;;  %v11074_v0 = vld [vmem:[%s15289_s3 + $0xe6c] ss:$16 sps:$4 sm:$0xff]  }
 0x2cc   : > { %8219 = vmatprep.subr.bf16.mxu1 %v11050_v28 }
 0x2cd   : > { %v7866_v58 = vpop.f32.mrf.mxu0  ;;  %8123 = vmatmul.mubr.bf16.vlgmr.msra.gmra.mxu0 %v12354_v51  ;;  %v11059_v51 = vld [vmem:[%s15289_s3 + $0xcac] ss:$16 sps:$4 sm:$0xff]  }
 0x2ce   : > { %v7909_v14 = vpop.f32.mrf.mxu1  ;;  %8166 = vmatmul.mubr.bf16.vlgmr.msra.gmra.mxu1 %v12361_v23  ;;  %v7867_v45 = vadd.f32 %v7866_v58, %v7824_v4  ;;  %8177 = vmatpush1.bf16.msra.mxu0 %v11045_v53  ;;  %v11062_v23 = vld [vmem:[%s15289_s3 + $0xeac] ss:$16 sps:$4 sm:$0xff]  }
 0x2cf   : > { %8220 = vmatpush1.bf16.msra.mxu1 %v11048_v22  ;;  %v7868_v44 = vpop.f32.mrf.mxu0  ;;  %8178 = vmatprep.subr.bf16.mxu0 %v11053_v63  ;;  %v11072_v63 = vld [vmem:[%s15289_s3 + $0xe68] ss:$16 sps:$4 sm:$0xff]   ;;  %v11080_v4 = vld [vmem:[%s15289_s3 + $0xe4c] ss:$16 sps:$4 sm:$0xff]  }
 0x2d0   : > { %v7911_v11 = vpop.f32.mrf.mxu1  ;;  %8221 = vmatprep.subr.bf16.mxu1 %v11056_v20  ;;  %v7869_v39 = vadd.f32 %v7868_v44, %v7826_v26  ;;  %8208 = vmatprep.mubr.bf16.mxu0 %v12402_v27  ;;  %v7910_v6 = vadd.f32 %v7909_v14, %v7867_v45  ;;  %v11078_v44 = vld [vmem:[%s15289_s3 + $0xe48] ss:$16 sps:$4 sm:$0xff]  }
 0x2d1   : > { %8251 = vmatprep.mubr.bf16.mxu1 %v12411_v34  ;;  %v7870_v19 = vpop.f32.mrf.mxu0  ;;  %v11065_v34 = vld [vmem:[%s15289_s3 + $0xc8c] ss:$16 sps:$4 sm:$0xff]  }
 0x2d2   : > { %v7913_v12 = vpop.f32.mrf.mxu1  ;;  %v7912_v37 = vadd.f32 %v7911_v11, %v7869_v39  ;;  %v7871_v10 = vadd.f32 %v7870_v19, %v7828_v41  ;;  %8179 = vmatpush1.bf16.msra.mxu0 %v11051_v62  ;;  %v8696_v31 = vmul.f32 %v7910_v6, %v7910_v6 }
 0x2d3   : > { %8222 = vmatpush1.bf16.msra.mxu1 %v11054_v33  ;;  %v7872_v27 = vpop.f32.mrf.mxu0  ;;  %8180 = vmatprep.subr.bf16.mxu0 %v11059_v51  ;;  %v11075_v33 = vld [vmem:[%s15289_s3 + $0xc48] ss:$16 sps:$4 sm:$0xff]   ;;  %v11083_v51 = vld [vmem:[%s15289_s3 + $0xc2c] ss:$16 sps:$4 sm:$0xff]  }
 0x2d4   : > { %8223 = vmatprep.subr.bf16.mxu1 %v11062_v23  ;;  %v9960_v3 = vpack.c.bf16 %v7912_v37, %v7910_v6  ;;  %v7914_v48 = vadd.f32 %v7913_v12, %v7871_v10  ;;  %v7873_v40 = vadd.f32 %v7872_v27, %v7830_v59  ;;  %v7915_v18 = vpop.f32.mrf.mxu1  ;;  %v8697_v38 = vmul.f32 %v7912_v37, %v7912_v37  ;;  %v11086_v23 = vld [vmem:[%s15289_s3 + $0xe2c] ss:$16 sps:$4 sm:$0xff]   ;;  %v11081_v59 = vld [vmem:[%s15289_s3 + $0xc28] ss:$16 sps:$4 sm:$0xff]  }
 0x2d5   : > { %v11092_v27 = vld [vmem:[%s15289_s3 + $0xe0c] ss:$16 sps:$4 sm:$0xff]  }
 0x2d6   : > { %8630 = vst [vmem:[%s14304_s29] sm:$0xff] %v9960_v3  ;;  %v8634_v61 = vadd.f32 %v7914_v48, %v7910_v6  ;;  %v8700_v32 = vmul.f32 %v7914_v48, %v7914_v48  ;;  %v7916_v30 = vadd.f32 %v7915_v18, %v7873_v40  ;;  %8181 = vmatpush1.bf16.msra.mxu0 %v11057_v16  ;;  %v11087_v40 = vld [vmem:[%s15289_s3 + $0xc08] ss:$16 sps:$4 sm:$0xff]  }
 0x2d7   : > { %8224 = vmatpush1.bf16.msra.mxu1 %v11060_v15  ;;  %8182 = vmatprep.subr.bf16.mxu0 %v11065_v34  ;;  %v11089_v15 = vld [vmem:[%s15289_s3 + $0xc0c] ss:$16 sps:$4 sm:$0xff]  }
 0x2d8   : > { %8225 = vmatprep.subr.bf16.mxu1 %v11068_v60  ;;  %v8635_v28 = vrot.slane %v8634_v61, 4  ;;  %v8704_v46 = vadd.f32 %v8700_v32, %v8696_v31  ;;  %v9962_v7 = vpack.c.bf16 %v7916_v30, %v7914_v48  ;;  %v8641_v52 = vadd.f32 %v7916_v30, %v7912_v37  ;;  %v11084_v37 = vld [vmem:[%s15289_s3 + $0xe28] ss:$16 sps:$4 sm:$0xff]   ;;  %v11095_v32 = vld [vmem:[%s15289_s3 + $0xdec] ss:$16 sps:$4 sm:$0xff]  }
 0x2d9   : > { %v8701_v8 = vmul.f32 %v7916_v30, %v7916_v30  ;;  %v11090_v31 = vld [vmem:[%s15289_s3 + $0xe08] ss:$16 sps:$4 sm:$0xff]   ;;  %v11098_v30 = vld [vmem:[%s15289_s3 + $0xfec] ss:$16 sps:$4 sm:$0xff]  }
 0x2da   : > { %v8636_v53 = vadd.f32 %v8635_v28, %v8634_v61  ;;  %v8705_v22 = vrot.slane %v8704_v46, 4  ;;  %8632 = vst [vmem:[%s14304_s29 + $0x10] sm:$0xff] %v9962_v7  ;;  %v8642_v50 = vrot.slane %v8641_v52, 4  ;;  %8183 = vmatpush1.bf16.msra.mxu0 %v11063_v25  ;;  %v11104_v28 = vld [vmem:[%s15289_s3 + $0xfcc] ss:$16 sps:$4 sm:$0xff]  }
 0x2db   : > { %8226 = vmatpush1.bf16.msra.mxu1 %v11066_v29  ;;  %v8711_v20 = vadd.f32 %v8701_v8, %v8697_v38  ;;  %8184 = vmatprep.subr.bf16.mxu0 %v11071_v9  ;;  %v11093_v29 = vld [vmem:[%s15289_s3 + $0xde8] ss:$16 sps:$4 sm:$0xff]   ;;  %v11110_v38 = vld [vmem:[%s15289_s3 + $0xfac] ss:$16 sps:$4 sm:$0xff]  }
 0x2dc   : > { %8227 = vmatprep.subr.bf16.mxu1 %v11074_v0  ;;  %v8637_v13 = vrot.slane %v8636_v53, 2  ;;  %v8706_v58 = vadd.f32 %v8705_v22, %v8704_v46  ;;  %v8643_v14 = vadd.f32 %v8642_v50, %v8641_v52  ;;  %v11096_v9 = vld [vmem:[%s15289_s3 + $0xfe8] ss:$16 sps:$4 sm:$0xff]   ;;  %v11101_v0 = vld [vmem:[%s15289_s3 + $0xdcc] ss:$16 sps:$4 sm:$0xff]  }
 0x2dd   : > { %v8712_v26 = vrot.slane %v8711_v20, 4  ;;  %v11099_v46 = vld [vmem:[%s15289_s3 + $0xdc8] ss:$16 sps:$4 sm:$0xff]   ;;  %v11107_v52 = vld [vmem:[%s15289_s3 + $0xdac] ss:$16 sps:$4 sm:$0xff]  }
 0x2de   : > { %v8638_v42 = vadd.f32 %v8637_v13, %v8636_v53  ;;  %v8707_v45 = vrot.slane %v8706_v58, 2  ;;  %v8644_v62 = vrot.slane %v8643_v14, 2  ;;  %8185 = vmatpush1.bf16.msra.mxu0 %v11069_v35  ;;  %v11102_v7 = vld [vmem:[%s15289_s3 + $0xfc8] ss:$16 sps:$4 sm:$0xff]   ;;  %v11113_v22 = vld [vmem:[%s15289_s3 + $0xd8c] ss:$16 sps:$4 sm:$0xff]  }
 0x2df   : > { %8228 = vmatpush1.bf16.msra.mxu1 %v11072_v63  ;;  %v8713_v11 = vadd.f32 %v8712_v26, %v8711_v20  ;;  %8186 = vmatprep.subr.bf16.mxu0 %v11077_v57  ;;  %v11105_v8 = vld [vmem:[%s15289_s3 + $0xda8] ss:$16 sps:$4 sm:$0xff]   ;;  %v11116_v50 = vld [vmem:[%s15289_s3 + $0xf8c] ss:$16 sps:$4 sm:$0xff]  }
 0x2e0   : > { %8229 = vmatprep.subr.bf16.mxu1 %v11080_v4  ;;  %v8639_v41 = vrot.slane %v8638_v42, 1  ;;  %v8708_v39 = vadd.f32 %v8707_v45, %v8706_v58  ;;  %v8645_v6 = vadd.f32 %v8644_v62, %v8643_v14  ;;  %v11108_v53 = vld [vmem:[%s15289_s3 + $0xfa8] ss:$16 sps:$4 sm:$0xff]   ;;  %v11119_v20 = vld [vmem:[%s15289_s3 + $0xd6c] ss:$16 sps:$4 sm:$0xff]  }
 0x2e1   : > { %v8714_v19 = vrot.slane %v8713_v11, 2  ;;  %v11111_v35 = vld [vmem:[%s15289_s3 + $0xd88] ss:$16 sps:$4 sm:$0xff]   ;;  %v11122_v57 = vld [vmem:[%s15289_s3 + $0xf6c] ss:$16 sps:$4 sm:$0xff]  }
 0x2e2   : > { %v8646_v12 = vrot.slane %v8645_v6, 1  ;;  %8187 = vmatpush1.bf16.msra.mxu0 %v11075_v33  ;;  %v8709_v10 = vrot.slane %v8708_v39, 1  ;;  %v14362_v34 = vadd.f32 %v8639_v41, %v8638_v42  ;;  %v11114_v63 = vld [vmem:[%s15289_s3 + $0xf88] ss:$16 sps:$4 sm:$0xff]   ;;  %v11125_v58 = vld [vmem:[%s15289_s3 + $0xd4c] ss:$16 sps:$4 sm:$0xff]  }
 0x2e3   : > { %8230 = vmatpush1.bf16.msra.mxu1 %v11078_v44  ;;  %v8715_v16 = vadd.f32 %v8714_v19, %v8713_v11  ;;  %8188 = vmatprep.subr.bf16.mxu0 %v11083_v51  ;;  %v11117_v4 = vld [vmem:[%s15289_s3 + $0xd68] ss:$16 sps:$4 sm:$0xff]   ;;  %v11128_v14 = vld [vmem:[%s15289_s3 + $0xf4c] ss:$16 sps:$4 sm:$0xff]  }
 0x2e4   : > { %8231 = vmatprep.subr.bf16.mxu1 %v11086_v23  ;;  %v14364_v60 = vadd.f32 %v8646_v12, %v8645_v6  ;;  %v14374_v18 = vadd.f32 %v8709_v10, %v8708_v39  ;;  %v11120_v13 = vld [vmem:[%s15289_s3 + $0xf68] ss:$16 sps:$4 sm:$0xff]   ;;  %v11131_v45 = vld [vmem:[%s15289_s3 + $0xd2c] ss:$16 sps:$4 sm:$0xff]  }
 0x2e5   : > { %v8716_v3 = vrot.slane %v8715_v16, 1  ;;  %v11123_v26 = vld [vmem:[%s15289_s3 + $0xd48] ss:$16 sps:$4 sm:$0xff]   ;;  %v11134_v62 = vld [vmem:[%s15289_s3 + $0xf2c] ss:$16 sps:$4 sm:$0xff]  }
 0x2e6   : > { %v8666_v48 = vcombine.low %v14362_v34, %v14364_v60  ;;  %8189 = vmatpush1.bf16.msra.mxu0 %v11081_v59  ;;  %v11126_v42 = vld [vmem:[%s15289_s3 + $0xf48] ss:$16 sps:$4 sm:$0xff]   ;;  %v11137_v11 = vld [vmem:[%s15289_s3 + $0xd0c] ss:$16 sps:$4 sm:$0xff]  }
 0x2e7   : > { %8232 = vmatpush1.bf16.msra.mxu1 %v11084_v37  ;;  %v14376_v61 = vadd.f32 %v8716_v3, %v8715_v16  ;;  %8190 = vmatprep.subr.bf16.mxu0 %v11089_v15  ;;  %v11129_v33 = vld [vmem:[%s15289_s3 + $0xd28] ss:$16 sps:$4 sm:$0xff]   ;;  %v11140_v51 = vld [vmem:[%s15289_s3 + $0xf0c] ss:$16 sps:$4 sm:$0xff]  }
 0x2e8   : > { %8233 = vmatprep.subr.bf16.mxu1 %v11092_v27  ;;  %v11132_v44 = vld [vmem:[%s15289_s3 + $0xf28] ss:$16 sps:$4 sm:$0xff]   ;;  %v11143_v39 = vld [vmem:[%s15289_s3 + $0x10ec] ss:$16 sps:$4 sm:$0xff]  }
 0x2e9   : > { %v8736_v25 = vcombine.low %v14374_v18, %v14376_v61  ;;  %v11135_v23 = vld [vmem:[%s15289_s3 + $0xd08] ss:$16 sps:$4 sm:$0xff]   ;;  %v11146_v6 = vld [vmem:[%s15289_s3 + $0x12ec] ss:$16 sps:$4 sm:$0xff]  }
 0x2ea   : > { %8191 = vmatpush1.bf16.msra.mxu0 %v11087_v40  ;;  %v11138_v41 = vld [vmem:[%s15289_s3 + $0xf08] ss:$16 sps:$4 sm:$0xff]   ;;  %v11149_v59 = vld [vmem:[%s15289_s3 + $0x10cc] ss:$16 sps:$4 sm:$0xff]  }
 0x2eb   : > { %8234 = vmatpush1.bf16.msra.mxu1 %v11090_v31  ;;  %8192 = vmatprep.subr.bf16.mxu0 %v11095_v32  ;;  %v11141_v19 = vld [vmem:[%s15289_s3 + $0x10e8] ss:$16 sps:$4 sm:$0xff]   ;;  %v11152_v37 = vld [vmem:[%s15289_s3 + $0x12cc] ss:$16 sps:$4 sm:$0xff]  }
 0x2ec   : > { %8235 = vmatprep.subr.bf16.mxu1 %v11098_v30  ;;  %v11144_v12 = vld [vmem:[%s15289_s3 + $0x12e8] ss:$16 sps:$4 sm:$0xff]   ;;  %v11155_v15 = vld [vmem:[%s15289_s3 + $0x10ac] ss:$16 sps:$4 sm:$0xff]  }
 0x2ed   : > { %v11147_v10 = vld [vmem:[%s15289_s3 + $0x10c8] ss:$16 sps:$4 sm:$0xff]   ;;  %v11161_v3 = vld [vmem:[%s15289_s3 + $0x108c] ss:$16 sps:$4 sm:$0xff]  }
 0x2ee   : > { %8193 = vmatpush2.bf16.msra.mxu0 %v11093_v29  ;;  %v11150_v16 = vld [vmem:[%s15289_s3 + $0x12c8] ss:$16 sps:$4 sm:$0xff]   ;;  %v11167_v31 = vld [vmem:[%s15289_s3 + $0x106c] ss:$16 sps:$4 sm:$0xff]  }
 0x2ef   : > { %8236 = vmatpush2.bf16.msra.mxu1 %v11096_v9  ;;  %8194 = vmatprep.subr.bf16.mxu0 %v11101_v0  ;;  %v11156_v27 = vld [vmem:[%s15289_s3 + $0x12a8] ss:$16 sps:$4 sm:$0xff]   ;;  %v11170_v32 = vld [vmem:[%s15289_s3 + $0x126c] ss:$16 sps:$4 sm:$0xff]  }
 0x2f0   : > { %8237 = vmatprep.subr.bf16.mxu1 %v11104_v28  ;;  %v11162_v40 = vld [vmem:[%s15289_s3 + $0x1288] ss:$16 sps:$4 sm:$0xff]   ;;  %v11173_v9 = vld [vmem:[%s15289_s3 + $0x104c] ss:$16 sps:$4 sm:$0xff]  }
 0x2f1   : > { %v11165_v30 = vld [vmem:[%s15289_s3 + $0x1068] ss:$16 sps:$4 sm:$0xff]   ;;  %v11176_v0 = vld [vmem:[%s15289_s3 + $0x124c] ss:$16 sps:$4 sm:$0xff]  }
 0x2f2   : > { %8195 = vmatpush2.bf16.msra.mxu0 %v11099_v46  ;;  %v11168_v29 = vld [vmem:[%s15289_s3 + $0x1268] ss:$16 sps:$4 sm:$0xff]  }
 0x2f3   : > { %8238 = vmatpush2.bf16.msra.mxu1 %v11102_v7  ;;  %8196 = vmatprep.subr.bf16.mxu0 %v11107_v52  ;;  %v11171_v28 = vld [vmem:[%s15289_s3 + $0x1048] ss:$16 sps:$4 sm:$0xff]   ;;  %v11179_v7 = vld [vmem:[%s15289_s3 + $0x102c] ss:$16 sps:$4 sm:$0xff]  }
 0x2f4   : > { %8239 = vmatprep.subr.bf16.mxu1 %v11110_v38  ;;  %v11174_v46 = vld [vmem:[%s15289_s3 + $0x1248] ss:$16 sps:$4 sm:$0xff]   ;;  %v11182_v52 = vld [vmem:[%s15289_s3 + $0x122c] ss:$16 sps:$4 sm:$0xff]  }
 0x2f5   : > { %v11177_v38 = vld [vmem:[%s15289_s3 + $0x1028] ss:$16 sps:$4 sm:$0xff]  }
 0x2f6   : > { %8197 = vmatpush2.bf16.msra.mxu0 %v11105_v8  ;;  %v11180_v8 = vld [vmem:[%s15289_s3 + $0x1228] ss:$16 sps:$4 sm:$0xff]  }
 0x2f7   : > { %8240 = vmatpush2.bf16.msra.mxu1 %v11108_v53  ;;  %8198 = vmatprep.subr.bf16.mxu0 %v11113_v22  ;;  %v11185_v53 = vld [vmem:[%s15289_s3 + $0x100c] ss:$16 sps:$4 sm:$0xff]  }
 0x2f8   : > { %8241 = vmatprep.subr.bf16.mxu1 %v11116_v50  ;;  %v11188_v22 = vld [vmem:[%s15289_s3 + $0x120c] ss:$16 sps:$4 sm:$0xff]   ;;  %v11183_v50 = vld [vmem:[%s15289_s3 + $0x1008] ss:$16 sps:$4 sm:$0xff]  }
 0x2fa   : > { %8199 = vmatpush2.bf16.msra.mxu0 %v11111_v35  ;;  %v11186_v35 = vld [vmem:[%s15289_s3 + $0x1208] ss:$16 sps:$4 sm:$0xff]  }
 0x2fb   : > { %8242 = vmatpush2.bf16.msra.mxu1 %v11114_v63  ;;  %8200 = vmatprep.subr.bf16.mxu0 %v11119_v20  ;;  %v11191_v63 = vld [vmem:[%s15289_s3 + $0x11ec] ss:$16 sps:$4 sm:$0xff]  }
 0x2fc   : > { %8243 = vmatprep.subr.bf16.mxu1 %v11122_v57  ;;  %v11194_v20 = vld [vmem:[%s15289_s3 + $0x13ec] ss:$16 sps:$4 sm:$0xff]   ;;  %v11189_v57 = vld [vmem:[%s15289_s3 + $0x11e8] ss:$16 sps:$4 sm:$0xff]  }
 0x2fe   : > { %8201 = vmatpush2.bf16.msra.mxu0 %v11117_v4  ;;  %v11192_v4 = vld [vmem:[%s15289_s3 + $0x13e8] ss:$16 sps:$4 sm:$0xff]  }
 0x2ff   : > { %8244 = vmatpush2.bf16.msra.mxu1 %v11120_v13  ;;  %8202 = vmatprep.subr.bf16.mxu0 %v11125_v58  ;;  %v11197_v13 = vld [vmem:[%s15289_s3 + $0x11cc] ss:$16 sps:$4 sm:$0xff]  }
 0x300   : > { %8245 = vmatprep.subr.bf16.mxu1 %v11128_v14  ;;  %v11200_v58 = vld [vmem:[%s15289_s3 + $0x13cc] ss:$16 sps:$4 sm:$0xff]   ;;  %v11195_v14 = vld [vmem:[%s15289_s3 + $0x11c8] ss:$16 sps:$4 sm:$0xff]  }
 0x302   : > { %8203 = vmatpush2.bf16.msra.mxu0 %v11123_v26  ;;  %v11198_v26 = vld [vmem:[%s15289_s3 + $0x13c8] ss:$16 sps:$4 sm:$0xff]  }
 0x303   : > { %8246 = vmatpush2.bf16.msra.mxu1 %v11126_v42  ;;  %8204 = vmatprep.subr.bf16.mxu0 %v11131_v45  ;;  %v11203_v42 = vld [vmem:[%s15289_s3 + $0x11ac] ss:$16 sps:$4 sm:$0xff]  }
 0x304   : > { %8247 = vmatprep.subr.bf16.mxu1 %v11134_v62  ;;  %v11206_v45 = vld [vmem:[%s15289_s3 + $0x13ac] ss:$16 sps:$4 sm:$0xff]   ;;  %v11201_v62 = vld [vmem:[%s15289_s3 + $0x11a8] ss:$16 sps:$4 sm:$0xff]  }
 0x306   : > { %8205 = vmatpush2.bf16.msra.mxu0 %v11129_v33  ;;  %v11204_v33 = vld [vmem:[%s15289_s3 + $0x13a8] ss:$16 sps:$4 sm:$0xff]  }
 0x307   : > { %8248 = vmatpush2.bf16.msra.mxu1 %v11132_v44  ;;  %8206 = vmatprep.subr.bf16.mxu0 %v11137_v11  ;;  %v11209_v44 = vld [vmem:[%s15289_s3 + $0x118c] ss:$16 sps:$4 sm:$0xff]  }
 0x308   : > { %8249 = vmatprep.subr.bf16.mxu1 %v11140_v51  ;;  %v11212_v11 = vld [vmem:[%s15289_s3 + $0x138c] ss:$16 sps:$4 sm:$0xff]   ;;  %v11207_v51 = vld [vmem:[%s15289_s3 + $0x1188] ss:$16 sps:$4 sm:$0xff]  }
 0x30a   : > { %8207 = vmatpush2.bf16.msra.mxu0 %v11135_v23  ;;  %v11210_v23 = vld [vmem:[%s15289_s3 + $0x1388] ss:$16 sps:$4 sm:$0xff]  }
 0x30b   : > { %8250 = vmatpush2.bf16.msra.mxu1 %v11138_v41  ;;  %8262 = vmatprep.subr.bf16.mxu0 %v11143_v39  ;;  %v11215_v41 = vld [vmem:[%s15289_s3 + $0x116c] ss:$16 sps:$4 sm:$0xff]  }
 0x30c   : > { %8305 = vmatprep.subr.bf16.mxu1 %v11146_v6  ;;  %v11218_v39 = vld [vmem:[%s15289_s3 + $0x136c] ss:$16 sps:$4 sm:$0xff]   ;;  %v11213_v6 = vld [vmem:[%s15289_s3 + $0x1168] ss:$16 sps:$4 sm:$0xff]  }
 0x30d   : > { %8209 = vmatmul.mubr.bf16.vlgmr.msra.gmra.mxu0 %v12416_v43  ;;  %v11158_v43 = vld [vmem:[%s15289_s3 + $0x12ac] ss:$16 sps:$4 sm:$0xff]  }
 0x30e   : > { %8252 = vmatmul.mubr.bf16.vlgmr.msra.gmra.mxu1 %v12435_v5  ;;  %8263 = vmatpush1.bf16.msra.mxu0 %v11141_v19  ;;  %v11153_v5 = vld [vmem:[%s15289_s3 + $0x10a8] ss:$16 sps:$4 sm:$0xff]  }
 0x30f   : > { %8306 = vmatpush1.bf16.msra.mxu1 %v11144_v12  ;;  %8264 = vmatprep.subr.bf16.mxu0 %v11149_v59  ;;  %v11216_v19 = vld [vmem:[%s15289_s3 + $0x1368] ss:$16 sps:$4 sm:$0xff]   ;;  %v11221_v12 = vld [vmem:[%s15289_s3 + $0x114c] ss:$16 sps:$4 sm:$0xff]  }
 0x310   : > { %8307 = vmatprep.subr.bf16.mxu1 %v11152_v37  ;;  %8294 = vmatprep.mubr.bf16.mxu0 %v12636_v54  ;;  %v11164_v54 = vld [vmem:[%s15289_s3 + $0x128c] ss:$16 sps:$4 sm:$0xff]   ;;  %v11219_v37 = vld [vmem:[%s15289_s3 + $0x1148] ss:$16 sps:$4 sm:$0xff]  }
 0x311   : > { %8337 = vmatprep.mubr.bf16.mxu1 %v12638_v1  ;;  %v11159_v1 = vld [vmem:[%s15289_s3 + $0x1088] ss:$16 sps:$4 sm:$0xff]   ;;  %v11224_v59 = vld [vmem:[%s15289_s3 + $0x134c] ss:$16 sps:$4 sm:$0xff]  }
 0x312   : > { %8265 = vmatpush1.bf16.msra.mxu0 %v11147_v10  ;;  %v11222_v10 = vld [vmem:[%s15289_s3 + $0x1348] ss:$16 sps:$4 sm:$0xff]  }
 0x313   : > { %8308 = vmatpush1.bf16.msra.mxu1 %v11150_v16  ;;  %8266 = vmatprep.subr.bf16.mxu0 %v11155_v15  ;;  %v11227_v16 = vld [vmem:[%s15289_s3 + $0x112c] ss:$16 sps:$4 sm:$0xff]  }
 0x314   : > { %8309 = vmatprep.subr.bf16.mxu1 %v11158_v43  ;;  %v11230_v15 = vld [vmem:[%s15289_s3 + $0x132c] ss:$16 sps:$4 sm:$0xff]   ;;  %v11225_v43 = vld [vmem:[%s15289_s3 + $0x1128] ss:$16 sps:$4 sm:$0xff]  }
 0x316   : > { %8267 = vmatpush1.bf16.msra.mxu0 %v11153_v5  ;;  %v11228_v5 = vld [vmem:[%s15289_s3 + $0x1328] ss:$16 sps:$4 sm:$0xff]  }
 0x317   : > { %8310 = vmatpush1.bf16.msra.mxu1 %v11156_v27  ;;  %8268 = vmatprep.subr.bf16.mxu0 %v11161_v3  ;;  %v11233_v27 = vld [vmem:[%s15289_s3 + $0x110c] ss:$16 sps:$4 sm:$0xff]  }
 0x318   : > { %8311 = vmatprep.subr.bf16.mxu1 %v11164_v54  ;;  %v11236_v3 = vld [vmem:[%s15289_s3 + $0x130c] ss:$16 sps:$4 sm:$0xff]   ;;  %v11231_v54 = vld [vmem:[%s15289_s3 + $0x1108] ss:$16 sps:$4 sm:$0xff]  }
 0x31a   : > { %8269 = vmatpush1.bf16.msra.mxu0 %v11159_v1  ;;  %v11234_v1 = vld [vmem:[%s15289_s3 + $0x1308] ss:$16 sps:$4 sm:$0xff]  }
 0x31b   : > { %8312 = vmatpush1.bf16.msra.mxu1 %v11162_v40  ;;  %8270 = vmatprep.subr.bf16.mxu0 %v11167_v31  ;;  %v11239_v40 = vld [vmem:[%s15289_s3 + $0x14ec] ss:$16 sps:$4 sm:$0xff]  }
 0x31c   : > { %8313 = vmatprep.subr.bf16.mxu1 %v11170_v32  ;;  %v11242_v31 = vld [vmem:[%s15289_s3 + $0x16ec] ss:$16 sps:$4 sm:$0xff]   ;;  %v11237_v32 = vld [vmem:[%s15289_s3 + $0x14e8] ss:$16 sps:$4 sm:$0xff]  }
 0x31e   : > { %8271 = vmatpush1.bf16.msra.mxu0 %v11165_v30  ;;  %v11240_v30 = vld [vmem:[%s15289_s3 + $0x16e8] ss:$16 sps:$4 sm:$0xff]  }
 0x31f   : > { %8314 = vmatpush1.bf16.msra.mxu1 %v11168_v29  ;;  %8272 = vmatprep.subr.bf16.mxu0 %v11173_v9  ;;  %v11245_v29 = vld [vmem:[%s15289_s3 + $0x14cc] ss:$16 sps:$4 sm:$0xff]  }
 0x320   : > { %8315 = vmatprep.subr.bf16.mxu1 %v11176_v0  ;;  %v11248_v9 = vld [vmem:[%s15289_s3 + $0x16cc] ss:$16 sps:$4 sm:$0xff]   ;;  %v11243_v0 = vld [vmem:[%s15289_s3 + $0x14c8] ss:$16 sps:$4 sm:$0xff]  }
 0x322   : > { %8273 = vmatpush1.bf16.msra.mxu0 %v11171_v28  ;;  %v11246_v28 = vld [vmem:[%s15289_s3 + $0x16c8] ss:$16 sps:$4 sm:$0xff]  }
 0x323   : > { %8316 = vmatpush1.bf16.msra.mxu1 %v11174_v46  ;;  %8274 = vmatprep.subr.bf16.mxu0 %v11179_v7  ;;  %v11251_v46 = vld [vmem:[%s15289_s3 + $0x14ac] ss:$16 sps:$4 sm:$0xff]   ;;  %v11252_v7 = vld [vmem:[%s15289_s3 + $0x16a8] ss:$16 sps:$4 sm:$0xff]  }
 0x324   : > { %8317 = vmatprep.subr.bf16.mxu1 %v11182_v52  ;;  %v11257_v52 = vld [vmem:[%s15289_s3 + $0x148c] ss:$16 sps:$4 sm:$0xff]  }
 0x326   : > { %8275 = vmatpush1.bf16.msra.mxu0 %v11177_v38  ;;  %v11258_v38 = vld [vmem:[%s15289_s3 + $0x1688] ss:$16 sps:$4 sm:$0xff]  }
 0x327   : > { %8318 = vmatpush1.bf16.msra.mxu1 %v11180_v8  ;;  %8276 = vmatprep.subr.bf16.mxu0 %v11185_v53  ;;  %v11263_v8 = vld [vmem:[%s15289_s3 + $0x146c] ss:$16 sps:$4 sm:$0xff]  }
 0x328   : > { %8319 = vmatprep.subr.bf16.mxu1 %v11188_v22  ;;  %v11266_v53 = vld [vmem:[%s15289_s3 + $0x166c] ss:$16 sps:$4 sm:$0xff]   ;;  %v11261_v22 = vld [vmem:[%s15289_s3 + $0x1468] ss:$16 sps:$4 sm:$0xff]  }
 0x32a   : > { %8277 = vmatpush1.bf16.msra.mxu0 %v11183_v50  ;;  %v11264_v50 = vld [vmem:[%s15289_s3 + $0x1668] ss:$16 sps:$4 sm:$0xff]  }
 0x32b   : > { %8320 = vmatpush1.bf16.msra.mxu1 %v11186_v35  ;;  %8278 = vmatprep.subr.bf16.mxu0 %v11191_v63  ;;  %v11269_v35 = vld [vmem:[%s15289_s3 + $0x144c] ss:$16 sps:$4 sm:$0xff]  }
 0x32c   : > { %8321 = vmatprep.subr.bf16.mxu1 %v11194_v20  ;;  %v11272_v63 = vld [vmem:[%s15289_s3 + $0x164c] ss:$16 sps:$4 sm:$0xff]   ;;  %v11267_v20 = vld [vmem:[%s15289_s3 + $0x1448] ss:$16 sps:$4 sm:$0xff]  }
 0x32e   : > { %8279 = vmatpush2.bf16.msra.mxu0 %v11189_v57  ;;  %v11270_v57 = vld [vmem:[%s15289_s3 + $0x1648] ss:$16 sps:$4 sm:$0xff]  }
 0x32f   : > { %8322 = vmatpush2.bf16.msra.mxu1 %v11192_v4  ;;  %8280 = vmatprep.subr.bf16.mxu0 %v11197_v13  ;;  %v11275_v4 = vld [vmem:[%s15289_s3 + $0x142c] ss:$16 sps:$4 sm:$0xff]  }
 0x330   : > { %8323 = vmatprep.subr.bf16.mxu1 %v11200_v58  ;;  %v11278_v13 = vld [vmem:[%s15289_s3 + $0x162c] ss:$16 sps:$4 sm:$0xff]   ;;  %v11273_v58 = vld [vmem:[%s15289_s3 + $0x1428] ss:$16 sps:$4 sm:$0xff]  }
 0x332   : > { %8281 = vmatpush2.bf16.msra.mxu0 %v11195_v14  ;;  %v11276_v14 = vld [vmem:[%s15289_s3 + $0x1628] ss:$16 sps:$4 sm:$0xff]  }
 0x333   : > { %8324 = vmatpush2.bf16.msra.mxu1 %v11198_v26  ;;  %8282 = vmatprep.subr.bf16.mxu0 %v11203_v42  ;;  %v11281_v26 = vld [vmem:[%s15289_s3 + $0x140c] ss:$16 sps:$4 sm:$0xff]  }
 0x334   : > { %8325 = vmatprep.subr.bf16.mxu1 %v11206_v45  ;;  %v11284_v42 = vld [vmem:[%s15289_s3 + $0x160c] ss:$16 sps:$4 sm:$0xff]   ;;  %v11279_v45 = vld [vmem:[%s15289_s3 + $0x1408] ss:$16 sps:$4 sm:$0xff]  }
 0x336   : > { %8283 = vmatpush2.bf16.msra.mxu0 %v11201_v62  ;;  %v11282_v62 = vld [vmem:[%s15289_s3 + $0x1608] ss:$16 sps:$4 sm:$0xff]  }
 0x337   : > { %8326 = vmatpush2.bf16.msra.mxu1 %v11204_v33  ;;  %8284 = vmatprep.subr.bf16.mxu0 %v11209_v44  ;;  %v11287_v33 = vld [vmem:[%s15289_s3 + $0x15ec] ss:$16 sps:$4 sm:$0xff]  }
 0x338   : > { %8327 = vmatprep.subr.bf16.mxu1 %v11212_v11  ;;  %v11290_v44 = vld [vmem:[%s15289_s3 + $0x17ec] ss:$16 sps:$4 sm:$0xff]   ;;  %v11285_v11 = vld [vmem:[%s15289_s3 + $0x15e8] ss:$16 sps:$4 sm:$0xff]  }
 0x33a   : > { %8285 = vmatpush2.bf16.msra.mxu0 %v11207_v51  ;;  %v11288_v51 = vld [vmem:[%s15289_s3 + $0x17e8] ss:$16 sps:$4 sm:$0xff]  }
 0x33b   : > { %8328 = vmatpush2.bf16.msra.mxu1 %v11210_v23  ;;  %8286 = vmatprep.subr.bf16.mxu0 %v11215_v41  ;;  %v11293_v23 = vld [vmem:[%s15289_s3 + $0x15cc] ss:$16 sps:$4 sm:$0xff]  }
 0x33c   : > { %8329 = vmatprep.subr.bf16.mxu1 %v11218_v39  ;;  %v11296_v41 = vld [vmem:[%s15289_s3 + $0x17cc] ss:$16 sps:$4 sm:$0xff]   ;;  %v11291_v39 = vld [vmem:[%s15289_s3 + $0x15c8] ss:$16 sps:$4 sm:$0xff]  }
 0x33e   : > { %8287 = vmatpush2.bf16.msra.mxu0 %v11213_v6  ;;  %v11294_v6 = vld [vmem:[%s15289_s3 + $0x17c8] ss:$16 sps:$4 sm:$0xff]  }
 0x33f   : > { %8330 = vmatpush2.bf16.msra.mxu1 %v11216_v19  ;;  %8288 = vmatprep.subr.bf16.mxu0 %v11221_v12  ;;  %v11299_v19 = vld [vmem:[%s15289_s3 + $0x15ac] ss:$16 sps:$4 sm:$0xff]  }
 0x340   : > { %8331 = vmatprep.subr.bf16.mxu1 %v11224_v59  ;;  %v11302_v12 = vld [vmem:[%s15289_s3 + $0x17ac] ss:$16 sps:$4 sm:$0xff]   ;;  %v11297_v59 = vld [vmem:[%s15289_s3 + $0x15a8] ss:$16 sps:$4 sm:$0xff]  }
 0x342   : > { %8289 = vmatpush2.bf16.msra.mxu0 %v11219_v37  ;;  %v11300_v37 = vld [vmem:[%s15289_s3 + $0x17a8] ss:$16 sps:$4 sm:$0xff]  }
 0x343   : > { %8332 = vmatpush2.bf16.msra.mxu1 %v11222_v10  ;;  %8290 = vmatprep.subr.bf16.mxu0 %v11227_v16  ;;  %v11305_v10 = vld [vmem:[%s15289_s3 + $0x158c] ss:$16 sps:$4 sm:$0xff]  }
 0x344   : > { %8333 = vmatprep.subr.bf16.mxu1 %v11230_v15  ;;  %v11308_v16 = vld [vmem:[%s15289_s3 + $0x178c] ss:$16 sps:$4 sm:$0xff]   ;;  %v11303_v15 = vld [vmem:[%s15289_s3 + $0x1588] ss:$16 sps:$4 sm:$0xff]  }
 0x346   : > { %8291 = vmatpush2.bf16.msra.mxu0 %v11225_v43  ;;  %v11306_v43 = vld [vmem:[%s15289_s3 + $0x1788] ss:$16 sps:$4 sm:$0xff]  }
 0x347   : > { %8334 = vmatpush2.bf16.msra.mxu1 %v11228_v5  ;;  %8292 = vmatprep.subr.bf16.mxu0 %v11233_v27  ;;  %v11311_v5 = vld [vmem:[%s15289_s3 + $0x156c] ss:$16 sps:$4 sm:$0xff]  }
 0x348   : > { %8335 = vmatprep.subr.bf16.mxu1 %v11236_v3  ;;  %v11314_v27 = vld [vmem:[%s15289_s3 + $0x176c] ss:$16 sps:$4 sm:$0xff]   ;;  %v11309_v3 = vld [vmem:[%s15289_s3 + $0x1568] ss:$16 sps:$4 sm:$0xff]  }
 0x34a   : > { %8293 = vmatpush2.bf16.msra.mxu0 %v11231_v54  ;;  %v11312_v54 = vld [vmem:[%s15289_s3 + $0x1768] ss:$16 sps:$4 sm:$0xff]  }
 0x34b   : > { %8336 = vmatpush2.bf16.msra.mxu1 %v11234_v1  ;;  %8348 = vmatprep.subr.bf16.mxu0 %v11239_v40  ;;  %v11317_v1 = vld [vmem:[%s15289_s3 + $0x154c] ss:$16 sps:$4 sm:$0xff]  }
 0x34c   : > { %8391 = vmatprep.subr.bf16.mxu1 %v11242_v31  ;;  %v11320_v40 = vld [vmem:[%s15289_s3 + $0x174c] ss:$16 sps:$4 sm:$0xff]   ;;  %v11315_v31 = vld [vmem:[%s15289_s3 + $0x1548] ss:$16 sps:$4 sm:$0xff]  }
 0x34d   : > { %8295 = vmatmul.mubr.bf16.vlgmr.msra.gmra.mxu0 %v12870_v24  ;;  %v11254_v24 = vld [vmem:[%s15289_s3 + $0x16ac] ss:$16 sps:$4 sm:$0xff]  }
 0x34e   : > { %8338 = vmatmul.mubr.bf16.vlgmr.msra.gmra.mxu1 %v12872_v2  ;;  %8349 = vmatpush1.bf16.msra.mxu0 %v11237_v32  ;;  %v11249_v2 = vld [vmem:[%s15289_s3 + $0x14a8] ss:$16 sps:$4 sm:$0xff]  }
 0x34f   : > { %8392 = vmatpush1.bf16.msra.mxu1 %v11240_v30  ;;  %8350 = vmatprep.subr.bf16.mxu0 %v11245_v29  ;;  %v11318_v32 = vld [vmem:[%s15289_s3 + $0x1748] ss:$16 sps:$4 sm:$0xff]   ;;  %v11323_v30 = vld [vmem:[%s15289_s3 + $0x152c] ss:$16 sps:$4 sm:$0xff]  }
 0x350   : > { %8393 = vmatprep.subr.bf16.mxu1 %v11248_v9  ;;  %8380 = vmatprep.mubr.bf16.mxu0 %v12765_v21  ;;  %v11260_v21 = vld [vmem:[%s15289_s3 + $0x168c] ss:$16 sps:$4 sm:$0xff]   ;;  %v11321_v9 = vld [vmem:[%s15289_s3 + $0x1528] ss:$16 sps:$4 sm:$0xff]  }
 0x351   : > { %8423 = vmatprep.mubr.bf16.mxu1 %v12773_v55  ;;  %v11255_v55 = vld [vmem:[%s15289_s3 + $0x1488] ss:$16 sps:$4 sm:$0xff]   ;;  %v11326_v29 = vld [vmem:[%s15289_s3 + $0x172c] ss:$16 sps:$4 sm:$0xff]  }
 0x352   : > { %8351 = vmatpush1.bf16.msra.mxu0 %v11243_v0  ;;  %v11324_v0 = vld [vmem:[%s15289_s3 + $0x1728] ss:$16 sps:$4 sm:$0xff]  }
 0x353   : > { %8394 = vmatpush1.bf16.msra.mxu1 %v11246_v28  ;;  %8352 = vmatprep.subr.bf16.mxu0 %v11251_v46  ;;  %v11329_v28 = vld [vmem:[%s15289_s3 + $0x150c] ss:$16 sps:$4 sm:$0xff]  }
 0x354   : > { %8395 = vmatprep.subr.bf16.mxu1 %v11254_v24  ;;  %v11332_v46 = vld [vmem:[%s15289_s3 + $0x170c] ss:$16 sps:$4 sm:$0xff]   ;;  %v11327_v24 = vld [vmem:[%s15289_s3 + $0x1508] ss:$16 sps:$4 sm:$0xff]  }
 0x356   : > { %8353 = vmatpush1.bf16.msra.mxu0 %v11249_v2  ;;  %v11330_v2 = vld [vmem:[%s15289_s3 + $0x1708] ss:$16 sps:$4 sm:$0xff]  }
 0x357   : > { %8396 = vmatpush1.bf16.msra.mxu1 %v11252_v7  ;;  %8354 = vmatprep.subr.bf16.mxu0 %v11257_v52  ;;  %v11335_v7 = vld [vmem:[%s15289_s3 + $0x18ec] ss:$16 sps:$4 sm:$0xff]  }
 0x358   : > { %8397 = vmatprep.subr.bf16.mxu1 %v11260_v21  ;;  %v11338_v52 = vld [vmem:[%s15289_s3 + $0x1aec] ss:$16 sps:$4 sm:$0xff]   ;;  %v11333_v21 = vld [vmem:[%s15289_s3 + $0x18e8] ss:$16 sps:$4 sm:$0xff]  }
 0x35a   : > { %8355 = vmatpush1.bf16.msra.mxu0 %v11255_v55  ;;  %v11336_v55 = vld [vmem:[%s15289_s3 + $0x1ae8] ss:$16 sps:$4 sm:$0xff]  }
 0x35b   : > { %8398 = vmatpush1.bf16.msra.mxu1 %v11258_v38  ;;  %8356 = vmatprep.subr.bf16.mxu0 %v11263_v8  ;;  %v11341_v38 = vld [vmem:[%s15289_s3 + $0x18cc] ss:$16 sps:$4 sm:$0xff]  }
 0x35c   : > { %8399 = vmatprep.subr.bf16.mxu1 %v11266_v53  ;;  %v11344_v8 = vld [vmem:[%s15289_s3 + $0x1acc] ss:$16 sps:$4 sm:$0xff]   ;;  %v11339_v53 = vld [vmem:[%s15289_s3 + $0x18c8] ss:$16 sps:$4 sm:$0xff]  }
 0x35e   : > { %8357 = vmatpush1.bf16.msra.mxu0 %v11261_v22  ;;  %v11342_v22 = vld [vmem:[%s15289_s3 + $0x1ac8] ss:$16 sps:$4 sm:$0xff]  }
 0x35f   : > { %8400 = vmatpush1.bf16.msra.mxu1 %v11264_v50  ;;  %8358 = vmatprep.subr.bf16.mxu0 %v11269_v35  ;;  %v11347_v50 = vld [vmem:[%s15289_s3 + $0x18ac] ss:$16 sps:$4 sm:$0xff]   ;;  %v11348_v35 = vld [vmem:[%s15289_s3 + $0x1aa8] ss:$16 sps:$4 sm:$0xff]  }
 0x360   : > { %8401 = vmatprep.subr.bf16.mxu1 %v11272_v63  ;;  %v11353_v63 = vld [vmem:[%s15289_s3 + $0x188c] ss:$16 sps:$4 sm:$0xff]  }
 0x362   : > { %8359 = vmatpush1.bf16.msra.mxu0 %v11267_v20  ;;  %v11354_v20 = vld [vmem:[%s15289_s3 + $0x1a88] ss:$16 sps:$4 sm:$0xff]  }
 0x363   : > { %8402 = vmatpush1.bf16.msra.mxu1 %v11270_v57  ;;  %8360 = vmatprep.subr.bf16.mxu0 %v11275_v4  ;;  %v11359_v57 = vld [vmem:[%s15289_s3 + $0x186c] ss:$16 sps:$4 sm:$0xff]  }
 0x364   : > { %8403 = vmatprep.subr.bf16.mxu1 %v11278_v13  ;;  %v11362_v4 = vld [vmem:[%s15289_s3 + $0x1a6c] ss:$16 sps:$4 sm:$0xff]   ;;  %v11357_v13 = vld [vmem:[%s15289_s3 + $0x1868] ss:$16 sps:$4 sm:$0xff]  }
 0x366   : > { %8361 = vmatpush1.bf16.msra.mxu0 %v11273_v58  ;;  %v11360_v58 = vld [vmem:[%s15289_s3 + $0x1a68] ss:$16 sps:$4 sm:$0xff]  }
 0x367   : > { %8404 = vmatpush1.bf16.msra.mxu1 %v11276_v14  ;;  %8362 = vmatprep.subr.bf16.mxu0 %v11281_v26  ;;  %v11365_v14 = vld [vmem:[%s15289_s3 + $0x184c] ss:$16 sps:$4 sm:$0xff]  }
 0x368   : > { %8405 = vmatprep.subr.bf16.mxu1 %v11284_v42  ;;  %v11368_v26 = vld [vmem:[%s15289_s3 + $0x1a4c] ss:$16 sps:$4 sm:$0xff]   ;;  %v11363_v42 = vld [vmem:[%s15289_s3 + $0x1848] ss:$16 sps:$4 sm:$0xff]  }
 0x36a   : > { %8363 = vmatpush1.bf16.msra.mxu0 %v11279_v45  ;;  %v11366_v45 = vld [vmem:[%s15289_s3 + $0x1a48] ss:$16 sps:$4 sm:$0xff]  }
 0x36b   : > { %8406 = vmatpush1.bf16.msra.mxu1 %v11282_v62  ;;  %8364 = vmatprep.subr.bf16.mxu0 %v11287_v33  ;;  %v11371_v62 = vld [vmem:[%s15289_s3 + $0x182c] ss:$16 sps:$4 sm:$0xff]  }
 0x36c   : > { %8407 = vmatprep.subr.bf16.mxu1 %v11290_v44  ;;  %v11374_v33 = vld [vmem:[%s15289_s3 + $0x1a2c] ss:$16 sps:$4 sm:$0xff]   ;;  %v11369_v44 = vld [vmem:[%s15289_s3 + $0x1828] ss:$16 sps:$4 sm:$0xff]  }
 0x36e   : > { %8365 = vmatpush2.bf16.msra.mxu0 %v11285_v11  ;;  %v11372_v11 = vld [vmem:[%s15289_s3 + $0x1a28] ss:$16 sps:$4 sm:$0xff]  }
 0x36f   : > { %8408 = vmatpush2.bf16.msra.mxu1 %v11288_v51  ;;  %8366 = vmatprep.subr.bf16.mxu0 %v11293_v23  ;;  %v11377_v51 = vld [vmem:[%s15289_s3 + $0x180c] ss:$16 sps:$4 sm:$0xff]  }
 0x370   : > { %8409 = vmatprep.subr.bf16.mxu1 %v11296_v41  ;;  %v11380_v23 = vld [vmem:[%s15289_s3 + $0x1a0c] ss:$16 sps:$4 sm:$0xff]   ;;  %v11375_v41 = vld [vmem:[%s15289_s3 + $0x1808] ss:$16 sps:$4 sm:$0xff]  }
 0x372   : > { %8367 = vmatpush2.bf16.msra.mxu0 %v11291_v39  ;;  %v11378_v39 = vld [vmem:[%s15289_s3 + $0x1a08] ss:$16 sps:$4 sm:$0xff]  }
 0x373   : > { %8410 = vmatpush2.bf16.msra.mxu1 %v11294_v6  ;;  %8368 = vmatprep.subr.bf16.mxu0 %v11299_v19  ;;  %v11383_v6 = vld [vmem:[%s15289_s3 + $0x19ec] ss:$16 sps:$4 sm:$0xff]  }
 0x374   : > { %8411 = vmatprep.subr.bf16.mxu1 %v11302_v12  ;;  %v11386_v19 = vld [vmem:[%s15289_s3 + $0x1bec] ss:$16 sps:$4 sm:$0xff]   ;;  %v11381_v12 = vld [vmem:[%s15289_s3 + $0x19e8] ss:$16 sps:$4 sm:$0xff]  }
 0x376   : > { %8369 = vmatpush2.bf16.msra.mxu0 %v11297_v59  ;;  %v11384_v59 = vld [vmem:[%s15289_s3 + $0x1be8] ss:$16 sps:$4 sm:$0xff]  }
 0x377   : > { %8412 = vmatpush2.bf16.msra.mxu1 %v11300_v37  ;;  %8370 = vmatprep.subr.bf16.mxu0 %v11305_v10  ;;  %v11389_v37 = vld [vmem:[%s15289_s3 + $0x19cc] ss:$16 sps:$4 sm:$0xff]  }
 0x378   : > { %8413 = vmatprep.subr.bf16.mxu1 %v11308_v16  ;;  %v11392_v10 = vld [vmem:[%s15289_s3 + $0x1bcc] ss:$16 sps:$4 sm:$0xff]   ;;  %v11387_v16 = vld [vmem:[%s15289_s3 + $0x19c8] ss:$16 sps:$4 sm:$0xff]  }
 0x37a   : > { %8371 = vmatpush2.bf16.msra.mxu0 %v11303_v15  ;;  %v11390_v15 = vld [vmem:[%s15289_s3 + $0x1bc8] ss:$16 sps:$4 sm:$0xff]  }
 0x37b   : > { %8414 = vmatpush2.bf16.msra.mxu1 %v11306_v43  ;;  %8372 = vmatprep.subr.bf16.mxu0 %v11311_v5  ;;  %v11395_v43 = vld [vmem:[%s15289_s3 + $0x19ac] ss:$16 sps:$4 sm:$0xff]  }
 0x37c   : > { %8415 = vmatprep.subr.bf16.mxu1 %v11314_v27  ;;  %v11398_v5 = vld [vmem:[%s15289_s3 + $0x1bac] ss:$16 sps:$4 sm:$0xff]   ;;  %v11393_v27 = vld [vmem:[%s15289_s3 + $0x19a8] ss:$16 sps:$4 sm:$0xff]  }
 0x37e   : > { %8373 = vmatpush2.bf16.msra.mxu0 %v11309_v3  ;;  %v11396_v3 = vld [vmem:[%s15289_s3 + $0x1ba8] ss:$16 sps:$4 sm:$0xff]  }
 0x37f   : > { %8416 = vmatpush2.bf16.msra.mxu1 %v11312_v54  ;;  %8374 = vmatprep.subr.bf16.mxu0 %v11317_v1  ;;  %v11401_v54 = vld [vmem:[%s15289_s3 + $0x198c] ss:$16 sps:$4 sm:$0xff]  }
 0x380   : > { %8417 = vmatprep.subr.bf16.mxu1 %v11320_v40  ;;  %v11404_v1 = vld [vmem:[%s15289_s3 + $0x1b8c] ss:$16 sps:$4 sm:$0xff]   ;;  %v11399_v40 = vld [vmem:[%s15289_s3 + $0x1988] ss:$16 sps:$4 sm:$0xff]  }
 0x382   : > { %8375 = vmatpush2.bf16.msra.mxu0 %v11315_v31  ;;  %v11402_v31 = vld [vmem:[%s15289_s3 + $0x1b88] ss:$16 sps:$4 sm:$0xff]  }
 0x383   : > { %8418 = vmatpush2.bf16.msra.mxu1 %v11318_v32  ;;  %8376 = vmatprep.subr.bf16.mxu0 %v11323_v30  ;;  %v11407_v32 = vld [vmem:[%s15289_s3 + $0x196c] ss:$16 sps:$4 sm:$0xff]  }
 0x384   : > { %8419 = vmatprep.subr.bf16.mxu1 %v11326_v29  ;;  %v11410_v30 = vld [vmem:[%s15289_s3 + $0x1b6c] ss:$16 sps:$4 sm:$0xff]   ;;  %v11405_v29 = vld [vmem:[%s15289_s3 + $0x1968] ss:$16 sps:$4 sm:$0xff]  }
 0x386   : > { %8377 = vmatpush2.bf16.msra.mxu0 %v11321_v9  ;;  %v11408_v9 = vld [vmem:[%s15289_s3 + $0x1b68] ss:$16 sps:$4 sm:$0xff]  }
 0x387   : > { %8420 = vmatpush2.bf16.msra.mxu1 %v11324_v0  ;;  %8378 = vmatprep.subr.bf16.mxu0 %v11329_v28  ;;  %v11413_v0 = vld [vmem:[%s15289_s3 + $0x194c] ss:$16 sps:$4 sm:$0xff]  }
 0x388   : > { %8421 = vmatprep.subr.bf16.mxu1 %v11332_v46  ;;  %v11416_v28 = vld [vmem:[%s15289_s3 + $0x1b4c] ss:$16 sps:$4 sm:$0xff]   ;;  %v11411_v46 = vld [vmem:[%s15289_s3 + $0x1948] ss:$16 sps:$4 sm:$0xff]  }
 0x38a   : > { %8379 = vmatpush2.bf16.msra.mxu0 %v11327_v24  ;;  %v11414_v24 = vld [vmem:[%s15289_s3 + $0x1b48] ss:$16 sps:$4 sm:$0xff]  }
 0x38b   : > { %8422 = vmatpush2.bf16.msra.mxu1 %v11330_v2  ;;  %8434 = vmatprep.subr.bf16.mxu0 %v11335_v7  ;;  %v11419_v2 = vld [vmem:[%s15289_s3 + $0x192c] ss:$16 sps:$4 sm:$0xff]  }
 0x38c   : > { %8477 = vmatprep.subr.bf16.mxu1 %v11338_v52  ;;  %v11422_v7 = vld [vmem:[%s15289_s3 + $0x1b2c] ss:$16 sps:$4 sm:$0xff]   ;;  %v11417_v52 = vld [vmem:[%s15289_s3 + $0x1928] ss:$16 sps:$4 sm:$0xff]  }
 0x38d   : > { %8381 = vmatmul.mubr.bf16.vlgmr.msra.gmra.mxu0 %v12785_v17  ;;  %v11350_v17 = vld [vmem:[%s15289_s3 + $0x1aac] ss:$16 sps:$4 sm:$0xff]  }
 0x38e   : > { %8424 = vmatmul.mubr.bf16.vlgmr.msra.gmra.mxu1 %v12799_v49  ;;  %8435 = vmatpush1.bf16.msra.mxu0 %v11333_v21  ;;  %v11345_v49 = vld [vmem:[%s15289_s3 + $0x18a8] ss:$16 sps:$4 sm:$0xff]  }
 0x38f   : > { %8478 = vmatpush1.bf16.msra.mxu1 %v11336_v55  ;;  %8436 = vmatprep.subr.bf16.mxu0 %v11341_v38  ;;  %v11420_v21 = vld [vmem:[%s15289_s3 + $0x1b28] ss:$16 sps:$4 sm:$0xff]   ;;  %v11425_v55 = vld [vmem:[%s15289_s3 + $0x190c] ss:$16 sps:$4 sm:$0xff]  }
 0x390   : > { %8479 = vmatprep.subr.bf16.mxu1 %v11344_v8  ;;  %8466 = vmatprep.mubr.bf16.mxu0 %v13080_v36  ;;  %v11356_v36 = vld [vmem:[%s15289_s3 + $0x1a8c] ss:$16 sps:$4 sm:$0xff]   ;;  %v11423_v8 = vld [vmem:[%s15289_s3 + $0x1908] ss:$16 sps:$4 sm:$0xff]  }
 0x391   : > { %8509 = vmatprep.mubr.bf16.mxu1 %v13082_v47  ;;  %v11351_v47 = vld [vmem:[%s15289_s3 + $0x1888] ss:$16 sps:$4 sm:$0xff]   ;;  %v11428_v38 = vld [vmem:[%s15289_s3 + $0x1b0c] ss:$16 sps:$4 sm:$0xff]  }
 0x392   : > { %8437 = vmatpush1.bf16.msra.mxu0 %v11339_v53  ;;  %v11426_v53 = vld [vmem:[%s15289_s3 + $0x1b08] ss:$16 sps:$4 sm:$0xff]  }
 0x393   : > { %8480 = vmatpush1.bf16.msra.mxu1 %v11342_v22  ;;  %8438 = vmatprep.subr.bf16.mxu0 %v11347_v50  ;;  %v11431_v22 = vld [vmem:[%s15289_s3 + $0x1cec] ss:$16 sps:$4 sm:$0xff]  }
 0x394   : > { %8481 = vmatprep.subr.bf16.mxu1 %v11350_v17  ;;  %v11434_v50 = vld [vmem:[%s15289_s3 + $0x1eec] ss:$16 sps:$4 sm:$0xff]   ;;  %v11429_v17 = vld [vmem:[%s15289_s3 + $0x1ce8] ss:$16 sps:$4 sm:$0xff]  }
 0x396   : > { %8439 = vmatpush1.bf16.msra.mxu0 %v11345_v49  ;;  %v11432_v49 = vld [vmem:[%s15289_s3 + $0x1ee8] ss:$16 sps:$4 sm:$0xff]  }
 0x397   : > { %8482 = vmatpush1.bf16.msra.mxu1 %v11348_v35  ;;  %8440 = vmatprep.subr.bf16.mxu0 %v11353_v63  ;;  %v11437_v35 = vld [vmem:[%s15289_s3 + $0x1ccc] ss:$16 sps:$4 sm:$0xff]  }
 0x398   : > { %8483 = vmatprep.subr.bf16.mxu1 %v11356_v36  ;;  %v11440_v63 = vld [vmem:[%s15289_s3 + $0x1ecc] ss:$16 sps:$4 sm:$0xff]  }
 0x399   : > { %v15305_v36 = vld [vmem:[#allocation7_spill] sm:$0xff] }
 0x39a   : > { %8441 = vmatpush1.bf16.msra.mxu0 %v11351_v47  ;;  %v11435_v47 = vld [vmem:[%s15289_s3 + $0x1cc8] ss:$16 sps:$4 sm:$0xff]  }
 0x39b   : > { %8484 = vmatpush1.bf16.msra.mxu1 %v11354_v20  ;;  %8442 = vmatprep.subr.bf16.mxu0 %v11359_v57  ;;  %v11438_v20 = vld [vmem:[%s15289_s3 + $0x1ec8] ss:$16 sps:$4 sm:$0xff]   ;;  %v11443_v57 = vld [vmem:[%s15289_s3 + $0x1cac] ss:$16 sps:$4 sm:$0xff]  }
 0x39c   : > { %8485 = vmatprep.subr.bf16.mxu1 %v11362_v4  ;;  %v15306_v4 = vld [vmem:[#allocation3_spill] sm:$0xff] }
 0x39e   : > { %8443 = vmatpush1.bf16.msra.mxu0 %v11357_v13  ;;  %v15307_v13 = vld [vmem:[#allocation4_spill] sm:$0xff] }
 0x39f   : > { %8486 = vmatpush1.bf16.msra.mxu1 %v11360_v58  ;;  %8444 = vmatprep.subr.bf16.mxu0 %v11365_v14  ;;  %v11441_v58 = vld [vmem:[%s15289_s3 + $0x1ca8] ss:$16 sps:$4 sm:$0xff]  }
 0x3a0   : > { %8487 = vmatprep.subr.bf16.mxu1 %v11368_v26  ;;  %v11444_v14 = vld [vmem:[%s15289_s3 + $0x1ea8] ss:$16 sps:$4 sm:$0xff]   ;;  %v11449_v26 = vld [vmem:[%s15289_s3 + $0x1c8c] ss:$16 sps:$4 sm:$0xff]  }
 0x3a2   : > { %8445 = vmatpush1.bf16.msra.mxu0 %v11363_v42  ;;  %v11452_v42 = vld [vmem:[%s15289_s3 + $0x1e8c] ss:$16 sps:$4 sm:$0xff]  }
 0x3a3   : > { %8488 = vmatpush1.bf16.msra.mxu1 %v11366_v45  ;;  %8446 = vmatprep.subr.bf16.mxu0 %v11371_v62  ;;  %v11447_v45 = vld [vmem:[%s15289_s3 + $0x1c88] ss:$16 sps:$4 sm:$0xff]  }
 0x3a4   : > { %8489 = vmatprep.subr.bf16.mxu1 %v11374_v33  ;;  %v11450_v62 = vld [vmem:[%s15289_s3 + $0x1e88] ss:$16 sps:$4 sm:$0xff]   ;;  %v11455_v33 = vld [vmem:[%s15289_s3 + $0x1c6c] ss:$16 sps:$4 sm:$0xff]  }
 0x3a6   : > { %8447 = vmatpush1.bf16.msra.mxu0 %v11369_v44  ;;  %v11458_v44 = vld [vmem:[%s15289_s3 + $0x1e6c] ss:$16 sps:$4 sm:$0xff]  }
 0x3a7   : > { %8490 = vmatpush1.bf16.msra.mxu1 %v11372_v11  ;;  %8448 = vmatprep.subr.bf16.mxu0 %v11377_v51  ;;  %v11453_v11 = vld [vmem:[%s15289_s3 + $0x1c68] ss:$16 sps:$4 sm:$0xff]  }
 0x3a8   : > { %8491 = vmatprep.subr.bf16.mxu1 %v11380_v23  ;;  %v11456_v51 = vld [vmem:[%s15289_s3 + $0x1e68] ss:$16 sps:$4 sm:$0xff]   ;;  %v11461_v23 = vld [vmem:[%s15289_s3 + $0x1c4c] ss:$16 sps:$4 sm:$0xff]  }
 0x3aa   : > { %8449 = vmatpush1.bf16.msra.mxu0 %v11375_v41  ;;  %v11464_v41 = vld [vmem:[%s15289_s3 + $0x1e4c] ss:$16 sps:$4 sm:$0xff]  }
 0x3ab   : > { %8492 = vmatpush1.bf16.msra.mxu1 %v11378_v39  ;;  %8450 = vmatprep.subr.bf16.mxu0 %v11383_v6  ;;  %v11459_v39 = vld [vmem:[%s15289_s3 + $0x1c48] ss:$16 sps:$4 sm:$0xff]  }
 0x3ac   : > { %8493 = vmatprep.subr.bf16.mxu1 %v11386_v19  ;;  %v11462_v6 = vld [vmem:[%s15289_s3 + $0x1e48] ss:$16 sps:$4 sm:$0xff]   ;;  %v11467_v19 = vld [vmem:[%s15289_s3 + $0x1c2c] ss:$16 sps:$4 sm:$0xff]  }
 0x3ae   : > { %8451 = vmatpush2.bf16.msra.mxu0 %v11381_v12  ;;  %v11470_v12 = vld [vmem:[%s15289_s3 + $0x1e2c] ss:$16 sps:$4 sm:$0xff]  }
 0x3af   : > { %8494 = vmatpush2.bf16.msra.mxu1 %v11384_v59  ;;  %8452 = vmatprep.subr.bf16.mxu0 %v11389_v37  ;;  %v11465_v59 = vld [vmem:[%s15289_s3 + $0x1c28] ss:$16 sps:$4 sm:$0xff]  }
 0x3b0   : > { %8495 = vmatprep.subr.bf16.mxu1 %v11392_v10  ;;  %v11468_v37 = vld [vmem:[%s15289_s3 + $0x1e28] ss:$16 sps:$4 sm:$0xff]   ;;  %v11473_v10 = vld [vmem:[%s15289_s3 + $0x1c0c] ss:$16 sps:$4 sm:$0xff]  }
 0x3b2   : > { %8453 = vmatpush2.bf16.msra.mxu0 %v11387_v16  ;;  %v11476_v16 = vld [vmem:[%s15289_s3 + $0x1e0c] ss:$16 sps:$4 sm:$0xff]  }
 0x3b3   : > { %8496 = vmatpush2.bf16.msra.mxu1 %v11390_v15  ;;  %8454 = vmatprep.subr.bf16.mxu0 %v11395_v43  ;;  %v11471_v15 = vld [vmem:[%s15289_s3 + $0x1c08] ss:$16 sps:$4 sm:$0xff]  }
 0x3b4   : > { %8497 = vmatprep.subr.bf16.mxu1 %v11398_v5  ;;  %v11474_v43 = vld [vmem:[%s15289_s3 + $0x1e08] ss:$16 sps:$4 sm:$0xff]   ;;  %v11479_v5 = vld [vmem:[%s15289_s3 + $0x1dec] ss:$16 sps:$4 sm:$0xff]  }
 0x3b6   : > { %8455 = vmatpush2.bf16.msra.mxu0 %v11393_v27  ;;  %v11482_v27 = vld [vmem:[%s15289_s3 + $0x1fec] ss:$16 sps:$4 sm:$0xff]  }
 0x3b7   : > { %8498 = vmatpush2.bf16.msra.mxu1 %v11396_v3  ;;  %8456 = vmatprep.subr.bf16.mxu0 %v11401_v54  ;;  %v11477_v3 = vld [vmem:[%s15289_s3 + $0x1de8] ss:$16 sps:$4 sm:$0xff]  }
 0x3b8   : > { %8499 = vmatprep.subr.bf16.mxu1 %v11404_v1  ;;  %v11480_v54 = vld [vmem:[%s15289_s3 + $0x1fe8] ss:$16 sps:$4 sm:$0xff]   ;;  %v11485_v1 = vld [vmem:[%s15289_s3 + $0x1dcc] ss:$16 sps:$4 sm:$0xff]  }
 0x3ba   : > { %8457 = vmatpush2.bf16.msra.mxu0 %v11399_v40  ;;  %v11488_v40 = vld [vmem:[%s15289_s3 + $0x1fcc] ss:$16 sps:$4 sm:$0xff]  }
 0x3bb   : > { %8500 = vmatpush2.bf16.msra.mxu1 %v11402_v31  ;;  %8458 = vmatprep.subr.bf16.mxu0 %v11407_v32  ;;  %v11483_v31 = vld [vmem:[%s15289_s3 + $0x1dc8] ss:$16 sps:$4 sm:$0xff]  }
 0x3bc   : > { %8501 = vmatprep.subr.bf16.mxu1 %v11410_v30  ;;  %v11486_v32 = vld [vmem:[%s15289_s3 + $0x1fc8] ss:$16 sps:$4 sm:$0xff]   ;;  %v11491_v30 = vld [vmem:[%s15289_s3 + $0x1dac] ss:$16 sps:$4 sm:$0xff]  }
 0x3be   : > { %8459 = vmatpush2.bf16.msra.mxu0 %v11405_v29  ;;  %v11494_v29 = vld [vmem:[%s15289_s3 + $0x1fac] ss:$16 sps:$4 sm:$0xff]  }
 0x3bf   : > { %8502 = vmatpush2.bf16.msra.mxu1 %v11408_v9  ;;  %8460 = vmatprep.subr.bf16.mxu0 %v11413_v0  ;;  %v11489_v9 = vld [vmem:[%s15289_s3 + $0x1da8] ss:$16 sps:$4 sm:$0xff]  }
 0x3c0   : > { %8503 = vmatprep.subr.bf16.mxu1 %v11416_v28  ;;  %v11492_v0 = vld [vmem:[%s15289_s3 + $0x1fa8] ss:$16 sps:$4 sm:$0xff]   ;;  %v11497_v28 = vld [vmem:[%s15289_s3 + $0x1d8c] ss:$16 sps:$4 sm:$0xff]  }
 0x3c2   : > { %8461 = vmatpush2.bf16.msra.mxu0 %v11411_v46  ;;  %v11500_v46 = vld [vmem:[%s15289_s3 + $0x1f8c] ss:$16 sps:$4 sm:$0xff]  }
 0x3c3   : > { %8504 = vmatpush2.bf16.msra.mxu1 %v11414_v24  ;;  %8462 = vmatprep.subr.bf16.mxu0 %v11419_v2  ;;  %v11495_v24 = vld [vmem:[%s15289_s3 + $0x1d88] ss:$16 sps:$4 sm:$0xff]  }
 0x3c4   : > { %8505 = vmatprep.subr.bf16.mxu1 %v11422_v7  ;;  %v11498_v2 = vld [vmem:[%s15289_s3 + $0x1f88] ss:$16 sps:$4 sm:$0xff]   ;;  %v11503_v7 = vld [vmem:[%s15289_s3 + $0x1d6c] ss:$16 sps:$4 sm:$0xff]  }
 0x3c6   : > { %8463 = vmatpush2.bf16.msra.mxu0 %v11417_v52  ;;  %v11506_v52 = vld [vmem:[%s15289_s3 + $0x1f6c] ss:$16 sps:$4 sm:$0xff]  }
 0x3c7   : > { %8506 = vmatpush2.bf16.msra.mxu1 %v11420_v21  ;;  %8464 = vmatprep.subr.bf16.mxu0 %v11425_v55  ;;  %v11501_v21 = vld [vmem:[%s15289_s3 + $0x1d68] ss:$16 sps:$4 sm:$0xff]  }
 0x3c8   : > { %8507 = vmatprep.subr.bf16.mxu1 %v11428_v38  ;;  %v11504_v55 = vld [vmem:[%s15289_s3 + $0x1f68] ss:$16 sps:$4 sm:$0xff]   ;;  %v11509_v38 = vld [vmem:[%s15289_s3 + $0x1d4c] ss:$16 sps:$4 sm:$0xff]  }
 0x3ca   : > { %8465 = vmatpush2.bf16.msra.mxu0 %v11423_v8  ;;  %v11512_v8 = vld [vmem:[%s15289_s3 + $0x1f4c] ss:$16 sps:$4 sm:$0xff]  }
 0x3cb   : > { %8508 = vmatpush2.bf16.msra.mxu1 %v11426_v53  ;;  %8520 = vmatprep.subr.bf16.mxu0 %v11431_v22  ;;  %v11507_v53 = vld [vmem:[%s15289_s3 + $0x1d48] ss:$16 sps:$4 sm:$0xff]  }
 0x3cc   : > { %8563 = vmatprep.subr.bf16.mxu1 %v11434_v50  ;;  %v11510_v22 = vld [vmem:[%s15289_s3 + $0x1f48] ss:$16 sps:$4 sm:$0xff]   ;;  %v11515_v50 = vld [vmem:[%s15289_s3 + $0x1d2c] ss:$16 sps:$4 sm:$0xff]  }
 0x3cd   : > { %8467 = vmatmul.mubr.bf16.vlgmr.msra.gmra.mxu0 %v13352_v56  ;;  %v11446_v56 = vld [vmem:[%s15289_s3 + $0x1eac] ss:$16 sps:$4 sm:$0xff]  }
 0x3ce   : > { %8510 = vmatmul.mubr.bf16.vlgmr.msra.gmra.mxu1 %v15305_v36  ;;  %8521 = vmatpush1.bf16.msra.mxu0 %v11429_v17  ;;  %v11518_v17 = vld [vmem:[%s15289_s3 + $0x1f2c] ss:$16 sps:$4 sm:$0xff]  }
 0x3cf   : > { %8564 = vmatpush1.bf16.msra.mxu1 %v11432_v49  ;;  %8522 = vmatprep.subr.bf16.mxu0 %v11437_v35  ;;  %v11513_v49 = vld [vmem:[%s15289_s3 + $0x1d28] ss:$16 sps:$4 sm:$0xff]   ;;  %v11524_v36 = vld [vmem:[%s15289_s3 + $0x1f0c] ss:$16 sps:$4 sm:$0xff]  }
 0x3d0   : > { %8565 = vmatprep.subr.bf16.mxu1 %v11440_v63  ;;  %8552 = vmatprep.mubr.bf16.mxu0 %v15306_v4  ;;  %v11516_v35 = vld [vmem:[%s15289_s3 + $0x1f28] ss:$16 sps:$4 sm:$0xff]   ;;  %v11521_v63 = vld [vmem:[%s15289_s3 + $0x1d0c] ss:$16 sps:$4 sm:$0xff]   ;;  %v7952_v4 = vpop.f32.mrf.mxu0 }
 0x3d1   : > { %8595 = vmatprep.mubr.bf16.mxu1 %v15307_v13  ;;  %v7995_v13 = vpop.f32.mrf.mxu1 }
 0x3d2   : > { %8523 = vmatpush1.bf16.msra.mxu0 %v11435_v47  ;;  %v11519_v47 = vld [vmem:[%s15289_s3 + $0x1d08] ss:$16 sps:$4 sm:$0xff]  }
 0x3d3   : > { %8566 = vmatpush1.bf16.msra.mxu1 %v11438_v20  ;;  %8524 = vmatprep.subr.bf16.mxu0 %v11443_v57  ;;  %v11522_v20 = vld [vmem:[%s15289_s3 + $0x1f08] ss:$16 sps:$4 sm:$0xff]  }
 0x3d4   : > { %8567 = vmatprep.subr.bf16.mxu1 %v11446_v56  ;;  %v15308_v57 = vld [vmem:[#allocation5_spill] sm:$0xff]  ;;  %v15309_v56 = vld [vmem:[#allocation6_spill] sm:$0xff] }
 0x3d6   : > { %8525 = vmatpush1.bf16.msra.mxu0 %v11441_v58  ;;  %v7954_v58 = vpop.f32.mrf.mxu0 }
 0x3d7   : > { %8568 = vmatpush1.bf16.msra.mxu1 %v11444_v14  ;;  %8526 = vmatprep.subr.bf16.mxu0 %v11449_v26  ;;  %v7997_v14 = vpop.f32.mrf.mxu1 }
 0x3d8   : > { %8569 = vmatprep.subr.bf16.mxu1 %v11452_v42  ;;  %v7956_v26 = vpop.f32.mrf.mxu0 }
 0x3d9   : > { %v7999_v42 = vpop.f32.mrf.mxu1 }
 0x3da   : > { %8527 = vmatpush1.bf16.msra.mxu0 %v11447_v45  ;;  %v7958_v45 = vpop.f32.mrf.mxu0 }
 0x3db   : > { %8570 = vmatpush1.bf16.msra.mxu1 %v11450_v62  ;;  %8528 = vmatprep.subr.bf16.mxu0 %v11455_v33  ;;  %v8001_v62 = vpop.f32.mrf.mxu1 }
 0x3dc   : > { %8571 = vmatprep.subr.bf16.mxu1 %v11458_v44  ;;  %v8038_v33 = vpop.f32.mrf.mxu0 }
 0x3dd   : > { %v8081_v44 = vpop.f32.mrf.mxu1 }
 0x3de   : > { %8529 = vmatpush1.bf16.msra.mxu0 %v11453_v11  ;;  %v8040_v11 = vpop.f32.mrf.mxu0 }
 0x3df   : > { %8572 = vmatpush1.bf16.msra.mxu1 %v11456_v51  ;;  %8530 = vmatprep.subr.bf16.mxu0 %v11461_v23  ;;  %v8083_v51 = vpop.f32.mrf.mxu1 }
 0x3e0   : > { %8573 = vmatprep.subr.bf16.mxu1 %v11464_v41  ;;  %v8042_v23 = vpop.f32.mrf.mxu0 }
 0x3e1   : > { %v8085_v41 = vpop.f32.mrf.mxu1 }
 0x3e2   : > { %8531 = vmatpush1.bf16.msra.mxu0 %v11459_v39  ;;  %v8044_v39 = vpop.f32.mrf.mxu0 }
 0x3e3   : > { %8574 = vmatpush1.bf16.msra.mxu1 %v11462_v6  ;;  %8532 = vmatprep.subr.bf16.mxu0 %v11467_v19  ;;  %v8087_v6 = vpop.f32.mrf.mxu1 }
 0x3e4   : > { %8575 = vmatprep.subr.bf16.mxu1 %v11470_v12  ;;  %v8124_v19 = vpop.f32.mrf.mxu0 }
 0x3e5   : > { %v8167_v12 = vpop.f32.mrf.mxu1 }
 0x3e6   : > { %8533 = vmatpush1.bf16.msra.mxu0 %v11465_v59  ;;  %v8126_v59 = vpop.f32.mrf.mxu0 }
 0x3e7   : > { %8576 = vmatpush1.bf16.msra.mxu1 %v11468_v37  ;;  %8534 = vmatprep.subr.bf16.mxu0 %v11473_v10  ;;  %v8169_v37 = vpop.f32.mrf.mxu1 }
 0x3e8   : > { %8577 = vmatprep.subr.bf16.mxu1 %v11476_v16  ;;  %v8128_v10 = vpop.f32.mrf.mxu0 }
 0x3e9   : > { %v8171_v16 = vpop.f32.mrf.mxu1 }
 0x3ea   : > { %8535 = vmatpush1.bf16.msra.mxu0 %v11471_v15  ;;  %v8130_v15 = vpop.f32.mrf.mxu0 }
 0x3eb   : > { %8578 = vmatpush1.bf16.msra.mxu1 %v11474_v43  ;;  %8536 = vmatprep.subr.bf16.mxu0 %v11479_v5  ;;  %v8173_v43 = vpop.f32.mrf.mxu1 }
 0x3ec   : > { %8579 = vmatprep.subr.bf16.mxu1 %v11482_v27  ;;  %v8210_v5 = vpop.f32.mrf.mxu0 }
 0x3ed   : > { %v8253_v27 = vpop.f32.mrf.mxu1 }
 0x3ee   : > { %8537 = vmatpush2.bf16.msra.mxu0 %v11477_v3  ;;  %v8212_v3 = vpop.f32.mrf.mxu0 }
 0x3ef   : > { %8580 = vmatpush2.bf16.msra.mxu1 %v11480_v54  ;;  %8538 = vmatprep.subr.bf16.mxu0 %v11485_v1  ;;  %v8255_v54 = vpop.f32.mrf.mxu1 }
 0x3f0   : > { %8581 = vmatprep.subr.bf16.mxu1 %v11488_v40  ;;  %v8214_v1 = vpop.f32.mrf.mxu0 }
 0x3f1   : > { %v8257_v40 = vpop.f32.mrf.mxu1 }
 0x3f2   : > { %8539 = vmatpush2.bf16.msra.mxu0 %v11483_v31  ;;  %v8216_v31 = vpop.f32.mrf.mxu0 }
 0x3f3   : > { %8582 = vmatpush2.bf16.msra.mxu1 %v11486_v32  ;;  %8540 = vmatprep.subr.bf16.mxu0 %v11491_v30  ;;  %v8259_v32 = vpop.f32.mrf.mxu1 }
 0x3f4   : > { %8583 = vmatprep.subr.bf16.mxu1 %v11494_v29 }
 0x3f6   : > { %8541 = vmatpush2.bf16.msra.mxu0 %v11489_v9 }
 0x3f7   : > { %8584 = vmatpush2.bf16.msra.mxu1 %v11492_v0  ;;  %8542 = vmatprep.subr.bf16.mxu0 %v11497_v28  ;;  %v7996_v28 = vadd.f32 %v7995_v13, %v7952_v4 }
 0x3f8   : > { %8585 = vmatprep.subr.bf16.mxu1 %v11500_v46  ;;  %v7998_v46 = vadd.f32 %v7997_v14, %v7954_v58 }
 0x3fa   : > { %8543 = vmatpush2.bf16.msra.mxu0 %v11495_v24  ;;  %v8039_v24 = vadd.f32 %v8038_v33, %v7996_v28 }
 0x3fb   : > { %8586 = vmatpush2.bf16.msra.mxu1 %v11498_v2  ;;  %8544 = vmatprep.subr.bf16.mxu0 %v11503_v7 }
 0x3fc   : > { %8587 = vmatprep.subr.bf16.mxu1 %v11506_v52  ;;  %v8000_v52 = vadd.f32 %v7999_v42, %v7956_v26 }
 0x3fe   : > { %8545 = vmatpush2.bf16.msra.mxu0 %v11501_v21  ;;  %v8041_v21 = vadd.f32 %v8040_v11, %v7998_v46 }
 0x3ff   : > { %8588 = vmatpush2.bf16.msra.mxu1 %v11504_v55  ;;  %8546 = vmatprep.subr.bf16.mxu0 %v11509_v38  ;;  %v8002_v55 = vadd.f32 %v8001_v62, %v7958_v45  ;;  %v8082_v38 = vadd.f32 %v8081_v44, %v8039_v24 }
 0x400   : > { %8589 = vmatprep.subr.bf16.mxu1 %v11512_v8  ;;  %v8043_v8 = vadd.f32 %v8042_v23, %v8000_v52 }
 0x402   : > { %8547 = vmatpush2.bf16.msra.mxu0 %v11507_v53 }
 0x403   : > { %8590 = vmatpush2.bf16.msra.mxu1 %v11510_v22  ;;  %8548 = vmatprep.subr.bf16.mxu0 %v11515_v50  ;;  %v8084_v50 = vadd.f32 %v8083_v51, %v8041_v21 }
 0x404   : > { %8591 = vmatprep.subr.bf16.mxu1 %v11518_v17  ;;  %v8045_v17 = vadd.f32 %v8044_v39, %v8002_v55 }
 0x406   : > { %8549 = vmatpush2.bf16.msra.mxu0 %v11513_v49  ;;  %v8125_v49 = vadd.f32 %v8124_v19, %v8082_v38 }
 0x407   : > { %8592 = vmatpush2.bf16.msra.mxu1 %v11516_v35  ;;  %8550 = vmatprep.subr.bf16.mxu0 %v11521_v63 }
 0x408   : > { %8593 = vmatprep.subr.bf16.mxu1 %v11524_v36  ;;  %v8086_v36 = vadd.f32 %v8085_v41, %v8043_v8 }
 0x40a   : > { %8551 = vmatpush2.bf16.msra.mxu0 %v11519_v47  ;;  %v8127_v47 = vadd.f32 %v8126_v59, %v8084_v50 }
 0x40b   : > { %8594 = vmatpush2.bf16.msra.mxu1 %v11522_v20  ;;  %v8088_v20 = vadd.f32 %v8087_v6, %v8045_v17 }
 0x40c   : > { %v8170_v58 = vadd.f32 %v8169_v37, %v8127_v47 }
 0x40d   : > { %8553 = vmatmul.mubr.bf16.vlgmr.msra.gmra.mxu0 %v15308_v57  ;;  %v8296_v30 = vpop.f32.mrf.mxu0  ;;  %v8168_v57 = vadd.f32 %v8167_v12, %v8125_v49  ;;  %v8131_v14 = vadd.f32 %v8130_v15, %v8088_v20 }
 0x40e   : > { %8596 = vmatmul.mubr.bf16.vlgmr.msra.gmra.mxu1 %v15309_v56  ;;  %v8339_v29 = vpop.f32.mrf.mxu1  ;;  %v8129_v56 = vadd.f32 %v8128_v10, %v8086_v36  ;;  %v8213_v45 = vadd.f32 %v8212_v3, %v8170_v58 }
 0x40f   : > { %v8298_v9 = vpop.f32.mrf.mxu0  ;;  %v8211_v26 = vadd.f32 %v8210_v5, %v8168_v57  ;;  %v8174_v44 = vadd.f32 %v8173_v43, %v8131_v14 }
 0x410   : > { %v8341_v0 = vpop.f32.mrf.mxu1  ;;  %v8172_v42 = vadd.f32 %v8171_v16, %v8129_v56  ;;  %v8256_v23 = vadd.f32 %v8255_v54, %v8213_v45 }
 0x411   : > { %v8300_v2 = vpop.f32.mrf.mxu0  ;;  %v8254_v11 = vadd.f32 %v8253_v27, %v8211_v26  ;;  %v8217_v39 = vadd.f32 %v8216_v31, %v8174_v44 }
 0x412   : > { %v8343_v7 = vpop.f32.mrf.mxu1  ;;  %v8215_v51 = vadd.f32 %v8214_v1, %v8172_v42  ;;  %v8299_v12 = vadd.f32 %v8298_v9, %v8256_v23 }
 0x413   : > { %v8302_v53 = vpop.f32.mrf.mxu0  ;;  %v8297_v19 = vadd.f32 %v8296_v30, %v8254_v11  ;;  %v8260_v46 = vadd.f32 %v8259_v32, %v8217_v39 }
 0x414   : > { %v8345_v22 = vpop.f32.mrf.mxu1  ;;  %v8258_v6 = vadd.f32 %v8257_v40, %v8215_v51  ;;  %v8342_v5 = vadd.f32 %v8341_v0, %v8299_v12 }
 0x415   : > { %v8340_v37 = vadd.f32 %v8339_v29, %v8297_v19  ;;  %v8303_v16 = vadd.f32 %v8302_v53, %v8260_v46 }
 0x416   : > { %v8301_v15 = vadd.f32 %v8300_v2, %v8258_v6 }
 0x417   : > { %v8346_v1 = vadd.f32 %v8345_v22, %v8303_v16 }
 0x418   : > { %v8344_v43 = vadd.f32 %v8343_v7, %v8301_v15 }
 0x44d   : > { %v8382_v35 = vpop.f32.mrf.mxu0 }
 0x44e   : > { %v8425_v63 = vpop.f32.mrf.mxu1  ;;  %v8383_v3 = vadd.f32 %v8382_v35, %v8340_v37  ;;  %v11549_v37 = vmov 1966171168  }
 0x44f   : > { %v8384_v4 = vpop.f32.mrf.mxu0  ;;  %v8669_v15 = vunpack.c.l.s4 %v11549_v37 }
 0x450   : > { %v8427_v13 = vpop.f32.mrf.mxu1  ;;  %v8385_v27 = vadd.f32 %v8384_v4, %v8342_v5  ;;  %v8426_v54 = vadd.f32 %v8425_v63, %v8383_v3 }
 0x451   : > { %v8386_v62 = vpop.f32.mrf.mxu0 }
 0x452   : > { %v8429_v33 = vpop.f32.mrf.mxu1  ;;  %v8387_v31 = vadd.f32 %v8386_v62, %v8344_v43  ;;  %v8428_v55 = vadd.f32 %v8427_v13, %v8385_v27 }
 0x453   : > { %v8388_v41 = vpop.f32.mrf.mxu0 }
 0x454   : > { %v8431_v59 = vpop.f32.mrf.mxu1  ;;  %v8389_v40 = vadd.f32 %v8388_v41, %v8346_v1  ;;  %v8430_v38 = vadd.f32 %v8429_v33, %v8387_v31 }
 0x456   : > { %v8432_v2 = vadd.f32 %v8431_v59, %v8389_v40 }
 0x48d   : > { %v8468_v10 = vpop.f32.mrf.mxu0 }
 0x48e   : > { %v8511_v28 = vpop.f32.mrf.mxu1  ;;  %v8469_v9 = vadd.f32 %v8468_v10, %v8426_v54  ;;  %v8670_v54 = vunpack.c.0.s8 %v8669_v15 }
 0x48f   : > { %v8470_v24 = vpop.f32.mrf.mxu0 }
 0x490   : > { %v8513_v52 = vpop.f32.mrf.mxu1  ;;  %v8471_v8 = vadd.f32 %v8470_v24, %v8428_v55  ;;  %v8512_v0 = vadd.f32 %v8511_v28, %v8469_v9 }
 0x491   : > { %v8472_v30 = vpop.f32.mrf.mxu0 }
 0x492   : > { %v8515_v21 = vpop.f32.mrf.mxu1  ;;  %v8473_v53 = vadd.f32 %v8472_v30, %v8430_v38  ;;  %v8514_v49 = vadd.f32 %v8513_v52, %v8471_v8  ;;  %v15310_v8 = vld [vmem:[#allocation2_spill] sm:$0xff] }
 0x493   : > { %v8474_v32 = vpop.f32.mrf.mxu0 }
 0x494   : > { %v8517_v29 = vpop.f32.mrf.mxu1  ;;  %v8475_v7 = vadd.f32 %v8474_v32, %v8432_v2  ;;  %v8516_v36 = vadd.f32 %v8515_v21, %v8473_v53  ;;  %v8673_v32 = vsub.s32 %v8670_v54, %v15310_v8 }
 0x496   : > { %v8518_v56 = vadd.f32 %v8517_v29, %v8475_v7 }
 0x4cd   : > { %v8554_v50 = vpop.f32.mrf.mxu0 }
 0x4ce   : > { %v8597_v17 = vpop.f32.mrf.mxu1  ;;  %v8555_v35 = vadd.f32 %v8554_v50, %v8512_v0 }
 0x4cf   : > { %v8556_v22 = vpop.f32.mrf.mxu0 }
 0x4d0   : > { %v8599_v63 = vpop.f32.mrf.mxu1  ;;  %v8557_v47 = vadd.f32 %v8556_v22, %v8514_v49  ;;  %v8598_v4 = vadd.f32 %v8597_v17, %v8555_v35  ;;  %v8674_v49 = vrot.slane %v8666_v48, %v8673_v32 }
 0x4d1   : > { %v8558_v20 = vpop.f32.mrf.mxu0 }
 0x4d2   : > { %v8601_v57 = vpop.f32.mrf.mxu1  ;;  %v8600_v13 = vadd.f32 %v8599_v63, %v8557_v47  ;;  %v8559_v58 = vadd.f32 %v8558_v20, %v8516_v36  ;;  %v8698_v33 = vmul.f32 %v8598_v4, %v8598_v4  ;;  %v8744_v63 = vrot.slane %v8736_v25, %v8673_v32 }
 0x4d3   : > { %v8560_v14 = vpop.f32.mrf.mxu0  ;;  %v15311_v36 = vlaneseq }
 0x4d4   : > { %v9961_v26 = vpack.c.bf16 %v8600_v13, %v8598_v4  ;;  %v8602_v42 = vadd.f32 %v8601_v57, %v8559_v58  ;;  %v8561_v45 = vadd.f32 %v8560_v14, %v8518_v56  ;;  %v8603_v62 = vpop.f32.mrf.mxu1  ;;  %v8699_v59 = vmul.f32 %v8600_v13, %v8600_v13 }
 0x4d5   : > { %vm8693_vm0 = vcmp.lt.s32.totalorder %v15311_v36, 512 }
 0x4d6   : > { %8631 = vst [vmem:[%s14304_s29 + $0x8] sm:$0xff] %v9961_v26  ;;  %v8648_v44 = vadd.f32 %v8602_v42, %v8598_v4  ;;  %v8702_v11 = vmul.f32 %v8602_v42, %v8602_v42  ;;  %v8604_v51 = vadd.f32 %v8603_v62, %v8561_v45 }
 0x4d8   : > { %v8649_v23 = vrot.slane %v8648_v44, 4  ;;  %v8718_v39 = vadd.f32 %v8702_v11, %v8698_v33  ;;  %v9963_v19 = vpack.c.bf16 %v8604_v51, %v8602_v42  ;;  %v8655_v41 = vadd.f32 %v8604_v51, %v8600_v13 }
 0x4d9   : > { %v8703_v6 = vmul.f32 %v8604_v51, %v8604_v51 }
 0x4da   : > { %v8650_v12 = vadd.f32 %v8649_v23, %v8648_v44  ;;  %v8719_v10 = vrot.slane %v8718_v39, 4  ;;  %8633 = vst [vmem:[%s14304_s29 + $0x18] sm:$0xff] %v9963_v19  ;;  %v8656_v28 = vrot.slane %v8655_v41, 4  ;;  %s9959_s29 = sshll.u32 %s15319_s18, 3 }
 0x4db   : > { %v8725_v46 = vadd.f32 %v8703_v6, %v8699_v59  ;;  %s300_s15 = scalar_lea.vmem %s15291_s5, %s9959_s29 }
 0x4dc   : > { %v8651_v5 = vrot.slane %v8650_v12, 2  ;;  %v8720_v16 = vadd.f32 %v8719_v10, %v8718_v39  ;;  %v8657_v3 = vadd.f32 %v8656_v28, %v8655_v41 }
 0x4dd   : > { %v8726_v24 = vrot.slane %v8725_v46, 4 }
 0x4de   : > { %v8652_v52 = vadd.f32 %v8651_v5, %v8650_v12  ;;  %v8721_v43 = vrot.slane %v8720_v16, 2  ;;  %v8658_v27 = vrot.slane %v8657_v3, 2 }
 0x4df   : > { %v8727_v1 = vadd.f32 %v8726_v24, %v8725_v46 }
 0x4e0   : > { %v8653_v31 = vrot.slane %v8652_v52, 1  ;;  %v8722_v30 = vadd.f32 %v8721_v43, %v8720_v16  ;;  %v8659_v21 = vadd.f32 %v8658_v27, %v8657_v3 }
 0x4e1   : > { %v8728_v55 = vrot.slane %v8727_v1, 2 }
 0x4e2   : > { %v8660_v40 = vrot.slane %v8659_v21, 1  ;;  %v8723_v9 = vrot.slane %v8722_v30, 1  ;;  %v8654_v29 = vadd.f32 %v8653_v31, %v8652_v52 }
 0x4e3   : > { %v8729_v38 = vadd.f32 %v8728_v55, %v8727_v1 }
 0x4e4   : > { %v8661_v2 = vadd.f32 %v8660_v40, %v8659_v21  ;;  %v8724_v50 = vadd.f32 %v8723_v9, %v8722_v30 }
 0x4e5   : > { %v8730_v0 = vrot.slane %v8729_v38, 1 }
 0x4e6   : > { %v8667_v53 = vcombine.low %v8654_v29, %v8661_v2 }
 0x4e7   : > { %v8731_v17 = vadd.f32 %v8730_v0, %v8729_v38 }
 0x4e8   : > { %v8681_v7 = vrot.slane %v8667_v53, %v8673_v32 }
 0x4e9   : > { %v8737_v35 = vcombine.low %v8724_v50, %v8731_v17 }
 0x4ea   : > { %v8682_v22 = vcombine.low %v8674_v49, %v8681_v7 }
 0x4eb   : > { %v8751_v47 = vrot.slane %v8737_v35, %v8673_v32 }
 0x4ec   : > { %v8689_v20 = vrot.slane %v8682_v22, %v8673_v32 }
 0x4ed   : > { %v8752_v57 = vcombine.low %v8744_v63, %v8751_v47 }
 0x4ee   : > { %8695 = vst.msk [vmem:[%s300_s15] ss:$2 sm:$0xf] %vm8693_vm0, %v8689_v20 }
 0x4ef   : > { %v8759_v34 = vrot.slane %v8752_v57, %v8673_v32 }
 0x4f1   : > { %9954 = vst.msk [vmem:[%s300_s15 + $0x1] ss:$2 sm:$0xf] %vm8693_vm0, %v8759_v34 }
 0x4f2 PF: > { %s16_s20 = sadd.s32 1, %s11547_s20   ;;  %s15312_s18 = smov %s11543_s19 }
 0x4f3   : > { %p13_p6 = scmp.ge.s32.totalorder %s16_s20, 4   ;;  %s15313_s19 = smov %s15315_s21 }
 0x4f5   :  { %15 = sbr.rel (!%p13_p6) target bundleno = 2 (0x2), region = 82 }

</bundles_post_ra>
